<compile_context>
chip_gen: v6e
topology: v6e:2x2x1
jax: 0.10.0
libtpu: 0.0.40
codegen_flags: <defaults>
</compile_context>

<pallas_src>
import math
from functools import partial

import numpy as np
import jax
import jax.numpy as jnp
from jax.experimental import pallas as pl
from jax.experimental.pallas import tpu as pltpu

LANE = 128   # lane width
SUB = 8      # sublane width


def _round_up(a, b):
    return (a + b - 1) // b * b


def _padded_vmem_bytes(shape, itemsize):
    s = [int(d) for d in shape]
    s[-1] = _round_up(s[-1], LANE)
    if len(s) >= 2:
        s[-2] = _round_up(s[-2], SUB)
    b = itemsize
    for d in s:
        b *= d
    return b


# ----------------------------------------------------------------------------
# Pass 1 kernel: shifted-window conv (bf16 MXU) + partial BatchNorm statistics.
# One grid step = one batch image x one Cout lane-tile.
# ----------------------------------------------------------------------------
def _conv_stats_kernel(x_ref, w_ref, mask_ref, pns_ref, pnb_ref,
                       y_ref, stats_ref, acc_ref,
                       *, k, wp, m_rows, pre_norm):
    # x_ref    : (1, X_rows, Cin) f32   flattened reflect-padded image (+ zero tail)
    # w_ref    : (k*k, Cin, tn)   bf16  conv weights for this Cout tile
    # mask_ref : (m_rows, 1)      f32   1.0 for valid output pixels, 0.0 for junk rows
    # pns_ref  : (1, Cin)         f32   fused previous-stage BN scale (unused if !pre_norm)
    # pnb_ref  : (1, Cin)         f32   fused previous-stage BN shift
    # y_ref    : (1, m_rows, tn)  f32   raw conv output (no bias / no scaling: folded into BN)
    # stats_ref: (1, 8, tn)       f32   row0 = masked sum, row1 = masked sum of squares
    # acc_ref  : (m_rows, tn)     f32   VMEM accumulator scratch
    for s in range(k * k):
        dy, dx = divmod(s, k)
        off = dy * wp + dx                       # static shifted-window offset (flat rows)
        win = x_ref[0, off:off + m_rows, :]      # (m_rows, Cin) f32
        if pre_norm:
            # fused BN+ReLU of the previous stage, applied to the window
            # before the matmul (per-channel pointwise).
            win = jnp.maximum(win * pns_ref[...] + pnb_ref[...], 0.0)
        a = win.astype(jnp.bfloat16)             # bf16 MXU operand, f32 accumulation
        contrib = jnp.dot(a, w_ref[s], preferred_element_type=jnp.float32)
        if s == 0:
            acc_ref[...] = contrib
        else:
            acc_ref[...] += contrib

    acc = acc_ref[...]
    y_ref[0] = acc

    # per-channel partial BatchNorm statistics over the valid pixels of this image
    m = mask_ref[...]                                     # (m_rows, 1)
    am = acc * m
    psum = jnp.sum(am, axis=0, keepdims=True)             # (1, tn)
    psq = jnp.sum(am * acc, axis=0, keepdims=True)        # (1, tn) masked sum of squares
    tn = stats_ref.shape[-1]
    row = jax.lax.broadcasted_iota(jnp.int32, (8, tn), 0)
    stats_ref[0] = jnp.where(row == 0, psum, jnp.where(row == 1, psq, 0.0))


def conv_with_stats(xflat, wmat, mask, pn_scale, pn_shift,
                    *, k, wp, m_rows, tn, pre_norm):
    n, x_rows, cin = xflat.shape
    k2, _, cpad = wmat.shape
    nj = cpad // tn

    kern = partial(_conv_stats_kernel, k=k, wp=wp, m_rows=m_rows, pre_norm=pre_norm)

    flops = 2 * n * m_rows * k2 * cin * cpad
    bytes_accessed = (xflat.size * 4 + wmat.size * 2 * n + mask.size * 4
                      + n * m_rows * cpad * 4 + n * 8 * cpad * 4)

    blk = (_padded_vmem_bytes((1, x_rows, cin), 4)
           + _padded_vmem_bytes((k2, cin, tn), 2)
           + _padded_vmem_bytes((m_rows, 1), 4)
           + 2 * _padded_vmem_bytes((1, cin), 4)
           + _padded_vmem_bytes((1, m_rows, tn), 4)
           + _padded_vmem_bytes((1, 8, tn), 4))
    vmem_limit = int(min(max(2 * blk + _padded_vmem_bytes((m_rows, tn), 4) + (4 << 20),
                             32 << 20), 100 << 20))

    y, stats = pl.pallas_call(
        kern,
        out_shape=(jax.ShapeDtypeStruct((n, m_rows, cpad), jnp.float32),
                   jax.ShapeDtypeStruct((n, 8, cpad), jnp.float32)),
        grid_spec=pltpu.PrefetchScalarGridSpec(
            num_scalar_prefetch=0,
            grid=(n, nj),
            in_specs=[
                pl.BlockSpec((1, x_rows, cin), lambda b, j: (b, 0, 0)),
                pl.BlockSpec((k2, cin, tn), lambda b, j: (0, 0, j)),
                pl.BlockSpec((m_rows, 1), lambda b, j: (0, 0)),
                pl.BlockSpec((1, cin), lambda b, j: (0, 0)),
                pl.BlockSpec((1, cin), lambda b, j: (0, 0)),
            ],
            out_specs=[
                pl.BlockSpec((1, m_rows, tn), lambda b, j: (b, 0, j)),
                pl.BlockSpec((1, 8, tn), lambda b, j: (b, 0, j)),
            ],
            scratch_shapes=[pltpu.VMEM((m_rows, tn), jnp.float32)],
        ),
        compiler_params=pltpu.CompilerParams(
            dimension_semantics=("parallel", "parallel"),
            vmem_limit_bytes=vmem_limit,
        ),
        cost_estimate=pl.CostEstimate(flops=flops, transcendentals=0,
                                      bytes_accessed=bytes_accessed),
    )(xflat, wmat, mask, pn_scale, pn_shift)
    return y, stats


# ----------------------------------------------------------------------------
# Pass 2 kernel: folded BatchNorm affine + ReLU (only needed for the final stage;
# stage-1 normalization is fused into stage-2's conv kernel as a pre-norm).
# ----------------------------------------------------------------------------
def _bn_relu_kernel(y_ref, scale_ref, shift_ref, o_ref):
    o_ref[0] = jnp.maximum(y_ref[0] * scale_ref[...] + shift_ref[...], 0.0
                           ).astype(o_ref.dtype)


def bn_relu(y, scale, shift, *, tn):
    n, m, c = y.shape
    nj = c // tn
    vmem_limit = int(min(max(4 * _padded_vmem_bytes((1, m, tn), 4) + (8 << 20),
                             32 << 20), 100 << 20))
    return pl.pallas_call(
        _bn_relu_kernel,
        out_shape=jax.ShapeDtypeStruct((n, m, c), jnp.float32),
        grid_spec=pltpu.PrefetchScalarGridSpec(
            num_scalar_prefetch=0,
            grid=(n, nj),
            in_specs=[
                pl.BlockSpec((1, m, tn), lambda b, j: (b, 0, j)),
                pl.BlockSpec((1, tn), lambda b, j: (0, j)),
                pl.BlockSpec((1, tn), lambda b, j: (0, j)),
            ],
            out_specs=pl.BlockSpec((1, m, tn), lambda b, j: (b, 0, j)),
        ),
        compiler_params=pltpu.CompilerParams(
            dimension_semantics=("parallel", "parallel"),
            vmem_limit_bytes=vmem_limit,
        ),
    )(y, scale, shift)


# ----------------------------------------------------------------------------
# One conv stage: reflect pad + flatten (JAX glue), Pallas conv+stats kernel,
# then fold bias / scaling / batch stats / gamma / beta into (scale, shift).
# ----------------------------------------------------------------------------
def _conv_stage(x_raw, w_hwio, gamma, beta, *, scaling, eps, pre_norm):
    k = 3 * scaling
    p = math.ceil((k - 1) / 2)
    n, h, w, cin = x_raw.shape
    assert p < h and p < w, "reflect padding requires pad < spatial dim"

    cout = w_hwio.shape[-1]
    cpad = _round_up(cout, LANE)
    tn = 128                                     # lane-dense output tile (tune 256 on v6e)

    hp, wp = h + 2 * p, w + 2 * p
    ho, wo = hp - k + 1, wp - k + 1
    m_out = ho * wp                              # output rows incl. junk cols c >= wo
    m_rows = _round_up(m_out, SUB)
    max_off = (k - 1) * (wp + 1)
    x_rows = max_off + m_rows                    # guarantees all static slices in bounds

    xp = jnp.pad(x_raw, ((0, 0), (p, p), (p, p), (0, 0)), mode="reflect")
    xflat = xp.reshape(n, hp * wp, cin)
    xflat = jnp.pad(xflat, ((0, 0), (0, x_rows - hp * wp), (0, 0)))

    # weights -> (k*k, Cin, Cpad) bf16, zero-padded output channels
    wk = w_hwio.reshape(k * k, cin, cout)
    wk = jnp.pad(wk, ((0, 0), (0, 0), (0, cpad - cout))).astype(jnp.bfloat16)

    # validity mask over flattened output rows (junk width columns / tail excluded)
    ridx = np.arange(m_rows)
    valid = (ridx < m_out) & ((ridx % wp) < wo)
    mask = jnp.asarray(valid.astype(np.float32)).reshape(m_rows, 1)

    if pre_norm is None:
        pns = jnp.ones((1, cin), jnp.float32)
        pnb = jnp.zeros((1, cin), jnp.float32)
        use_pre = False
    else:
        pns, pnb = pre_norm
        use_pre = True

    y_flat, stats = conv_with_stats(xflat, wk, mask, pns, pnb,
                                    k=k, wp=wp, m_rows=m_rows, tn=tn,
                                    pre_norm=use_pre)

    # Fold bias (cancels under mean subtraction), 1/scaling^2 (eps' = eps*scaling^4),
    # batch statistics and the BN affine into a single per-channel scale/shift.
    cnt = float(n * ho * wo)
    ssum = jnp.sum(stats[:, 0, :], axis=0)
    ssq = jnp.sum(stats[:, 1, :], axis=0)
    mean = ssum / cnt
    var = jnp.maximum(ssq / cnt - mean * mean, 0.0)
    g = jnp.pad(gamma.reshape(-1), (0, cpad - cout))
    b = jnp.pad(beta.reshape(-1), (0, cpad - cout))
    scale = g * jax.lax.rsqrt(var + eps * float(scaling) ** 4)
    shift = b - mean * scale

    geom = dict(ho=ho, wo=wo, wp=wp, m_rows=m_rows, cout=cout, cpad=cpad, tn=tn)
    return y_flat, scale.reshape(1, cpad), shift.reshape(1, cpad), geom


def double_conv_forward(x_nchw, params, *, scaling=1, eps=1e-5):
    n, _, h, w = x_nchw.shape
    x = jnp.transpose(x_nchw, (0, 2, 3, 1)).astype(jnp.float32)   # NCHW -> NHWC

    # stage 1: conv1 + batch stats (its BN+ReLU is deferred / fused into stage 2)
    y1, sc1, sh1, g1 = _conv_stage(x, params["w1"], params["g1"], params["beta1"],
                                   scaling=scaling, eps=eps, pre_norm=None)
    cmid = g1["cout"]
    raw1 = y1[:, :g1["ho"] * g1["wp"], :cmid]
    raw1 = raw1.reshape(n, g1["ho"], g1["wp"], cmid)[:, :, :g1["wo"], :]

    # stage 2: fused BN1+ReLU1 (pre-norm) + conv2 + batch stats
    pre = (sc1[:, :cmid], sh1[:, :cmid])
    y2, sc2, sh2, g2 = _conv_stage(raw1, params["w2"], params["g2"], params["beta2"],
                                   scaling=scaling, eps=eps, pre_norm=pre)

    # final BN2 + ReLU2, then strip junk columns / channel padding, crop, NCHW
    act2 = bn_relu(y2, sc2, sh2, tn=g2["tn"])
    cout = g2["cout"]
    y = act2[:, :g2["ho"] * g2["wp"], :cout]
    y = y.reshape(n, g2["ho"], g2["wp"], cout)[:, :, :g2["wo"], :]
    y = y[:, :h, :w, :]
    return jnp.transpose(y, (0, 3, 1, 2))


# ----------------------------------------------------------------------------
# Deterministic parameter init (shapes follow nn.Conv2d / nn.BatchNorm2d)
# ----------------------------------------------------------------------------
def init_params(key, cin, cmid, cout, k):
    ks = jax.random.split(key, 8)

    def conv_w(kk, ci, co):
        bound = 1.0 / math.sqrt(ci * k * k)
        return jax.random.uniform(kk, (k, k, ci, co), jnp.float32, -bound, bound)  # HWIO

    def vec(kk, c, lo, hi):
        return jax.random.uniform(kk, (c,), jnp.float32, lo, hi)

    return {
        "w1": conv_w(ks[0], cin, cmid),
        "b1": vec(ks[1], cmid, -0.1, 0.1),
        "g1": vec(ks[2], cmid, 0.8, 1.2),
        "beta1": vec(ks[3], cmid, -0.1, 0.1),
        "w2": conv_w(ks[4], cmid, cout),
        "b2": vec(ks[5], cout, -0.1, 0.1),
        "g2": vec(ks[6], cout, 0.8, 1.2),
        "beta2": vec(ks[7], cout, -0.1, 0.1),
    }


# ----------------------------------------------------------------------------
# Pure-JAX reference mirroring the PyTorch module (independent conv path).
# Conv operands are rounded to bf16 to match the MXU operand precision.
# ----------------------------------------------------------------------------
def reference(x_nchw, params, scaling=1, eps=1e-5):
    k = 3 * scaling
    p = math.ceil((k - 1) / 2)
    _, _, h, w = x_nchw.shape
    x = jnp.transpose(x_nchw, (0, 2, 3, 1)).astype(jnp.float32)

    def rnd(a):
        return a.astype(jnp.bfloat16).astype(jnp.float32)

    def stage(xx, wq, b, g, bt):
        xp = jnp.pad(xx, ((0, 0), (p, p), (p, p), (0, 0)), mode="reflect")
        y = jax.lax.conv_general_dilated(
            rnd(xp), rnd(wq), (1, 1), "VALID",
            dimension_numbers=("NHWC", "HWIO", "NHWC"),
            preferred_element_type=jnp.float32)
        y = y + b.reshape(1, 1, 1, -1)
        y = y / float(scaling) ** 2
        mean = jnp.mean(y, axis=(0, 1, 2), keepdims=True)
        var = jnp.mean((y - mean) ** 2, axis=(0, 1, 2), keepdims=True)
        y = (y - mean) * jax.lax.rsqrt(var + eps)
        y = y * g.reshape(1, 1, 1, -1) + bt.reshape(1, 1, 1, -1)
        return jnp.maximum(y, 0.0)

    y = stage(x, params["w1"], params["b1"], params["g1"], params["beta1"])
    y = stage(y, params["w2"], params["b2"], params["g2"], params["beta2"])
    return jnp.transpose(y[:, :h, :w, :], (0, 3, 1, 2))


if __name__ == "__main__":
    key = jax.random.PRNGKey(0)
    kx, kp = jax.random.split(key)

    N, Cin, H, W = 2, 4, 16, 16
    Cout = 8                 # mid_channels defaults to out_channels
    scaling = 1
    k = 3 * scaling

    x = jax.random.normal(kx, (N, Cin, H, W), jnp.float32)
    params = init_params(kp, Cin, Cout, Cout, k)

    fwd = jax.jit(lambda xx: double_conv_forward(xx, params, scaling=scaling))
    out = jax.block_until_ready(fwd(x))
    assert out.shape == (N, Cout, H, W), out.shape

    ref = reference(x, params, scaling)
    max_err = float(jnp.max(jnp.abs(out - ref)))
    assert jnp.allclose(out, ref, rtol=5e-3, atol=5e-3), f"max_err={max_err}"

    print("KERNEL_OK")
</pallas_src>

<mosaic_0001>
module attributes {stable_mosaic.version = 11 : i64} {
  func.func @_conv_stats_kernel(%arg0: i32, %arg1: i32, %arg2: memref<1x326x4xf32, #tpu.memory_space<vmem>>, %arg3: memref<9x4x128xbf16, #tpu.memory_space<vmem>>, %arg4: memref<288x1xf32, #tpu.memory_space<vmem>>, %arg5: memref<1x4xf32, #tpu.memory_space<vmem>>, %arg6: memref<1x4xf32, #tpu.memory_space<vmem>>, %arg7: memref<1x288x128xf32, #tpu.memory_space<vmem>>, %arg8: memref<1x8x128xf32, #tpu.memory_space<vmem>>, %arg9: memref<288x128xf32, #tpu.memory_space<vmem>>) attributes {dimension_semantics = [#tpu.dimension_semantics<parallel>, #tpu.dimension_semantics<parallel>], iteration_bounds = array<i64: 2, 1>, scalar_prefetch = 0 : i64, scratch_operands = 1 : i64, tpu.core_type = #tpu.core_type<tc>, window_params = [{transform_indices = @transform_0, window_bounds = array<i64: 1, 326, 4>}, {transform_indices = @transform_1, window_bounds = array<i64: 9, 4, 128>}, {pipeline_mode = #tpu.pipeline_mode<synchronous>, transform_indices = @transform_2, window_bounds = array<i64: 288, 1>}, {pipeline_mode = #tpu.pipeline_mode<synchronous>, transform_indices = @transform_3, window_bounds = array<i64: 1, 4>}, {pipeline_mode = #tpu.pipeline_mode<synchronous>, transform_indices = @transform_4, window_bounds = array<i64: 1, 4>}, {transform_indices = @transform_5, window_bounds = array<i64: 1, 288, 128>}, {transform_indices = @transform_6, window_bounds = array<i64: 1, 8, 128>}]} {
    %c0 = arith.constant 0 : index
    %c0_0 = arith.constant 0 : index
    %c0_1 = arith.constant 0 : index
    %0 = vector.load %arg2[%c0, %c0_0, %c0_1] : memref<1x326x4xf32, #tpu.memory_space<vmem>>, vector<1x288x4xf32>
    %1 = vector.shape_cast %0 : vector<1x288x4xf32> to vector<288x4xf32>
    %2 = arith.truncf %1 : vector<288x4xf32> to vector<288x4xbf16>
    %c0_2 = arith.constant 0 : index
    %c0_3 = arith.constant 0 : index
    %c0_4 = arith.constant 0 : index
    %3 = vector.load %arg3[%c0_2, %c0_3, %c0_4] : memref<9x4x128xbf16, #tpu.memory_space<vmem>>, vector<1x4x128xbf16>
    %4 = vector.shape_cast %3 : vector<1x4x128xbf16> to vector<4x128xbf16>
    %cst = arith.constant dense<0.000000e+00> : vector<288x128xf32>
    %5 = tpu.matmul %2, %4, %cst {dimension_numbers = #tpu.dot_dimension_numbers<[1], [0], [0], [1], [0, 0, 1, 1], [], []>} : vector<288x4xbf16>, vector<4x128xbf16>, vector<288x128xf32> -> vector<288x128xf32>
    %c0_5 = arith.constant 0 : index
    %c0_6 = arith.constant 0 : index
    %6 = vector.load %arg9[%c0_5, %c0_6] : memref<288x128xf32, #tpu.memory_space<vmem>>, vector<288x128xf32>
    tpu.vector_store %arg9[%c0_5, %c0_6], %5 {strides = array<i32>} : memref<288x128xf32, #tpu.memory_space<vmem>>, vector<288x128xf32>,
    %c0_7 = arith.constant 0 : index
    %c1 = arith.constant 1 : index
    %c0_8 = arith.constant 0 : index
    %7 = vector.load %arg2[%c0_7, %c1, %c0_8] : memref<1x326x4xf32, #tpu.memory_space<vmem>>, vector<1x288x4xf32>
    %8 = vector.shape_cast %7 : vector<1x288x4xf32> to vector<288x4xf32>
    %9 = arith.truncf %8 : vector<288x4xf32> to vector<288x4xbf16>
    %c1_9 = arith.constant 1 : index
    %c0_10 = arith.constant 0 : index
    %c0_11 = arith.constant 0 : index
    %10 = vector.load %arg3[%c1_9, %c0_10, %c0_11] : memref<9x4x128xbf16, #tpu.memory_space<vmem>>, vector<1x4x128xbf16>
    %11 = vector.shape_cast %10 : vector<1x4x128xbf16> to vector<4x128xbf16>
    %cst_12 = arith.constant dense<0.000000e+00> : vector<288x128xf32>
    %12 = tpu.matmul %9, %11, %cst_12 {dimension_numbers = #tpu.dot_dimension_numbers<[1], [0], [0], [1], [0, 0, 1, 1], [], []>} : vector<288x4xbf16>, vector<4x128xbf16>, vector<288x128xf32> -> vector<288x128xf32>
    %c0_13 = arith.constant 0 : index
    %c0_14 = arith.constant 0 : index
    %13 = vector.load %arg9[%c0_13, %c0_14] : memref<288x128xf32, #tpu.memory_space<vmem>>, vector<288x128xf32>
    %14 = arith.addf %13, %12 : vector<288x128xf32>
    %c0_15 = arith.constant 0 : index
    %c0_16 = arith.constant 0 : index
    %15 = vector.load %arg9[%c0_15, %c0_16] : memref<288x128xf32, #tpu.memory_space<vmem>>, vector<288x128xf32>
    tpu.vector_store %arg9[%c0_15, %c0_16], %14 {strides = array<i32>} : memref<288x128xf32, #tpu.memory_space<vmem>>, vector<288x128xf32>,
    %c0_17 = arith.constant 0 : index
    %c2 = arith.constant 2 : index
    %c0_18 = arith.constant 0 : index
    %16 = vector.load %arg2[%c0_17, %c2, %c0_18] : memref<1x326x4xf32, #tpu.memory_space<vmem>>, vector<1x288x4xf32>
    %17 = vector.shape_cast %16 : vector<1x288x4xf32> to vector<288x4xf32>
    %18 = arith.truncf %17 : vector<288x4xf32> to vector<288x4xbf16>
    %c2_19 = arith.constant 2 : index
    %c0_20 = arith.constant 0 : index
    %c0_21 = arith.constant 0 : index
    %19 = vector.load %arg3[%c2_19, %c0_20, %c0_21] : memref<9x4x128xbf16, #tpu.memory_space<vmem>>, vector<1x4x128xbf16>
    %20 = vector.shape_cast %19 : vector<1x4x128xbf16> to vector<4x128xbf16>
    %cst_22 = arith.constant dense<0.000000e+00> : vector<288x128xf32>
    %21 = tpu.matmul %18, %20, %cst_22 {dimension_numbers = #tpu.dot_dimension_numbers<[1], [0], [0], [1], [0, 0, 1, 1], [], []>} : vector<288x4xbf16>, vector<4x128xbf16>, vector<288x128xf32> -> vector<288x128xf32>
    %c0_23 = arith.constant 0 : index
    %c0_24 = arith.constant 0 : index
    %22 = vector.load %arg9[%c0_23, %c0_24] : memref<288x128xf32, #tpu.memory_space<vmem>>, vector<288x128xf32>
    %23 = arith.addf %22, %21 : vector<288x128xf32>
    %c0_25 = arith.constant 0 : index
    %c0_26 = arith.constant 0 : index
    %24 = vector.load %arg9[%c0_25, %c0_26] : memref<288x128xf32, #tpu.memory_space<vmem>>, vector<288x128xf32>
    tpu.vector_store %arg9[%c0_25, %c0_26], %23 {strides = array<i32>} : memref<288x128xf32, #tpu.memory_space<vmem>>, vector<288x128xf32>,
    %c0_27 = arith.constant 0 : index
    %c18 = arith.constant 18 : index
    %c0_28 = arith.constant 0 : index
    %25 = vector.load %arg2[%c0_27, %c18, %c0_28] : memref<1x326x4xf32, #tpu.memory_space<vmem>>, vector<1x288x4xf32>
    %26 = vector.shape_cast %25 : vector<1x288x4xf32> to vector<288x4xf32>
    %27 = arith.truncf %26 : vector<288x4xf32> to vector<288x4xbf16>
    %c3 = arith.constant 3 : index
    %c0_29 = arith.constant 0 : index
    %c0_30 = arith.constant 0 : index
    %28 = vector.load %arg3[%c3, %c0_29, %c0_30] : memref<9x4x128xbf16, #tpu.memory_space<vmem>>, vector<1x4x128xbf16>
    %29 = vector.shape_cast %28 : vector<1x4x128xbf16> to vector<4x128xbf16>
    %cst_31 = arith.constant dense<0.000000e+00> : vector<288x128xf32>
    %30 = tpu.matmul %27, %29, %cst_31 {dimension_numbers = #tpu.dot_dimension_numbers<[1], [0], [0], [1], [0, 0, 1, 1], [], []>} : vector<288x4xbf16>, vector<4x128xbf16>, vector<288x128xf32> -> vector<288x128xf32>
    %c0_32 = arith.constant 0 : index
    %c0_33 = arith.constant 0 : index
    %31 = vector.load %arg9[%c0_32, %c0_33] : memref<288x128xf32, #tpu.memory_space<vmem>>, vector<288x128xf32>
    %32 = arith.addf %31, %30 : vector<288x128xf32>
    %c0_34 = arith.constant 0 : index
    %c0_35 = arith.constant 0 : index
    %33 = vector.load %arg9[%c0_34, %c0_35] : memref<288x128xf32, #tpu.memory_space<vmem>>, vector<288x128xf32>
    tpu.vector_store %arg9[%c0_34, %c0_35], %32 {strides = array<i32>} : memref<288x128xf32, #tpu.memory_space<vmem>>, vector<288x128xf32>,
    %c0_36 = arith.constant 0 : index
    %c19 = arith.constant 19 : index
    %c0_37 = arith.constant 0 : index
    %34 = vector.load %arg2[%c0_36, %c19, %c0_37] : memref<1x326x4xf32, #tpu.memory_space<vmem>>, vector<1x288x4xf32>
    %35 = vector.shape_cast %34 : vector<1x288x4xf32> to vector<288x4xf32>
    %36 = arith.truncf %35 : vector<288x4xf32> to vector<288x4xbf16>
    %c4 = arith.constant 4 : index
    %c0_38 = arith.constant 0 : index
    %c0_39 = arith.constant 0 : index
    %37 = vector.load %arg3[%c4, %c0_38, %c0_39] : memref<9x4x128xbf16, #tpu.memory_space<vmem>>, vector<1x4x128xbf16>
    %38 = vector.shape_cast %37 : vector<1x4x128xbf16> to vector<4x128xbf16>
    %cst_40 = arith.constant dense<0.000000e+00> : vector<288x128xf32>
    %39 = tpu.matmul %36, %38, %cst_40 {dimension_numbers = #tpu.dot_dimension_numbers<[1], [0], [0], [1], [0, 0, 1, 1], [], []>} : vector<288x4xbf16>, vector<4x128xbf16>, vector<288x128xf32> -> vector<288x128xf32>
    %c0_41 = arith.constant 0 : index
    %c0_42 = arith.constant 0 : index
    %40 = vector.load %arg9[%c0_41, %c0_42] : memref<288x128xf32, #tpu.memory_space<vmem>>, vector<288x128xf32>
    %41 = arith.addf %40, %39 : vector<288x128xf32>
    %c0_43 = arith.constant 0 : index
    %c0_44 = arith.constant 0 : index
    %42 = vector.load %arg9[%c0_43, %c0_44] : memref<288x128xf32, #tpu.memory_space<vmem>>, vector<288x128xf32>
    tpu.vector_store %arg9[%c0_43, %c0_44], %41 {strides = array<i32>} : memref<288x128xf32, #tpu.memory_space<vmem>>, vector<288x128xf32>,
    %c0_45 = arith.constant 0 : index
    %c20 = arith.constant 20 : index
    %c0_46 = arith.constant 0 : index
    %43 = vector.load %arg2[%c0_45, %c20, %c0_46] : memref<1x326x4xf32, #tpu.memory_space<vmem>>, vector<1x288x4xf32>
    %44 = vector.shape_cast %43 : vector<1x288x4xf32> to vector<288x4xf32>
    %45 = arith.truncf %44 : vector<288x4xf32> to vector<288x4xbf16>
    %c5 = arith.constant 5 : index
    %c0_47 = arith.constant 0 : index
    %c0_48 = arith.constant 0 : index
    %46 = vector.load %arg3[%c5, %c0_47, %c0_48] : memref<9x4x128xbf16, #tpu.memory_space<vmem>>, vector<1x4x128xbf16>
    %47 = vector.shape_cast %46 : vector<1x4x128xbf16> to vector<4x128xbf16>
    %cst_49 = arith.constant dense<0.000000e+00> : vector<288x128xf32>
    %48 = tpu.matmul %45, %47, %cst_49 {dimension_numbers = #tpu.dot_dimension_numbers<[1], [0], [0], [1], [0, 0, 1, 1], [], []>} : vector<288x4xbf16>, vector<4x128xbf16>, vector<288x128xf32> -> vector<288x128xf32>
    %c0_50 = arith.constant 0 : index
    %c0_51 = arith.constant 0 : index
    %49 = vector.load %arg9[%c0_50, %c0_51] : memref<288x128xf32, #tpu.memory_space<vmem>>, vector<288x128xf32>
    %50 = arith.addf %49, %48 : vector<288x128xf32>
    %c0_52 = arith.constant 0 : index
    %c0_53 = arith.constant 0 : index
    %51 = vector.load %arg9[%c0_52, %c0_53] : memref<288x128xf32, #tpu.memory_space<vmem>>, vector<288x128xf32>
    tpu.vector_store %arg9[%c0_52, %c0_53], %50 {strides = array<i32>} : memref<288x128xf32, #tpu.memory_space<vmem>>, vector<288x128xf32>,
    %c0_54 = arith.constant 0 : index
    %c36 = arith.constant 36 : index
    %c0_55 = arith.constant 0 : index
    %52 = vector.load %arg2[%c0_54, %c36, %c0_55] : memref<1x326x4xf32, #tpu.memory_space<vmem>>, vector<1x288x4xf32>
    %53 = vector.shape_cast %52 : vector<1x288x4xf32> to vector<288x4xf32>
    %54 = arith.truncf %53 : vector<288x4xf32> to vector<288x4xbf16>
    %c6 = arith.constant 6 : index
    %c0_56 = arith.constant 0 : index
    %c0_57 = arith.constant 0 : index
    %55 = vector.load %arg3[%c6, %c0_56, %c0_57] : memref<9x4x128xbf16, #tpu.memory_space<vmem>>, vector<1x4x128xbf16>
    %56 = vector.shape_cast %55 : vector<1x4x128xbf16> to vector<4x128xbf16>
    %cst_58 = arith.constant dense<0.000000e+00> : vector<288x128xf32>
    %57 = tpu.matmul %54, %56, %cst_58 {dimension_numbers = #tpu.dot_dimension_numbers<[1], [0], [0], [1], [0, 0, 1, 1], [], []>} : vector<288x4xbf16>, vector<4x128xbf16>, vector<288x128xf32> -> vector<288x128xf32>
    %c0_59 = arith.constant 0 : index
    %c0_60 = arith.constant 0 : index
    %58 = vector.load %arg9[%c0_59, %c0_60] : memref<288x128xf32, #tpu.memory_space<vmem>>, vector<288x128xf32>
    %59 = arith.addf %58, %57 : vector<288x128xf32>
    %c0_61 = arith.constant 0 : index
    %c0_62 = arith.constant 0 : index
    %60 = vector.load %arg9[%c0_61, %c0_62] : memref<288x128xf32, #tpu.memory_space<vmem>>, vector<288x128xf32>
    tpu.vector_store %arg9[%c0_61, %c0_62], %59 {strides = array<i32>} : memref<288x128xf32, #tpu.memory_space<vmem>>, vector<288x128xf32>,
    %c0_63 = arith.constant 0 : index
    %c37 = arith.constant 37 : index
    %c0_64 = arith.constant 0 : index
    %61 = vector.load %arg2[%c0_63, %c37, %c0_64] : memref<1x326x4xf32, #tpu.memory_space<vmem>>, vector<1x288x4xf32>
    %62 = vector.shape_cast %61 : vector<1x288x4xf32> to vector<288x4xf32>
    %63 = arith.truncf %62 : vector<288x4xf32> to vector<288x4xbf16>
    %c7 = arith.constant 7 : index
    %c0_65 = arith.constant 0 : index
    %c0_66 = arith.constant 0 : index
    %64 = vector.load %arg3[%c7, %c0_65, %c0_66] : memref<9x4x128xbf16, #tpu.memory_space<vmem>>, vector<1x4x128xbf16>
    %65 = vector.shape_cast %64 : vector<1x4x128xbf16> to vector<4x128xbf16>
    %cst_67 = arith.constant dense<0.000000e+00> : vector<288x128xf32>
    %66 = tpu.matmul %63, %65, %cst_67 {dimension_numbers = #tpu.dot_dimension_numbers<[1], [0], [0], [1], [0, 0, 1, 1], [], []>} : vector<288x4xbf16>, vector<4x128xbf16>, vector<288x128xf32> -> vector<288x128xf32>
    %c0_68 = arith.constant 0 : index
    %c0_69 = arith.constant 0 : index
    %67 = vector.load %arg9[%c0_68, %c0_69] : memref<288x128xf32, #tpu.memory_space<vmem>>, vector<288x128xf32>
    %68 = arith.addf %67, %66 : vector<288x128xf32>
    %c0_70 = arith.constant 0 : index
    %c0_71 = arith.constant 0 : index
    %69 = vector.load %arg9[%c0_70, %c0_71] : memref<288x128xf32, #tpu.memory_space<vmem>>, vector<288x128xf32>
    tpu.vector_store %arg9[%c0_70, %c0_71], %68 {strides = array<i32>} : memref<288x128xf32, #tpu.memory_space<vmem>>, vector<288x128xf32>,
    %c0_72 = arith.constant 0 : index
    %c38 = arith.constant 38 : index
    %c0_73 = arith.constant 0 : index
    %70 = vector.load %arg2[%c0_72, %c38, %c0_73] : memref<1x326x4xf32, #tpu.memory_space<vmem>>, vector<1x288x4xf32>
    %71 = vector.shape_cast %70 : vector<1x288x4xf32> to vector<288x4xf32>
    %72 = arith.truncf %71 : vector<288x4xf32> to vector<288x4xbf16>
    %c8 = arith.constant 8 : index
    %c0_74 = arith.constant 0 : index
    %c0_75 = arith.constant 0 : index
    %73 = vector.load %arg3[%c8, %c0_74, %c0_75] : memref<9x4x128xbf16, #tpu.memory_space<vmem>>, vector<1x4x128xbf16>
    %74 = vector.shape_cast %73 : vector<1x4x128xbf16> to vector<4x128xbf16>
    %cst_76 = arith.constant dense<0.000000e+00> : vector<288x128xf32>
    %75 = tpu.matmul %72, %74, %cst_76 {dimension_numbers = #tpu.dot_dimension_numbers<[1], [0], [0], [1], [0, 0, 1, 1], [], []>} : vector<288x4xbf16>, vector<4x128xbf16>, vector<288x128xf32> -> vector<288x128xf32>
    %c0_77 = arith.constant 0 : index
    %c0_78 = arith.constant 0 : index
    %76 = vector.load %arg9[%c0_77, %c0_78] : memref<288x128xf32, #tpu.memory_space<vmem>>, vector<288x128xf32>
    %77 = arith.addf %76, %75 : vector<288x128xf32>
    %c0_79 = arith.constant 0 : index
    %c0_80 = arith.constant 0 : index
    %78 = vector.load %arg9[%c0_79, %c0_80] : memref<288x128xf32, #tpu.memory_space<vmem>>, vector<288x128xf32>
    tpu.vector_store %arg9[%c0_79, %c0_80], %77 {strides = array<i32>} : memref<288x128xf32, #tpu.memory_space<vmem>>, vector<288x128xf32>,
    %c0_81 = arith.constant 0 : index
    %c0_82 = arith.constant 0 : index
    %79 = vector.load %arg9[%c0_81, %c0_82] : memref<288x128xf32, #tpu.memory_space<vmem>>, vector<288x128xf32>
    %c0_83 = arith.constant 0 : index
    %c0_84 = arith.constant 0 : index
    %c0_85 = arith.constant 0 : index
    %80 = vector.load %arg7[%c0_83, %c0_84, %c0_85] : memref<1x288x128xf32, #tpu.memory_space<vmem>>, vector<1x288x128xf32>
    %81 = vector.shape_cast %80 : vector<1x288x128xf32> to vector<288x128xf32>
    %82 = vector.shape_cast %79 : vector<288x128xf32> to vector<1x288x128xf32>
    tpu.vector_store %arg7[%c0_83, %c0_84, %c0_85], %82 {strides = array<i32>} : memref<1x288x128xf32, #tpu.memory_space<vmem>>, vector<1x288x128xf32>,
    %c0_86 = arith.constant 0 : index
    %c0_87 = arith.constant 0 : index
    %83 = vector.load %arg4[%c0_86, %c0_87] : memref<288x1xf32, #tpu.memory_space<vmem>>, vector<288x1xf32>
    %84 = vector.broadcast %83 : vector<288x1xf32> to vector<288x128xf32>
    %85 = arith.mulf %79, %84 : vector<288x128xf32>
    %cst_88 = arith.constant dense<0.000000e+00> : vector<128xf32>
    %86 = vector.multi_reduction <add>, %85, %cst_88 [0] : vector<288x128xf32> to vector<128xf32>
    %87 = vector.shape_cast %86 : vector<128xf32> to vector<1x128xf32>
    %88 = arith.mulf %85, %79 : vector<288x128xf32>
    %cst_89 = arith.constant dense<0.000000e+00> : vector<128xf32>
    %89 = vector.multi_reduction <add>, %88, %cst_89 [0] : vector<288x128xf32> to vector<128xf32>
    %90 = vector.shape_cast %89 : vector<128xf32> to vector<1x128xf32>
    %91 = tpu.iota {dimensions = array<i32: 0>} : vector<8x128xi32>
    %c0_i32 = arith.constant 0 : i32
    %92 = vector.broadcast %c0_i32 : i32 to vector<8x128xi32>
    %93 = arith.cmpi eq, %91, %92 : vector<8x128xi32>
    %c1_i32 = arith.constant 1 : i32
    %94 = vector.broadcast %c1_i32 : i32 to vector<8x128xi32>
    %95 = arith.cmpi eq, %91, %94 : vector<8x128xi32>
    %cst_90 = arith.constant 0.000000e+00 : f32
    %96 = vector.shape_cast %90 : vector<1x128xf32> to vector<1x128xf32>
    %97 = vector.broadcast %96 : vector<1x128xf32> to vector<8x128xf32>
    %98 = vector.broadcast %cst_90 : f32 to vector<8x128xf32>
    %99 = arith.select %95, %97, %98 : vector<8x128xi1>, vector<8x128xf32>
    %100 = vector.shape_cast %87 : vector<1x128xf32> to vector<1x128xf32>
    %101 = vector.broadcast %100 : vector<1x128xf32> to vector<8x128xf32>
    %102 = arith.select %93, %101, %99 : vector<8x128xi1>, vector<8x128xf32>
    %c0_91 = arith.constant 0 : index
    %c0_92 = arith.constant 0 : index
    %c0_93 = arith.constant 0 : index
    %103 = vector.load %arg8[%c0_91, %c0_92, %c0_93] : memref<1x8x128xf32, #tpu.memory_space<vmem>>, vector<1x8x128xf32>
    %104 = vector.shape_cast %103 : vector<1x8x128xf32> to vector<8x128xf32>
    %105 = vector.shape_cast %102 : vector<8x128xf32> to vector<1x8x128xf32>
    tpu.vector_store %arg8[%c0_91, %c0_92, %c0_93], %105 {strides = array<i32>} : memref<1x8x128xf32, #tpu.memory_space<vmem>>, vector<1x8x128xf32>,
    return
  }
  func.func @transform_0(%arg0: i32, %arg1: i32) -> (i32, i32, i32) {
    %c0_i32 = arith.constant 0 : i32
    %c0_i32_0 = arith.constant 0 : i32
    %c0_i32_1 = arith.constant 0 : i32
    return %arg0, %c0_i32, %c0_i32_0 : i32, i32, i32
  }
  func.func @transform_1(%arg0: i32, %arg1: i32) -> (i32, i32, i32) {
    %c0_i32 = arith.constant 0 : i32
    %c0_i32_0 = arith.constant 0 : i32
    %c0_i32_1 = arith.constant 0 : i32
    return %c0_i32, %c0_i32_0, %arg1 : i32, i32, i32
  }
  func.func @transform_2(%arg0: i32, %arg1: i32) -> (i32, i32) {
    %c0_i32 = arith.constant 0 : i32
    %c0_i32_0 = arith.constant 0 : i32
    %c0_i32_1 = arith.constant 0 : i32
    return %c0_i32, %c0_i32_0 : i32, i32
  }
  func.func @transform_3(%arg0: i32, %arg1: i32) -> (i32, i32) {
    %c0_i32 = arith.constant 0 : i32
    %c0_i32_0 = arith.constant 0 : i32
    %c0_i32_1 = arith.constant 0 : i32
    return %c0_i32, %c0_i32_0 : i32, i32
  }
  func.func @transform_4(%arg0: i32, %arg1: i32) -> (i32, i32) {
    %c0_i32 = arith.constant 0 : i32
    %c0_i32_0 = arith.constant 0 : i32
    %c0_i32_1 = arith.constant 0 : i32
    return %c0_i32, %c0_i32_0 : i32, i32
  }
  func.func @transform_5(%arg0: i32, %arg1: i32) -> (i32, i32, i32) {
    %c0_i32 = arith.constant 0 : i32
    %c0_i32_0 = arith.constant 0 : i32
    return %arg0, %c0_i32, %arg1 : i32, i32, i32
  }
  func.func @transform_6(%arg0: i32, %arg1: i32) -> (i32, i32, i32) {
    %c0_i32 = arith.constant 0 : i32
    %c0_i32_0 = arith.constant 0 : i32
    return %arg0, %c0_i32, %arg1 : i32, i32, i32
  }
}

module attributes {stable_mosaic.version = 11 : i64} {
  func.func @_conv_stats_kernel(%arg0: i32, %arg1: i32, %arg2: memref<1x326x8xf32, #tpu.memory_space<vmem>>, %arg3: memref<9x8x128xbf16, #tpu.memory_space<vmem>>, %arg4: memref<288x1xf32, #tpu.memory_space<vmem>>, %arg5: memref<1x8xf32, #tpu.memory_space<vmem>>, %arg6: memref<1x8xf32, #tpu.memory_space<vmem>>, %arg7: memref<1x288x128xf32, #tpu.memory_space<vmem>>, %arg8: memref<1x8x128xf32, #tpu.memory_space<vmem>>, %arg9: memref<288x128xf32, #tpu.memory_space<vmem>>) attributes {dimension_semantics = [#tpu.dimension_semantics<parallel>, #tpu.dimension_semantics<parallel>], iteration_bounds = array<i64: 2, 1>, scalar_prefetch = 0 : i64, scratch_operands = 1 : i64, tpu.core_type = #tpu.core_type<tc>, window_params = [{transform_indices = @transform_0, window_bounds = array<i64: 1, 326, 8>}, {transform_indices = @transform_1, window_bounds = array<i64: 9, 8, 128>}, {pipeline_mode = #tpu.pipeline_mode<synchronous>, transform_indices = @transform_2, window_bounds = array<i64: 288, 1>}, {pipeline_mode = #tpu.pipeline_mode<synchronous>, transform_indices = @transform_3, window_bounds = array<i64: 1, 8>}, {pipeline_mode = #tpu.pipeline_mode<synchronous>, transform_indices = @transform_4, window_bounds = array<i64: 1, 8>}, {transform_indices = @transform_5, window_bounds = array<i64: 1, 288, 128>}, {transform_indices = @transform_6, window_bounds = array<i64: 1, 8, 128>}]} {
    %c0 = arith.constant 0 : index
    %c0_0 = arith.constant 0 : index
    %c0_1 = arith.constant 0 : index
    %0 = vector.load %arg2[%c0, %c0_0, %c0_1] : memref<1x326x8xf32, #tpu.memory_space<vmem>>, vector<1x288x8xf32>
    %1 = vector.shape_cast %0 : vector<1x288x8xf32> to vector<288x8xf32>
    %c0_2 = arith.constant 0 : index
    %c0_3 = arith.constant 0 : index
    %2 = vector.load %arg5[%c0_2, %c0_3] : memref<1x8xf32, #tpu.memory_space<vmem>>, vector<1x8xf32>
    %3 = vector.broadcast %2 : vector<1x8xf32> to vector<288x8xf32>
    %4 = arith.mulf %1, %3 : vector<288x8xf32>
    %c0_4 = arith.constant 0 : index
    %c0_5 = arith.constant 0 : index
    %5 = vector.load %arg6[%c0_4, %c0_5] : memref<1x8xf32, #tpu.memory_space<vmem>>, vector<1x8xf32>
    %6 = vector.broadcast %5 : vector<1x8xf32> to vector<288x8xf32>
    %7 = arith.addf %4, %6 : vector<288x8xf32>
    %cst = arith.constant 0.000000e+00 : f32
    %8 = vector.broadcast %cst : f32 to vector<288x8xf32>
    %9 = arith.maximumf %7, %8 : vector<288x8xf32>
    %10 = arith.truncf %9 : vector<288x8xf32> to vector<288x8xbf16>
    %c0_6 = arith.constant 0 : index
    %c0_7 = arith.constant 0 : index
    %c0_8 = arith.constant 0 : index
    %11 = vector.load %arg3[%c0_6, %c0_7, %c0_8] : memref<9x8x128xbf16, #tpu.memory_space<vmem>>, vector<1x8x128xbf16>
    %12 = vector.shape_cast %11 : vector<1x8x128xbf16> to vector<8x128xbf16>
    %cst_9 = arith.constant dense<0.000000e+00> : vector<288x128xf32>
    %13 = tpu.matmul %10, %12, %cst_9 {dimension_numbers = #tpu.dot_dimension_numbers<[1], [0], [0], [1], [0, 0, 1, 1], [], []>} : vector<288x8xbf16>, vector<8x128xbf16>, vector<288x128xf32> -> vector<288x128xf32>
    %c0_10 = arith.constant 0 : index
    %c0_11 = arith.constant 0 : index
    %14 = vector.load %arg9[%c0_10, %c0_11] : memref<288x128xf32, #tpu.memory_space<vmem>>, vector<288x128xf32>
    tpu.vector_store %arg9[%c0_10, %c0_11], %13 {strides = array<i32>} : memref<288x128xf32, #tpu.memory_space<vmem>>, vector<288x128xf32>,
    %c0_12 = arith.constant 0 : index
    %c1 = arith.constant 1 : index
    %c0_13 = arith.constant 0 : index
    %15 = vector.load %arg2[%c0_12, %c1, %c0_13] : memref<1x326x8xf32, #tpu.memory_space<vmem>>, vector<1x288x8xf32>
    %16 = vector.shape_cast %15 : vector<1x288x8xf32> to vector<288x8xf32>
    %c0_14 = arith.constant 0 : index
    %c0_15 = arith.constant 0 : index
    %17 = vector.load %arg5[%c0_14, %c0_15] : memref<1x8xf32, #tpu.memory_space<vmem>>, vector<1x8xf32>
    %18 = vector.broadcast %17 : vector<1x8xf32> to vector<288x8xf32>
    %19 = arith.mulf %16, %18 : vector<288x8xf32>
    %c0_16 = arith.constant 0 : index
    %c0_17 = arith.constant 0 : index
    %20 = vector.load %arg6[%c0_16, %c0_17] : memref<1x8xf32, #tpu.memory_space<vmem>>, vector<1x8xf32>
    %21 = vector.broadcast %20 : vector<1x8xf32> to vector<288x8xf32>
    %22 = arith.addf %19, %21 : vector<288x8xf32>
    %cst_18 = arith.constant 0.000000e+00 : f32
    %23 = vector.broadcast %cst_18 : f32 to vector<288x8xf32>
    %24 = arith.maximumf %22, %23 : vector<288x8xf32>
    %25 = arith.truncf %24 : vector<288x8xf32> to vector<288x8xbf16>
    %c1_19 = arith.constant 1 : index
    %c0_20 = arith.constant 0 : index
    %c0_21 = arith.constant 0 : index
    %26 = vector.load %arg3[%c1_19, %c0_20, %c0_21] : memref<9x8x128xbf16, #tpu.memory_space<vmem>>, vector<1x8x128xbf16>
    %27 = vector.shape_cast %26 : vector<1x8x128xbf16> to vector<8x128xbf16>
    %cst_22 = arith.constant dense<0.000000e+00> : vector<288x128xf32>
    %28 = tpu.matmul %25, %27, %cst_22 {dimension_numbers = #tpu.dot_dimension_numbers<[1], [0], [0], [1], [0, 0, 1, 1], [], []>} : vector<288x8xbf16>, vector<8x128xbf16>, vector<288x128xf32> -> vector<288x128xf32>
    %c0_23 = arith.constant 0 : index
    %c0_24 = arith.constant 0 : index
    %29 = vector.load %arg9[%c0_23, %c0_24] : memref<288x128xf32, #tpu.memory_space<vmem>>, vector<288x128xf32>
    %30 = arith.addf %29, %28 : vector<288x128xf32>
    %c0_25 = arith.constant 0 : index
    %c0_26 = arith.constant 0 : index
    %31 = vector.load %arg9[%c0_25, %c0_26] : memref<288x128xf32, #tpu.memory_space<vmem>>, vector<288x128xf32>
    tpu.vector_store %arg9[%c0_25, %c0_26], %30 {strides = array<i32>} : memref<288x128xf32, #tpu.memory_space<vmem>>, vector<288x128xf32>,
    %c0_27 = arith.constant 0 : index
    %c2 = arith.constant 2 : index
    %c0_28 = arith.constant 0 : index
    %32 = vector.load %arg2[%c0_27, %c2, %c0_28] : memref<1x326x8xf32, #tpu.memory_space<vmem>>, vector<1x288x8xf32>
    %33 = vector.shape_cast %32 : vector<1x288x8xf32> to vector<288x8xf32>
    %c0_29 = arith.constant 0 : index
    %c0_30 = arith.constant 0 : index
    %34 = vector.load %arg5[%c0_29, %c0_30] : memref<1x8xf32, #tpu.memory_space<vmem>>, vector<1x8xf32>
    %35 = vector.broadcast %34 : vector<1x8xf32> to vector<288x8xf32>
    %36 = arith.mulf %33, %35 : vector<288x8xf32>
    %c0_31 = arith.constant 0 : index
    %c0_32 = arith.constant 0 : index
    %37 = vector.load %arg6[%c0_31, %c0_32] : memref<1x8xf32, #tpu.memory_space<vmem>>, vector<1x8xf32>
    %38 = vector.broadcast %37 : vector<1x8xf32> to vector<288x8xf32>
    %39 = arith.addf %36, %38 : vector<288x8xf32>
    %cst_33 = arith.constant 0.000000e+00 : f32
    %40 = vector.broadcast %cst_33 : f32 to vector<288x8xf32>
    %41 = arith.maximumf %39, %40 : vector<288x8xf32>
    %42 = arith.truncf %41 : vector<288x8xf32> to vector<288x8xbf16>
    %c2_34 = arith.constant 2 : index
    %c0_35 = arith.constant 0 : index
    %c0_36 = arith.constant 0 : index
    %43 = vector.load %arg3[%c2_34, %c0_35, %c0_36] : memref<9x8x128xbf16, #tpu.memory_space<vmem>>, vector<1x8x128xbf16>
    %44 = vector.shape_cast %43 : vector<1x8x128xbf16> to vector<8x128xbf16>
    %cst_37 = arith.constant dense<0.000000e+00> : vector<288x128xf32>
    %45 = tpu.matmul %42, %44, %cst_37 {dimension_numbers = #tpu.dot_dimension_numbers<[1], [0], [0], [1], [0, 0, 1, 1], [], []>} : vector<288x8xbf16>, vector<8x128xbf16>, vector<288x128xf32> -> vector<288x128xf32>
    %c0_38 = arith.constant 0 : index
    %c0_39 = arith.constant 0 : index
    %46 = vector.load %arg9[%c0_38, %c0_39] : memref<288x128xf32, #tpu.memory_space<vmem>>, vector<288x128xf32>
    %47 = arith.addf %46, %45 : vector<288x128xf32>
    %c0_40 = arith.constant 0 : index
    %c0_41 = arith.constant 0 : index
    %48 = vector.load %arg9[%c0_40, %c0_41] : memref<288x128xf32, #tpu.memory_space<vmem>>, vector<288x128xf32>
    tpu.vector_store %arg9[%c0_40, %c0_41], %47 {strides = array<i32>} : memref<288x128xf32, #tpu.memory_space<vmem>>, vector<288x128xf32>,
    %c0_42 = arith.constant 0 : index
    %c18 = arith.constant 18 : index
    %c0_43 = arith.constant 0 : index
    %49 = vector.load %arg2[%c0_42, %c18, %c0_43] : memref<1x326x8xf32, #tpu.memory_space<vmem>>, vector<1x288x8xf32>
    %50 = vector.shape_cast %49 : vector<1x288x8xf32> to vector<288x8xf32>
    %c0_44 = arith.constant 0 : index
    %c0_45 = arith.constant 0 : index
    %51 = vector.load %arg5[%c0_44, %c0_45] : memref<1x8xf32, #tpu.memory_space<vmem>>, vector<1x8xf32>
    %52 = vector.broadcast %51 : vector<1x8xf32> to vector<288x8xf32>
    %53 = arith.mulf %50, %52 : vector<288x8xf32>
    %c0_46 = arith.constant 0 : index
    %c0_47 = arith.constant 0 : index
    %54 = vector.load %arg6[%c0_46, %c0_47] : memref<1x8xf32, #tpu.memory_space<vmem>>, vector<1x8xf32>
    %55 = vector.broadcast %54 : vector<1x8xf32> to vector<288x8xf32>
    %56 = arith.addf %53, %55 : vector<288x8xf32>
    %cst_48 = arith.constant 0.000000e+00 : f32
    %57 = vector.broadcast %cst_48 : f32 to vector<288x8xf32>
    %58 = arith.maximumf %56, %57 : vector<288x8xf32>
    %59 = arith.truncf %58 : vector<288x8xf32> to vector<288x8xbf16>
    %c3 = arith.constant 3 : index
    %c0_49 = arith.constant 0 : index
    %c0_50 = arith.constant 0 : index
    %60 = vector.load %arg3[%c3, %c0_49, %c0_50] : memref<9x8x128xbf16, #tpu.memory_space<vmem>>, vector<1x8x128xbf16>
    %61 = vector.shape_cast %60 : vector<1x8x128xbf16> to vector<8x128xbf16>
    %cst_51 = arith.constant dense<0.000000e+00> : vector<288x128xf32>
    %62 = tpu.matmul %59, %61, %cst_51 {dimension_numbers = #tpu.dot_dimension_numbers<[1], [0], [0], [1], [0, 0, 1, 1], [], []>} : vector<288x8xbf16>, vector<8x128xbf16>, vector<288x128xf32> -> vector<288x128xf32>
    %c0_52 = arith.constant 0 : index
    %c0_53 = arith.constant 0 : index
    %63 = vector.load %arg9[%c0_52, %c0_53] : memref<288x128xf32, #tpu.memory_space<vmem>>, vector<288x128xf32>
    %64 = arith.addf %63, %62 : vector<288x128xf32>
    %c0_54 = arith.constant 0 : index
    %c0_55 = arith.constant 0 : index
    %65 = vector.load %arg9[%c0_54, %c0_55] : memref<288x128xf32, #tpu.memory_space<vmem>>, vector<288x128xf32>
    tpu.vector_store %arg9[%c0_54, %c0_55], %64 {strides = array<i32>} : memref<288x128xf32, #tpu.memory_space<vmem>>, vector<288x128xf32>,
    %c0_56 = arith.constant 0 : index
    %c19 = arith.constant 19 : index
    %c0_57 = arith.constant 0 : index
    %66 = vector.load %arg2[%c0_56, %c19, %c0_57] : memref<1x326x8xf32, #tpu.memory_space<vmem>>, vector<1x288x8xf32>
    %67 = vector.shape_cast %66 : vector<1x288x8xf32> to vector<288x8xf32>
    %c0_58 = arith.constant 0 : index
    %c0_59 = arith.constant 0 : index
    %68 = vector.load %arg5[%c0_58, %c0_59] : memref<1x8xf32, #tpu.memory_space<vmem>>, vector<1x8xf32>
    %69 = vector.broadcast %68 : vector<1x8xf32> to vector<288x8xf32>
    %70 = arith.mulf %67, %69 : vector<288x8xf32>
    %c0_60 = arith.constant 0 : index
    %c0_61 = arith.constant 0 : index
    %71 = vector.load %arg6[%c0_60, %c0_61] : memref<1x8xf32, #tpu.memory_space<vmem>>, vector<1x8xf32>
    %72 = vector.broadcast %71 : vector<1x8xf32> to vector<288x8xf32>
    %73 = arith.addf %70, %72 : vector<288x8xf32>
    %cst_62 = arith.constant 0.000000e+00 : f32
    %74 = vector.broadcast %cst_62 : f32 to vector<288x8xf32>
    %75 = arith.maximumf %73, %74 : vector<288x8xf32>
    %76 = arith.truncf %75 : vector<288x8xf32> to vector<288x8xbf16>
    %c4 = arith.constant 4 : index
    %c0_63 = arith.constant 0 : index
    %c0_64 = arith.constant 0 : index
    %77 = vector.load %arg3[%c4, %c0_63, %c0_64] : memref<9x8x128xbf16, #tpu.memory_space<vmem>>, vector<1x8x128xbf16>
    %78 = vector.shape_cast %77 : vector<1x8x128xbf16> to vector<8x128xbf16>
    %cst_65 = arith.constant dense<0.000000e+00> : vector<288x128xf32>
    %79 = tpu.matmul %76, %78, %cst_65 {dimension_numbers = #tpu.dot_dimension_numbers<[1], [0], [0], [1], [0, 0, 1, 1], [], []>} : vector<288x8xbf16>, vector<8x128xbf16>, vector<288x128xf32> -> vector<288x128xf32>
    %c0_66 = arith.constant 0 : index
    %c0_67 = arith.constant 0 : index
    %80 = vector.load %arg9[%c0_66, %c0_67] : memref<288x128xf32, #tpu.memory_space<vmem>>, vector<288x128xf32>
    %81 = arith.addf %80, %79 : vector<288x128xf32>
    %c0_68 = arith.constant 0 : index
    %c0_69 = arith.constant 0 : index
    %82 = vector.load %arg9[%c0_68, %c0_69] : memref<288x128xf32, #tpu.memory_space<vmem>>, vector<288x128xf32>
    tpu.vector_store %arg9[%c0_68, %c0_69], %81 {strides = array<i32>} : memref<288x128xf32, #tpu.memory_space<vmem>>, vector<288x128xf32>,
    %c0_70 = arith.constant 0 : index
    %c20 = arith.constant 20 : index
    %c0_71 = arith.constant 0 : index
    %83 = vector.load %arg2[%c0_70, %c20, %c0_71] : memref<1x326x8xf32, #tpu.memory_space<vmem>>, vector<1x288x8xf32>
    %84 = vector.shape_cast %83 : vector<1x288x8xf32> to vector<288x8xf32>
    %c0_72 = arith.constant 0 : index
    %c0_73 = arith.constant 0 : index
    %85 = vector.load %arg5[%c0_72, %c0_73] : memref<1x8xf32, #tpu.memory_space<vmem>>, vector<1x8xf32>
    %86 = vector.broadcast %85 : vector<1x8xf32> to vector<288x8xf32>
    %87 = arith.mulf %84, %86 : vector<288x8xf32>
    %c0_74 = arith.constant 0 : index
    %c0_75 = arith.constant 0 : index
    %88 = vector.load %arg6[%c0_74, %c0_75] : memref<1x8xf32, #tpu.memory_space<vmem>>, vector<1x8xf32>
    %89 = vector.broadcast %88 : vector<1x8xf32> to vector<288x8xf32>
    %90 = arith.addf %87, %89 : vector<288x8xf32>
    %cst_76 = arith.constant 0.000000e+00 : f32
    %91 = vector.broadcast %cst_76 : f32 to vector<288x8xf32>
    %92 = arith.maximumf %90, %91 : vector<288x8xf32>
    %93 = arith.truncf %92 : vector<288x8xf32> to vector<288x8xbf16>
    %c5 = arith.constant 5 : index
    %c0_77 = arith.constant 0 : index
    %c0_78 = arith.constant 0 : index
    %94 = vector.load %arg3[%c5, %c0_77, %c0_78] : memref<9x8x128xbf16, #tpu.memory_space<vmem>>, vector<1x8x128xbf16>
    %95 = vector.shape_cast %94 : vector<1x8x128xbf16> to vector<8x128xbf16>
    %cst_79 = arith.constant dense<0.000000e+00> : vector<288x128xf32>
    %96 = tpu.matmul %93, %95, %cst_79 {dimension_numbers = #tpu.dot_dimension_numbers<[1], [0], [0], [1], [0, 0, 1, 1], [], []>} : vector<288x8xbf16>, vector<8x128xbf16>, vector<288x128xf32> -> vector<288x128xf32>
    %c0_80 = arith.constant 0 : index
    %c0_81 = arith.constant 0 : index
    %97 = vector.load %arg9[%c0_80, %c0_81] : memref<288x128xf32, #tpu.memory_space<vmem>>, vector<288x128xf32>
    %98 = arith.addf %97, %96 : vector<288x128xf32>
    %c0_82 = arith.constant 0 : index
    %c0_83 = arith.constant 0 : index
    %99 = vector.load %arg9[%c0_82, %c0_83] : memref<288x128xf32, #tpu.memory_space<vmem>>, vector<288x128xf32>
    tpu.vector_store %arg9[%c0_82, %c0_83], %98 {strides = array<i32>} : memref<288x128xf32, #tpu.memory_space<vmem>>, vector<288x128xf32>,
    %c0_84 = arith.constant 0 : index
    %c36 = arith.constant 36 : index
    %c0_85 = arith.constant 0 : index
    %100 = vector.load %arg2[%c0_84, %c36, %c0_85] : memref<1x326x8xf32, #tpu.memory_space<vmem>>, vector<1x288x8xf32>
    %101 = vector.shape_cast %100 : vector<1x288x8xf32> to vector<288x8xf32>
    %c0_86 = arith.constant 0 : index
    %c0_87 = arith.constant 0 : index
    %102 = vector.load %arg5[%c0_86, %c0_87] : memref<1x8xf32, #tpu.memory_space<vmem>>, vector<1x8xf32>
    %103 = vector.broadcast %102 : vector<1x8xf32> to vector<288x8xf32>
    %104 = arith.mulf %101, %103 : vector<288x8xf32>
    %c0_88 = arith.constant 0 : index
    %c0_89 = arith.constant 0 : index
    %105 = vector.load %arg6[%c0_88, %c0_89] : memref<1x8xf32, #tpu.memory_space<vmem>>, vector<1x8xf32>
    %106 = vector.broadcast %105 : vector<1x8xf32> to vector<288x8xf32>
    %107 = arith.addf %104, %106 : vector<288x8xf32>
    %cst_90 = arith.constant 0.000000e+00 : f32
    %108 = vector.broadcast %cst_90 : f32 to vector<288x8xf32>
    %109 = arith.maximumf %107, %108 : vector<288x8xf32>
    %110 = arith.truncf %109 : vector<288x8xf32> to vector<288x8xbf16>
    %c6 = arith.constant 6 : index
    %c0_91 = arith.constant 0 : index
    %c0_92 = arith.constant 0 : index
    %111 = vector.load %arg3[%c6, %c0_91, %c0_92] : memref<9x8x128xbf16, #tpu.memory_space<vmem>>, vector<1x8x128xbf16>
    %112 = vector.shape_cast %111 : vector<1x8x128xbf16> to vector<8x128xbf16>
    %cst_93 = arith.constant dense<0.000000e+00> : vector<288x128xf32>
    %113 = tpu.matmul %110, %112, %cst_93 {dimension_numbers = #tpu.dot_dimension_numbers<[1], [0], [0], [1], [0, 0, 1, 1], [], []>} : vector<288x8xbf16>, vector<8x128xbf16>, vector<288x128xf32> -> vector<288x128xf32>
    %c0_94 = arith.constant 0 : index
    %c0_95 = arith.constant 0 : index
    %114 = vector.load %arg9[%c0_94, %c0_95] : memref<288x128xf32, #tpu.memory_space<vmem>>, vector<288x128xf32>
    %115 = arith.addf %114, %113 : vector<288x128xf32>
    %c0_96 = arith.constant 0 : index
    %c0_97 = arith.constant 0 : index
    %116 = vector.load %arg9[%c0_96, %c0_97] : memref<288x128xf32, #tpu.memory_space<vmem>>, vector<288x128xf32>
    tpu.vector_store %arg9[%c0_96, %c0_97], %115 {strides = array<i32>} : memref<288x128xf32, #tpu.memory_space<vmem>>, vector<288x128xf32>,
    %c0_98 = arith.constant 0 : index
    %c37 = arith.constant 37 : index
    %c0_99 = arith.constant 0 : index
    %117 = vector.load %arg2[%c0_98, %c37, %c0_99] : memref<1x326x8xf32, #tpu.memory_space<vmem>>, vector<1x288x8xf32>
    %118 = vector.shape_cast %117 : vector<1x288x8xf32> to vector<288x8xf32>
    %c0_100 = arith.constant 0 : index
    %c0_101 = arith.constant 0 : index
    %119 = vector.load %arg5[%c0_100, %c0_101] : memref<1x8xf32, #tpu.memory_space<vmem>>, vector<1x8xf32>
    %120 = vector.broadcast %119 : vector<1x8xf32> to vector<288x8xf32>
    %121 = arith.mulf %118, %120 : vector<288x8xf32>
    %c0_102 = arith.constant 0 : index
    %c0_103 = arith.constant 0 : index
    %122 = vector.load %arg6[%c0_102, %c0_103] : memref<1x8xf32, #tpu.memory_space<vmem>>, vector<1x8xf32>
    %123 = vector.broadcast %122 : vector<1x8xf32> to vector<288x8xf32>
    %124 = arith.addf %121, %123 : vector<288x8xf32>
    %cst_104 = arith.constant 0.000000e+00 : f32
    %125 = vector.broadcast %cst_104 : f32 to vector<288x8xf32>
    %126 = arith.maximumf %124, %125 : vector<288x8xf32>
    %127 = arith.truncf %126 : vector<288x8xf32> to vector<288x8xbf16>
    %c7 = arith.constant 7 : index
    %c0_105 = arith.constant 0 : index
    %c0_106 = arith.constant 0 : index
    %128 = vector.load %arg3[%c7, %c0_105, %c0_106] : memref<9x8x128xbf16, #tpu.memory_space<vmem>>, vector<1x8x128xbf16>
    %129 = vector.shape_cast %128 : vector<1x8x128xbf16> to vector<8x128xbf16>
    %cst_107 = arith.constant dense<0.000000e+00> : vector<288x128xf32>
    %130 = tpu.matmul %127, %129, %cst_107 {dimension_numbers = #tpu.dot_dimension_numbers<[1], [0], [0], [1], [0, 0, 1, 1], [], []>} : vector<288x8xbf16>, vector<8x128xbf16>, vector<288x128xf32> -> vector<288x128xf32>
    %c0_108 = arith.constant 0 : index
    %c0_109 = arith.constant 0 : index
    %131 = vector.load %arg9[%c0_108, %c0_109] : memref<288x128xf32, #tpu.memory_space<vmem>>, vector<288x128xf32>
    %132 = arith.addf %131, %130 : vector<288x128xf32>
    %c0_110 = arith.constant 0 : index
    %c0_111 = arith.constant 0 : index
    %133 = vector.load %arg9[%c0_110, %c0_111] : memref<288x128xf32, #tpu.memory_space<vmem>>, vector<288x128xf32>
    tpu.vector_store %arg9[%c0_110, %c0_111], %132 {strides = array<i32>} : memref<288x128xf32, #tpu.memory_space<vmem>>, vector<288x128xf32>,
    %c0_112 = arith.constant 0 : index
    %c38 = arith.constant 38 : index
    %c0_113 = arith.constant 0 : index
    %134 = vector.load %arg2[%c0_112, %c38, %c0_113] : memref<1x326x8xf32, #tpu.memory_space<vmem>>, vector<1x288x8xf32>
    %135 = vector.shape_cast %134 : vector<1x288x8xf32> to vector<288x8xf32>
    %c0_114 = arith.constant 0 : index
    %c0_115 = arith.constant 0 : index
    %136 = vector.load %arg5[%c0_114, %c0_115] : memref<1x8xf32, #tpu.memory_space<vmem>>, vector<1x8xf32>
    %137 = vector.broadcast %136 : vector<1x8xf32> to vector<288x8xf32>
    %138 = arith.mulf %135, %137 : vector<288x8xf32>
    %c0_116 = arith.constant 0 : index
    %c0_117 = arith.constant 0 : index
    %139 = vector.load %arg6[%c0_116, %c0_117] : memref<1x8xf32, #tpu.memory_space<vmem>>, vector<1x8xf32>
    %140 = vector.broadcast %139 : vector<1x8xf32> to vector<288x8xf32>
    %141 = arith.addf %138, %140 : vector<288x8xf32>
    %cst_118 = arith.constant 0.000000e+00 : f32
    %142 = vector.broadcast %cst_118 : f32 to vector<288x8xf32>
    %143 = arith.maximumf %141, %142 : vector<288x8xf32>
    %144 = arith.truncf %143 : vector<288x8xf32> to vector<288x8xbf16>
    %c8 = arith.constant 8 : index
    %c0_119 = arith.constant 0 : index
    %c0_120 = arith.constant 0 : index
    %145 = vector.load %arg3[%c8, %c0_119, %c0_120] : memref<9x8x128xbf16, #tpu.memory_space<vmem>>, vector<1x8x128xbf16>
    %146 = vector.shape_cast %145 : vector<1x8x128xbf16> to vector<8x128xbf16>
    %cst_121 = arith.constant dense<0.000000e+00> : vector<288x128xf32>
    %147 = tpu.matmul %144, %146, %cst_121 {dimension_numbers = #tpu.dot_dimension_numbers<[1], [0], [0], [1], [0, 0, 1, 1], [], []>} : vector<288x8xbf16>, vector<8x128xbf16>, vector<288x128xf32> -> vector<288x128xf32>
    %c0_122 = arith.constant 0 : index
    %c0_123 = arith.constant 0 : index
    %148 = vector.load %arg9[%c0_122, %c0_123] : memref<288x128xf32, #tpu.memory_space<vmem>>, vector<288x128xf32>
    %149 = arith.addf %148, %147 : vector<288x128xf32>
    %c0_124 = arith.constant 0 : index
    %c0_125 = arith.constant 0 : index
    %150 = vector.load %arg9[%c0_124, %c0_125] : memref<288x128xf32, #tpu.memory_space<vmem>>, vector<288x128xf32>
    tpu.vector_store %arg9[%c0_124, %c0_125], %149 {strides = array<i32>} : memref<288x128xf32, #tpu.memory_space<vmem>>, vector<288x128xf32>,
    %c0_126 = arith.constant 0 : index
    %c0_127 = arith.constant 0 : index
    %151 = vector.load %arg9[%c0_126, %c0_127] : memref<288x128xf32, #tpu.memory_space<vmem>>, vector<288x128xf32>
    %c0_128 = arith.constant 0 : index
    %c0_129 = arith.constant 0 : index
    %c0_130 = arith.constant 0 : index
    %152 = vector.load %arg7[%c0_128, %c0_129, %c0_130] : memref<1x288x128xf32, #tpu.memory_space<vmem>>, vector<1x288x128xf32>
    %153 = vector.shape_cast %152 : vector<1x288x128xf32> to vector<288x128xf32>
    %154 = vector.shape_cast %151 : vector<288x128xf32> to vector<1x288x128xf32>
    tpu.vector_store %arg7[%c0_128, %c0_129, %c0_130], %154 {strides = array<i32>} : memref<1x288x128xf32, #tpu.memory_space<vmem>>, vector<1x288x128xf32>,
    %c0_131 = arith.constant 0 : index
    %c0_132 = arith.constant 0 : index
    %155 = vector.load %arg4[%c0_131, %c0_132] : memref<288x1xf32, #tpu.memory_space<vmem>>, vector<288x1xf32>
    %156 = vector.broadcast %155 : vector<288x1xf32> to vector<288x128xf32>
    %157 = arith.mulf %151, %156 : vector<288x128xf32>
    %cst_133 = arith.constant dense<0.000000e+00> : vector<128xf32>
    %158 = vector.multi_reduction <add>, %157, %cst_133 [0] : vector<288x128xf32> to vector<128xf32>
    %159 = vector.shape_cast %158 : vector<128xf32> to vector<1x128xf32>
    %160 = arith.mulf %157, %151 : vector<288x128xf32>
    %cst_134 = arith.constant dense<0.000000e+00> : vector<128xf32>
    %161 = vector.multi_reduction <add>, %160, %cst_134 [0] : vector<288x128xf32> to vector<128xf32>
    %162 = vector.shape_cast %161 : vector<128xf32> to vector<1x128xf32>
    %163 = tpu.iota {dimensions = array<i32: 0>} : vector<8x128xi32>
    %c0_i32 = arith.constant 0 : i32
    %164 = vector.broadcast %c0_i32 : i32 to vector<8x128xi32>
    %165 = arith.cmpi eq, %163, %164 : vector<8x128xi32>
    %c1_i32 = arith.constant 1 : i32
    %166 = vector.broadcast %c1_i32 : i32 to vector<8x128xi32>
    %167 = arith.cmpi eq, %163, %166 : vector<8x128xi32>
    %cst_135 = arith.constant 0.000000e+00 : f32
    %168 = vector.shape_cast %162 : vector<1x128xf32> to vector<1x128xf32>
    %169 = vector.broadcast %168 : vector<1x128xf32> to vector<8x128xf32>
    %170 = vector.broadcast %cst_135 : f32 to vector<8x128xf32>
    %171 = arith.select %167, %169, %170 : vector<8x128xi1>, vector<8x128xf32>
    %172 = vector.shape_cast %159 : vector<1x128xf32> to vector<1x128xf32>
    %173 = vector.broadcast %172 : vector<1x128xf32> to vector<8x128xf32>
    %174 = arith.select %165, %173, %171 : vector<8x128xi1>, vector<8x128xf32>
    %c0_136 = arith.constant 0 : index
    %c0_137 = arith.constant 0 : index
    %c0_138 = arith.constant 0 : index
    %175 = vector.load %arg8[%c0_136, %c0_137, %c0_138] : memref<1x8x128xf32, #tpu.memory_space<vmem>>, vector<1x8x128xf32>
    %176 = vector.shape_cast %175 : vector<1x8x128xf32> to vector<8x128xf32>
    %177 = vector.shape_cast %174 : vector<8x128xf32> to vector<1x8x128xf32>
    tpu.vector_store %arg8[%c0_136, %c0_137, %c0_138], %177 {strides = array<i32>} : memref<1x8x128xf32, #tpu.memory_space<vmem>>, vector<1x8x128xf32>,
    return
  }
  func.func @transform_0(%arg0: i32, %arg1: i32) -> (i32, i32, i32) {
    %c0_i32 = arith.constant 0 : i32
    %c0_i32_0 = arith.constant 0 : i32
    %c0_i32_1 = arith.constant 0 : i32
    return %arg0, %c0_i32, %c0_i32_0 : i32, i32, i32
  }
  func.func @transform_1(%arg0: i32, %arg1: i32) -> (i32, i32, i32) {
    %c0_i32 = arith.constant 0 : i32
    %c0_i32_0 = arith.constant 0 : i32
    %c0_i32_1 = arith.constant 0 : i32
    return %c0_i32, %c0_i32_0, %arg1 : i32, i32, i32
  }
  func.func @transform_2(%arg0: i32, %arg1: i32) -> (i32, i32) {
    %c0_i32 = arith.constant 0 : i32
    %c0_i32_0 = arith.constant 0 : i32
    %c0_i32_1 = arith.constant 0 : i32
    return %c0_i32, %c0_i32_0 : i32, i32
  }
  func.func @transform_3(%arg0: i32, %arg1: i32) -> (i32, i32) {
    %c0_i32 = arith.constant 0 : i32
    %c0_i32_0 = arith.constant 0 : i32
    %c0_i32_1 = arith.constant 0 : i32
    return %c0_i32, %c0_i32_0 : i32, i32
  }
  func.func @transform_4(%arg0: i32, %arg1: i32) -> (i32, i32) {
    %c0_i32 = arith.constant 0 : i32
    %c0_i32_0 = arith.constant 0 : i32
    %c0_i32_1 = arith.constant 0 : i32
    return %c0_i32, %c0_i32_0 : i32, i32
  }
  func.func @transform_5(%arg0: i32, %arg1: i32) -> (i32, i32, i32) {
    %c0_i32 = arith.constant 0 : i32
    %c0_i32_0 = arith.constant 0 : i32
    return %arg0, %c0_i32, %arg1 : i32, i32, i32
  }
  func.func @transform_6(%arg0: i32, %arg1: i32) -> (i32, i32, i32) {
    %c0_i32 = arith.constant 0 : i32
    %c0_i32_0 = arith.constant 0 : i32
    return %arg0, %c0_i32, %arg1 : i32, i32, i32
  }
}

module attributes {stable_mosaic.version = 11 : i64} {
  func.func @_bn_relu_kernel(%arg0: i32, %arg1: i32, %arg2: memref<1x288x128xf32, #tpu.memory_space<vmem>>, %arg3: memref<1x128xf32, #tpu.memory_space<vmem>>, %arg4: memref<1x128xf32, #tpu.memory_space<vmem>>, %arg5: memref<1x288x128xf32, #tpu.memory_space<vmem>>) attributes {dimension_semantics = [#tpu.dimension_semantics<parallel>, #tpu.dimension_semantics<parallel>], iteration_bounds = array<i64: 2, 1>, scalar_prefetch = 0 : i64, scratch_operands = 0 : i64, tpu.core_type = #tpu.core_type<tc>, window_params = [{transform_indices = @transform_0, window_bounds = array<i64: 1, 288, 128>}, {transform_indices = @transform_1, window_bounds = array<i64: 1, 128>}, {transform_indices = @transform_2, window_bounds = array<i64: 1, 128>}, {transform_indices = @transform_3, window_bounds = array<i64: 1, 288, 128>}]} {
    %c0 = arith.constant 0 : index
    %c0_0 = arith.constant 0 : index
    %c0_1 = arith.constant 0 : index
    %0 = vector.load %arg2[%c0, %c0_0, %c0_1] : memref<1x288x128xf32, #tpu.memory_space<vmem>>, vector<1x288x128xf32>
    %1 = vector.shape_cast %0 : vector<1x288x128xf32> to vector<288x128xf32>
    %c0_2 = arith.constant 0 : index
    %c0_3 = arith.constant 0 : index
    %2 = vector.load %arg3[%c0_2, %c0_3] : memref<1x128xf32, #tpu.memory_space<vmem>>, vector<1x128xf32>
    %3 = vector.broadcast %2 : vector<1x128xf32> to vector<288x128xf32>
    %4 = arith.mulf %1, %3 : vector<288x128xf32>
    %c0_4 = arith.constant 0 : index
    %c0_5 = arith.constant 0 : index
    %5 = vector.load %arg4[%c0_4, %c0_5] : memref<1x128xf32, #tpu.memory_space<vmem>>, vector<1x128xf32>
    %6 = vector.broadcast %5 : vector<1x128xf32> to vector<288x128xf32>
    %7 = arith.addf %4, %6 : vector<288x128xf32>
    %cst = arith.constant 0.000000e+00 : f32
    %8 = vector.broadcast %cst : f32 to vector<288x128xf32>
    %9 = arith.maximumf %7, %8 : vector<288x128xf32>
    %c0_6 = arith.constant 0 : index
    %c0_7 = arith.constant 0 : index
    %c0_8 = arith.constant 0 : index
    %10 = vector.load %arg5[%c0_6, %c0_7, %c0_8] : memref<1x288x128xf32, #tpu.memory_space<vmem>>, vector<1x288x128xf32>
    %11 = vector.shape_cast %10 : vector<1x288x128xf32> to vector<288x128xf32>
    %12 = vector.shape_cast %9 : vector<288x128xf32> to vector<1x288x128xf32>
    tpu.vector_store %arg5[%c0_6, %c0_7, %c0_8], %12 {strides = array<i32>} : memref<1x288x128xf32, #tpu.memory_space<vmem>>, vector<1x288x128xf32>,
    return
  }
  func.func @transform_0(%arg0: i32, %arg1: i32) -> (i32, i32, i32) {
    %c0_i32 = arith.constant 0 : i32
    %c0_i32_0 = arith.constant 0 : i32
    return %arg0, %c0_i32, %arg1 : i32, i32, i32
  }
  func.func @transform_1(%arg0: i32, %arg1: i32) -> (i32, i32) {
    %c0_i32 = arith.constant 0 : i32
    %c0_i32_0 = arith.constant 0 : i32
    return %c0_i32, %arg1 : i32, i32
  }
  func.func @transform_2(%arg0: i32, %arg1: i32) -> (i32, i32) {
    %c0_i32 = arith.constant 0 : i32
    %c0_i32_0 = arith.constant 0 : i32
    return %c0_i32, %arg1 : i32, i32
  }
  func.func @transform_3(%arg0: i32, %arg1: i32) -> (i32, i32, i32) {
    %c0_i32 = arith.constant 0 : i32
    %c0_i32_0 = arith.constant 0 : i32
    return %arg0, %c0_i32, %arg1 : i32, i32, i32
  }
}

</mosaic_0001>

<bundles_post_ra>
// kernel: _lambda_.5
= control target key start
LH: loop header
LB: loop body
LE: loop exit
PB: predicated region body
PF: predicated region fallthrough
CT: control target
= control target key end

     0   :  { %s614_s12 = smov 0   ;;  %s616_s13 = smov 0   ;;  %s805_s0 = inlined_call_operand.vmem [shape: f32[2,288,128], index: 0, kind: input, shape index: {}]   ;;  %s806_s1 = inlined_call_operand.vmem [shape: f32[1,128], index: 1, kind: input, shape index: {}]   ;;  %s807_s2 = inlined_call_operand.vmem [shape: f32[1,128], index: 2, kind: input, shape index: {}]   ;;  %s808_s3 = inlined_call_operand.vmem [shape: f32[2,288,128], index: 3, kind: output, shape index: {}]  }
   0x1   :  { %s618_s14 = smov 0  }
   0x2 LB: > { %s25_s15 = sadd.s32 1, %s588_s13  ;;  %p538_p0 = scmp.ge.s32.totalorder %s592_s14, 1  ;;  %s592_s14 = sphi %s618_s14, %s13_s14   ;;  %s588_s13 = sphi %s616_s13, %s810_s13   ;;  %s584_s12 = sphi %s614_s12, %s809_s12  }
   0x3   : > { %p27_p1 = scmp.ge.s32.totalorder %s25_s15, 2  ;;  %p172_p2 = scmp.lt.s32.totalorder %s592_s14, 3 }
   0x5   : > { %s812_s15 = smov (%p27_p1, %s25_s15), 0  ;;  %p173_p3 = pnand %p538_p0, %p172_p2 }
   0x6   : > { %p208_p4 = scmp.lt.s32.totalorder (!%p173_p3), %s584_s12, 1 }
   0x7   : > { %176 = sbr.rel (%p173_p3) target bundleno = 49 (0x31), region = 32 }
   0xc   : > { %s814_s12 = smov (!%p208_p4, %s584_s12), 1  ;;  %v635_v0 = vld [vmem:[%s806_s1] ss:$0 sm:$0xff] }
   0xd   : > { %s545_s16 = smul.u32 288, %s814_s12  ;;  %v645_v1 = vld [vmem:[%s807_s2] ss:$0 sm:$0xff] }
   0xf   : > { %s640_s21 = scalar_lea.vmem %s805_s0, %s545_s16  ;;  %s668_s26 = scalar_lea.vmem %s808_s3, %s545_s16 }
  0x10   : > { %v230_v2 = vld [vmem:[%s640_s21] sm:$0xff]  ;;  %v231_v3 = vld [vmem:[%s640_s21 + $0x8] sm:$0xff]  ;;  %v232_v4 = vld [vmem:[%s640_s21 + $0x10] sm:$0xff] }
  0x11   : > { %v273_v5 = vmul.f32 %v635_v0, %v230_v2  ;;  %v274_v6 = vmul.f32 %v635_v0, %v231_v3  ;;  %v275_v7 = vmul.f32 %v635_v0, %v232_v4  ;;  %v233_v8 = vld [vmem:[%s640_s21 + $0x18] sm:$0xff]  ;;  %v234_v9 = vld [vmem:[%s640_s21 + $0x20] sm:$0xff]  ;;  %v235_v10 = vld [vmem:[%s640_s21 + $0x28] sm:$0xff] }
  0x12   : > { %v276_v11 = vmul.f32 %v635_v0, %v233_v8  ;;  %v277_v12 = vmul.f32 %v635_v0, %v234_v9  ;;  %v278_v13 = vmul.f32 %v635_v0, %v235_v10  ;;  %v236_v14 = vld [vmem:[%s640_s21 + $0x30] sm:$0xff]  ;;  %v237_v15 = vld [vmem:[%s640_s21 + $0x38] sm:$0xff]  ;;  %v238_v24 = vld [vmem:[%s640_s21 + $0x40] sm:$0xff] }
  0x13   : > { %v316_v16 = vadd.f32 %v645_v1, %v273_v5  ;;  %v317_v17 = vadd.f32 %v645_v1, %v274_v6  ;;  %v318_v18 = vadd.f32 %v645_v1, %v275_v7  ;;  %v279_v19 = vmul.f32 %v635_v0, %v236_v14  ;;  %v239_v25 = vld [vmem:[%s640_s21 + $0x48] sm:$0xff]  ;;  %v240_v26 = vld [vmem:[%s640_s21 + $0x50] sm:$0xff]  ;;  %v241_v31 = vld [vmem:[%s640_s21 + $0x58] sm:$0xff] }
  0x14   : > { %v319_v20 = vadd.f32 %v645_v1, %v276_v11  ;;  %v320_v21 = vadd.f32 %v645_v1, %v277_v12  ;;  %v321_v22 = vadd.f32 %v645_v1, %v278_v13  ;;  %v280_v23 = vmul.f32 %v635_v0, %v237_v15  ;;  %v242_v32 = vld [vmem:[%s640_s21 + $0x60] sm:$0xff]  ;;  %v243_v33 = vld [vmem:[%s640_s21 + $0x68] sm:$0xff]  ;;  %v244_v38 = vld [vmem:[%s640_s21 + $0x70] sm:$0xff] }
  0x15   : > { %v352_v27 = vmax.f32 %v316_v16, 0.0  ;;  %v353_v28 = vmax.f32 %v317_v17, 0.0  ;;  %v354_v29 = vmax.f32 %v318_v18, 0.0  ;;  %v322_v30 = vadd.f32 %v645_v1, %v279_v19  ;;  %v245_v43 = vld [vmem:[%s640_s21 + $0x78] sm:$0xff]  ;;  %v246_v56 = vld [vmem:[%s640_s21 + $0x80] sm:$0xff]  ;;  %v247_v57 = vld [vmem:[%s640_s21 + $0x88] sm:$0xff] }
  0x16   : > { %v355_v34 = vmax.f32 %v319_v20, 0.0  ;;  %v356_v35 = vmax.f32 %v320_v21, 0.0  ;;  %v357_v36 = vmax.f32 %v321_v22, 0.0  ;;  %v323_v37 = vadd.f32 %v645_v1, %v280_v23  ;;  %v248_v58 = vld [vmem:[%s640_s21 + $0x90] sm:$0xff]  ;;  %v249_v63 = vld [vmem:[%s640_s21 + $0x98] sm:$0xff]  ;;  %v250_v2 = vld [vmem:[%s640_s21 + $0xa0] sm:$0xff] }
  0x17   : > { %388 = vst [vmem:[%s668_s26] sm:$0xff] %v352_v27  ;;  %389 = vst [vmem:[%s668_s26 + $0x8] sm:$0xff] %v353_v28  ;;  %v358_v39 = vmax.f32 %v322_v30, 0.0  ;;  %v281_v40 = vmul.f32 %v635_v0, %v238_v24  ;;  %v282_v41 = vmul.f32 %v635_v0, %v239_v25  ;;  %v283_v42 = vmul.f32 %v635_v0, %v240_v26  ;;  %v251_v3 = vld [vmem:[%s640_s21 + $0xa8] sm:$0xff]  ;;  %v252_v8 = vld [vmem:[%s640_s21 + $0xb0] sm:$0xff] }
  0x18   : > { %390 = vst [vmem:[%s668_s26 + $0x10] sm:$0xff] %v354_v29  ;;  %391 = vst [vmem:[%s668_s26 + $0x18] sm:$0xff] %v355_v34  ;;  %v359_v44 = vmax.f32 %v323_v37, 0.0  ;;  %v284_v45 = vmul.f32 %v635_v0, %v241_v31  ;;  %v285_v46 = vmul.f32 %v635_v0, %v242_v32  ;;  %v286_v47 = vmul.f32 %v635_v0, %v243_v33  ;;  %v253_v13 = vld [vmem:[%s640_s21 + $0xb8] sm:$0xff]  ;;  %v254_v26 = vld [vmem:[%s640_s21 + $0xc0] sm:$0xff] }
  0x19   : > { %392 = vst [vmem:[%s668_s26 + $0x20] sm:$0xff] %v356_v35  ;;  %393 = vst [vmem:[%s668_s26 + $0x28] sm:$0xff] %v357_v36  ;;  %v324_v48 = vadd.f32 %v645_v1, %v281_v40  ;;  %v325_v49 = vadd.f32 %v645_v1, %v282_v41  ;;  %v326_v50 = vadd.f32 %v645_v1, %v283_v42  ;;  %v255_v27 = vld [vmem:[%s640_s21 + $0xc8] sm:$0xff]  ;;  %v256_v28 = vld [vmem:[%s640_s21 + $0xd0] sm:$0xff] }
  0x1a   : > { %394 = vst [vmem:[%s668_s26 + $0x30] sm:$0xff] %v358_v39  ;;  %v287_v51 = vmul.f32 %v635_v0, %v244_v38  ;;  %395 = vst [vmem:[%s668_s26 + $0x38] sm:$0xff] %v359_v44  ;;  %v327_v52 = vadd.f32 %v645_v1, %v284_v45  ;;  %v328_v53 = vadd.f32 %v645_v1, %v285_v46  ;;  %v257_v33 = vld [vmem:[%s640_s21 + $0xd8] sm:$0xff]  ;;  %v258_v34 = vld [vmem:[%s640_s21 + $0xe0] sm:$0xff] }
  0x1b   : > { %v329_v54 = vadd.f32 %v645_v1, %v286_v47  ;;  %v288_v55 = vmul.f32 %v635_v0, %v245_v43  ;;  %v360_v59 = vmax.f32 %v324_v48, 0.0  ;;  %v361_v60 = vmax.f32 %v325_v49, 0.0  ;;  %v259_v35 = vld [vmem:[%s640_s21 + $0xe8] sm:$0xff]  ;;  %v260_v40 = vld [vmem:[%s640_s21 + $0xf0] sm:$0xff]  ;;  %v261_v45 = vld [vmem:[%s640_s21 + $0xf8] sm:$0xff] }
  0x1c   : > { %v362_v61 = vmax.f32 %v326_v50, 0.0  ;;  %v330_v62 = vadd.f32 %v645_v1, %v287_v51  ;;  %v363_v4 = vmax.f32 %v327_v52, 0.0  ;;  %v364_v5 = vmax.f32 %v328_v53, 0.0 }
  0x1d   : > { %v365_v6 = vmax.f32 %v329_v54, 0.0  ;;  %v331_v7 = vadd.f32 %v645_v1, %v288_v55  ;;  %396 = vst [vmem:[%s668_s26 + $0x40] sm:$0xff] %v360_v59  ;;  %397 = vst [vmem:[%s668_s26 + $0x48] sm:$0xff] %v361_v60  ;;  %v289_v10 = vmul.f32 %v635_v0, %v246_v56  ;;  %v290_v11 = vmul.f32 %v635_v0, %v247_v57  ;;  %v263_v59 = vld [vmem:[%s640_s21 + $0x108] sm:$0xff]  ;;  %v264_v60 = vld [vmem:[%s640_s21 + $0x110] sm:$0xff] }
  0x1e   : > { %398 = vst [vmem:[%s668_s26 + $0x50] sm:$0xff] %v362_v61  ;;  %v366_v9 = vmax.f32 %v330_v62, 0.0  ;;  %v291_v12 = vmul.f32 %v635_v0, %v248_v58  ;;  %399 = vst [vmem:[%s668_s26 + $0x58] sm:$0xff] %v363_v4  ;;  %v292_v15 = vmul.f32 %v635_v0, %v249_v63  ;;  %v293_v16 = vmul.f32 %v635_v0, %v250_v2  ;;  %v262_v58 = vld [vmem:[%s640_s21 + $0x100] sm:$0xff] }
  0x1f   : > { %400 = vst [vmem:[%s668_s26 + $0x60] sm:$0xff] %v364_v5  ;;  %401 = vst [vmem:[%s668_s26 + $0x68] sm:$0xff] %v365_v6  ;;  %v367_v14 = vmax.f32 %v331_v7, 0.0  ;;  %v294_v17 = vmul.f32 %v635_v0, %v251_v3  ;;  %v332_v18 = vadd.f32 %v645_v1, %v289_v10  ;;  %v333_v19 = vadd.f32 %v645_v1, %v290_v11  ;;  %v265_v3 = vld [vmem:[%s640_s21 + $0x118] sm:$0xff] }
  0x20   : > { %402 = vst [vmem:[%s668_s26 + $0x70] sm:$0xff] %v366_v9  ;;  %v334_v20 = vadd.f32 %v645_v1, %v291_v12  ;;  %v295_v21 = vmul.f32 %v635_v0, %v252_v8  ;;  %v335_v22 = vadd.f32 %v645_v1, %v292_v15  ;;  %v336_v23 = vadd.f32 %v645_v1, %v293_v16 }
  0x21   : > { %403 = vst [vmem:[%s668_s26 + $0x78] sm:$0xff] %v367_v14  ;;  %v337_v24 = vadd.f32 %v645_v1, %v294_v17  ;;  %v296_v25 = vmul.f32 %v635_v0, %v253_v13  ;;  %v368_v29 = vmax.f32 %v332_v18, 0.0  ;;  %v369_v30 = vmax.f32 %v333_v19, 0.0 }
  0x22   : > { %v370_v31 = vmax.f32 %v334_v20, 0.0  ;;  %v338_v32 = vadd.f32 %v645_v1, %v295_v21  ;;  %v371_v36 = vmax.f32 %v335_v22, 0.0  ;;  %v372_v37 = vmax.f32 %v336_v23, 0.0 }
  0x23   : > { %v373_v38 = vmax.f32 %v337_v24, 0.0  ;;  %v339_v39 = vadd.f32 %v645_v1, %v296_v25  ;;  %404 = vst [vmem:[%s668_s26 + $0x80] sm:$0xff] %v368_v29  ;;  %405 = vst [vmem:[%s668_s26 + $0x88] sm:$0xff] %v369_v30  ;;  %v297_v42 = vmul.f32 %v635_v0, %v254_v26  ;;  %v298_v43 = vmul.f32 %v635_v0, %v255_v27 }
  0x24   : > { %406 = vst [vmem:[%s668_s26 + $0x90] sm:$0xff] %v370_v31  ;;  %v374_v41 = vmax.f32 %v338_v32, 0.0  ;;  %v299_v44 = vmul.f32 %v635_v0, %v256_v28  ;;  %407 = vst [vmem:[%s668_s26 + $0x98] sm:$0xff] %v371_v36  ;;  %v300_v47 = vmul.f32 %v635_v0, %v257_v33  ;;  %v301_v48 = vmul.f32 %v635_v0, %v258_v34 }
  0x25   : > { %408 = vst [vmem:[%s668_s26 + $0xa0] sm:$0xff] %v372_v37  ;;  %409 = vst [vmem:[%s668_s26 + $0xa8] sm:$0xff] %v373_v38  ;;  %v375_v46 = vmax.f32 %v339_v39, 0.0  ;;  %v302_v49 = vmul.f32 %v635_v0, %v259_v35  ;;  %v340_v50 = vadd.f32 %v645_v1, %v297_v42  ;;  %v341_v51 = vadd.f32 %v645_v1, %v298_v43 }
  0x26   : > { %410 = vst [vmem:[%s668_s26 + $0xb0] sm:$0xff] %v374_v41  ;;  %v342_v52 = vadd.f32 %v645_v1, %v299_v44  ;;  %v303_v53 = vmul.f32 %v635_v0, %v260_v40  ;;  %v343_v54 = vadd.f32 %v645_v1, %v300_v47  ;;  %v344_v55 = vadd.f32 %v645_v1, %v301_v48 }
  0x27   : > { %411 = vst [vmem:[%s668_s26 + $0xb8] sm:$0xff] %v375_v46  ;;  %v345_v56 = vadd.f32 %v645_v1, %v302_v49  ;;  %v304_v57 = vmul.f32 %v635_v0, %v261_v45  ;;  %v376_v61 = vmax.f32 %v340_v50, 0.0  ;;  %v377_v62 = vmax.f32 %v341_v51, 0.0 }
  0x28   : > { %v378_v63 = vmax.f32 %v342_v52, 0.0  ;;  %v346_v2 = vadd.f32 %v645_v1, %v303_v53  ;;  %v379_v4 = vmax.f32 %v343_v54, 0.0  ;;  %v380_v5 = vmax.f32 %v344_v55, 0.0 }
  0x29   : > { %v381_v6 = vmax.f32 %v345_v56, 0.0  ;;  %v347_v7 = vadd.f32 %v645_v1, %v304_v57  ;;  %412 = vst [vmem:[%s668_s26 + $0xc0] sm:$0xff] %v376_v61  ;;  %413 = vst [vmem:[%s668_s26 + $0xc8] sm:$0xff] %v377_v62  ;;  %v305_v9 = vmul.f32 %v635_v0, %v262_v58  ;;  %v306_v10 = vmul.f32 %v635_v0, %v263_v59 }
  0x2a   : > { %414 = vst [vmem:[%s668_s26 + $0xd0] sm:$0xff] %v378_v63  ;;  %v382_v8 = vmax.f32 %v346_v2, 0.0  ;;  %v307_v11 = vmul.f32 %v635_v0, %v264_v60  ;;  %415 = vst [vmem:[%s668_s26 + $0xd8] sm:$0xff] %v379_v4  ;;  %v308_v13 = vmul.f32 %v635_v0, %v265_v3 }
  0x2b   : > { %416 = vst [vmem:[%s668_s26 + $0xe0] sm:$0xff] %v380_v5  ;;  %417 = vst [vmem:[%s668_s26 + $0xe8] sm:$0xff] %v381_v6  ;;  %v383_v12 = vmax.f32 %v347_v7, 0.0  ;;  %v348_v14 = vadd.f32 %v645_v1, %v305_v9  ;;  %v349_v15 = vadd.f32 %v645_v1, %v306_v10 }
  0x2c   : > { %418 = vst [vmem:[%s668_s26 + $0xf0] sm:$0xff] %v382_v8  ;;  %v350_v16 = vadd.f32 %v645_v1, %v307_v11  ;;  %v351_v17 = vadd.f32 %v645_v1, %v308_v13 }
  0x2d   : > { %419 = vst [vmem:[%s668_s26 + $0xf8] sm:$0xff] %v383_v12  ;;  %v384_v18 = vmax.f32 %v348_v14, 0.0  ;;  %v385_v19 = vmax.f32 %v349_v15, 0.0 }
  0x2e   : > { %v386_v20 = vmax.f32 %v350_v16, 0.0  ;;  %v387_v21 = vmax.f32 %v351_v17, 0.0 }
  0x2f   : > { %420 = vst [vmem:[%s668_s26 + $0x100] sm:$0xff] %v384_v18  ;;  %421 = vst [vmem:[%s668_s26 + $0x108] sm:$0xff] %v385_v19 }
  0x30   : > { %422 = vst [vmem:[%s668_s26 + $0x110] sm:$0xff] %v386_v20  ;;  %423 = vst [vmem:[%s668_s26 + $0x118] sm:$0xff] %v387_v21 }
  0x31 PF: > { %s13_s14 = sadd.s32 1, %s592_s14   ;;  %s809_s12 = smov %s588_s13 }
  0x32   : > { %p10_p5 = scmp.ge.s32.totalorder %s13_s14, 4   ;;  %s810_s13 = smov %s812_s15 }
  0x34   :  { %12 = sbr.rel (!%p10_p5) target bundleno = 2 (0x2), region = 68 }

// kernel: _lambda_.3
= control target key start
LH: loop header
LB: loop body
LE: loop exit
PB: predicated region body
PF: predicated region fallthrough
CT: control target
= control target key end

     0   :  { %s5198_s21 = smov 0   ;;  %s5200_s22 = smov 0   ;;  %s6447_s0 = inlined_call_operand.vmem [shape: f32[2,326,4], index: 0, kind: input, shape index: {}]   ;;  %s6448_s1 = inlined_call_operand.vmem [shape: bf16[9,4,128], index: 1, kind: input, shape index: {}]   ;;  %s6449_s2 = inlined_call_operand.vmem [shape: f32[288,1], index: 2, kind: input, shape index: {}]   ;;  %s6450_s3 = inlined_call_operand.vmem [shape: f32[1,4], index: 3, kind: input, shape index: {}]   ;;  %s6451_s4 = inlined_call_operand.vmem [shape: f32[1,4], index: 4, kind: input, shape index: {}]   ;;  %s6452_s5 = inlined_call_operand.vmem [shape: f32[2,288,128], index: 5, kind: output, shape index: {0}]   ;;  %s6453_s6 = inlined_call_operand.vmem [shape: f32[2,8,128], index: 6, kind: output, shape index: {1}]  }
   0x1   :  { %s5202_s23 = smov 0  }
   0x2 LB: > { %s29_s3 = sadd.s32 1, %s5156_s22  ;;  %p4408_p0 = scmp.ge.s32.totalorder %s5160_s23, 1  ;;  %s5160_s23 = sphi %s5202_s23, %s17_s23   ;;  %s5156_s22 = sphi %s5200_s22, %s6463_s22   ;;  %s5152_s21 = sphi %s5198_s21, %s6462_s21  }
   0x3   : > { %p31_p1 = scmp.ge.s32.totalorder %s29_s3, 2  ;;  %p240_p2 = scmp.lt.s32.totalorder %s5160_s23, 3 }
   0x5   : > { %s6465_s3 = smov (%p31_p1, %s29_s3), 0  ;;  %p241_p3 = pnand %p4408_p0, %p240_p2 }
   0x7   : > { %244 = sbr.rel (%p241_p3) target bundleno = 568 (0x238), region = 40 }
   0xc   : > { %v363_v0 = vld [vmem:[%s6448_s1] sm:$0x3]  ;;  %vm419_vm0 = vcmask 1041408   ;;  %p284_p4 = scmp.lt.s32.totalorder %s5152_s21, 1  ;;  %v4449_v2 = vld [vmem:[%s6448_s1 + $0x4] sm:$0x3] }
   0xd   : > { %5099 = vmatprep.subr.msk.bf16.mxu0 %vm419_vm0, %v363_v0  ;;  %5100 = vmatprep.subr.msk.bf16.mxu1 %vm419_vm0, %v363_v0  ;;  %v421_v1 = vsel %vm419_vm0, %v363_v0, 0  ;;  %v4430_v3 = vld [vmem:[%s6448_s1 + $0x2] sm:$0x3]  ;;  %vm364_vm1 = vcmask 31744   ;;  %v1145_v15 = vsel %vm419_vm0, %v4449_v2, 0 }
   0xe   : > { %4756 = vmatpush3.bf16.msra.mxu0 %v421_v1  ;;  %5098 = vmatpush3.bf16.msra.mxu1 %v421_v1  ;;  %s6467_s21 = smov (!%p284_p4, %s5152_s21), 1  ;;  %v747_v18 = vsel %vm419_vm0, %v4430_v3, 0  ;;  %v5258_v24 = vld [vmem:[%s6448_s1 + $0x6] sm:$0x3]  ;;  %v5263_v25 = vld [vmem:[%s6448_s1 + $0x8] sm:$0x3] }
   0xf   : > { %5102 = vmatprep.subr.msk.bf16.mxu0 %vm419_vm0, %v4449_v2  ;;  %5101 = vmatprep.subr.msk.bf16.mxu1 %vm419_vm0, %v4430_v3  ;;  %s5109_s29 = smul.u32 328, %s6467_s21  ;;  %s4411_s12 = sshll.u32 %s6467_s21, 3 }
  0x10   : > { %s307_s15 = scalar_lea.vmem %s6453_s6, %s4411_s12 }
  0x11   : > { %s5236_s8 = scalar_lea.vmem %s6447_s0, %s5109_s29 }
  0x12   : > { %v309_v4 = vld [vmem:[%s5236_s8] sm:$0xff]  ;;  %v310_v5 = vld [vmem:[%s5236_s8 + $0x8] sm:$0xff]  ;;  %v311_v9 = vld [vmem:[%s5236_s8 + $0x10] sm:$0xff] }
  0x13   : > { %v329_v6 = vld [vmem:[%s5236_s8 + $0xa0] sm:$0xff]  ;;  %v345_v7 = vpack.c.bf16 %v310_v5, %v309_v4  ;;  %v330_v8 = vld [vmem:[%s5236_s8 + $0xa8] sm:$0xff]  ;;  %v312_v10 = vld [vmem:[%s5236_s8 + $0x18] sm:$0xff] }
  0x14   : > { %v355_v11 = vpack.c.bf16 %v330_v8, %v329_v6  ;;  %v346_v12 = vpack.c.bf16 %v312_v10, %v311_v9  ;;  %v331_v13 = vld [vmem:[%s5236_s8 + $0xb0] sm:$0xff]  ;;  %v332_v14 = vld [vmem:[%s5236_s8 + $0xb8] sm:$0xff]  ;;  %v313_v16 = vld [vmem:[%s5236_s8 + $0x20] sm:$0xff]  ;;  %v1543_v10 = vsel %vm419_vm0, %v5258_v24, 0 }
  0x15   : > { %4757 = vmatprep.mubr.msk.bf16.mxu0 %vm364_vm1, %v345_v7  ;;  %v356_v17 = vpack.c.bf16 %v332_v14, %v331_v13  ;;  %v314_v19 = vld [vmem:[%s5236_s8 + $0x28] sm:$0xff]  ;;  %v333_v20 = vld [vmem:[%s5236_s8 + $0xc0] sm:$0xff]  ;;  %v315_v26 = vld [vmem:[%s5236_s8 + $0x30] sm:$0xff] }
  0x16   : > { %v334_v21 = vld [vmem:[%s5236_s8 + $0xc8] sm:$0xff]  ;;  %4777 = vmatprep.mubr.msk.bf16.mxu1 %vm364_vm1, %v355_v11  ;;  %4758 = vmatmul.mubr.msk.bf16.vlgmr.msra.gmra.mxu0 %vm364_vm1, %v346_v12  ;;  %v347_v22 = vpack.c.bf16 %v314_v19, %v313_v16  ;;  %v316_v27 = vld [vmem:[%s5236_s8 + $0x38] sm:$0xff]  ;;  %v335_v28 = vld [vmem:[%s5236_s8 + $0xd0] sm:$0xff] }
  0x17   : > { %v357_v23 = vpack.c.bf16 %v334_v21, %v333_v20  ;;  %4778 = vmatmul.mubr.msk.bf16.vlgmr.msra.gmra.mxu1 %vm364_vm1, %v356_v17  ;;  %4832 = vmatpush3.bf16.msra.mxu0 %v1145_v15  ;;  %v336_v29 = vld [vmem:[%s5236_s8 + $0xd8] sm:$0xff]  ;;  %v317_v30 = vld [vmem:[%s5236_s8 + $0x40] sm:$0xff]  ;;  %v318_v31 = vld [vmem:[%s5236_s8 + $0x48] sm:$0xff]  ;;  %v348_v34 = vpack.c.bf16 %v316_v27, %v315_v26 }
  0x18   : > { %4794 = vmatpush3.bf16.msra.mxu1 %v747_v18  ;;  %4761 = vmatprep.mubr.msk.bf16.mxu0 %vm364_vm1, %v347_v22  ;;  %v337_v32 = vld [vmem:[%s5236_s8 + $0xe0] sm:$0xff]  ;;  %v338_v33 = vld [vmem:[%s5236_s8 + $0xe8] sm:$0xff]  ;;  %v358_v35 = vpack.c.bf16 %v336_v29, %v335_v28  ;;  %v349_v36 = vpack.c.bf16 %v318_v31, %v317_v30  ;;  %v319_v38 = vld [vmem:[%s5236_s8 + $0x50] sm:$0xff]  ;;  %v1941_v22 = vsel %vm419_vm0, %v5263_v25, 0 }
  0x19   : > { %4781 = vmatprep.mubr.msk.bf16.mxu1 %vm364_vm1, %v357_v23  ;;  %5103 = vmatprep.subr.msk.bf16.mxu1 %vm419_vm0, %v5258_v24  ;;  %v359_v37 = vpack.c.bf16 %v338_v33, %v337_v32  ;;  %v320_v39 = vld [vmem:[%s5236_s8 + $0x58] sm:$0xff]  ;;  %v339_v40 = vld [vmem:[%s5236_s8 + $0xf0] sm:$0xff]  ;;  %v321_v42 = vld [vmem:[%s5236_s8 + $0x60] sm:$0xff] }
  0x1a   : > { %5104 = vmatprep.subr.msk.bf16.mxu0 %vm419_vm0, %v5263_v25  ;;  %v340_v41 = vld [vmem:[%s5236_s8 + $0xf8] sm:$0xff]  ;;  %v322_v43 = vld [vmem:[%s5236_s8 + $0x68] sm:$0xff]  ;;  %v341_v44 = vld [vmem:[%s5236_s8 + $0x100] sm:$0xff]  ;;  %v350_v46 = vpack.c.bf16 %v320_v39, %v319_v38 }
  0x1b   : > { %v342_v45 = vld [vmem:[%s5236_s8 + $0x108] sm:$0xff]  ;;  %v360_v47 = vpack.c.bf16 %v340_v41, %v339_v40  ;;  %v351_v48 = vpack.c.bf16 %v322_v43, %v321_v42  ;;  %v323_v50 = vld [vmem:[%s5236_s8 + $0x70] sm:$0xff]  ;;  %v324_v51 = vld [vmem:[%s5236_s8 + $0x78] sm:$0xff] }
  0x1c   : > { %v361_v49 = vpack.c.bf16 %v342_v45, %v341_v44  ;;  %v343_v52 = vld [vmem:[%s5236_s8 + $0x110] sm:$0xff]  ;;  %v344_v53 = vld [vmem:[%s5236_s8 + $0x118] sm:$0xff]  ;;  %v325_v54 = vld [vmem:[%s5236_s8 + $0x80] sm:$0xff]  ;;  %v352_v58 = vpack.c.bf16 %v324_v51, %v323_v50 }
  0x1d   : > { %v326_v55 = vld [vmem:[%s5236_s8 + $0x88] sm:$0xff]  ;;  %v362_v59 = vpack.c.bf16 %v344_v53, %v343_v52  ;;  %v327_v62 = vld [vmem:[%s5236_s8 + $0x90] sm:$0xff]  ;;  %v328_v63 = vld [vmem:[%s5236_s8 + $0x98] sm:$0xff] }
  0x1e   : > { %4762 = vmatmul.mubr.msk.bf16.gmra.mxu0 %vm364_vm1, %v348_v34  ;;  %v636_v56 = vld [vmem:[%s5236_s8 + $0x1] sm:$0xff]  ;;  %v637_v57 = vld [vmem:[%s5236_s8 + $0x9] sm:$0xff]  ;;  %v353_v60 = vpack.c.bf16 %v326_v55, %v325_v54  ;;  %v638_v0 = vld [vmem:[%s5236_s8 + $0x11] sm:$0xff]  ;;  %v354_v6 = vpack.c.bf16 %v328_v63, %v327_v62 }
  0x1f   : > { %4782 = vmatmul.mubr.msk.bf16.gmra.mxu1 %vm364_vm1, %v358_v35  ;;  %4765 = vmatprep.mubr.msk.bf16.mxu0 %vm364_vm1, %v349_v36  ;;  %v672_v61 = vpack.c.bf16 %v637_v57, %v636_v56  ;;  %v639_v1 = vld [vmem:[%s5236_s8 + $0x19] sm:$0xff]  ;;  %v1034_v2 = vld [vmem:[%s5236_s8 + $0x2] sm:$0xff]  ;;  %v1035_v3 = vld [vmem:[%s5236_s8 + $0xa] sm:$0xff] }
  0x20   : > { %4785 = vmatprep.mubr.msk.bf16.mxu1 %vm364_vm1, %v359_v37  ;;  %v640_v4 = vld [vmem:[%s5236_s8 + $0x21] sm:$0xff]  ;;  %v641_v5 = vld [vmem:[%s5236_s8 + $0x29] sm:$0xff]  ;;  %v673_v7 = vpack.c.bf16 %v639_v1, %v638_v0  ;;  %v1070_v8 = vpack.c.bf16 %v1035_v3, %v1034_v2  ;;  %v1036_v12 = vld [vmem:[%s5236_s8 + $0x12] sm:$0xff] }
  0x21   : > { %v674_v9 = vpack.c.bf16 %v641_v5, %v640_v4  ;;  %v5322_v11 = vld [vmem:[%s6448_s1 + $0xa] sm:$0x3]  ;;  %v1037_v13 = vld [vmem:[%s5236_s8 + $0x1a] sm:$0xff]  ;;  %v642_v14 = vld [vmem:[%s5236_s8 + $0x31] sm:$0xff] }
  0x22   : > { %v643_v15 = vld [vmem:[%s5236_s8 + $0x39] sm:$0xff]  ;;  %v644_v16 = vld [vmem:[%s5236_s8 + $0x41] sm:$0xff]  ;;  %v645_v17 = vld [vmem:[%s5236_s8 + $0x49] sm:$0xff]  ;;  %v5337_v20 = vpack.c.bf16 %v1037_v13, %v1036_v12 }
  0x23   : > { %v1038_v18 = vld [vmem:[%s5236_s8 + $0x22] sm:$0xff]  ;;  %v1039_v19 = vld [vmem:[%s5236_s8 + $0x2a] sm:$0xff]  ;;  %v675_v21 = vpack.c.bf16 %v643_v15, %v642_v14  ;;  %v676_v23 = vpack.c.bf16 %v645_v17, %v644_v16  ;;  %v1040_v28 = vld [vmem:[%s5236_s8 + $0x32] sm:$0xff] }
  0x24   : > { %v5341_v24 = vpack.c.bf16 %v1039_v19, %v1038_v18  ;;  %v5348_v26 = vld [vmem:[%s6448_s1 + $0xc] sm:$0x3]  ;;  %v646_v27 = vld [vmem:[%s5236_s8 + $0x51] sm:$0xff]  ;;  %v1041_v29 = vld [vmem:[%s5236_s8 + $0x3a] sm:$0xff] }
  0x25   : > { %v647_v25 = vld [vmem:[%s5236_s8 + $0x59] sm:$0xff]  ;;  %v1042_v30 = vld [vmem:[%s5236_s8 + $0x42] sm:$0xff]  ;;  %v1043_v31 = vld [vmem:[%s5236_s8 + $0x4a] sm:$0xff]  ;;  %v5364_v34 = vpack.c.bf16 %v1041_v29, %v1040_v28 }
  0x26   : > { %4766 = vmatmul.mubr.msk.bf16.gmra.mxu0 %vm364_vm1, %v350_v46  ;;  %v648_v32 = vld [vmem:[%s5236_s8 + $0x61] sm:$0xff]  ;;  %v649_v33 = vld [vmem:[%s5236_s8 + $0x69] sm:$0xff]  ;;  %v677_v35 = vpack.c.bf16 %v647_v25, %v646_v27  ;;  %v5366_v36 = vpack.c.bf16 %v1043_v31, %v1042_v30  ;;  %v650_v38 = vld [vmem:[%s5236_s8 + $0x71] sm:$0xff] }
  0x27   : > { %4786 = vmatmul.mubr.msk.bf16.gmra.mxu1 %vm364_vm1, %v360_v47  ;;  %4769 = vmatprep.mubr.msk.bf16.mxu0 %vm364_vm1, %v351_v48  ;;  %v678_v37 = vpack.c.bf16 %v649_v33, %v648_v32  ;;  %v1044_v39 = vld [vmem:[%s5236_s8 + $0x52] sm:$0xff]  ;;  %v1045_v40 = vld [vmem:[%s5236_s8 + $0x5a] sm:$0xff]  ;;  %v1046_v42 = vld [vmem:[%s5236_s8 + $0x62] sm:$0xff] }
  0x28   : > { %4789 = vmatprep.mubr.msk.bf16.mxu1 %vm364_vm1, %v361_v49  ;;  %v651_v41 = vld [vmem:[%s5236_s8 + $0x79] sm:$0xff]  ;;  %v1047_v43 = vld [vmem:[%s5236_s8 + $0x6a] sm:$0xff]  ;;  %v652_v44 = vld [vmem:[%s5236_s8 + $0x81] sm:$0xff]  ;;  %v5382_v46 = vpack.c.bf16 %v1045_v40, %v1044_v39 }
  0x29   : > { %v653_v45 = vld [vmem:[%s5236_s8 + $0x89] sm:$0xff]  ;;  %v679_v47 = vpack.c.bf16 %v651_v41, %v650_v38  ;;  %v5384_v48 = vpack.c.bf16 %v1047_v43, %v1046_v42  ;;  %v654_v50 = vld [vmem:[%s5236_s8 + $0x91] sm:$0xff]  ;;  %v1049_v52 = vld [vmem:[%s5236_s8 + $0x7a] sm:$0xff] }
  0x2a   : > { %v680_v49 = vpack.c.bf16 %v653_v45, %v652_v44  ;;  %v1048_v51 = vld [vmem:[%s5236_s8 + $0x72] sm:$0xff]  ;;  %v1050_v54 = vld [vmem:[%s5236_s8 + $0x82] sm:$0xff]  ;;  %v1051_v55 = vld [vmem:[%s5236_s8 + $0x8a] sm:$0xff] }
  0x2b   : > { %v655_v53 = vld [vmem:[%s5236_s8 + $0x99] sm:$0xff]  ;;  %v656_v56 = vld [vmem:[%s5236_s8 + $0xa1] sm:$0xff]  ;;  %v657_v57 = vld [vmem:[%s5236_s8 + $0xa9] sm:$0xff] }
  0x2c   : > { %v658_v62 = vld [vmem:[%s5236_s8 + $0xb1] sm:$0xff]  ;;  %v1053_v0 = vld [vmem:[%s5236_s8 + $0x9a] sm:$0xff]  ;;  %v1054_v2 = vld [vmem:[%s5236_s8 + $0xa2] sm:$0xff] }
  0x2d   : > { %v1052_v63 = vld [vmem:[%s5236_s8 + $0x92] sm:$0xff]  ;;  %v1055_v3 = vld [vmem:[%s5236_s8 + $0xaa] sm:$0xff]  ;;  %v660_v4 = vld [vmem:[%s5236_s8 + $0xc1] sm:$0xff] }
  0x2e   : > { %4770 = vmatmul.mubr.msk.bf16.gmra.mxu0 %vm364_vm1, %v352_v58  ;;  %v5400_v58 = vpack.c.bf16 %v1049_v52, %v1048_v51  ;;  %v659_v1 = vld [vmem:[%s5236_s8 + $0xb9] sm:$0xff]  ;;  %v661_v5 = vld [vmem:[%s5236_s8 + $0xc9] sm:$0xff]  ;;  %v664_v17 = vld [vmem:[%s5236_s8 + $0xe1] sm:$0xff] }
  0x2f   : > { %4790 = vmatmul.mubr.msk.bf16.gmra.mxu1 %vm364_vm1, %v362_v59  ;;  %4773 = vmatprep.mubr.msk.bf16.mxu0 %vm364_vm1, %v353_v60  ;;  %v681_v59 = vpack.c.bf16 %v655_v53, %v654_v50  ;;  %v5402_v60 = vpack.c.bf16 %v1051_v55, %v1050_v54  ;;  %v1056_v12 = vld [vmem:[%s5236_s8 + $0xb2] sm:$0xff]  ;;  %v1057_v13 = vld [vmem:[%s5236_s8 + $0xba] sm:$0xff]  ;;  %v1058_v15 = vld [vmem:[%s5236_s8 + $0xc2] sm:$0xff] }
  0x30   : > { %4795 = vmatprep.mubr.msk.bf16.mxu1 %vm364_vm1, %v672_v61  ;;  %v682_v61 = vpack.c.bf16 %v657_v57, %v656_v56  ;;  %v663_v14 = vld [vmem:[%s5236_s8 + $0xd9] sm:$0xff]  ;;  %v1059_v16 = vld [vmem:[%s5236_s8 + $0xca] sm:$0xff]  ;;  %v5436_v19 = vpack.c.bf16 %v1057_v13, %v1056_v12  ;;  %v1062_v30 = vld [vmem:[%s5236_s8 + $0xe2] sm:$0xff]  ;;  %v2339_v57 = vsel %vm419_vm0, %v5322_v11, 0 }
  0x31   : > { %v665_v18 = vld [vmem:[%s5236_s8 + $0xe9] sm:$0xff]  ;;  %v666_v27 = vld [vmem:[%s5236_s8 + $0xf1] sm:$0xff]  ;;  %v1061_v29 = vld [vmem:[%s5236_s8 + $0xda] sm:$0xff] }
  0x32   : > { %v1060_v28 = vld [vmem:[%s5236_s8 + $0xd2] sm:$0xff]  ;;  %v1063_v31 = vld [vmem:[%s5236_s8 + $0xea] sm:$0xff]  ;;  %v668_v32 = vld [vmem:[%s5236_s8 + $0x101] sm:$0xff] }
  0x33   : > { %v667_v25 = vld [vmem:[%s5236_s8 + $0xf9] sm:$0xff]  ;;  %v669_v33 = vld [vmem:[%s5236_s8 + $0x109] sm:$0xff]  ;;  %v5456_v38 = vpack.c.bf16 %v1063_v31, %v1062_v30  ;;  %v670_v40 = vld [vmem:[%s5236_s8 + $0x111] sm:$0xff] }
  0x34   : > { %v688_v39 = vpack.c.bf16 %v669_v33, %v668_v32  ;;  %v1064_v41 = vld [vmem:[%s5236_s8 + $0xf2] sm:$0xff]  ;;  %v1065_v42 = vld [vmem:[%s5236_s8 + $0xfa] sm:$0xff]  ;;  %v1066_v44 = vld [vmem:[%s5236_s8 + $0x102] sm:$0xff] }
  0x35   : > { %v671_v43 = vld [vmem:[%s5236_s8 + $0x119] sm:$0xff]  ;;  %v1067_v45 = vld [vmem:[%s5236_s8 + $0x10a] sm:$0xff] }
  0x36   : > { %4774 = vmatmul.mubr.msk.bf16.gmra.mxu0 %vm364_vm1, %v354_v6  ;;  %v5418_v6 = vpack.c.bf16 %v1053_v0, %v1052_v63  ;;  %v5472_v50 = vpack.c.bf16 %v1067_v45, %v1066_v44  ;;  %v1068_v51 = vld [vmem:[%s5236_s8 + $0x112] sm:$0xff]  ;;  %v1069_v52 = vld [vmem:[%s5236_s8 + $0x11a] sm:$0xff]  ;;  %v3897_v32 = vld [vmem:[%s6449_s2 + $0x28] sm:$0xff] }
  0x37   : > { %4796 = vmatmul.mubr.msk.bf16.vlgmr.msra.gmra.mxu1 %vm364_vm1, %v673_v7  ;;  %4833 = vmatprep.mubr.msk.bf16.mxu0 %vm364_vm1, %v1070_v8  ;;  %v683_v7 = vpack.c.bf16 %v659_v1, %v658_v62  ;;  %v5420_v8 = vpack.c.bf16 %v1055_v3, %v1054_v2  ;;  %v1830_v53 = vld [vmem:[%s5236_s8 + $0x13] sm:$0xff]  ;;  %v1831_v54 = vld [vmem:[%s5236_s8 + $0x1b] sm:$0xff]  ;;  %v5485_v55 = vpack.c.bf16 %v1069_v52, %v1068_v51  ;;  %v5513_v1 = vld [vmem:[%s6448_s1 + $0x10] sm:$0x3] }
  0x38   : > { %4870 = vmatpush3.bf16.msra.mxu1 %v1543_v10  ;;  %4799 = vmatprep.mubr.msk.bf16.mxu1 %vm364_vm1, %v674_v9  ;;  %v684_v9 = vpack.c.bf16 %v661_v5, %v660_v4  ;;  %v662_v10 = vld [vmem:[%s5236_s8 + $0xd1] sm:$0xff]  ;;  %v1866_v56 = vpack.c.bf16 %v1831_v54, %v1830_v53  ;;  %v1835_v62 = vld [vmem:[%s5236_s8 + $0x3b] sm:$0xff]  ;;  %v3901_v44 = vld [vmem:[%s6449_s2 + $0x48] sm:$0xff] }
  0x39   : > { %5105 = vmatprep.subr.msk.bf16.mxu1 %vm419_vm0, %v5322_v11  ;;  %v1834_v11 = vld [vmem:[%s5236_s8 + $0x33] sm:$0xff]  ;;  %v1837_v2 = vld [vmem:[%s5236_s8 + $0x4b] sm:$0xff]  ;;  %v1839_v3 = vld [vmem:[%s5236_s8 + $0x5b] sm:$0xff] }
  0x3a   : > { %v1868_v0 = vpack.c.bf16 %v1835_v62, %v1834_v11  ;;  %v1845_v13 = vld [vmem:[%s5236_s8 + $0x8b] sm:$0xff]  ;;  %v3896_v30 = vld [vmem:[%s6449_s2 + $0x20] sm:$0xff]  ;;  %v3903_v53 = vld [vmem:[%s6449_s2 + $0x58] sm:$0xff] }
  0x3b   : > { %v1853_v31 = vld [vmem:[%s5236_s8 + $0xcb] sm:$0xff]  ;;  %v1859_v51 = vld [vmem:[%s5236_s8 + $0xfb] sm:$0xff]  ;;  %v1862_v62 = vld [vmem:[%s5236_s8 + $0x113] sm:$0xff] }
  0x3c   : > { %v3898_v33 = vld [vmem:[%s6449_s2 + $0x30] sm:$0xff]  ;;  %v3904_v54 = vld [vmem:[%s6449_s2 + $0x60] sm:$0xff] }
  0x3d   : > { %v3902_v45 = vld [vmem:[%s6449_s2 + $0x50] sm:$0xff] }
  0x3e   : > { %4834 = vmatmul.mubr.msk.bf16.vlgmr.msra.gmra.mxu0 %vm364_vm1, %v5337_v20  ;;  %v1467_v11 = vld [vmem:[%s5236_s8 + $0x12a] sm:$0xff] }
  0x3f   : > { %4800 = vmatmul.mubr.msk.bf16.gmra.mxu1 %vm364_vm1, %v675_v21  ;;  %4908 = vmatpush3.bf16.msra.mxu0 %v1941_v22  ;;  %v685_v21 = vpack.c.bf16 %v663_v14, %v662_v10  ;;  %v5438_v22 = vpack.c.bf16 %v1059_v16, %v1058_v15  ;;  %v1846_v14 = vld [vmem:[%s5236_s8 + $0x93] sm:$0xff] }
  0x40   : > { %4803 = vmatprep.mubr.msk.bf16.mxu1 %vm364_vm1, %v676_v23  ;;  %4837 = vmatprep.mubr.msk.bf16.mxu0 %vm364_vm1, %v5341_v24  ;;  %v686_v23 = vpack.c.bf16 %v665_v18, %v664_v17  ;;  %v5162_v17 = vmov 0   ;;  %v1848_v18 = vld [vmem:[%s5236_s8 + $0xa3] sm:$0xff] }
  0x41   : > { %5106 = vmatprep.subr.msk.bf16.mxu0 %vm419_vm0, %v5348_v26  ;;  %5136 = vset.pattern.permute.xlu0 %v5162_v17 }
  0x42   : > { %5137 = vset.pattern.permute.xlu1 %v5162_v17  ;;  %v3913_v17 = vld [vmem:[%s6449_s2 + $0xa8] sm:$0xff] }
  0x46   : > { %4838 = vmatmul.mubr.msk.bf16.gmra.mxu0 %vm364_vm1, %v5364_v34 }
  0x47   : > { %4804 = vmatmul.mubr.msk.bf16.gmra.mxu1 %vm364_vm1, %v677_v35  ;;  %4841 = vmatprep.mubr.msk.bf16.mxu0 %vm364_vm1, %v5366_v36  ;;  %v5454_v35 = vpack.c.bf16 %v1061_v29, %v1060_v28  ;;  %v1851_v28 = vld [vmem:[%s5236_s8 + $0xbb] sm:$0xff] }
  0x48   : > { %4807 = vmatprep.mubr.msk.bf16.mxu1 %vm364_vm1, %v678_v37  ;;  %v687_v37 = vpack.c.bf16 %v667_v25, %v666_v27  ;;  %v1850_v27 = vld [vmem:[%s5236_s8 + $0xb3] sm:$0xff] }
  0x49   : > { %v1876_v29 = vpack.c.bf16 %v1851_v28, %v1850_v27  ;;  %v3895_v25 = vld [vmem:[%s6449_s2 + $0x18] sm:$0xff]  ;;  %v3916_v28 = vld [vmem:[%s6449_s2 + $0xc0] sm:$0xff] }
  0x4a   : > { %v3915_v27 = vld [vmem:[%s6449_s2 + $0xb8] sm:$0xff] }
  0x4e   : > { %4842 = vmatmul.mubr.msk.bf16.gmra.mxu0 %vm364_vm1, %v5382_v46 }
  0x4f   : > { %4808 = vmatmul.mubr.msk.bf16.gmra.mxu1 %vm364_vm1, %v679_v47  ;;  %4845 = vmatprep.mubr.msk.bf16.mxu0 %vm364_vm1, %v5384_v48  ;;  %v5470_v47 = vpack.c.bf16 %v1065_v42, %v1064_v41  ;;  %v3899_v41 = vld [vmem:[%s6449_s2 + $0x38] sm:$0xff]  ;;  %v3900_v42 = vld [vmem:[%s6449_s2 + $0x40] sm:$0xff] }
  0x50   : > { %4811 = vmatprep.mubr.msk.bf16.mxu1 %vm364_vm1, %v680_v49  ;;  %v689_v49 = vpack.c.bf16 %v671_v43, %v670_v40  ;;  %v1857_v43 = vld [vmem:[%s5236_s8 + $0xeb] sm:$0xff] }
  0x56   : > { %4846 = vmatmul.mubr.msk.bf16.gmra.mxu0 %vm364_vm1, %v5400_v58 }
  0x57   : > { %4812 = vmatmul.mubr.msk.bf16.gmra.mxu1 %vm364_vm1, %v681_v59  ;;  %4849 = vmatprep.mubr.msk.bf16.mxu0 %vm364_vm1, %v5402_v60  ;;  %v5494_v59 = vld [vmem:[%s6448_s1 + $0xe] sm:$0x3] }
  0x58   : > { %4815 = vmatprep.mubr.msk.bf16.mxu1 %vm364_vm1, %v682_v61  ;;  %v1833_v61 = vld [vmem:[%s5236_s8 + $0x2b] sm:$0xff] }
  0x5e   : > { %4850 = vmatmul.mubr.msk.bf16.gmra.mxu0 %vm364_vm1, %v5418_v6 }
  0x5f   : > { %4816 = vmatmul.mubr.msk.bf16.gmra.mxu1 %vm364_vm1, %v683_v7  ;;  %4853 = vmatprep.mubr.msk.bf16.mxu0 %vm364_vm1, %v5420_v8  ;;  %v1842_v7 = vld [vmem:[%s5236_s8 + $0x73] sm:$0xff] }
  0x60   : > { %4819 = vmatprep.mubr.msk.bf16.mxu1 %vm364_vm1, %v684_v9  ;;  %v1843_v9 = vld [vmem:[%s5236_s8 + $0x7b] sm:$0xff] }
  0x61   : > { %v1872_v12 = vpack.c.bf16 %v1843_v9, %v1842_v7  ;;  %v2230_v7 = vld [vmem:[%s5236_s8 + $0x24] sm:$0xff]  ;;  %v2231_v9 = vld [vmem:[%s5236_s8 + $0x2c] sm:$0xff] }
  0x66   : > { %4854 = vmatmul.mubr.msk.bf16.gmra.mxu0 %vm364_vm1, %v5436_v19 }
  0x67   : > { %4820 = vmatmul.mubr.msk.bf16.gmra.mxu1 %vm364_vm1, %v685_v21  ;;  %4857 = vmatprep.mubr.msk.bf16.mxu0 %vm364_vm1, %v5438_v22  ;;  %v3894_v21 = vld [vmem:[%s6449_s2 + $0x10] sm:$0xff] }
  0x68   : > { %4823 = vmatprep.mubr.msk.bf16.mxu1 %vm364_vm1, %v686_v23  ;;  %v3893_v23 = vld [vmem:[%s6449_s2 + $0x8] sm:$0xff]  ;;  %3940 = vperm.xlu1 %5137, %v3894_v21   ;;  %v2237_v21 = vld [vmem:[%s5236_s8 + $0x5c] sm:$0xff] }
  0x6c   : > { %3945 = vperm.xlu1 %5137, %v3895_v25   ;;  %v3917_v25 = vld [vmem:[%s6449_s2 + $0xc8] sm:$0xff] }
  0x6e   : > { %4858 = vmatmul.mubr.msk.bf16.gmra.mxu0 %vm364_vm1, %v5454_v35 }
  0x6f   : > { %4824 = vmatmul.mubr.msk.bf16.gmra.mxu1 %vm364_vm1, %v687_v37  ;;  %4861 = vmatprep.mubr.msk.bf16.mxu0 %vm364_vm1, %v5456_v38  ;;  %v1854_v37 = vld [vmem:[%s5236_s8 + $0xd3] sm:$0xff] }
  0x70   : > { %4827 = vmatprep.mubr.msk.bf16.mxu1 %vm364_vm1, %v688_v39  ;;  %v1855_v39 = vld [vmem:[%s5236_s8 + $0xdb] sm:$0xff]  ;;  %3955 = vperm.xlu1 %5137, %v3897_v32  }
  0x71   : > { %v1878_v40 = vpack.c.bf16 %v1855_v39, %v1854_v37  ;;  %v2241_v32 = vld [vmem:[%s5236_s8 + $0x7c] sm:$0xff] }
  0x72   : > { %v3919_v37 = vld [vmem:[%s6449_s2 + $0xd8] sm:$0xff]  ;;  %v3920_v39 = vld [vmem:[%s6449_s2 + $0xe0] sm:$0xff] }
  0x74   : > { %3965 = vperm.xlu1 %5137, %v3899_v41  }
  0x76   : > { %4862 = vmatmul.mubr.msk.bf16.gmra.mxu0 %vm364_vm1, %v5470_v47 }
  0x77   : > { %4828 = vmatmul.mubr.msk.bf16.gmra.mxu1 %vm364_vm1, %v689_v49  ;;  %4865 = vmatprep.mubr.msk.bf16.mxu0 %vm364_vm1, %v5472_v50  ;;  %v1858_v49 = vld [vmem:[%s5236_s8 + $0xf3] sm:$0xff] }
  0x78   : > { %4871 = vmatprep.mubr.msk.bf16.mxu1 %vm364_vm1, %v5337_v20  ;;  %v1832_v20 = vld [vmem:[%s5236_s8 + $0x23] sm:$0xff]  ;;  %3975 = vperm.xlu1 %5137, %v3901_v44   ;;  %v1880_v52 = vpack.c.bf16 %v1859_v51, %v1858_v49  ;;  %v2244_v51 = vld [vmem:[%s5236_s8 + $0x94] sm:$0xff] }
  0x79   : > { %v1867_v63 = vpack.c.bf16 %v1833_v61, %v1832_v20  ;;  %v3905_v20 = vld [vmem:[%s6449_s2 + $0x68] sm:$0xff]  ;;  %v3906_v61 = vld [vmem:[%s6449_s2 + $0x70] sm:$0xff] }
  0x7a   : > { %v2242_v44 = vld [vmem:[%s5236_s8 + $0x84] sm:$0xff] }
  0x7c   : > { %3985 = vperm.xlu1 %5137, %v3903_v53  }
  0x7e   : > { %4866 = vmatmul.mubr.msk.bf16.gmra.mxu0 %vm364_vm1, %v5485_v55 }
  0x7f   : > { %4872 = vmatmul.mubr.msk.bf16.vlgmr.msra.gmra.mxu1 %vm364_vm1, %v5341_v24  ;;  %4909 = vmatprep.mubr.msk.bf16.mxu0 %vm364_vm1, %v1866_v56  ;;  %v2737_v24 = vsel %vm419_vm0, %v5348_v26, 0  ;;  %v1838_v26 = vld [vmem:[%s5236_s8 + $0x53] sm:$0xff]  ;;  %v1860_v56 = vld [vmem:[%s5236_s8 + $0x103] sm:$0xff] }
  0x80   : > { %4946 = vmatpush3.bf16.msra.mxu1 %v2339_v57  ;;  %4875 = vmatprep.mubr.msk.bf16.mxu1 %vm364_vm1, %v5364_v34  ;;  %v1836_v34 = vld [vmem:[%s5236_s8 + $0x43] sm:$0xff]  ;;  %v1870_v5 = vpack.c.bf16 %v1839_v3, %v1838_v26  ;;  %v1861_v57 = vld [vmem:[%s5236_s8 + $0x10b] sm:$0xff]  ;;  %v3907_v26 = vld [vmem:[%s6449_s2 + $0x78] sm:$0xff] }
  0x81   : > { %5107 = vmatprep.subr.msk.bf16.mxu1 %vm419_vm0, %v5494_v59  ;;  %v1869_v4 = vpack.c.bf16 %v1837_v2, %v1836_v34  ;;  %3995 = vperm.xlu1 %5137, %v3905_v20  }
  0x85   : > { %4005 = vperm.xlu1 %5137, %v3907_v26   ;;  %v2248_v26 = vld [vmem:[%s5236_s8 + $0xb4] sm:$0xff] }
  0x86   : > { %4910 = vmatmul.mubr.msk.bf16.vlgmr.msra.gmra.mxu0 %vm364_vm1, %v1867_v63  ;;  %v1863_v63 = vld [vmem:[%s5236_s8 + $0x11b] sm:$0xff] }
  0x87   : > { %4876 = vmatmul.mubr.msk.bf16.gmra.mxu1 %vm364_vm1, %v5366_v36  ;;  %4984 = vmatpush3.bf16.msra.mxu0 %v2737_v24  ;;  %v1840_v36 = vld [vmem:[%s5236_s8 + $0x63] sm:$0xff]  ;;  %v1882_v2 = vpack.c.bf16 %v1863_v63, %v1862_v62 }
  0x88   : > { %4879 = vmatprep.mubr.msk.bf16.mxu1 %vm364_vm1, %v5382_v46  ;;  %4913 = vmatprep.mubr.msk.bf16.mxu0 %vm364_vm1, %v1868_v0  ;;  %v1841_v46 = vld [vmem:[%s5236_s8 + $0x6b] sm:$0xff]  ;;  %v2229_v24 = vld [vmem:[%s5236_s8 + $0x1c] sm:$0xff]  ;;  %v1881_v0 = vpack.c.bf16 %v1861_v57, %v1860_v56 }
  0x89   : > { %5108 = vmatprep.subr.msk.bf16.mxu0 %vm419_vm0, %v5513_v1  ;;  %v1871_v10 = vpack.c.bf16 %v1841_v46, %v1840_v36  ;;  %v3909_v36 = vld [vmem:[%s6449_s2 + $0x88] sm:$0xff]  ;;  %v3910_v46 = vld [vmem:[%s6449_s2 + $0x90] sm:$0xff]  ;;  %v3924_v56 = vld [vmem:[%s6449_s2 + $0x100] sm:$0xff] }
  0x8a   : > { %4015 = vperm.xlu1 %5137, %v3909_v36   ;;  %v3925_v63 = vld [vmem:[%s6449_s2 + $0x108] sm:$0xff]  ;;  %v3927_v36 = vld [vmem:[%s6449_s2 + $0x118] sm:$0xff] }
  0x8e   : > { %4914 = vmatmul.mubr.msk.bf16.gmra.mxu0 %vm364_vm1, %v1869_v4  ;;  %v1864_v4 = vld [vmem:[%s5236_s8 + $0x123] sm:$0xff] }
  0x8f   : > { %4880 = vmatmul.mubr.msk.bf16.gmra.mxu1 %vm364_vm1, %v5384_v48  ;;  %4917 = vmatprep.mubr.msk.bf16.mxu0 %vm364_vm1, %v1870_v5  ;;  %v1844_v48 = vld [vmem:[%s5236_s8 + $0x83] sm:$0xff]  ;;  %v1865_v5 = vld [vmem:[%s5236_s8 + $0x12b] sm:$0xff] }
  0x90   : > { %4883 = vmatprep.mubr.msk.bf16.mxu1 %vm364_vm1, %v5400_v58  ;;  %v1847_v58 = vld [vmem:[%s5236_s8 + $0x9b] sm:$0xff]  ;;  %v1873_v15 = vpack.c.bf16 %v1845_v13, %v1844_v48  ;;  %v1883_v48 = vpack.c.bf16 %v1865_v5, %v1864_v4  ;;  %v2265_v13 = vpack.c.bf16 %v2231_v9, %v2230_v7 }
  0x91   : > { %v1874_v16 = vpack.c.bf16 %v1847_v58, %v1846_v14  ;;  %v3911_v14 = vld [vmem:[%s6449_s2 + $0x98] sm:$0xff]  ;;  %v3912_v58 = vld [vmem:[%s6449_s2 + $0xa0] sm:$0xff] }
  0x92   : > { %4025 = vperm.xlu1 %5137, %v3911_v14   ;;  %v2251_v14 = vld [vmem:[%s5236_s8 + $0xcc] sm:$0xff] }
  0x96   : > { %4918 = vmatmul.mubr.msk.bf16.gmra.mxu0 %vm364_vm1, %v1871_v10  ;;  %v2232_v10 = vld [vmem:[%s5236_s8 + $0x34] sm:$0xff]  ;;  %4035 = vperm.xlu1 %5137, %v3913_v17  }
  0x97   : > { %4884 = vmatmul.mubr.msk.bf16.gmra.mxu1 %vm364_vm1, %v5402_v60  ;;  %4921 = vmatprep.mubr.msk.bf16.mxu0 %vm364_vm1, %v1872_v12  ;;  %v3892_v60 = vld [vmem:[%s6449_s2] sm:$0xff] }
  0x98   : > { %4887 = vmatprep.mubr.msk.bf16.mxu1 %vm364_vm1, %v5418_v6  ;;  %3930 = vperm.xlu0 %5136, %v3892_v60   ;;  %v1849_v6 = vld [vmem:[%s5236_s8 + $0xab] sm:$0xff]  ;;  %v2233_v12 = vld [vmem:[%s5236_s8 + $0x3c] sm:$0xff] }
  0x99   : > { %v3914_v60 = vld [vmem:[%s6449_s2 + $0xb0] sm:$0xff] }
  0x9a   : > { %4045 = vperm.xlu1 %5137, %v3915_v27  }
  0x9c   : > { %3935 = vperm.xlu0 %5136, %v3893_v23  }
  0x9e   : > { %4922 = vmatmul.mubr.msk.bf16.gmra.mxu0 %vm364_vm1, %v1873_v15  ;;  %v2266_v15 = vpack.c.bf16 %v2233_v12, %v2232_v10  ;;  %4055 = vperm.xlu1 %5137, %v3917_v25  }
  0x9f   : > { %4888 = vmatmul.mubr.msk.bf16.gmra.mxu1 %vm364_vm1, %v5420_v8  ;;  %4925 = vmatprep.mubr.msk.bf16.mxu0 %vm364_vm1, %v1874_v16  ;;  %v1875_v8 = vpack.c.bf16 %v1849_v6, %v1848_v18  ;;  %v3135_v16 = vsel %vm419_vm0, %v5494_v59, 0  ;;  %v2234_v18 = vld [vmem:[%s5236_s8 + $0x44] sm:$0xff]  ;;  %v2235_v59 = vld [vmem:[%s5236_s8 + $0x4c] sm:$0xff]  ;;  %v2236_v6 = vld [vmem:[%s5236_s8 + $0x54] sm:$0xff] }
  0xa0   : > { %4891 = vmatprep.mubr.msk.bf16.mxu1 %vm364_vm1, %v5436_v19  ;;  %3950 = vperm.xlu0 %5136, %v3896_v30   ;;  %v1852_v19 = vld [vmem:[%s5236_s8 + $0xc3] sm:$0xff]  ;;  %v2267_v23 = vpack.c.bf16 %v2235_v59, %v2234_v18  ;;  %v3918_v30 = vld [vmem:[%s6449_s2 + $0xd0] sm:$0xff] }
  0xa2   : > { %4065 = vperm.xlu1 %5137, %v3919_v37  }
  0xa4   : > { %3960 = vperm.xlu0 %5136, %v3898_v33  }
  0xa6   : > { %4926 = vmatmul.mubr.msk.bf16.gmra.mxu0 %vm364_vm1, %v1875_v8  ;;  %v3533_v8 = vsel %vm419_vm0, %v5513_v1, 0  ;;  %v2238_v1 = vld [vmem:[%s5236_s8 + $0x64] sm:$0xff] }
  0xa7   : > { %4892 = vmatmul.mubr.msk.bf16.gmra.mxu1 %vm364_vm1, %v5438_v22  ;;  %4929 = vmatprep.mubr.msk.bf16.mxu0 %vm364_vm1, %v1876_v29  ;;  %v1877_v22 = vpack.c.bf16 %v1853_v31, %v1852_v19  ;;  %v2268_v29 = vpack.c.bf16 %v2237_v21, %v2236_v6  ;;  %v2239_v19 = vld [vmem:[%s5236_s8 + $0x6c] sm:$0xff]  ;;  %v2240_v31 = vld [vmem:[%s5236_s8 + $0x74] sm:$0xff] }
  0xa8   : > { %4895 = vmatprep.mubr.msk.bf16.mxu1 %vm364_vm1, %v5454_v35  ;;  %3970 = vperm.xlu0 %5136, %v3900_v42   ;;  %v1856_v35 = vld [vmem:[%s5236_s8 + $0xe3] sm:$0xff]  ;;  %v2269_v33 = vpack.c.bf16 %v2239_v19, %v2238_v1 }
  0xa9   : > { %v3921_v42 = vld [vmem:[%s6449_s2 + $0xe8] sm:$0xff]  ;;  %v2257_v1 = vld [vmem:[%s5236_s8 + $0xfc] sm:$0xff] }
  0xaa   : > { %4075 = vperm.xlu1 %5137, %v3921_v42  }
  0xac   : > { %3980 = vperm.xlu0 %5136, %v3902_v45   ;;  %v2243_v45 = vld [vmem:[%s5236_s8 + $0x8c] sm:$0xff] }
  0xae   : > { %4930 = vmatmul.mubr.msk.bf16.gmra.mxu0 %vm364_vm1, %v1877_v22  ;;  %v2270_v22 = vpack.c.bf16 %v2241_v32, %v2240_v31 }
  0xaf   : > { %4896 = vmatmul.mubr.msk.bf16.gmra.mxu1 %vm364_vm1, %v5456_v38  ;;  %4933 = vmatprep.mubr.msk.bf16.mxu0 %vm364_vm1, %v1878_v40  ;;  %v1879_v38 = vpack.c.bf16 %v1857_v43, %v1856_v35  ;;  %v3922_v35 = vld [vmem:[%s6449_s2 + $0xf0] sm:$0xff] }
  0xb0   : > { %4899 = vmatprep.mubr.msk.bf16.mxu1 %vm364_vm1, %v5470_v47  ;;  %3990 = vperm.xlu0 %5136, %v3904_v54   ;;  %v1466_v47 = vld [vmem:[%s5236_s8 + $0x122] sm:$0xff]  ;;  %v2271_v54 = vpack.c.bf16 %v2243_v45, %v2242_v44 }
  0xb1   : > { %v1485_v34 = vpack.c.bf16 %v1467_v11, %v1466_v47  ;;  %v3923_v47 = vld [vmem:[%s6449_s2 + $0xf8] sm:$0xff]  ;;  %v2258_v45 = vld [vmem:[%s5236_s8 + $0x104] sm:$0xff] }
  0xb2   : > { %4085 = vperm.xlu1 %5137, %v3923_v47   ;;  %v2261_v47 = vld [vmem:[%s5236_s8 + $0x11c] sm:$0xff] }
  0xb4   : > { %4000 = vperm.xlu0 %5136, %v3906_v61  }
  0xb6   : > { %4934 = vmatmul.mubr.msk.bf16.gmra.mxu0 %vm364_vm1, %v1879_v38  ;;  %v2245_v38 = vld [vmem:[%s5236_s8 + $0x9c] sm:$0xff]  ;;  %4095 = vperm.xlu1 %5137, %v3925_v63  }
  0xb7   : > { %4900 = vmatmul.mubr.msk.bf16.gmra.mxu1 %vm364_vm1, %v5472_v50  ;;  %4937 = vmatprep.mubr.msk.bf16.mxu0 %vm364_vm1, %v1880_v52  ;;  %v2228_v50 = vld [vmem:[%s5236_s8 + $0x14] sm:$0xff]  ;;  %v2272_v20 = vpack.c.bf16 %v2245_v38, %v2244_v51  ;;  %v2259_v51 = vld [vmem:[%s5236_s8 + $0x10c] sm:$0xff] }
  0xb8   : > { %4903 = vmatprep.mubr.msk.bf16.mxu1 %vm364_vm1, %v5485_v55  ;;  %v3908_v55 = vld [vmem:[%s6449_s2 + $0x80] sm:$0xff]  ;;  %v2264_v3 = vpack.c.bf16 %v2229_v24, %v2228_v50  ;;  %v3926_v50 = vld [vmem:[%s6449_s2 + $0x110] sm:$0xff] }
  0xb9   : > { %4010 = vperm.xlu0 %5136, %v3908_v55   ;;  %v2249_v55 = vld [vmem:[%s5236_s8 + $0xbc] sm:$0xff] }
  0xba   : > { %v2274_v7 = vpack.c.bf16 %v2249_v55, %v2248_v26  ;;  %4105 = vperm.xlu1 %5137, %v3927_v36  }
  0xbd   : > { %4020 = vperm.xlu0 %5136, %v3910_v46  }
  0xbe   : > { %4938 = vmatmul.mubr.msk.bf16.gmra.mxu0 %vm364_vm1, %v1881_v0  ;;  %v2246_v0 = vld [vmem:[%s5236_s8 + $0xa4] sm:$0xff] }
  0xbf   : > { %4904 = vmatmul.mubr.msk.bf16.gmra.mxu1 %vm364_vm1, %v1485_v34  ;;  %4941 = vmatprep.mubr.msk.bf16.mxu0 %vm364_vm1, %v1882_v2  ;;  %v2247_v34 = vld [vmem:[%s5236_s8 + $0xac] sm:$0xff] }
  0xc0   : > { %4947 = vmatprep.mubr.msk.bf16.mxu1 %vm364_vm1, %v2264_v3  ;;  %v2273_v5 = vpack.c.bf16 %v2247_v34, %v2246_v0 }
  0xc1   : > { %4030 = vperm.xlu0 %5136, %v3912_v58  }
  0xc5   : > { %4040 = vperm.xlu0 %5136, %v3914_v60  }
  0xc6   : > { %4942 = vmatmul.mubr.msk.bf16.gmra.mxu0 %vm364_vm1, %v1883_v48 }
  0xc7   : > { %4948 = vmatmul.mubr.msk.bf16.vlgmr.msra.gmra.mxu1 %vm364_vm1, %v2265_v13  ;;  %4985 = vmatprep.mubr.msk.bf16.mxu0 %vm364_vm1, %v2265_v13  ;;  %v2250_v13 = vld [vmem:[%s5236_s8 + $0xc4] sm:$0xff] }
  0xc8   : > { %5022 = vmatpush3.bf16.msra.mxu1 %v3135_v16  ;;  %4951 = vmatprep.mubr.msk.bf16.mxu1 %vm364_vm1, %v2266_v15  ;;  %v2253_v16 = vld [vmem:[%s5236_s8 + $0xdc] sm:$0xff]  ;;  %v2275_v18 = vpack.c.bf16 %v2251_v14, %v2250_v13  ;;  %v2262_v13 = vld [vmem:[%s5236_s8 + $0x124] sm:$0xff]  ;;  %v2263_v14 = vld [vmem:[%s5236_s8 + $0x12c] sm:$0xff] }
  0xc9   : > { %4050 = vperm.xlu0 %5136, %v3916_v28  }
  0xcd   : > { %4060 = vperm.xlu0 %5136, %v3918_v30   ;;  %v2256_v30 = vld [vmem:[%s5236_s8 + $0xf4] sm:$0xff] }
  0xce   : > { %4986 = vmatmul.mubr.msk.bf16.vlgmr.msra.gmra.mxu0 %vm364_vm1, %v2266_v15  ;;  %v2252_v15 = vld [vmem:[%s5236_s8 + $0xd4] sm:$0xff]  ;;  %v2278_v37 = vpack.c.bf16 %v2257_v1, %v2256_v30 }
  0xcf   : > { %4952 = vmatmul.mubr.msk.bf16.gmra.mxu1 %vm364_vm1, %v2267_v23  ;;  %5060 = vmatpush3.bf16.msra.mxu0 %v3533_v8  ;;  %v2276_v6 = vpack.c.bf16 %v2253_v16, %v2252_v15  ;;  %v2254_v8 = vld [vmem:[%s5236_s8 + $0xe4] sm:$0xff] }
  0xd0   : > { %4955 = vmatprep.mubr.msk.bf16.mxu1 %vm364_vm1, %v2268_v29  ;;  %4989 = vmatprep.mubr.msk.bf16.mxu0 %vm364_vm1, %v2267_v23 }
  0xd1   : > { %4070 = vperm.xlu0 %5136, %v3920_v39  }
  0xd5   : > { %4080 = vperm.xlu0 %5136, %v3922_v35  }
  0xd6   : > { %v5707_v40 = vpop.f32.mrf.mxu0  ;;  %4990 = vmatmul.mubr.msk.bf16.gmra.mxu0 %vm364_vm1, %v2268_v29  ;;  %v2255_v29 = vld [vmem:[%s5236_s8 + $0xec] sm:$0xff] }
  0xd7   : > { %v5710_v41 = vpop.f32.mrf.mxu1  ;;  %4956 = vmatmul.mubr.msk.bf16.gmra.mxu1 %vm364_vm1, %v2269_v33  ;;  %4993 = vmatprep.mubr.msk.bf16.mxu0 %vm364_vm1, %v2269_v33  ;;  %v2277_v32 = vpack.c.bf16 %v2255_v29, %v2254_v8 }
  0xd8   : > { %v5720_v43 = vpop.f32.mrf.mxu0  ;;  %4959 = vmatprep.mubr.msk.bf16.mxu1 %vm364_vm1, %v2270_v22 }
  0xd9   : > { %v5725_v49 = vpop.f32.mrf.mxu1  ;;  %4090 = vperm.xlu0 %5136, %v3924_v56  }
  0xda   : > { %v5729_v52 = vpop.f32.mrf.mxu0 }
  0xdb   : > { %v5731_v53 = vpop.f32.mrf.mxu1 }
  0xdc   : > { %v5739_v57 = vpop.f32.mrf.mxu0 }
  0xdd   : > { %v5741_v61 = vpop.f32.mrf.mxu1  ;;  %4100 = vperm.xlu0 %5136, %v3926_v50   ;;  %v2279_v50 = vpack.c.bf16 %v2259_v51, %v2258_v45 }
  0xde   : > { %v5743_v11 = vpop.f32.mrf.mxu0  ;;  %4994 = vmatmul.mubr.msk.bf16.gmra.mxu0 %vm364_vm1, %v2270_v22 }
  0xdf   : > { %v5746_v62 = vpop.f32.mrf.mxu1  ;;  %4960 = vmatmul.mubr.msk.bf16.gmra.mxu1 %vm364_vm1, %v2271_v54  ;;  %4997 = vmatprep.mubr.msk.bf16.mxu0 %vm364_vm1, %v2271_v54  ;;  %v2260_v54 = vld [vmem:[%s5236_s8 + $0x114] sm:$0xff] }
  0xe0   : > { %v5756_v24 = vpop.f32.mrf.mxu0  ;;  %4963 = vmatprep.mubr.msk.bf16.mxu1 %vm364_vm1, %v2272_v20  ;;  %v2280_v34 = vpack.c.bf16 %v2261_v47, %v2260_v54  ;;  %v2661_v54 = vld [vmem:[%s5236_s8 + $0x13c] sm:$0xff] }
  0xe1   : > { %v5761_v2 = vpop.f32.mrf.mxu1  ;;  %v3026_v47 = vld [vmem:[%s5236_s8 + $0x35] sm:$0xff] }
  0xe2   : > { %v5765_v3 = vpop.f32.mrf.mxu0 }
  0xe3   : > { %v5767_v4 = vpop.f32.mrf.mxu1 }
  0xe4   : > { %v5772_v46 = vpop.f32.mrf.mxu0 }
  0xe5   : > { %v5774_v9 = vpop.f32.mrf.mxu1 }
  0xe6   : > { %v5776_v10 = vpop.f32.mrf.mxu0  ;;  %4998 = vmatmul.mubr.msk.bf16.gmra.mxu0 %vm364_vm1, %v2272_v20 }
  0xe7   : > { %v5779_v12 = vpop.f32.mrf.mxu1  ;;  %4964 = vmatmul.mubr.msk.bf16.gmra.mxu1 %vm364_vm1, %v2273_v5  ;;  %5001 = vmatprep.mubr.msk.bf16.mxu0 %vm364_vm1, %v2273_v5 }
  0xe8   : > { %v5783_v48 = vpop.f32.mrf.mxu0  ;;  %4967 = vmatprep.mubr.msk.bf16.mxu1 %vm364_vm1, %v2274_v7 }
  0xe9   : > { %v5788_v58 = vpop.f32.mrf.mxu1 }
  0xea   : > { %v5792_v17 = vpop.f32.mrf.mxu0 }
  0xeb   : > { %v5794_v60 = vpop.f32.mrf.mxu1 }
  0xec   : > { %v5796_v59 = vpop.f32.mrf.mxu0 }
  0xed   : > { %v5798_v21 = vpop.f32.mrf.mxu1 }
  0xee   : > { %v5800_v23 = vpop.f32.mrf.mxu0  ;;  %5002 = vmatmul.mubr.msk.bf16.gmra.mxu0 %vm364_vm1, %v2274_v7 }
  0xef   : > { %v5803_v27 = vpop.f32.mrf.mxu1  ;;  %4968 = vmatmul.mubr.msk.bf16.gmra.mxu1 %vm364_vm1, %v2275_v18  ;;  %5005 = vmatprep.mubr.msk.bf16.mxu0 %vm364_vm1, %v2275_v18  ;;  %v3025_v18 = vld [vmem:[%s5236_s8 + $0x2d] sm:$0xff] }
  0xf0   : > { %v5807_v28 = vpop.f32.mrf.mxu0  ;;  %4971 = vmatprep.mubr.msk.bf16.mxu1 %vm364_vm1, %v2276_v6 }
  0xf1   : > { %v5812_v25 = vpop.f32.mrf.mxu1 }
  0xf2   : > { %v5816_v19 = vpop.f32.mrf.mxu0 }
  0xf3   : > { %v5818_v31 = vpop.f32.mrf.mxu1 }
  0xf4   : > { %v5820_v33 = vpop.f32.mrf.mxu0 }
  0xf5   : > { %v5822_v39 = vpop.f32.mrf.mxu1 }
  0xf6   : > { %v5824_v22 = vpop.f32.mrf.mxu0  ;;  %5006 = vmatmul.mubr.msk.bf16.gmra.mxu0 %vm364_vm1, %v2276_v6 }
  0xf7   : > { %v4797_v42 = vpop.f32.mrf.mxu1  ;;  %4972 = vmatmul.mubr.msk.bf16.gmra.mxu1 %vm364_vm1, %v2277_v32  ;;  %5009 = vmatprep.mubr.msk.bf16.mxu0 %vm364_vm1, %v2277_v32 }
  0xf8   : > { %v964_v35 = vadd.f32 %v4797_v42, %v5707_v40  ;;  %v5830_v44 = vpop.f32.mrf.mxu0  ;;  %4975 = vmatprep.mubr.msk.bf16.mxu1 %vm364_vm1, %v2278_v37 }
  0xf9   : > { %v783_v38 = vpop.f32.mrf.mxu1 }
  0xfa   : > { %v962_v56 = vadd.f32 %v783_v38, %v5720_v43  ;;  %v5838_v20 = vpop.f32.mrf.mxu0 }
  0xfb   : > { %v4798_v63 = vpop.f32.mrf.mxu1 }
  0xfc   : > { %v965_v0 = vadd.f32 %v4798_v63, %v5729_v52  ;;  %v5841_v40 = vpop.f32.mrf.mxu0 }
  0xfd   : > { %v786_v26 = vpop.f32.mrf.mxu1 }
  0xfe   : > { %v963_v55 = vadd.f32 %v786_v26, %v5739_v57  ;;  %v4835_v5 = vpop.f32.mrf.mxu0  ;;  %5010 = vmatmul.mubr.msk.bf16.gmra.mxu0 %vm364_vm1, %v2278_v37  ;;  %v3024_v57 = vld [vmem:[%s5236_s8 + $0x25] sm:$0xff] }
  0xff   : > { %v4801_v43 = vpop.f32.mrf.mxu1  ;;  %v5845_v36 = vadd.f32 %v4835_v5, %v964_v35  ;;  %4976 = vmatmul.mubr.msk.bf16.gmra.mxu1 %vm364_vm1, %v2279_v50  ;;  %5013 = vmatprep.mubr.msk.bf16.mxu0 %vm364_vm1, %v2279_v50  ;;  %v3060_v37 = vpack.c.bf16 %v3025_v18, %v3024_v57  ;;  %v3422_v50 = vld [vmem:[%s5236_s8 + $0x26] sm:$0xff] }
 0x100   : > { %v968_v52 = vadd.f32 %v4801_v43, %v5743_v11  ;;  %v1181_v7 = vpop.f32.mrf.mxu0  ;;  %4979 = vmatprep.mubr.msk.bf16.mxu1 %vm364_vm1, %v2280_v34  ;;  %v2281_v11 = vpack.c.bf16 %v2263_v14, %v2262_v13  ;;  %v3029_v5 = vld [vmem:[%s5236_s8 + $0x4d] sm:$0xff] }
 0x101   : > { %v799_v15 = vpop.f32.mrf.mxu1  ;;  %v5853_v16 = vadd.f32 %v1181_v7, %v962_v56 }
 0x102   : > { %v966_v6 = vadd.f32 %v799_v15, %v5756_v24  ;;  %v4836_v8 = vpop.f32.mrf.mxu0 }
 0x103   : > { %v4802_v29 = vpop.f32.mrf.mxu1  ;;  %v5858_v30 = vadd.f32 %v4836_v8, %v965_v0  ;;  %v3423_v0 = vld [vmem:[%s5236_s8 + $0x2e] sm:$0xff] }
 0x104   : > { %v969_v1 = vadd.f32 %v4802_v29, %v5765_v3  ;;  %v1184_v32 = vpop.f32.mrf.mxu0  ;;  %v2660_v3 = vld [vmem:[%s5236_s8 + $0x134] sm:$0xff]  ;;  %v3458_v15 = vpack.c.bf16 %v3423_v0, %v3422_v50 }
 0x105   : > { %v802_v42 = vpop.f32.mrf.mxu1  ;;  %v5861_v35 = vadd.f32 %v1184_v32, %v963_v55  ;;  %v3028_v55 = vld [vmem:[%s5236_s8 + $0x45] sm:$0xff]  ;;  %v2679_v7 = vpack.c.bf16 %v2661_v54, %v2660_v3  ;;  %v3427_v3 = vld [vmem:[%s5236_s8 + $0x4e] sm:$0xff] }
 0x106   : > { %v967_v24 = vadd.f32 %v802_v42, %v5772_v46  ;;  %v4839_v45 = vpop.f32.mrf.mxu0  ;;  %5014 = vmatmul.mubr.msk.bf16.gmra.mxu0 %vm364_vm1, %v2280_v34  ;;  %v3027_v46 = vld [vmem:[%s5236_s8 + $0x3d] sm:$0xff]  ;;  %v3062_v8 = vpack.c.bf16 %v3029_v5, %v3028_v55 }
 0x107   : > { %v4805_v51 = vpop.f32.mrf.mxu1  ;;  %v5865_v38 = vadd.f32 %v4839_v45, %v968_v52  ;;  %4980 = vmatmul.mubr.msk.bf16.gmra.mxu1 %vm364_vm1, %v2281_v11  ;;  %5017 = vmatprep.mubr.msk.bf16.mxu0 %vm364_vm1, %v2281_v11  ;;  %v3425_v42 = vld [vmem:[%s5236_s8 + $0x3e] sm:$0xff] }
 0x108   : > { %v972_v56 = vadd.f32 %v4805_v51, %v5776_v10  ;;  %v1197_v63 = vpop.f32.mrf.mxu0  ;;  %5023 = vmatprep.mubr.msk.bf16.mxu1 %vm364_vm1, %v3060_v37  ;;  %v3061_v10 = vpack.c.bf16 %v3027_v46, %v3026_v47  ;;  %v3424_v37 = vld [vmem:[%s5236_s8 + $0x36] sm:$0xff]  ;;  %v3426_v51 = vld [vmem:[%s5236_s8 + $0x46] sm:$0xff] }
 0x109   : > { %v815_v34 = vpop.f32.mrf.mxu1  ;;  %v5877_v26 = vadd.f32 %v1197_v63, %v966_v6  ;;  %v3033_v63 = vld [vmem:[%s5236_s8 + $0x6d] sm:$0xff]  ;;  %v3459_v0 = vpack.c.bf16 %v3425_v42, %v3424_v37  ;;  %v3460_v5 = vpack.c.bf16 %v3427_v3, %v3426_v51 }
 0x10a   : > { %v970_v43 = vadd.f32 %v815_v34, %v5783_v48  ;;  %v4840_v52 = vpop.f32.mrf.mxu0 }
 0x10b   : > { %v4806_v13 = vpop.f32.mrf.mxu1  ;;  %v5882_v14 = vadd.f32 %v4840_v52, %v969_v1 }
 0x10c   : > { %v973_v57 = vadd.f32 %v4806_v13, %v5792_v17  ;;  %v1200_v18 = vpop.f32.mrf.mxu0  ;;  %v3030_v17 = vld [vmem:[%s5236_s8 + $0x55] sm:$0xff] }
 0x10d   : > { %v818_v6 = vpop.f32.mrf.mxu1  ;;  %v5885_v29 = vadd.f32 %v1200_v18, %v967_v24 }
 0x10e   : > { %v971_v48 = vadd.f32 %v818_v6, %v5796_v59  ;;  %v4843_v11 = vpop.f32.mrf.mxu0  ;;  %5018 = vmatmul.mubr.msk.bf16.gmra.mxu0 %vm364_vm1, %v2679_v7  ;;  %v3031_v59 = vld [vmem:[%s5236_s8 + $0x5d] sm:$0xff] }
 0x10f   : > { %v4809_v1 = vpop.f32.mrf.mxu1  ;;  %v5889_v32 = vadd.f32 %v4843_v11, %v972_v56  ;;  %5024 = vmatmul.mubr.msk.bf16.vlgmr.msra.gmra.mxu1 %vm364_vm1, %v3061_v10  ;;  %5061 = vmatprep.mubr.msk.bf16.mxu0 %vm364_vm1, %v3458_v15  ;;  %v3032_v56 = vld [vmem:[%s5236_s8 + $0x65] sm:$0xff] }
 0x110   : > { %v976_v24 = vadd.f32 %v4809_v1, %v5800_v23  ;;  %v1213_v45 = vpop.f32.mrf.mxu0  ;;  %5027 = vmatprep.mubr.msk.bf16.mxu1 %vm364_vm1, %v3062_v8  ;;  %v3063_v23 = vpack.c.bf16 %v3031_v59, %v3030_v17  ;;  %v3064_v13 = vpack.c.bf16 %v3033_v63, %v3032_v56  ;;  %v3428_v8 = vld [vmem:[%s5236_s8 + $0x56] sm:$0xff]  ;;  %v3429_v6 = vld [vmem:[%s5236_s8 + $0x5e] sm:$0xff]  ;;  %v3430_v1 = vld [vmem:[%s5236_s8 + $0x66] sm:$0xff] }
 0x111   : > { %v831_v54 = vpop.f32.mrf.mxu1  ;;  %v5901_v47 = vadd.f32 %v1213_v45, %v970_v43  ;;  %v3431_v17 = vld [vmem:[%s5236_s8 + $0x6e] sm:$0xff]  ;;  %v3461_v3 = vpack.c.bf16 %v3429_v6, %v3428_v8  ;;  %v3040_v6 = vld [vmem:[%s5236_s8 + $0xa5] sm:$0xff] }
 0x112   : > { %v974_v46 = vadd.f32 %v831_v54, %v5807_v28  ;;  %v4844_v50 = vpop.f32.mrf.mxu0  ;;  %v3037_v45 = vld [vmem:[%s5236_s8 + $0x8d] sm:$0xff]  ;;  %v3462_v63 = vpack.c.bf16 %v3431_v17, %v3430_v1 }
 0x113   : > { %v4810_v34 = vpop.f32.mrf.mxu1  ;;  %v5906_v55 = vadd.f32 %v4844_v50, %v973_v57 }
 0x114   : > { %v977_v52 = vadd.f32 %v4810_v34, %v5816_v19  ;;  %v1216_v7 = vpop.f32.mrf.mxu0  ;;  %v3034_v19 = vld [vmem:[%s5236_s8 + $0x75] sm:$0xff] }
 0x115   : > { %v834_v43 = vpop.f32.mrf.mxu1  ;;  %v5909_v10 = vadd.f32 %v1216_v7, %v971_v48 }
 0x116   : > { %v975_v28 = vadd.f32 %v834_v43, %v5820_v33  ;;  %v4847_v15 = vpop.f32.mrf.mxu0  ;;  %5062 = vmatmul.mubr.msk.bf16.vlgmr.msra.gmra.mxu0 %vm364_vm1, %v3459_v0  ;;  %v3035_v33 = vld [vmem:[%s5236_s8 + $0x7d] sm:$0xff] }
 0x117   : > { %v4813_v57 = vpop.f32.mrf.mxu1  ;;  %v5913_v18 = vadd.f32 %v4847_v15, %v976_v24  ;;  %5028 = vmatmul.mubr.msk.bf16.gmra.mxu1 %vm364_vm1, %v3063_v23  ;;  %5065 = vmatprep.mubr.msk.bf16.mxu0 %vm364_vm1, %v3460_v5  ;;  %v3036_v24 = vld [vmem:[%s5236_s8 + $0x85] sm:$0xff] }
 0x118   : > { %v980_v48 = vadd.f32 %v4813_v57, %v5824_v22  ;;  %v1229_v11 = vpop.f32.mrf.mxu0  ;;  %5031 = vmatprep.mubr.msk.bf16.mxu1 %vm364_vm1, %v3064_v13  ;;  %v3065_v22 = vpack.c.bf16 %v3035_v33, %v3034_v19  ;;  %v3432_v13 = vld [vmem:[%s5236_s8 + $0x76] sm:$0xff]  ;;  %v3433_v43 = vld [vmem:[%s5236_s8 + $0x7e] sm:$0xff]  ;;  %v3435_v57 = vld [vmem:[%s5236_s8 + $0x8e] sm:$0xff] }
 0x119   : > { %v847_v37 = vpop.f32.mrf.mxu1  ;;  %v5925_v42 = vadd.f32 %v1229_v11, %v974_v46  ;;  %v3066_v46 = vpack.c.bf16 %v3037_v45, %v3036_v24  ;;  %v3041_v11 = vld [vmem:[%s5236_s8 + $0xad] sm:$0xff]  ;;  %v3463_v33 = vpack.c.bf16 %v3433_v43, %v3432_v13 }
 0x11a   : > { %v978_v59 = vadd.f32 %v847_v37, %v5830_v44  ;;  %v4848_v51 = vpop.f32.mrf.mxu0 }
 0x11b   : > { %v4814_v54 = vpop.f32.mrf.mxu1  ;;  %v5930_v56 = vadd.f32 %v4848_v51, %v977_v52  ;;  %v3068_v51 = vpack.c.bf16 %v3041_v11, %v3040_v6 }
 0x11c   : > { %v981_v50 = vadd.f32 %v4814_v54, %v5838_v20  ;;  %v1232_v0 = vpop.f32.mrf.mxu0  ;;  %v3038_v20 = vld [vmem:[%s5236_s8 + $0x95] sm:$0xff] }
 0x11d   : > { %v850_v34 = vpop.f32.mrf.mxu1  ;;  %v5933_v23 = vadd.f32 %v1232_v0, %v975_v28  ;;  %v3039_v28 = vld [vmem:[%s5236_s8 + $0x9d] sm:$0xff] }
 0x11e   : > { %v979_v44 = vadd.f32 %v850_v34, %v5841_v40  ;;  %v4851_v5 = vpop.f32.mrf.mxu0  ;;  %5066 = vmatmul.mubr.msk.bf16.gmra.mxu0 %vm364_vm1, %v3461_v3  ;;  %v3434_v40 = vld [vmem:[%s5236_s8 + $0x86] sm:$0xff]  ;;  %v3067_v37 = vpack.c.bf16 %v3039_v28, %v3038_v20  ;;  %v3437_v34 = vld [vmem:[%s5236_s8 + $0x9e] sm:$0xff]  ;;  %v3439_v20 = vld [vmem:[%s5236_s8 + $0xae] sm:$0xff] }
 0x11f   : > { %v4817_v52 = vpop.f32.mrf.mxu1  ;;  %v5937_v7 = vadd.f32 %v4851_v5, %v980_v48  ;;  %5032 = vmatmul.mubr.msk.bf16.gmra.mxu1 %vm364_vm1, %v3065_v22  ;;  %5069 = vmatprep.mubr.msk.bf16.mxu0 %vm364_vm1, %v3462_v63  ;;  %v3464_v24 = vpack.c.bf16 %v3435_v57, %v3434_v40  ;;  %v3045_v28 = vld [vmem:[%s5236_s8 + $0xcd] sm:$0xff] }
 0x120   : > { %v1245_v15 = vpop.f32.mrf.mxu0  ;;  %5035 = vmatprep.mubr.msk.bf16.mxu1 %vm364_vm1, %v3066_v46  ;;  %v984_v3 = vadd.f32 %v4817_v52, %v5710_v41  ;;  %v3042_v41 = vld [vmem:[%s5236_s8 + $0xb5] sm:$0xff]  ;;  %v3438_v52 = vld [vmem:[%s5236_s8 + $0xa6] sm:$0xff] }
 0x121   : > { %v863_v19 = vpop.f32.mrf.mxu1  ;;  %v5948_v8 = vadd.f32 %v1245_v15, %v978_v59  ;;  %v3436_v46 = vld [vmem:[%s5236_s8 + $0x96] sm:$0xff]  ;;  %v3044_v15 = vld [vmem:[%s5236_s8 + $0xc5] sm:$0xff] }
 0x122   : > { %v4852_v48 = vpop.f32.mrf.mxu0  ;;  %v982_v63 = vadd.f32 %v863_v19, %v5725_v49  ;;  %v3465_v57 = vpack.c.bf16 %v3437_v34, %v3436_v46  ;;  %v3442_v46 = vld [vmem:[%s5236_s8 + $0xc6] sm:$0xff]  ;;  %v3443_v34 = vld [vmem:[%s5236_s8 + $0xce] sm:$0xff] }
 0x123   : > { %v4818_v1 = vpop.f32.mrf.mxu1  ;;  %v5952_v17 = vadd.f32 %v4852_v48, %v981_v50 }
 0x124   : > { %v1248_v45 = vpop.f32.mrf.mxu0  ;;  %v985_v49 = vadd.f32 %v4818_v1, %v5731_v53 }
 0x125   : > { %v866_v59 = vpop.f32.mrf.mxu1  ;;  %v5955_v54 = vadd.f32 %v1248_v45, %v979_v44  ;;  %v3043_v44 = vld [vmem:[%s5236_s8 + $0xbd] sm:$0xff] }
 0x126   : > { %v4855_v22 = vpop.f32.mrf.mxu0  ;;  %5070 = vmatmul.mubr.msk.bf16.gmra.mxu0 %vm364_vm1, %v3463_v33  ;;  %v983_v19 = vadd.f32 %v866_v59, %v5741_v61  ;;  %v3069_v48 = vpack.c.bf16 %v3043_v44, %v3042_v41  ;;  %v3466_v33 = vpack.c.bf16 %v3439_v20, %v3438_v52  ;;  %v3047_v41 = vld [vmem:[%s5236_s8 + $0xdd] sm:$0xff]  ;;  %v3048_v52 = vld [vmem:[%s5236_s8 + $0xe5] sm:$0xff]  ;;  %v3049_v20 = vld [vmem:[%s5236_s8 + $0xed] sm:$0xff] }
 0x127   : > { %v4821_v50 = vpop.f32.mrf.mxu1  ;;  %v5959_v0 = vadd.f32 %v4855_v22, %v984_v3  ;;  %5036 = vmatmul.mubr.msk.bf16.gmra.mxu1 %vm364_vm1, %v3067_v37  ;;  %5073 = vmatprep.mubr.msk.bf16.mxu0 %vm364_vm1, %v3464_v24  ;;  %v3070_v24 = vpack.c.bf16 %v3045_v28, %v3044_v15  ;;  %v3440_v22 = vld [vmem:[%s5236_s8 + $0xb6] sm:$0xff] }
 0x128   : > { %v1261_v5 = vpop.f32.mrf.mxu0  ;;  %5039 = vmatprep.mubr.msk.bf16.mxu1 %vm364_vm1, %v3068_v51  ;;  %v988_v53 = vadd.f32 %v4821_v50, %v5746_v62  ;;  %v3046_v62 = vld [vmem:[%s5236_s8 + $0xd5] sm:$0xff] }
 0x129   : > { %v879_v13 = vpop.f32.mrf.mxu1  ;;  %v5971_v43 = vadd.f32 %v1261_v5, %v982_v63  ;;  %v3441_v63 = vld [vmem:[%s5236_s8 + $0xbe] sm:$0xff] }
 0x12a   : > { %v4856_v40 = vpop.f32.mrf.mxu0  ;;  %v986_v61 = vadd.f32 %v879_v13, %v5761_v2  ;;  %v3467_v13 = vpack.c.bf16 %v3441_v63, %v3440_v22  ;;  %v3446_v22 = vld [vmem:[%s5236_s8 + $0xe6] sm:$0xff]  ;;  %v3447_v63 = vld [vmem:[%s5236_s8 + $0xee] sm:$0xff] }
 0x12b   : > { %v4822_v6 = vpop.f32.mrf.mxu1  ;;  %v5976_v11 = vadd.f32 %v4856_v40, %v985_v49 }
 0x12c   : > { %v1264_v37 = vpop.f32.mrf.mxu0  ;;  %v989_v2 = vadd.f32 %v4822_v6, %v5767_v4 }
 0x12d   : > { %v882_v1 = vpop.f32.mrf.mxu1  ;;  %v5979_v45 = vadd.f32 %v1264_v37, %v983_v19  ;;  %v3468_v19 = vpack.c.bf16 %v3443_v34, %v3442_v46  ;;  %v3052_v46 = vld [vmem:[%s5236_s8 + $0x105] sm:$0xff]  ;;  %v3053_v34 = vld [vmem:[%s5236_s8 + $0x10d] sm:$0xff] }
 0x12e   : > { %v4859_v51 = vpop.f32.mrf.mxu0  ;;  %5074 = vmatmul.mubr.msk.bf16.gmra.mxu0 %vm364_vm1, %v3465_v57  ;;  %v987_v15 = vadd.f32 %v882_v1, %v5774_v9  ;;  %v3071_v57 = vpack.c.bf16 %v3047_v41, %v3046_v62  ;;  %v3051_v62 = vld [vmem:[%s5236_s8 + $0xfd] sm:$0xff] }
 0x12f   : > { %v4825_v3 = vpop.f32.mrf.mxu1  ;;  %v5983_v59 = vadd.f32 %v4859_v51, %v988_v53  ;;  %5040 = vmatmul.mubr.msk.bf16.gmra.mxu1 %vm364_vm1, %v3069_v48  ;;  %5077 = vmatprep.mubr.msk.bf16.mxu0 %vm364_vm1, %v3466_v33  ;;  %v3072_v33 = vpack.c.bf16 %v3049_v20, %v3048_v52  ;;  %v3444_v51 = vld [vmem:[%s5236_s8 + $0xd6] sm:$0xff] }
 0x130   : > { %v1277_v50 = vpop.f32.mrf.mxu0  ;;  %5043 = vmatprep.mubr.msk.bf16.mxu1 %vm364_vm1, %v3070_v24  ;;  %v992_v4 = vadd.f32 %v4825_v3, %v5779_v12  ;;  %v3050_v12 = vld [vmem:[%s5236_s8 + $0xf5] sm:$0xff] }
 0x131   : > { %v895_v5 = vpop.f32.mrf.mxu1  ;;  %v5995_v44 = vadd.f32 %v1277_v50, %v986_v61  ;;  %v3445_v61 = vld [vmem:[%s5236_s8 + $0xde] sm:$0xff] }
 0x132   : > { %v4860_v49 = vpop.f32.mrf.mxu0  ;;  %v990_v9 = vadd.f32 %v895_v5, %v5788_v58  ;;  %v3469_v5 = vpack.c.bf16 %v3445_v61, %v3444_v51  ;;  %v3055_v51 = vld [vmem:[%s5236_s8 + $0x11d] sm:$0xff]  ;;  %v3450_v61 = vld [vmem:[%s5236_s8 + $0x106] sm:$0xff] }
 0x133   : > { %v4826_v28 = vpop.f32.mrf.mxu1  ;;  %v6000_v40 = vadd.f32 %v4860_v49, %v989_v2 }
 0x134   : > { %v1280_v48 = vpop.f32.mrf.mxu0  ;;  %v993_v58 = vadd.f32 %v4826_v28, %v5794_v60 }
 0x135   : > { %v898_v6 = vpop.f32.mrf.mxu1  ;;  %v6003_v37 = vadd.f32 %v1280_v48, %v987_v15  ;;  %v3470_v15 = vpack.c.bf16 %v3447_v63, %v3446_v22  ;;  %v3056_v63 = vld [vmem:[%s5236_s8 + $0x125] sm:$0xff] }
 0x136   : > { %v4863_v24 = vpop.f32.mrf.mxu0  ;;  %5078 = vmatmul.mubr.msk.bf16.gmra.mxu0 %vm364_vm1, %v3467_v13  ;;  %v991_v52 = vadd.f32 %v898_v6, %v5798_v21  ;;  %v3073_v13 = vpack.c.bf16 %v3051_v62, %v3050_v12 }
 0x137   : > { %v4829_v53 = vpop.f32.mrf.mxu1  ;;  %v6007_v1 = vadd.f32 %v4863_v24, %v992_v4  ;;  %5044 = vmatmul.mubr.msk.bf16.gmra.mxu1 %vm364_vm1, %v3071_v57  ;;  %5081 = vmatprep.mubr.msk.bf16.mxu0 %vm364_vm1, %v3468_v19  ;;  %v3074_v19 = vpack.c.bf16 %v3053_v34, %v3052_v46  ;;  %v3448_v24 = vld [vmem:[%s5236_s8 + $0xf6] sm:$0xff] }
 0x138   : > { %v1293_v3 = vpop.f32.mrf.mxu0  ;;  %5047 = vmatprep.mubr.msk.bf16.mxu1 %vm364_vm1, %v3072_v33  ;;  %v996_v60 = vadd.f32 %v4829_v53, %v5803_v27  ;;  %v3054_v27 = vld [vmem:[%s5236_s8 + $0x115] sm:$0xff] }
 0x139   : > { %v911_v50 = vpop.f32.mrf.mxu1  ;;  %v6019_v41 = vadd.f32 %v1293_v3, %v990_v9  ;;  %v3449_v9 = vld [vmem:[%s5236_s8 + $0xfe] sm:$0xff] }
 0x13a   : > { %v4864_v2 = vpop.f32.mrf.mxu0  ;;  %v994_v21 = vadd.f32 %v911_v50, %v5812_v25  ;;  %v3451_v25 = vld [vmem:[%s5236_s8 + $0x10e] sm:$0xff]  ;;  %v3471_v34 = vpack.c.bf16 %v3449_v9, %v3448_v24  ;;  %v3059_v24 = vld [vmem:[%s5236_s8 + $0x13d] sm:$0xff] }
 0x13b   : > { %v4830_v20 = vpop.f32.mrf.mxu1  ;;  %v6024_v49 = vadd.f32 %v4864_v2, %v993_v58  ;;  %v3057_v58 = vld [vmem:[%s5236_s8 + $0x12d] sm:$0xff] }
 0x13c   : > { %v1296_v57 = vpop.f32.mrf.mxu0  ;;  %v997_v3 = vadd.f32 %v4830_v20, %v5818_v31  ;;  %v3455_v9 = vld [vmem:[%s5236_s8 + $0x12e] sm:$0xff] }
 0x13d   : > { %v914_v28 = vpop.f32.mrf.mxu1  ;;  %v6027_v48 = vadd.f32 %v1296_v57, %v991_v52  ;;  %v3075_v52 = vpack.c.bf16 %v3055_v51, %v3054_v27 }
 0x13e   : > { %v4867_v33 = vpop.f32.mrf.mxu0  ;;  %5082 = vmatmul.mubr.msk.bf16.gmra.mxu0 %vm364_vm1, %v3469_v5  ;;  %v995_v2 = vadd.f32 %v914_v28, %v5822_v39 }
 0x13f   : > { %v6031_v4 = vadd.f32 %v4867_v33, %v996_v60  ;;  %v4873_v6 = vpop.f32.mrf.mxu1  ;;  %5048 = vmatmul.mubr.msk.bf16.gmra.mxu1 %vm364_vm1, %v3073_v13  ;;  %5085 = vmatprep.mubr.msk.bf16.mxu0 %vm364_vm1, %v3470_v15  ;;  %v3472_v13 = vpack.c.bf16 %v3451_v25, %v3450_v61  ;;  %v3076_v15 = vpack.c.bf16 %v3057_v58, %v3056_v63  ;;  %v3452_v33 = vld [vmem:[%s5236_s8 + $0x116] sm:$0xff] }
 0x140   : > { %v1760_v53 = vadd.f32 %v4873_v6, %v5845_v36  ;;  %v1309_v12 = vpop.f32.mrf.mxu0  ;;  %5051 = vmatprep.mubr.msk.bf16.mxu1 %vm364_vm1, %v3074_v19 }
 0x141   : > { %v6044_v62 = vadd.f32 %v1309_v12, %v994_v21  ;;  %v1579_v22 = vpop.f32.mrf.mxu1  ;;  %v3453_v21 = vld [vmem:[%s5236_s8 + $0x11e] sm:$0xff] }
 0x142   : > { %v1758_v50 = vadd.f32 %v1579_v22, %v5853_v16  ;;  %v4868_v46 = vpop.f32.mrf.mxu0  ;;  %v3473_v25 = vpack.c.bf16 %v3453_v21, %v3452_v33 }
 0x143   : > { %v6050_v36 = vadd.f32 %v4868_v46, %v997_v3  ;;  %v4874_v5 = vpop.f32.mrf.mxu1 }
 0x144   : > { %v1761_v31 = vadd.f32 %v4874_v5, %v5858_v30  ;;  %v1312_v20 = vpop.f32.mrf.mxu0  ;;  %v3058_v30 = vld [vmem:[%s5236_s8 + $0x135] sm:$0xff] }
 0x145   : > { %v6053_v57 = vadd.f32 %v1312_v20, %v995_v2  ;;  %v1582_v16 = vpop.f32.mrf.mxu1  ;;  %v3077_v63 = vpack.c.bf16 %v3059_v24, %v3058_v30 }
 0x146   : > { %v1759_v39 = vadd.f32 %v1582_v16, %v5861_v35  ;;  %v4911_v19 = vpop.f32.mrf.mxu0  ;;  %5086 = vmatmul.mubr.msk.bf16.gmra.mxu0 %vm364_vm1, %v3471_v34  ;;  %v3454_v35 = vld [vmem:[%s5236_s8 + $0x126] sm:$0xff] }
 0x147   : > { %v4877_v60 = vpop.f32.mrf.mxu1  ;;  %v6057_v28 = vadd.f32 %v4911_v19, %v1760_v53  ;;  %5052 = vmatmul.mubr.msk.bf16.gmra.mxu1 %vm364_vm1, %v3075_v52  ;;  %5089 = vmatprep.mubr.msk.bf16.mxu0 %vm364_vm1, %v3472_v13  ;;  %v3456_v13 = vld [vmem:[%s5236_s8 + $0x136] sm:$0xff] }
 0x148   : > { %v1764_v6 = vadd.f32 %v4877_v60, %v5865_v38  ;;  %v1977_v27 = vpop.f32.mrf.mxu0  ;;  %5055 = vmatprep.mubr.msk.bf16.mxu1 %vm364_vm1, %v3076_v15  ;;  %v3474_v38 = vpack.c.bf16 %v3455_v9, %v3454_v35 }
 0x149   : > { %v1595_v12 = vpop.f32.mrf.mxu1  ;;  %v6069_v51 = vadd.f32 %v1977_v27, %v1758_v50 }
 0x14a   : > { %v1762_v53 = vadd.f32 %v1595_v12, %v5877_v26  ;;  %v4912_v61 = vpop.f32.mrf.mxu0 }
 0x14b   : > { %v4878_v3 = vpop.f32.mrf.mxu1  ;;  %v6072_v22 = vadd.f32 %v4912_v61, %v1761_v31  ;;  %v3457_v31 = vld [vmem:[%s5236_s8 + $0x13e] sm:$0xff]  ;;  %s5110_s8 = smul.u32 288, %s6467_s21 }
 0x14c   : > { %v1765_v58 = vadd.f32 %v4878_v3, %v5882_v14  ;;  %v1980_v46 = vpop.f32.mrf.mxu0  ;;  %v3475_v19 = vpack.c.bf16 %v3457_v31, %v3456_v13 }
 0x14d   : > { %v1598_v34 = vpop.f32.mrf.mxu1  ;;  %v6075_v2 = vadd.f32 %v1980_v46, %v1759_v39  ;;  %s6309_s11 = scalar_lea.vmem %s6452_s5, %s5110_s8 }
 0x14e   : > { %v1763_v50 = vadd.f32 %v1598_v34, %v5885_v29  ;;  %v4915_v5 = vpop.f32.mrf.mxu0  ;;  %5090 = vmatmul.mubr.msk.bf16.gmra.mxu0 %vm364_vm1, %v3473_v25 }
 0x14f   : > { %v4881_v26 = vpop.f32.mrf.mxu1  ;;  %v6079_v52 = vadd.f32 %v4915_v5, %v1764_v6  ;;  %5056 = vmatmul.mubr.msk.bf16.gmra.mxu1 %vm364_vm1, %v3077_v63  ;;  %5093 = vmatprep.mubr.msk.bf16.mxu0 %vm364_vm1, %v3474_v38 }
 0x150   : > { %v1768_v14 = vadd.f32 %v4881_v26, %v5889_v32  ;;  %v1993_v20 = vpop.f32.mrf.mxu0 }
 0x151   : > { %v1611_v15 = vpop.f32.mrf.mxu1  ;;  %v6086_v16 = vadd.f32 %v1993_v20, %v1762_v53 }
 0x152   : > { %v1766_v29 = vadd.f32 %v1611_v15, %v5901_v47  ;;  %v4916_v39 = vpop.f32.mrf.mxu0 }
 0x153   : > { %v4882_v60 = vpop.f32.mrf.mxu1  ;;  %v6089_v30 = vadd.f32 %v4916_v39, %v1765_v58 }
 0x154   : > { %v1769_v33 = vadd.f32 %v4882_v60, %v5906_v55  ;;  %v1996_v21 = vpop.f32.mrf.mxu0 }
 0x155   : > { %v1614_v6 = vpop.f32.mrf.mxu1  ;;  %v6092_v27 = vadd.f32 %v1996_v21, %v1763_v50 }
 0x156   : > { %v1767_v24 = vadd.f32 %v1614_v6, %v5909_v10  ;;  %v4919_v32 = vpop.f32.mrf.mxu0  ;;  %5094 = vmatmul.mubr.msk.bf16.gmra.mxu0 %vm364_vm1, %v3475_v19 }
 0x157   : > { %v4885_v35 = vpop.f32.mrf.mxu1  ;;  %v6096_v9 = vadd.f32 %v4919_v32, %v1768_v14 }
 0x158   : > { %v1772_v47 = vadd.f32 %v4885_v35, %v5913_v18  ;;  %v2009_v12 = vpop.f32.mrf.mxu0 }
 0x159   : > { %v1627_v53 = vpop.f32.mrf.mxu1  ;;  %v6099_v61 = vadd.f32 %v2009_v12, %v1766_v29 }
 0x15a   : > { %v1770_v55 = vadd.f32 %v1627_v53, %v5925_v42  ;;  %v4920_v25 = vpop.f32.mrf.mxu0 }
 0x15b   : > { %v4886_v3 = vpop.f32.mrf.mxu1  ;;  %v6102_v63 = vadd.f32 %v4920_v25, %v1769_v33 }
 0x15c   : > { %v1773_v10 = vadd.f32 %v4886_v3, %v5930_v56  ;;  %v2012_v38 = vpop.f32.mrf.mxu0 }
 0x15d   : > { %v1630_v58 = vpop.f32.mrf.mxu1  ;;  %v6105_v46 = vadd.f32 %v2012_v38, %v1767_v24 }
 0x15e   : > { %v1771_v34 = vadd.f32 %v1630_v58, %v5933_v23  ;;  %v4923_v50 = vpop.f32.mrf.mxu0 }
 0x15f   : > { %v4889_v18 = vpop.f32.mrf.mxu1  ;;  %v6108_v5 = vadd.f32 %v4923_v50, %v1772_v47 }
 0x160   : > { %v1776_v26 = vadd.f32 %v4889_v18, %v5937_v7  ;;  %v2025_v13 = vpop.f32.mrf.mxu0 }
 0x161   : > { %v1643_v42 = vpop.f32.mrf.mxu1  ;;  %v6111_v31 = vadd.f32 %v2025_v13, %v1770_v55 }
 0x162   : > { %v1774_v14 = vadd.f32 %v1643_v42, %v5948_v8  ;;  %v4924_v20 = vpop.f32.mrf.mxu0 }
 0x163   : > { %v4890_v56 = vpop.f32.mrf.mxu1  ;;  %v6114_v15 = vadd.f32 %v4924_v20, %v1773_v10 }
 0x164   : > { %v1777_v29 = vadd.f32 %v4890_v56, %v5952_v17  ;;  %v2028_v39 = vpop.f32.mrf.mxu0 }
 0x165   : > { %v1646_v23 = vpop.f32.mrf.mxu1  ;;  %v6117_v19 = vadd.f32 %v2028_v39, %v1771_v34 }
 0x166   : > { %v1775_v60 = vadd.f32 %v1646_v23, %v5955_v54  ;;  %v4927_v33 = vpop.f32.mrf.mxu0 }
 0x167   : > { %v4893_v7 = vpop.f32.mrf.mxu1  ;;  %v6120_v21 = vadd.f32 %v4927_v33, %v1776_v26 }
 0x168   : > { %v1780_v6 = vadd.f32 %v4893_v7, %v5959_v0  ;;  %v2041_v24 = vpop.f32.mrf.mxu0 }
 0x169   : > { %v1659_v8 = vpop.f32.mrf.mxu1  ;;  %v6123_v32 = vadd.f32 %v2041_v24, %v1774_v14 }
 0x16a   : > { %v1778_v35 = vadd.f32 %v1659_v8, %v5971_v43  ;;  %v4928_v47 = vpop.f32.mrf.mxu0 }
 0x16b   : > { %v4894_v17 = vpop.f32.mrf.mxu1  ;;  %v6126_v12 = vadd.f32 %v4928_v47, %v1777_v29 }
 0x16c   : > { %v1781_v53 = vadd.f32 %v4894_v17, %v5976_v11  ;;  %v2044_v55 = vpop.f32.mrf.mxu0 }
 0x16d   : > { %v1662_v54 = vpop.f32.mrf.mxu1  ;;  %v6129_v25 = vadd.f32 %v2044_v55, %v1775_v60 }
 0x16e   : > { %v1779_v3 = vadd.f32 %v1662_v54, %v5979_v45  ;;  %v4931_v10 = vpop.f32.mrf.mxu0 }
 0x16f   : > { %v4897_v0 = vpop.f32.mrf.mxu1  ;;  %v6132_v38 = vadd.f32 %v4931_v10, %v1780_v6 }
 0x170   : > { %v1784_v58 = vadd.f32 %v4897_v0, %v5983_v59  ;;  %v2057_v34 = vpop.f32.mrf.mxu0 }
 0x171   : > { %v1675_v43 = vpop.f32.mrf.mxu1  ;;  %v6135_v50 = vadd.f32 %v2057_v34, %v1778_v35 }
 0x172   : > { %v1782_v18 = vadd.f32 %v1675_v43, %v5995_v44  ;;  %v4932_v26 = vpop.f32.mrf.mxu0 }
 0x173   : > { %v4898_v11 = vpop.f32.mrf.mxu1  ;;  %v6138_v13 = vadd.f32 %v4932_v26, %v1781_v53 }
 0x174   : > { %v1785_v42 = vadd.f32 %v4898_v11, %v6000_v40  ;;  %v2060_v14 = vpop.f32.mrf.mxu0 }
 0x175   : > { %v1678_v45 = vpop.f32.mrf.mxu1  ;;  %v6141_v20 = vadd.f32 %v2060_v14, %v1779_v3 }
 0x176   : > { %v1783_v56 = vadd.f32 %v1678_v45, %v6003_v37  ;;  %v4935_v29 = vpop.f32.mrf.mxu0 }
 0x177   : > { %v4901_v59 = vpop.f32.mrf.mxu1  ;;  %v6144_v39 = vadd.f32 %v4935_v29, %v1784_v58 }
 0x178   : > { %v1788_v23 = vadd.f32 %v4901_v59, %v6007_v1  ;;  %v2073_v60 = vpop.f32.mrf.mxu0 }
 0x179   : > { %v1691_v44 = vpop.f32.mrf.mxu1  ;;  %v6147_v33 = vadd.f32 %v2073_v60, %v1782_v18 }
 0x17a   : > { %v1786_v7 = vadd.f32 %v1691_v44, %v6019_v41  ;;  %v4936_v6 = vpop.f32.mrf.mxu0 }
 0x17b   : > { %v4902_v40 = vpop.f32.mrf.mxu1  ;;  %v6150_v24 = vadd.f32 %v4936_v6, %v1785_v42 }
 0x17c   : > { %v1789_v8 = vadd.f32 %v4902_v40, %v6024_v49  ;;  %v2076_v35 = vpop.f32.mrf.mxu0 }
 0x17d   : > { %v1694_v37 = vpop.f32.mrf.mxu1  ;;  %v6153_v47 = vadd.f32 %v2076_v35, %v1783_v56 }
 0x17e   : > { %v1787_v17 = vadd.f32 %v1694_v37, %v6027_v48  ;;  %v4939_v53 = vpop.f32.mrf.mxu0 }
 0x17f   : > { %v4905_v1 = vpop.f32.mrf.mxu1  ;;  %v6156_v55 = vadd.f32 %v4939_v53, %v1788_v23 }
 0x180   : > { %v1792_v54 = vadd.f32 %v4905_v1, %v6031_v4  ;;  %v2089_v3 = vpop.f32.mrf.mxu0 }
 0x181   : > { %v1707_v41 = vpop.f32.mrf.mxu1  ;;  %v6159_v10 = vadd.f32 %v2089_v3, %v1786_v7 }
 0x182   : > { %v1790_v0 = vadd.f32 %v1707_v41, %v6044_v62  ;;  %v4940_v58 = vpop.f32.mrf.mxu0 }
 0x183   : > { %v4906_v49 = vpop.f32.mrf.mxu1  ;;  %v6162_v34 = vadd.f32 %v4940_v58, %v1789_v8 }
 0x184   : > { %v1793_v43 = vadd.f32 %v4906_v49, %v6050_v36  ;;  %v2092_v18 = vpop.f32.mrf.mxu0 }
 0x185   : > { %v1710_v48 = vpop.f32.mrf.mxu1  ;;  %v6165_v26 = vadd.f32 %v2092_v18, %v1787_v17 }
 0x186   : > { %v1791_v11 = vadd.f32 %v1710_v48, %v6053_v57  ;;  %v4943_v42 = vpop.f32.mrf.mxu0 }
 0x187   : > { %v6168_v4 = vadd.f32 %v4943_v42, %v1792_v54  ;;  %v4949_v14 = vpop.f32.mrf.mxu1 }
 0x188   : > { %v2556_v45 = vadd.f32 %v4949_v14, %v6057_v28  ;;  %v2105_v56 = vpop.f32.mrf.mxu0 }
 0x189   : > { %v6171_v62 = vadd.f32 %v2105_v56, %v1790_v0  ;;  %v2375_v29 = vpop.f32.mrf.mxu1 }
 0x18a   : > { %v2554_v59 = vadd.f32 %v2375_v29, %v6069_v51  ;;  %v4944_v23 = vpop.f32.mrf.mxu0 }
 0x18b   : > { %v6174_v36 = vadd.f32 %v4944_v23, %v1793_v43  ;;  %v4950_v60 = vpop.f32.mrf.mxu1 }
 0x18c   : > { %v2557_v44 = vadd.f32 %v4950_v60, %v6072_v22  ;;  %v2108_v7 = vpop.f32.mrf.mxu0 }
 0x18d   : > { %v6177_v57 = vadd.f32 %v2108_v7, %v1791_v11  ;;  %v2378_v6 = vpop.f32.mrf.mxu1 }
 0x18e   : > { %v2555_v40 = vadd.f32 %v2378_v6, %v6075_v2  ;;  %v4987_v8 = vpop.f32.mrf.mxu0 }
 0x18f   : > { %v4953_v28 = vpop.f32.mrf.mxu1  ;;  %v6180_v35 = vadd.f32 %v4987_v8, %v2556_v45 }
 0x190   : > { %v2560_v37 = vadd.f32 %v4953_v28, %v6079_v52  ;;  %v2773_v17 = vpop.f32.mrf.mxu0 }
 0x191   : > { %v2391_v51 = vpop.f32.mrf.mxu1  ;;  %v6183_v53 = vadd.f32 %v2773_v17, %v2554_v59 }
 0x192   : > { %v2558_v1 = vadd.f32 %v2391_v51, %v6086_v16  ;;  %v4988_v54 = vpop.f32.mrf.mxu0 }
 0x193   : > { %v4954_v22 = vpop.f32.mrf.mxu1  ;;  %v6186_v3 = vadd.f32 %v4988_v54, %v2557_v44 }
 0x194   : > { %v2561_v41 = vadd.f32 %v4954_v22, %v6089_v30  ;;  %v2776_v0 = vpop.f32.mrf.mxu0 }
 0x195   : > { %v2394_v2 = vpop.f32.mrf.mxu1  ;;  %v6189_v58 = vadd.f32 %v2776_v0, %v2555_v40 }
 0x196   : > { %v2559_v49 = vadd.f32 %v2394_v2, %v6092_v27  ;;  %v4991_v43 = vpop.f32.mrf.mxu0 }
 0x197   : > { %v4957_v52 = vpop.f32.mrf.mxu1  ;;  %v6192_v18 = vadd.f32 %v4991_v43, %v2560_v37 }
 0x198   : > { %v2564_v48 = vadd.f32 %v4957_v52, %v6096_v9  ;;  %v2789_v11 = vpop.f32.mrf.mxu0 }
 0x199   : > { %v2407_v16 = vpop.f32.mrf.mxu1  ;;  %v6195_v42 = vadd.f32 %v2789_v11, %v2558_v1 }
 0x19a   : > { %v2562_v14 = vadd.f32 %v2407_v16, %v6099_v61  ;;  %v4992_v45 = vpop.f32.mrf.mxu0 }
 0x19b   : > { %v4958_v30 = vpop.f32.mrf.mxu1  ;;  %v6198_v56 = vadd.f32 %v4992_v45, %v2561_v41 }
 0x19c   : > { %v2565_v29 = vadd.f32 %v4958_v30, %v6102_v63  ;;  %v2792_v59 = vpop.f32.mrf.mxu0 }
 0x19d   : > { %v2410_v27 = vpop.f32.mrf.mxu1  ;;  %v6201_v23 = vadd.f32 %v2792_v59, %v2559_v49 }
 0x19e   : > { %v2563_v60 = vadd.f32 %v2410_v27, %v6105_v46  ;;  %v4995_v44 = vpop.f32.mrf.mxu0 }
 0x19f   : > { %v4961_v9 = vpop.f32.mrf.mxu1  ;;  %v6204_v7 = vadd.f32 %v4995_v44, %v2564_v48 }
 0x1a0   : > { %v2568_v6 = vadd.f32 %v4961_v9, %v6108_v5  ;;  %v2805_v40 = vpop.f32.mrf.mxu0 }
 0x1a1   : > { %v2423_v61 = vpop.f32.mrf.mxu1  ;;  %v6207_v8 = vadd.f32 %v2805_v40, %v2562_v14 }
 0x1a2   : > { %v2566_v28 = vadd.f32 %v2423_v61, %v6111_v31  ;;  %v4996_v37 = vpop.f32.mrf.mxu0 }
 0x1a3   : > { %v4962_v63 = vpop.f32.mrf.mxu1  ;;  %v6210_v17 = vadd.f32 %v4996_v37, %v2565_v29 }
 0x1a4   : > { %v2569_v51 = vadd.f32 %v4962_v63, %v6114_v15  ;;  %v2808_v1 = vpop.f32.mrf.mxu0 }
 0x1a5   : > { %v2426_v46 = vpop.f32.mrf.mxu1  ;;  %v6213_v54 = vadd.f32 %v2808_v1, %v2563_v60 }
 0x1a6   : > { %v2567_v22 = vadd.f32 %v2426_v46, %v6117_v19  ;;  %v4999_v41 = vpop.f32.mrf.mxu0 }
 0x1a7   : > { %v4965_v5 = vpop.f32.mrf.mxu1  ;;  %v6216_v0 = vadd.f32 %v4999_v41, %v2568_v6 }
 0x1a8   : > { %v2572_v2 = vadd.f32 %v4965_v5, %v6120_v21  ;;  %v2821_v49 = vpop.f32.mrf.mxu0 }
 0x1a9   : > { %v2439_v31 = vpop.f32.mrf.mxu1  ;;  %v6219_v43 = vadd.f32 %v2821_v49, %v2566_v28  ;;  %v6248_v49 = vpop.permute.xlu1 %3940 }
 0x1aa   : > { %v2570_v52 = vadd.f32 %v2439_v31, %v6123_v32  ;;  %v5000_v48 = vpop.f32.mrf.mxu0 }
 0x1ab   : > { %v4966_v15 = vpop.f32.mrf.mxu1  ;;  %v6222_v11 = vadd.f32 %v5000_v48, %v2569_v51 }
 0x1ac   : > { %v2573_v16 = vadd.f32 %v4966_v15, %v6126_v12  ;;  %v2824_v14 = vpop.f32.mrf.mxu0 }
 0x1ad   : > { %v2442_v19 = vpop.f32.mrf.mxu1  ;;  %v6225_v45 = vadd.f32 %v2824_v14, %v2567_v22 }
 0x1ae   : > { %v2571_v30 = vadd.f32 %v2442_v19, %v6129_v25  ;;  %v5003_v29 = vpop.f32.mrf.mxu0 }
 0x1af   : > { %v4969_v21 = vpop.f32.mrf.mxu1  ;;  %v6228_v59 = vadd.f32 %v5003_v29, %v2572_v2 }
 0x1b0   : > { %v2576_v27 = vadd.f32 %v4969_v21, %v6132_v38  ;;  %v2837_v60 = vpop.f32.mrf.mxu0 }
 0x1b1   : > { %v2455_v32 = vpop.f32.mrf.mxu1  ;;  %v6231_v44 = vadd.f32 %v2837_v60, %v2570_v52 }
 0x1b2   : > { %v2574_v9 = vadd.f32 %v2455_v32, %v6135_v50  ;;  %v5004_v6 = vpop.f32.mrf.mxu0  ;;  %v6243_v50 = vpop.permute.xlu0 %3930 }
 0x1b3   : > { %v4970_v12 = vpop.f32.mrf.mxu1  ;;  %v6234_v40 = vadd.f32 %v5004_v6, %v2573_v16 }
 0x1b4   : > { %v2577_v61 = vadd.f32 %v4970_v12, %v6138_v13  ;;  %v2840_v28 = vpop.f32.mrf.mxu0 }
 0x1b5   : > { %v2458_v25 = vpop.f32.mrf.mxu1  ;;  %v6237_v37 = vadd.f32 %v2840_v28, %v2571_v30 }
 0x1b6   : > { %v2575_v63 = vadd.f32 %v2458_v25, %v6141_v20  ;;  %v5007_v51 = vpop.f32.mrf.mxu0  ;;  %v6256_v19 = vpop.permute.xlu0 %3935 }
 0x1b7   : > { %v4973_v38 = vpop.f32.mrf.mxu1  ;;  %v6240_v1 = vadd.f32 %v5007_v51, %v2576_v27  ;;  %v6261_v27 = vpop.permute.xlu1 %3945 }
 0x1b8   : > { %v2580_v46 = vadd.f32 %v4973_v38, %v6144_v39  ;;  %v2853_v22 = vpop.f32.mrf.mxu0 }
 0x1b9   : > { %v2471_v41 = vpop.f32.mrf.mxu1  ;;  %v6245_v5 = vadd.f32 %v2853_v22, %v2574_v9 }
 0x1ba   : > { %v2578_v13 = vadd.f32 %v2471_v41, %v6147_v33  ;;  %v5008_v2 = vpop.f32.mrf.mxu0  ;;  %v6269_v28 = vpop.permute.xlu0 %3950 }
 0x1bb   : > { %v4974_v31 = vpop.f32.mrf.mxu1  ;;  %v6250_v52 = vadd.f32 %v5008_v2, %v2577_v61  ;;  %v6274_v38 = vpop.permute.xlu1 %3955 }
 0x1bc   : > { %v2581_v20 = vadd.f32 %v4974_v31, %v6150_v24  ;;  %v2856_v48 = vpop.f32.mrf.mxu0 }
 0x1bd   : > { %v2474_v15 = vpop.f32.mrf.mxu1  ;;  %v6253_v16 = vadd.f32 %v2856_v48, %v2575_v63 }
 0x1be   : > { %v2579_v39 = vadd.f32 %v2474_v15, %v6153_v47  ;;  %v5011_v14 = vpop.f32.mrf.mxu0 }
 0x1bf   : > { %v4977_v30 = vpop.f32.mrf.mxu1  ;;  %v6258_v29 = vadd.f32 %v5011_v14, %v2580_v46  ;;  %v6287_v14 = vpop.permute.xlu1 %3965 }
 0x1c0   : > { %v2584_v33 = vadd.f32 %v4977_v30, %v6156_v55  ;;  %v2869_v21 = vpop.f32.mrf.mxu0 }
 0x1c1   : > { %v2487_v60 = vpop.f32.mrf.mxu1  ;;  %v6263_v32 = vadd.f32 %v2869_v21, %v2578_v13 }
 0x1c2   : > { %v2582_v24 = vadd.f32 %v2487_v60, %v6159_v10  ;;  %v5012_v9 = vpop.f32.mrf.mxu0 }
 0x1c3   : > { %v4978_v6 = vpop.f32.mrf.mxu1  ;;  %v6266_v12 = vadd.f32 %v5012_v9, %v2581_v20  ;;  %v6282_v20 = vpop.permute.xlu0 %3960 }
 0x1c4   : > { %v2585_v47 = vadd.f32 %v4978_v6, %v6162_v34  ;;  %v2872_v61 = vpop.f32.mrf.mxu0 }
 0x1c5   : > { %v2490_v25 = vpop.f32.mrf.mxu1  ;;  %v6271_v63 = vadd.f32 %v2872_v61, %v2579_v39 }
 0x1c6   : > { %v2583_v55 = vadd.f32 %v2490_v25, %v6165_v26  ;;  %v5015_v51 = vpop.f32.mrf.mxu0 }
 0x1c7   : > { %v4981_v46 = vpop.f32.mrf.mxu1  ;;  %v6276_v22 = vadd.f32 %v5015_v51, %v2584_v33  ;;  %v6294_v9 = vpop.permute.xlu0 %3970 }
 0x1c8   : > { %v2588_v10 = vadd.f32 %v4981_v46, %v6168_v4  ;;  %v2885_v41 = vpop.f32.mrf.mxu0 }
 0x1c9   : > { %v2503_v13 = vpop.f32.mrf.mxu1  ;;  %v6279_v2 = vadd.f32 %v2885_v41, %v2582_v24 }
 0x1ca   : > { %v2586_v34 = vadd.f32 %v2503_v13, %v6171_v62  ;;  %v5016_v31 = vpop.f32.mrf.mxu0 }
 0x1cb   : > { %v4982_v48 = vpop.f32.mrf.mxu1  ;;  %v6284_v26 = vadd.f32 %v5016_v31, %v2585_v47  ;;  %v6311_v13 = vpop.permute.xlu0 %3980 }
 0x1cc   : > { %v2589_v15 = vadd.f32 %v4982_v48, %v6174_v36  ;;  %v2888_v39 = vpop.f32.mrf.mxu0  ;;  %v6299_v36 = vpop.permute.xlu1 %3975 }
 0x1cd   : > { %v2506_v30 = vpop.f32.mrf.mxu1  ;;  %v6289_v4 = vadd.f32 %v2888_v39, %v2583_v55 }
 0x1ce   : > { %v2587_v33 = vadd.f32 %v2506_v30, %v6177_v57  ;;  %v5019_v21 = vpop.f32.mrf.mxu0 }
 0x1cf   : > { %v6292_v60 = vadd.f32 %v5019_v21, %v2588_v10  ;;  %v5025_v62 = vpop.f32.mrf.mxu1 }
 0x1d0   : > { %v2901_v24 = vpop.f32.mrf.mxu0  ;;  %v3352_v57 = vadd.f32 %v5025_v62, %v6180_v35  ;;  %v6314_v35 = vpop.permute.xlu1 %3985 }
 0x1d1   : > { %6454 = vst [vmem:[#allocation3_spill] sm:$0xff] %v6292_v60  ;;  %v6296_v6 = vadd.f32 %v2901_v24, %v2586_v34  ;;  %v3171_v47 = vpop.f32.mrf.mxu1 }
 0x1d2   : > { %v5020_v61 = vpop.f32.mrf.mxu0  ;;  %v3350_v34 = vadd.f32 %v3171_v47, %v6183_v53  ;;  %v6320_v53 = vpop.permute.xlu0 %3990 }
 0x1d3   : > { %6455 = vst [vmem:[#allocation4_spill] sm:$0xff] %v6296_v6  ;;  %v6301_v25 = vadd.f32 %v5020_v61, %v2589_v15  ;;  %v5026_v55 = vpop.f32.mrf.mxu1 }
 0x1d4   : > { %v2904_v51 = vpop.f32.mrf.mxu0  ;;  %v3353_v39 = vadd.f32 %v5026_v55, %v6186_v3 }
 0x1d5   : > { %6456 = vst [vmem:[#allocation5_spill] sm:$0xff] %v6301_v25  ;;  %v6304_v46 = vadd.f32 %v2904_v51, %v2587_v33  ;;  %v3174_v10 = vpop.f32.mrf.mxu1 }
 0x1d6   : > { %v5063_v41 = vpop.f32.mrf.mxu0  ;;  %v3351_v62 = vadd.f32 %v3174_v10, %v6189_v58 }
 0x1d7   : > { %6457 = vst [vmem:[#allocation6_spill] sm:$0xff] %v6304_v46  ;;  %v5029_v31 = vpop.f32.mrf.mxu1  ;;  %v3750_v48 = vadd.f32 %v5063_v41, %v3352_v57 }
 0x1d8   : > { %v3569_v15 = vpop.f32.mrf.mxu0  ;;  %v3356_v47 = vadd.f32 %v5029_v31, %v6192_v18 }
 0x1d9   : > { %3858 = vst [vmem:[%s6309_s11 + $0x10] sm:$0xff] %v3750_v48  ;;  %v3187_v30 = vpop.f32.mrf.mxu1  ;;  %v3748_v33 = vadd.f32 %v3569_v15, %v3350_v34  ;;  %v4110_v41 = vmul.f32 %v6248_v49, %v3750_v48  ;;  %v6326_v15 = vpop.permute.xlu1 %3995 }
 0x1da   : > { %v5064_v21 = vpop.f32.mrf.mxu0  ;;  %v3354_v58 = vadd.f32 %v3187_v30, %v6195_v42  ;;  %v6334_v42 = vpop.permute.xlu0 %4000 }
 0x1db   : > { %3856 = vst [vmem:[%s6309_s11] sm:$0xff] %v3748_v33  ;;  %v5030_v24 = vpop.f32.mrf.mxu1  ;;  %v3751_v61 = vadd.f32 %v5064_v21, %v3353_v39  ;;  %v4108_v57 = vmul.f32 %v6243_v50, %v3748_v33 }
 0x1dc   : > { %v3572_v51 = vpop.f32.mrf.mxu0  ;;  %v3357_v6 = vadd.f32 %v5030_v24, %v6198_v56 }
 0x1dd   : > { %3859 = vst [vmem:[%s6309_s11 + $0x18] sm:$0xff] %v3751_v61  ;;  %v3190_v3 = vpop.f32.mrf.mxu1  ;;  %v3749_v55 = vadd.f32 %v3572_v51, %v3351_v62  ;;  %v4111_v18 = vmul.f32 %v6261_v27, %v3751_v61  ;;  %v4185_v31 = vmul.f32 %v4108_v57, %v3748_v33  ;;  %v4187_v51 = vmul.f32 %v4110_v41, %v3750_v48 }
 0x1de   : > { %v5067_v34 = vpop.f32.mrf.mxu0 }
 0x1df   : > { %3857 = vst [vmem:[%s6309_s11 + $0x8] sm:$0xff] %v3749_v55  ;;  %v4109_v10 = vmul.f32 %v6256_v19, %v3749_v55  ;;  %v5033_v39 = vpop.f32.mrf.mxu1  ;;  %v3754_v21 = vadd.f32 %v5067_v34, %v3356_v47  ;;  %v3355_v19 = vadd.f32 %v3190_v3, %v6201_v23 }
 0x1e0   : > { %v3585_v50 = vpop.f32.mrf.mxu0  ;;  %v3360_v56 = vadd.f32 %v5033_v39, %v6204_v7 }
 0x1e1   : > { %v4144_v46 = vadd.f32 %v4109_v10, %v4108_v57  ;;  %v4186_v25 = vmul.f32 %v4109_v10, %v3749_v55  ;;  %3862 = vst [vmem:[%s6309_s11 + $0x30] sm:$0xff] %v3754_v21  ;;  %v3203_v62 = vpop.f32.mrf.mxu1  ;;  %v3752_v49 = vadd.f32 %v3585_v50, %v3354_v58  ;;  %v4188_v57 = vmul.f32 %v4111_v18, %v3751_v61  ;;  %v6339_v58 = vpop.permute.xlu1 %4005 }
 0x1e2   : > { %v5068_v60 = vpop.f32.mrf.mxu0  ;;  %v4114_v23 = vmul.f32 %v6282_v20, %v3754_v21 }
 0x1e3   : > { %v4145_v30 = vadd.f32 %v4144_v46, %v4110_v41  ;;  %v4221_v47 = vadd.f32 %v4186_v25, %v4185_v31  ;;  %3860 = vst [vmem:[%s6309_s11 + $0x20] sm:$0xff] %v3752_v49  ;;  %v4112_v27 = vmul.f32 %v6269_v28, %v3752_v49  ;;  %v5034_v33 = vpop.f32.mrf.mxu1  ;;  %v3755_v55 = vadd.f32 %v5068_v60, %v3357_v6 }
 0x1e4   : > { %v3588_v34 = vpop.f32.mrf.mxu0  ;;  %v3358_v41 = vadd.f32 %v3203_v62, %v6207_v8  ;;  %v3361_v7 = vadd.f32 %v5034_v33, %v6210_v17 }
 0x1e5   : > { %v4222_v48 = vadd.f32 %v4221_v47, %v4187_v51  ;;  %v4146_v24 = vadd.f32 %v4145_v30, %v4111_v18  ;;  %v3206_v10 = vpop.f32.mrf.mxu1  ;;  %v3753_v50 = vadd.f32 %v3588_v34, %v3355_v19  ;;  %v4189_v46 = vmul.f32 %v4112_v27, %v3752_v49  ;;  %3863 = vst [vmem:[%s6309_s11 + $0x38] sm:$0xff] %v3755_v55  ;;  %v6348_v18 = vpop.permute.xlu0 %4010 }
 0x1e6   : > { %v5071_v25 = vpop.f32.mrf.mxu0  ;;  %v4115_v31 = vmul.f32 %v6287_v14, %v3755_v55  ;;  %v4191_v30 = vmul.f32 %v4114_v23, %v3754_v21  ;;  %v3359_v8 = vadd.f32 %v3206_v10, %v6213_v54 }
 0x1e7   : > { %v4147_v28 = vadd.f32 %v4146_v24, %v4112_v27  ;;  %v4223_v3 = vadd.f32 %v4222_v48, %v4188_v57  ;;  %3861 = vst [vmem:[%s6309_s11 + $0x28] sm:$0xff] %v3753_v50  ;;  %v4113_v60 = vmul.f32 %v6274_v38, %v3753_v50  ;;  %v5037_v6 = vpop.f32.mrf.mxu1  ;;  %v3758_v61 = vadd.f32 %v5071_v25, %v3360_v56  ;;  %v6352_v27 = vpop.permute.xlu1 %4015 }
 0x1e8   : > { %v3601_v39 = vpop.f32.mrf.mxu0  ;;  %v4192_v48 = vmul.f32 %v4115_v31, %v3755_v55 }
 0x1e9   : > { %v4224_v20 = vadd.f32 %v4223_v3, %v4189_v46  ;;  %v4148_v49 = vadd.f32 %v4147_v28, %v4113_v60  ;;  %v4190_v51 = vmul.f32 %v4113_v60, %v3753_v50  ;;  %3866 = vst [vmem:[%s6309_s11 + $0x50] sm:$0xff] %v3758_v61  ;;  %v3219_v19 = vpop.f32.mrf.mxu1  ;;  %v3756_v38 = vadd.f32 %v3601_v39, %v3358_v41 }
 0x1ea   : > { %v5072_v47 = vpop.f32.mrf.mxu0  ;;  %v3364_v46 = vadd.f32 %v5037_v6, %v6216_v0  ;;  %v4118_v25 = vmul.f32 %v6311_v13, %v3758_v61  ;;  %v3362_v54 = vadd.f32 %v3219_v19, %v6219_v43 }
 0x1eb   : > { %v4149_v17 = vadd.f32 %v4148_v49, %v4114_v23  ;;  %v4225_v62 = vadd.f32 %v4224_v20, %v4190_v51  ;;  %v5038_v33 = vpop.f32.mrf.mxu1  ;;  %v3759_v57 = vadd.f32 %v5072_v47, %v3361_v7  ;;  %3864 = vst [vmem:[%s6309_s11 + $0x40] sm:$0xff] %v3756_v38  ;;  %v4116_v34 = vmul.f32 %v6294_v9, %v3756_v38  ;;  %v6361_v23 = vpop.permute.xlu0 %4020 }
 0x1ec   : > { %v3604_v14 = vpop.f32.mrf.mxu0  ;;  %v3365_v41 = vadd.f32 %v5038_v33, %v6222_v11  ;;  %v6367_v7 = vpop.permute.xlu1 %4025  ;;  %v4195_v51 = vmul.f32 %v4118_v25, %v3758_v61 }
 0x1ed   : > { %v4226_v56 = vadd.f32 %v4225_v62, %v4191_v30  ;;  %v4150_v24 = vadd.f32 %v4149_v17, %v4115_v31  ;;  %3867 = vst [vmem:[%s6309_s11 + $0x58] sm:$0xff] %v3759_v57  ;;  %v3222_v21 = vpop.f32.mrf.mxu1  ;;  %v3757_v50 = vadd.f32 %v3604_v14, %v3359_v8  ;;  %v4193_v3 = vmul.f32 %v4116_v34, %v3756_v38 }
 0x1ee   : > { %v5075_v10 = vpop.f32.mrf.mxu0  ;;  %v4119_v0 = vmul.f32 %v6314_v35, %v3759_v57  ;;  %v3363_v47 = vadd.f32 %v3222_v21, %v6225_v45 }
 0x1ef   : > { %v4151_v28 = vadd.f32 %v4150_v24, %v4116_v34  ;;  %v4227_v9 = vadd.f32 %v4226_v56, %v4192_v48  ;;  %3865 = vst [vmem:[%s6309_s11 + $0x48] sm:$0xff] %v3757_v50  ;;  %v4117_v55 = vmul.f32 %v6299_v36, %v3757_v50  ;;  %v5041_v60 = vpop.f32.mrf.mxu1  ;;  %v3762_v6 = vadd.f32 %v5075_v10, %v3364_v46  ;;  %v6373_v17 = vpop.permute.xlu0 %4030 }
 0x1f0   : > { %v3617_v13 = vpop.f32.mrf.mxu0  ;;  %v4196_v62 = vmul.f32 %v4119_v0, %v3759_v57  ;;  %v3368_v61 = vadd.f32 %v5041_v60, %v6228_v59  ;;  %v6378_v24 = vpop.permute.xlu1 %4035 }
 0x1f1   : > { %v4228_v43 = vadd.f32 %v4227_v9, %v4193_v3  ;;  %v4152_v39 = vadd.f32 %v4151_v28, %v4117_v55  ;;  %v4194_v20 = vmul.f32 %v4117_v55, %v3757_v50  ;;  %v3235_v31 = vpop.f32.mrf.mxu1  ;;  %v3760_v49 = vadd.f32 %v3617_v13, %v3362_v54  ;;  %3870 = vst [vmem:[%s6309_s11 + $0x70] sm:$0xff] %v3762_v6 }
 0x1f2   : > { %v5076_v19 = vpop.f32.mrf.mxu0  ;;  %v3366_v48 = vadd.f32 %v3235_v31, %v6231_v44  ;;  %v4122_v57 = vmul.f32 %v6334_v42, %v3762_v6 }
 0x1f3   : > { %v4153_v36 = vadd.f32 %v4152_v39, %v4118_v25  ;;  %v4229_v30 = vadd.f32 %v4228_v43, %v4194_v20  ;;  %3868 = vst [vmem:[%s6309_s11 + $0x60] sm:$0xff] %v3760_v49  ;;  %v4120_v11 = vmul.f32 %v6320_v53, %v3760_v49  ;;  %v5042_v38 = vpop.f32.mrf.mxu1  ;;  %v3763_v35 = vadd.f32 %v5076_v19, %v3365_v41 }
 0x1f4   : > { %v3620_v8 = vpop.f32.mrf.mxu0  ;;  %v3369_v28 = vadd.f32 %v5042_v38, %v6234_v40  ;;  %v4199_v43 = vmul.f32 %v4122_v57, %v3762_v6 }
 0x1f5   : > { %v4230_v33 = vadd.f32 %v4229_v30, %v4195_v51  ;;  %v4154_v34 = vadd.f32 %v4153_v36, %v4119_v0  ;;  %3871 = vst [vmem:[%s6309_s11 + $0x78] sm:$0xff] %v3763_v35  ;;  %v3238_v14 = vpop.f32.mrf.mxu1  ;;  %v3761_v56 = vadd.f32 %v3620_v8, %v3363_v47  ;;  %v4197_v45 = vmul.f32 %v4120_v11, %v3760_v49  ;;  %v6386_v0 = vpop.permute.xlu0 %4040 }
 0x1f6   : > { %v5079_v53 = vpop.f32.mrf.mxu0  ;;  %v4123_v9 = vmul.f32 %v6339_v58, %v3763_v35  ;;  %v3367_v42 = vadd.f32 %v3238_v14, %v6237_v37  ;;  %v6391_v49 = vpop.permute.xlu1 %4045 }
 0x1f7   : > { %v4155_v50 = vadd.f32 %v4154_v34, %v4120_v11  ;;  %v4231_v21 = vadd.f32 %v4230_v33, %v4196_v62  ;;  %v5045_v46 = vpop.f32.mrf.mxu1  ;;  %v3766_v25 = vadd.f32 %v5079_v53, %v3368_v61  ;;  %3869 = vst [vmem:[%s6309_s11 + $0x68] sm:$0xff] %v3761_v56  ;;  %v4121_v59 = vmul.f32 %v6326_v15, %v3761_v56 }
 0x1f8   : > { %v3633_v54 = vpop.f32.mrf.mxu0  ;;  %v3372_v58 = vadd.f32 %v5045_v46, %v6240_v1  ;;  %v4200_v36 = vmul.f32 %v4123_v9, %v3763_v35 }
 0x1f9   : > { %v4232_v10 = vadd.f32 %v4231_v21, %v4197_v45  ;;  %3874 = vst [vmem:[%s6309_s11 + $0x90] sm:$0xff] %v3766_v25  ;;  %v3251_v44 = vpop.f32.mrf.mxu1  ;;  %v3764_v3 = vadd.f32 %v3633_v54, %v3366_v48  ;;  %v4156_v55 = vadd.f32 %v4155_v50, %v4121_v59  ;;  %v4198_v60 = vmul.f32 %v4121_v59, %v3761_v56  ;;  %v4051_v34 = vpop.permute.xlu0 %4050 }
 0x1fa   : > { %v5080_v41 = vpop.f32.mrf.mxu0  ;;  %v3370_v38 = vadd.f32 %v3251_v44, %v6245_v5  ;;  %v4126_v8 = vmul.f32 %v6361_v23, %v3766_v25  ;;  %v4056_v45 = vpop.permute.xlu1 %4055 }
 0x1fb   : > { %3872 = vst [vmem:[%s6309_s11 + $0x80] sm:$0xff] %v3764_v3  ;;  %v5046_v13 = vpop.f32.mrf.mxu1  ;;  %v3767_v15 = vadd.f32 %v5080_v41, %v3369_v28  ;;  %v4157_v39 = vadd.f32 %v4156_v55, %v4122_v57  ;;  %v4233_v40 = vadd.f32 %v4232_v10, %v4198_v60  ;;  %v4124_v20 = vmul.f32 %v6348_v18, %v3764_v3 }
 0x1fc   : > { %v3636_v31 = vpop.f32.mrf.mxu0  ;;  %v3373_v35 = vadd.f32 %v5046_v13, %v6250_v52  ;;  %v4203_v57 = vmul.f32 %v4126_v8, %v3766_v25 }
 0x1fd   : > { %3875 = vst [vmem:[%s6309_s11 + $0x98] sm:$0xff] %v3767_v15  ;;  %v3254_v51 = vpop.f32.mrf.mxu1  ;;  %v3765_v19 = vadd.f32 %v3636_v31, %v3367_v42  ;;  %v4234_v30 = vadd.f32 %v4233_v40, %v4199_v43  ;;  %v4158_v37 = vadd.f32 %v4157_v39, %v4123_v9  ;;  %v4201_v1 = vmul.f32 %v4124_v20, %v3764_v3  ;;  %v4061_v60 = vpop.permute.xlu0 %4060 }
 0x1fe   : > { %v5083_v11 = vpop.f32.mrf.mxu0  ;;  %v3371_v23 = vadd.f32 %v3254_v51, %v6253_v16 }
 0x1ff   : > { %3873 = vst [vmem:[%s6309_s11 + $0x88] sm:$0xff] %v3765_v19  ;;  %v4125_v6 = vmul.f32 %v6352_v27, %v3765_v19  ;;  %v5049_v47 = vpop.f32.mrf.mxu1  ;;  %v3770_v18 = vadd.f32 %v5083_v11, %v3372_v58  ;;  %v4159_v62 = vadd.f32 %v4158_v37, %v4124_v20  ;;  %v4235_v33 = vadd.f32 %v4234_v30, %v4200_v36 }
 0x200   : > { %v3649_v61 = vpop.f32.mrf.mxu0  ;;  %v4127_v27 = vmul.f32 %v6367_v7, %v3767_v15  ;;  %v3376_v28 = vadd.f32 %v5049_v47, %v6258_v29 }
 0x201   : > { %v4202_v14 = vmul.f32 %v4125_v6, %v3765_v19  ;;  %3878 = vst [vmem:[%s6309_s11 + $0xb0] sm:$0xff] %v3770_v18  ;;  %v3267_v48 = vpop.f32.mrf.mxu1  ;;  %v3768_v56 = vadd.f32 %v3649_v61, %v3370_v38  ;;  %v4236_v5 = vadd.f32 %v4235_v33, %v4201_v1  ;;  %v4160_v53 = vadd.f32 %v4159_v62, %v4125_v6 }
 0x202   : > { %v5084_v50 = vpop.f32.mrf.mxu0  ;;  %v4204_v3 = vmul.f32 %v4127_v27, %v3767_v15  ;;  %v3374_v41 = vadd.f32 %v3267_v48, %v6263_v32  ;;  %v4066_v15 = vpop.permute.xlu1 %4065 }
 0x203   : > { %3876 = vst [vmem:[%s6309_s11 + $0xa0] sm:$0xff] %v3768_v56  ;;  %v5050_v21 = vpop.f32.mrf.mxu1  ;;  %v3771_v46 = vadd.f32 %v5084_v50, %v3373_v35  ;;  %v4161_v59 = vadd.f32 %v4160_v53, %v4126_v8  ;;  %v4237_v52 = vadd.f32 %v4236_v5, %v4202_v14  ;;  %v4128_v54 = vmul.f32 %v6373_v17, %v3768_v56  ;;  %v4071_v8 = vpop.permute.xlu0 %4070 }
 0x204   : > { %v3652_v10 = vpop.f32.mrf.mxu0  ;;  %v4130_v17 = vmul.f32 %v6386_v0, %v3770_v18  ;;  %v3377_v20 = vadd.f32 %v5050_v21, %v6266_v12 }
 0x205   : > { %3879 = vst [vmem:[%s6309_s11 + $0xb8] sm:$0xff] %v3771_v46  ;;  %v3270_v44 = vpop.f32.mrf.mxu1  ;;  %v3769_v7 = vadd.f32 %v3652_v10, %v3371_v23  ;;  %v4238_v9 = vadd.f32 %v4237_v52, %v4203_v57  ;;  %v4162_v55 = vadd.f32 %v4161_v59, %v4127_v27  ;;  %v4205_v43 = vmul.f32 %v4128_v54, %v3768_v56 }
 0x206   : > { %v5087_v16 = vpop.f32.mrf.mxu0  ;;  %v3375_v0 = vadd.f32 %v3270_v44, %v6271_v63  ;;  %v4207_v11 = vmul.f32 %v4130_v17, %v3770_v18  ;;  %v4076_v14 = vpop.permute.xlu1 %4075 }
 0x207   : > { %3877 = vst [vmem:[%s6309_s11 + $0xa8] sm:$0xff] %v3769_v7  ;;  %v4129_v25 = vmul.f32 %v6378_v24, %v3769_v7  ;;  %v5053_v42 = vpop.f32.mrf.mxu1  ;;  %v3774_v13 = vadd.f32 %v5087_v16, %v3376_v28  ;;  %v4163_v29 = vadd.f32 %v4162_v55, %v4128_v54  ;;  %v4239_v39 = vadd.f32 %v4238_v9, %v4204_v3 }
 0x208   : > { %v3665_v40 = vpop.f32.mrf.mxu0  ;;  %v4131_v24 = vmul.f32 %v6391_v49, %v3771_v46  ;;  %v3380_v62 = vadd.f32 %v5053_v42, %v6276_v22 }
 0x209   : > { %v4206_v31 = vmul.f32 %v4129_v25, %v3769_v7  ;;  %3882 = vst [vmem:[%s6309_s11 + $0xd0] sm:$0xff] %v3774_v13  ;;  %v3283_v58 = vpop.f32.mrf.mxu1  ;;  %v3772_v51 = vadd.f32 %v3665_v40, %v3374_v41  ;;  %v4240_v32 = vadd.f32 %v4239_v39, %v4205_v43  ;;  %v4164_v19 = vadd.f32 %v4163_v29, %v4129_v25 }
 0x20a   : > { %v5088_v36 = vpop.f32.mrf.mxu0  ;;  %v4208_v49 = vmul.f32 %v4131_v24, %v3771_v46  ;;  %v3378_v48 = vadd.f32 %v3283_v58, %v6279_v2  ;;  %v4086_v16 = vpop.permute.xlu1 %4085 }
 0x20b   : > { %3880 = vst [vmem:[%s6309_s11 + $0xc0] sm:$0xff] %v3772_v51  ;;  %v5054_v30 = vpop.f32.mrf.mxu1  ;;  %v3775_v37 = vadd.f32 %v5088_v36, %v3377_v20  ;;  %v4165_v38 = vadd.f32 %v4164_v19, %v4130_v17  ;;  %v4241_v6 = vadd.f32 %v4240_v32, %v4206_v31  ;;  %v4132_v12 = vmul.f32 %v4051_v34, %v3772_v51  ;;  %v6460_v19 = vld [vmem:[#allocation5_spill] sm:$0xff] }
 0x20c   : > { %v3668_v47 = vpop.f32.mrf.mxu0  ;;  %v4134_v34 = vmul.f32 %v4061_v60, %v3774_v13  ;;  %v3381_v23 = vadd.f32 %v5054_v30, %v6284_v26  ;;  %v6458_v60 = vld [vmem:[#allocation3_spill] sm:$0xff] }
 0x20d   : > { %3883 = vst [vmem:[%s6309_s11 + $0xd8] sm:$0xff] %v3775_v37  ;;  %v3286_v1 = vpop.f32.mrf.mxu1  ;;  %v3773_v33 = vadd.f32 %v3668_v47, %v3375_v0  ;;  %v4242_v61 = vadd.f32 %v4241_v6, %v4207_v11  ;;  %v4166_v35 = vadd.f32 %v4165_v38, %v4131_v24  ;;  %v4209_v53 = vmul.f32 %v4132_v12, %v3772_v51  ;;  %v6461_v47 = vld [vmem:[#allocation6_spill] sm:$0xff] }
 0x20e   : > { %v5091_v63 = vpop.f32.mrf.mxu0  ;;  %v4135_v52 = vmul.f32 %v4066_v15, %v3775_v37  ;;  %v3379_v10 = vadd.f32 %v3286_v1, %v6289_v4  ;;  %v4211_v44 = vmul.f32 %v4134_v34, %v3774_v13  ;;  %v6459_v4 = vld [vmem:[#allocation4_spill] sm:$0xff] }
 0x20f   : > { %3881 = vst [vmem:[%s6309_s11 + $0xc8] sm:$0xff] %v3773_v33  ;;  %v4133_v18 = vmul.f32 %v4056_v45, %v3773_v33  ;;  %v5057_v56 = vpop.f32.mrf.mxu1  ;;  %v3778_v5 = vadd.f32 %v5091_v63, %v3380_v62  ;;  %v4167_v27 = vadd.f32 %v4166_v35, %v4132_v12  ;;  %v4243_v22 = vadd.f32 %v4242_v61, %v4208_v49  ;;  %v4081_v45 = vpop.permute.xlu0 %4080 }
 0x210   : > { %v3681_v50 = vpop.f32.mrf.mxu0  ;;  %v3384_v41 = vadd.f32 %v5057_v56, %v6458_v60  ;;  %v4212_v42 = vmul.f32 %v4135_v52, %v3775_v37  ;;  %v4096_v12 = vpop.permute.xlu1 %4095 }
 0x211   : > { %v4210_v21 = vmul.f32 %v4133_v18, %v3773_v33  ;;  %3886 = vst [vmem:[%s6309_s11 + $0xf0] sm:$0xff] %v3778_v5  ;;  %v3299_v46 = vpop.f32.mrf.mxu1  ;;  %v3776_v57 = vadd.f32 %v3681_v50, %v3378_v48  ;;  %v4244_v59 = vadd.f32 %v4243_v22, %v4209_v53  ;;  %v4168_v2 = vadd.f32 %v4167_v27, %v4133_v18 }
 0x212   : > { %v5092_v54 = vpop.f32.mrf.mxu0  ;;  %v3382_v39 = vadd.f32 %v3299_v46, %v6459_v4  ;;  %v4138_v15 = vmul.f32 %v4081_v45, %v3778_v5 }
 0x213   : > { %3884 = vst [vmem:[%s6309_s11 + $0xe0] sm:$0xff] %v3776_v57  ;;  %v3779_v28 = vadd.f32 %v5092_v54, %v3381_v23  ;;  %v4169_v7 = vadd.f32 %v4168_v2, %v4134_v34  ;;  %v4245_v3 = vadd.f32 %v4244_v59, %v4210_v21  ;;  %v4136_v9 = vmul.f32 %v4071_v8, %v3776_v57  ;;  %v5058_v26 = vpop.f32.mrf.mxu1  ;;  %v4091_v24 = vpop.permute.xlu0 %4090 }
 0x214   : > { %v3684_v55 = vpop.f32.mrf.mxu0  ;;  %v3385_v36 = vadd.f32 %v5058_v26, %v6460_v19  ;;  %v4215_v1 = vmul.f32 %v4138_v15, %v3778_v5  ;;  %v4106_v23 = vpop.permute.xlu1 %4105 }
 0x215   : > { %3887 = vst [vmem:[%s6309_s11 + $0xf8] sm:$0xff] %v3779_v28  ;;  %v3777_v25 = vadd.f32 %v3684_v55, %v3379_v10  ;;  %v4246_v17 = vadd.f32 %v4245_v3, %v4211_v44  ;;  %v4170_v29 = vadd.f32 %v4169_v7, %v4135_v52  ;;  %v4213_v31 = vmul.f32 %v4136_v9, %v3776_v57  ;;  %v3302_v51 = vpop.f32.mrf.mxu1 }
 0x216   : > { %v5095_v43 = vpop.f32.mrf.mxu0  ;;  %v4139_v11 = vmul.f32 %v4086_v16, %v3779_v28  ;;  %v3383_v8 = vadd.f32 %v3302_v51, %v6461_v47 }
 0x217   : > { %3885 = vst [vmem:[%s6309_s11 + $0xe8] sm:$0xff] %v3777_v25  ;;  %v4137_v40 = vmul.f32 %v4076_v14, %v3777_v25  ;;  %v3782_v13 = vadd.f32 %v5095_v43, %v3384_v41  ;;  %v4171_v20 = vadd.f32 %v4170_v29, %v4136_v9  ;;  %v4247_v58 = vadd.f32 %v4246_v17, %v4212_v42  ;;  %v4101_v56 = vpop.permute.xlu0 %4100 }
 0x218   : > { %v3697_v32 = vpop.f32.mrf.mxu0  ;;  %v4216_v14 = vmul.f32 %v4139_v11, %v3779_v28  ;;  %v4262_v9 = vlaneseq }
 0x219   : > { %v4214_v0 = vmul.f32 %v4137_v40, %v3777_v25  ;;  %3890 = vst [vmem:[%s6309_s11 + $0x110] sm:$0xff] %v3782_v13  ;;  %v3780_v30 = vadd.f32 %v3697_v32, %v3382_v39  ;;  %v4248_v37 = vadd.f32 %v4247_v58, %v4213_v31  ;;  %v4172_v38 = vadd.f32 %v4171_v20, %v4137_v40 }
 0x21a   : > { %v5096_v6 = vpop.f32.mrf.mxu0  ;;  %v4142_v27 = vmul.f32 %v4101_v56, %v3782_v13  ;;  %v4263_v41 = vshrl.u32 %v4262_v9, 7 }
 0x21b   : > { %3888 = vst [vmem:[%s6309_s11 + $0x100] sm:$0xff] %v3780_v30  ;;  %v3783_v62 = vadd.f32 %v5096_v6, %v3385_v36  ;;  %v4173_v33 = vadd.f32 %v4172_v38, %v4138_v15  ;;  %v4249_v49 = vadd.f32 %v4248_v37, %v4214_v0  ;;  %v4140_v61 = vmul.f32 %v4091_v24, %v3780_v30 }
 0x21c   : > { %v3700_v35 = vpop.f32.mrf.mxu0  ;;  %v4219_v59 = vmul.f32 %v4142_v27, %v3782_v13  ;;  %vm4265_vm2 = vcmp.eq.s32.totalorder %v4263_v41, 1  ;;  %vm4264_vm3 = vcmp.eq.s32.totalorder %v4263_v41, 0 }
 0x21d   : > { %3891 = vst [vmem:[%s6309_s11 + $0x118] sm:$0xff] %v3783_v62  ;;  %v3781_v63 = vadd.f32 %v3700_v35, %v3383_v8  ;;  %v4250_v48 = vadd.f32 %v4249_v49, %v4215_v1  ;;  %v4174_v18 = vadd.f32 %v4173_v33, %v4139_v11  ;;  %v4217_v22 = vmul.f32 %v4140_v61, %v3780_v30 }
 0x21e   : > { %v4143_v5 = vmul.f32 %v4106_v23, %v3783_v62 }
 0x21f   : > { %3889 = vst [vmem:[%s6309_s11 + $0x108] sm:$0xff] %v3781_v63  ;;  %v4141_v34 = vmul.f32 %v4096_v12, %v3781_v63  ;;  %v4175_v53 = vadd.f32 %v4174_v18, %v4140_v61  ;;  %v4251_v50 = vadd.f32 %v4250_v48, %v4216_v14 }
 0x220   : > { %v4220_v54 = vmul.f32 %v4143_v5, %v3783_v62 }
 0x221   : > { %v4218_v21 = vmul.f32 %v4141_v34, %v3781_v63  ;;  %v4252_v46 = vadd.f32 %v4251_v50, %v4217_v22  ;;  %v4176_v57 = vadd.f32 %v4175_v53, %v4141_v34 }
 0x223   : > { %v4177_v52 = vadd.f32 %v4176_v57, %v4142_v27  ;;  %v4253_v2 = vadd.f32 %v4252_v46, %v4218_v21 }
 0x225   : > { %v4178_v45 = vadd.f32 %v4177_v52, %v4143_v5  ;;  %v4254_v10 = vadd.f32 %v4253_v2, %v4219_v59 }
 0x227   : > { %v4179_v28 = vrot.slane %v4178_v45, 4  ;;  %v4255_v44 = vadd.f32 %v4254_v10, %v4220_v54 }
 0x229   : > { %v4180_v7 = vadd.f32 %v4179_v28, %v4178_v45  ;;  %v4256_v3 = vrot.slane %v4255_v44, 4 }
 0x22b   : > { %v4181_v26 = vrot.slane %v4180_v7, 2  ;;  %v4257_v55 = vadd.f32 %v4256_v3, %v4255_v44 }
 0x22d   : > { %v4182_v16 = vadd.f32 %v4181_v26, %v4180_v7  ;;  %v4258_v60 = vrot.slane %v4257_v55, 2 }
 0x22f   : > { %v4259_v25 = vadd.f32 %v4258_v60, %v4257_v55  ;;  %v4183_v42 = vrot.slane %v4182_v16, 1 }
 0x231   : > { %v4260_v17 = vrot.slane %v4259_v25, 1  ;;  %v4184_v43 = vadd.f32 %v4183_v42, %v4182_v16 }
 0x233   : > { %v4261_v29 = vadd.f32 %v4260_v17, %v4259_v25 }
 0x235   : > { %v4266_v4 = vsel %vm4265_vm2, %v4261_v29, 0.0 }
 0x236   : > { %v4267_v39 = vsel %vm4264_vm3, %v4184_v43, %v4266_v4 }
 0x237   : > { %4268 = vst [vmem:[%s307_s15] sm:$0xff] %v4267_v39 }
 0x238 PF: > { %s17_s23 = sadd.s32 1, %s5160_s23   ;;  %s6462_s21 = smov %s5156_s22 }
 0x239   : > { %p14_p5 = scmp.ge.s32.totalorder %s17_s23, 4   ;;  %s6463_s22 = smov %s6465_s3 }
 0x23b   :  { %16 = sbr.rel (!%p14_p5) target bundleno = 2 (0x2), region = 93 }

// kernel: _lambda_.4
= control target key start
LH: loop header
LB: loop body
LE: loop exit
PB: predicated region body
PF: predicated region fallthrough
CT: control target
= control target key end

     0   :  { %s6320_s21 = smov 0   ;;  %s6322_s22 = smov 0   ;;  %s8410_s0 = inlined_call_operand.vmem [shape: f32[2,326,8], index: 0, kind: input, shape index: {}]   ;;  %s8411_s1 = inlined_call_operand.vmem [shape: bf16[9,8,128], index: 1, kind: input, shape index: {}]   ;;  %s8412_s2 = inlined_call_operand.vmem [shape: f32[288,1], index: 2, kind: input, shape index: {}]   ;;  %s8413_s3 = inlined_call_operand.vmem [shape: f32[1,8], index: 3, kind: input, shape index: {}]   ;;  %s8414_s4 = inlined_call_operand.vmem [shape: f32[1,8], index: 4, kind: input, shape index: {}]   ;;  %s8415_s5 = inlined_call_operand.vmem [shape: f32[2,288,128], index: 5, kind: output, shape index: {0}]   ;;  %s8416_s6 = inlined_call_operand.vmem [shape: f32[2,8,128], index: 6, kind: output, shape index: {1}]  }
   0x1   :  { %s6324_s23 = smov 0  }
   0x2 LB: > { %s29_s24 = sadd.s32 1, %s6278_s22  ;;  %p5506_p0 = scmp.ge.s32.totalorder %s6282_s23, 1  ;;  %s6282_s23 = sphi %s6324_s23, %s17_s23   ;;  %s6278_s22 = sphi %s6322_s22, %s8449_s22   ;;  %s6274_s21 = sphi %s6320_s21, %s8448_s21  }
   0x3   : > { %p31_p1 = scmp.ge.s32.totalorder %s29_s24, 2  ;;  %p240_p2 = scmp.lt.s32.totalorder %s6282_s23, 3 }
   0x5   : > { %s8451_s24 = smov (%p31_p1, %s29_s24), 0  ;;  %p241_p3 = pnand %p5506_p0, %p240_p2 }
   0x7   : > { %244 = sbr.rel (%p241_p3) target bundleno = 574 (0x23e), region = 40 }
   0xc   : > { %v485_v0 = vld [vmem:[%s8411_s1] sm:$0xf]  ;;  %vm541_vm0 = vcmask 1043456   ;;  %p284_p4 = scmp.lt.s32.totalorder %s6274_s21, 1  ;;  %v5553_v2 = vld [vmem:[%s8411_s1 + $0x8] sm:$0xf] }
   0xd   : > { %6215 = vmatprep.subr.msk.bf16.mxu0 %vm541_vm0, %v485_v0  ;;  %6216 = vmatprep.subr.msk.bf16.mxu1 %vm541_vm0, %v485_v0  ;;  %v543_v1 = vsel %vm541_vm0, %v485_v0, 0  ;;  %v5532_v3 = vld [vmem:[%s8411_s1 + $0x4] sm:$0xf]  ;;  %v6358_v4 = vld [vmem:[%s8413_s3] ss:$0 sm:$0xff]  ;;  %vm486_vm1 = vcmask 64512  }
   0xe   : > { %5872 = vmatpush3.bf16.msra.mxu0 %v543_v1  ;;  %6214 = vmatpush3.bf16.msra.mxu1 %v543_v1  ;;  %s8453_s21 = smov (!%p284_p4, %s6274_s21), 1  ;;  %v6368_v5 = vld [vmem:[%s8414_s4] ss:$0 sm:$0xff]  ;;  %v6373_v6 = vld [vmem:[%s8411_s1 + $0xc] sm:$0xf]  ;;  %v1511_v10 = vsel %vm541_vm0, %v5553_v2, 0 }
   0xf   : > { %6218 = vmatprep.subr.msk.bf16.mxu0 %vm541_vm0, %v5553_v2  ;;  %6217 = vmatprep.subr.msk.bf16.mxu1 %vm541_vm0, %v5532_v3  ;;  %s6225_s7 = smul.u32 328, %s8453_s21  ;;  %v6386_v17 = vsel %vm541_vm0, %v5532_v3, 0  ;;  %v6395_v23 = vsel %vm541_vm0, %v6373_v6, 0  ;;  %v5595_v50 = vld [vmem:[%s8411_s1 + $0x10] sm:$0xf] }
  0x10   : > { %v6432_v1 = vsel %vm541_vm0, %v5595_v50, 0 }
  0x11   : > { %s6363_s12 = scalar_lea.vmem %s8410_s0, %s6225_s7  ;;  %s5509_s7 = sshll.u32 %s8453_s21, 3 }
  0x12   : > { %v309_v7 = vld [vmem:[%s6363_s12] sm:$0xff]  ;;  %v310_v8 = vld [vmem:[%s6363_s12 + $0x8] sm:$0xff]  ;;  %v311_v15 = vld [vmem:[%s6363_s12 + $0x10] sm:$0xff]  ;;  %s307_s10 = scalar_lea.vmem %s8416_s6, %s5509_s7 }
  0x13   : > { %v329_v9 = vld [vmem:[%s6363_s12 + $0xa0] sm:$0xff]  ;;  %v352_v11 = vmul.f32 %v6358_v4, %v309_v7  ;;  %v353_v12 = vmul.f32 %v6358_v4, %v310_v8  ;;  %v330_v13 = vld [vmem:[%s6363_s12 + $0xa8] sm:$0xff]  ;;  %v312_v16 = vld [vmem:[%s6363_s12 + $0x18] sm:$0xff]  ;;  %v354_v19 = vmul.f32 %v6358_v4, %v311_v15 }
  0x14   : > { %v372_v14 = vmul.f32 %v6358_v4, %v329_v9  ;;  %v373_v18 = vmul.f32 %v6358_v4, %v330_v13  ;;  %v355_v20 = vmul.f32 %v6358_v4, %v312_v16  ;;  %v331_v21 = vld [vmem:[%s6363_s12 + $0xb0] sm:$0xff]  ;;  %v332_v22 = vld [vmem:[%s6363_s12 + $0xb8] sm:$0xff]  ;;  %v313_v32 = vld [vmem:[%s6363_s12 + $0x20] sm:$0xff] }
  0x15   : > { %v395_v24 = vadd.f32 %v6368_v5, %v352_v11  ;;  %v396_v25 = vadd.f32 %v6368_v5, %v353_v12  ;;  %v374_v27 = vmul.f32 %v6358_v4, %v331_v21  ;;  %v397_v29 = vadd.f32 %v6368_v5, %v354_v19  ;;  %v314_v33 = vld [vmem:[%s6363_s12 + $0x28] sm:$0xff]  ;;  %v333_v38 = vld [vmem:[%s6363_s12 + $0xc0] sm:$0xff]  ;;  %v315_v44 = vld [vmem:[%s6363_s12 + $0x30] sm:$0xff] }
  0x16   : > { %v415_v26 = vadd.f32 %v6368_v5, %v372_v14  ;;  %v416_v28 = vadd.f32 %v6368_v5, %v373_v18  ;;  %v398_v30 = vadd.f32 %v6368_v5, %v355_v20  ;;  %v375_v31 = vmul.f32 %v6358_v4, %v332_v22  ;;  %v334_v43 = vld [vmem:[%s6363_s12 + $0xc8] sm:$0xff]  ;;  %v316_v49 = vld [vmem:[%s6363_s12 + $0x38] sm:$0xff]  ;;  %v335_v59 = vld [vmem:[%s6363_s12 + $0xd0] sm:$0xff] }
  0x17   : > { %v431_v34 = vmax.f32 %v395_v24, 0.0  ;;  %v432_v35 = vmax.f32 %v396_v25, 0.0  ;;  %v417_v37 = vadd.f32 %v6368_v5, %v374_v27  ;;  %v433_v40 = vmax.f32 %v397_v29, 0.0  ;;  %v336_v60 = vld [vmem:[%s6363_s12 + $0xd8] sm:$0xff]  ;;  %v317_v0 = vld [vmem:[%s6363_s12 + $0x40] sm:$0xff]  ;;  %v318_v9 = vld [vmem:[%s6363_s12 + $0x48] sm:$0xff] }
  0x18   : > { %v451_v36 = vmax.f32 %v415_v26, 0.0  ;;  %v452_v39 = vmax.f32 %v416_v28, 0.0  ;;  %v434_v41 = vmax.f32 %v398_v30, 0.0  ;;  %v418_v42 = vadd.f32 %v6368_v5, %v375_v31  ;;  %v337_v15 = vld [vmem:[%s6363_s12 + $0xe0] sm:$0xff]  ;;  %v338_v16 = vld [vmem:[%s6363_s12 + $0xe8] sm:$0xff]  ;;  %v319_v26 = vld [vmem:[%s6363_s12 + $0x50] sm:$0xff] }
  0x19   : > { %v467_v45 = vpack.c.bf16 %v432_v35, %v431_v34  ;;  %v453_v46 = vmax.f32 %v417_v37, 0.0  ;;  %v356_v47 = vmul.f32 %v6358_v4, %v313_v32  ;;  %v357_v48 = vmul.f32 %v6358_v4, %v314_v33  ;;  %v320_v30 = vld [vmem:[%s6363_s12 + $0x58] sm:$0xff]  ;;  %v339_v31 = vld [vmem:[%s6363_s12 + $0xf0] sm:$0xff] }
  0x1a   : > { %v477_v51 = vpack.c.bf16 %v452_v39, %v451_v36  ;;  %v468_v52 = vpack.c.bf16 %v434_v41, %v433_v40  ;;  %v454_v53 = vmax.f32 %v418_v42, 0.0  ;;  %v376_v54 = vmul.f32 %v6358_v4, %v333_v38  ;;  %v340_v36 = vld [vmem:[%s6363_s12 + $0xf8] sm:$0xff]  ;;  %v321_v40 = vld [vmem:[%s6363_s12 + $0x60] sm:$0xff] }
  0x1b   : > { %5873 = vmatprep.mubr.msk.bf16.mxu0 %vm486_vm1, %v467_v45  ;;  %v399_v55 = vadd.f32 %v6368_v5, %v356_v47  ;;  %v400_v56 = vadd.f32 %v6368_v5, %v357_v48  ;;  %v377_v57 = vmul.f32 %v6358_v4, %v334_v43  ;;  %v358_v58 = vmul.f32 %v6358_v4, %v315_v44  ;;  %v322_v45 = vld [vmem:[%s6363_s12 + $0x68] sm:$0xff] }
  0x1c   : > { %5893 = vmatprep.mubr.msk.bf16.mxu1 %vm486_vm1, %v477_v51  ;;  %5874 = vmatmul.mubr.msk.bf16.vlgmr.msra.gmra.mxu0 %vm486_vm1, %v468_v52  ;;  %v478_v61 = vpack.c.bf16 %v454_v53, %v453_v46  ;;  %v419_v62 = vadd.f32 %v6368_v5, %v376_v54  ;;  %v359_v63 = vmul.f32 %v6358_v4, %v316_v49 }
  0x1d   : > { %5948 = vmatpush3.bf16.msra.mxu0 %v1511_v10  ;;  %v435_v2 = vmax.f32 %v399_v55, 0.0  ;;  %v436_v3 = vmax.f32 %v400_v56, 0.0  ;;  %v420_v7 = vadd.f32 %v6368_v5, %v377_v57  ;;  %v401_v8 = vadd.f32 %v6368_v5, %v358_v58  ;;  %v342_v55 = vld [vmem:[%s6363_s12 + $0x108] sm:$0xff]  ;;  %v323_v56 = vld [vmem:[%s6363_s12 + $0x70] sm:$0xff] }
  0x1e   : > { %5894 = vmatmul.mubr.msk.bf16.vlgmr.msra.gmra.mxu1 %vm486_vm1, %v478_v61  ;;  %v455_v11 = vmax.f32 %v419_v62, 0.0  ;;  %v402_v12 = vadd.f32 %v6368_v5, %v359_v63  ;;  %v378_v13 = vmul.f32 %v6358_v4, %v335_v59  ;;  %v379_v14 = vmul.f32 %v6358_v4, %v336_v60  ;;  %6220 = vmatprep.subr.msk.bf16.mxu0 %vm541_vm0, %v5595_v50  ;;  %v341_v50 = vld [vmem:[%s6363_s12 + $0x100] sm:$0xff]  ;;  %v324_v61 = vld [vmem:[%s6363_s12 + $0x78] sm:$0xff] }
  0x1f   : > { %5910 = vmatpush3.bf16.msra.mxu1 %v6386_v17  ;;  %v469_v10 = vpack.c.bf16 %v436_v3, %v435_v2  ;;  %v456_v18 = vmax.f32 %v420_v7, 0.0  ;;  %v437_v19 = vmax.f32 %v401_v8, 0.0  ;;  %v360_v20 = vmul.f32 %v6358_v4, %v317_v0 }
  0x20   : > { %v438_v21 = vmax.f32 %v402_v12, 0.0  ;;  %v421_v22 = vadd.f32 %v6368_v5, %v378_v13  ;;  %v422_v24 = vadd.f32 %v6368_v5, %v379_v14  ;;  %v361_v25 = vmul.f32 %v6358_v4, %v318_v9  ;;  %6219 = vmatprep.subr.msk.bf16.mxu1 %vm541_vm0, %v6373_v6  ;;  %v344_v12 = vld [vmem:[%s6363_s12 + $0x118] sm:$0xff] }
  0x21   : > { %5877 = vmatprep.mubr.msk.bf16.mxu0 %vm486_vm1, %v469_v10  ;;  %v479_v17 = vpack.c.bf16 %v456_v18, %v455_v11  ;;  %v403_v27 = vadd.f32 %v6368_v5, %v360_v20  ;;  %v380_v28 = vmul.f32 %v6358_v4, %v337_v15  ;;  %v381_v29 = vmul.f32 %v6358_v4, %v338_v16  ;;  %v343_v11 = vld [vmem:[%s6363_s12 + $0x110] sm:$0xff]  ;;  %v325_v10 = vld [vmem:[%s6363_s12 + $0x80] sm:$0xff] }
  0x22   : > { %v470_v32 = vpack.c.bf16 %v438_v21, %v437_v19  ;;  %v457_v33 = vmax.f32 %v421_v22, 0.0  ;;  %v458_v34 = vmax.f32 %v422_v24, 0.0  ;;  %v404_v35 = vadd.f32 %v6368_v5, %v361_v25  ;;  %v326_v22 = vld [vmem:[%s6363_s12 + $0x88] sm:$0xff] }
  0x23   : > { %5897 = vmatprep.mubr.msk.bf16.mxu1 %vm486_vm1, %v479_v17  ;;  %v439_v6 = vmax.f32 %v403_v27, 0.0  ;;  %v423_v37 = vadd.f32 %v6368_v5, %v380_v28  ;;  %v424_v38 = vadd.f32 %v6368_v5, %v381_v29  ;;  %v362_v39 = vmul.f32 %v6358_v4, %v319_v26  ;;  %v758_v27 = vld [vmem:[%s6363_s12 + $0x1] sm:$0xff]  ;;  %v759_v28 = vld [vmem:[%s6363_s12 + $0x9] sm:$0xff] }
  0x24   : > { %5878 = vmatmul.mubr.msk.bf16.gmra.mxu0 %vm486_vm1, %v470_v32  ;;  %v480_v41 = vpack.c.bf16 %v458_v34, %v457_v33  ;;  %v440_v42 = vmax.f32 %v404_v35, 0.0  ;;  %v363_v43 = vmul.f32 %v6358_v4, %v320_v30  ;;  %v382_v44 = vmul.f32 %v6358_v4, %v339_v31 }
  0x25   : > { %v459_v46 = vmax.f32 %v423_v37, 0.0  ;;  %v460_v47 = vmax.f32 %v424_v38, 0.0  ;;  %v405_v48 = vadd.f32 %v6368_v5, %v362_v39  ;;  %v383_v49 = vmul.f32 %v6358_v4, %v340_v36 }
  0x26   : > { %5898 = vmatmul.mubr.msk.bf16.gmra.mxu1 %vm486_vm1, %v480_v41  ;;  %v471_v51 = vpack.c.bf16 %v440_v42, %v439_v6  ;;  %v406_v52 = vadd.f32 %v6368_v5, %v363_v43  ;;  %v425_v53 = vadd.f32 %v6368_v5, %v382_v44  ;;  %v364_v54 = vmul.f32 %v6358_v4, %v321_v40  ;;  %v327_v6 = vld [vmem:[%s6363_s12 + $0x90] sm:$0xff]  ;;  %v328_v41 = vld [vmem:[%s6363_s12 + $0x98] sm:$0xff] }
  0x27   : > { %v481_v57 = vpack.c.bf16 %v460_v47, %v459_v46  ;;  %v441_v58 = vmax.f32 %v405_v48, 0.0  ;;  %v426_v59 = vadd.f32 %v6368_v5, %v383_v49  ;;  %v365_v60 = vmul.f32 %v6358_v4, %v322_v45  ;;  %v760_v42 = vld [vmem:[%s6363_s12 + $0x11] sm:$0xff]  ;;  %v761_v47 = vld [vmem:[%s6363_s12 + $0x19] sm:$0xff] }
  0x28   : > { %5881 = vmatprep.mubr.msk.bf16.mxu0 %vm486_vm1, %v471_v51  ;;  %v442_v62 = vmax.f32 %v406_v52, 0.0  ;;  %v461_v63 = vmax.f32 %v425_v53, 0.0  ;;  %v407_v0 = vadd.f32 %v6368_v5, %v364_v54  ;;  %v384_v2 = vmul.f32 %v6358_v4, %v341_v50  ;;  %v762_v52 = vld [vmem:[%s6363_s12 + $0x21] sm:$0xff] }
  0x29   : > { %5901 = vmatprep.mubr.msk.bf16.mxu1 %vm486_vm1, %v481_v57  ;;  %v462_v3 = vmax.f32 %v426_v59, 0.0  ;;  %v408_v7 = vadd.f32 %v6368_v5, %v365_v60  ;;  %v385_v8 = vmul.f32 %v6358_v4, %v342_v55  ;;  %v366_v9 = vmul.f32 %v6358_v4, %v323_v56  ;;  %v763_v57 = vld [vmem:[%s6363_s12 + $0x29] sm:$0xff] }
  0x2a   : > { %v472_v13 = vpack.c.bf16 %v442_v62, %v441_v58  ;;  %v443_v14 = vmax.f32 %v407_v0, 0.0  ;;  %v427_v15 = vadd.f32 %v6368_v5, %v384_v2  ;;  %v367_v16 = vmul.f32 %v6358_v4, %v324_v61  ;;  %v1278_v62 = vld [vmem:[%s6363_s12 + $0x2] sm:$0xff] }
  0x2b   : > { %v482_v18 = vpack.c.bf16 %v462_v3, %v461_v63  ;;  %v444_v19 = vmax.f32 %v408_v7, 0.0  ;;  %v428_v20 = vadd.f32 %v6368_v5, %v385_v8  ;;  %v409_v21 = vadd.f32 %v6368_v5, %v366_v9  ;;  %v1279_v7 = vld [vmem:[%s6363_s12 + $0xa] sm:$0xff] }
  0x2c   : > { %5882 = vmatmul.mubr.msk.bf16.gmra.mxu0 %vm486_vm1, %v472_v13  ;;  %v463_v24 = vmax.f32 %v427_v15, 0.0  ;;  %v410_v25 = vadd.f32 %v6368_v5, %v367_v16  ;;  %v386_v26 = vmul.f32 %v6358_v4, %v343_v11  ;;  %v387_v17 = vmul.f32 %v6358_v4, %v344_v12  ;;  %v764_v8 = vld [vmem:[%s6363_s12 + $0x31] sm:$0xff] }
  0x2d   : > { %v473_v29 = vpack.c.bf16 %v444_v19, %v443_v14  ;;  %v464_v30 = vmax.f32 %v428_v20, 0.0  ;;  %v445_v31 = vmax.f32 %v409_v21, 0.0  ;;  %v368_v32 = vmul.f32 %v6358_v4, %v325_v10  ;;  %v765_v14 = vld [vmem:[%s6363_s12 + $0x39] sm:$0xff] }
  0x2e   : > { %5902 = vmatmul.mubr.msk.bf16.gmra.mxu1 %vm486_vm1, %v482_v18  ;;  %v446_v33 = vmax.f32 %v410_v25, 0.0  ;;  %v429_v34 = vadd.f32 %v6368_v5, %v386_v26  ;;  %v430_v35 = vadd.f32 %v6368_v5, %v387_v17  ;;  %v369_v36 = vmul.f32 %v6358_v4, %v326_v22  ;;  %v6548_v25 = vld [vmem:[%s6363_s12 + $0x1a] sm:$0xff] }
  0x2f   : > { %5885 = vmatprep.mubr.msk.bf16.mxu0 %vm486_vm1, %v473_v29  ;;  %v483_v37 = vpack.c.bf16 %v464_v30, %v463_v24  ;;  %v411_v38 = vadd.f32 %v6368_v5, %v368_v32  ;;  %v801_v39 = vmul.f32 %v6358_v4, %v758_v27  ;;  %v802_v40 = vmul.f32 %v6358_v4, %v759_v28  ;;  %v6545_v24 = vld [vmem:[%s6363_s12 + $0x12] sm:$0xff]  ;;  %v766_v29 = vld [vmem:[%s6363_s12 + $0x41] sm:$0xff] }
  0x30   : > { %v474_v43 = vpack.c.bf16 %v446_v33, %v445_v31  ;;  %v465_v44 = vmax.f32 %v429_v34, 0.0  ;;  %v466_v45 = vmax.f32 %v430_v35, 0.0  ;;  %v412_v46 = vadd.f32 %v6368_v5, %v369_v36  ;;  %v767_v34 = vld [vmem:[%s6363_s12 + $0x49] sm:$0xff] }
  0x31   : > { %5905 = vmatprep.mubr.msk.bf16.mxu1 %vm486_vm1, %v483_v37  ;;  %v447_v48 = vmax.f32 %v411_v38, 0.0  ;;  %v844_v49 = vadd.f32 %v6368_v5, %v801_v39  ;;  %v845_v50 = vadd.f32 %v6368_v5, %v802_v40  ;;  %v370_v51 = vmul.f32 %v6358_v4, %v327_v6  ;;  %v6562_v38 = vld [vmem:[%s6363_s12 + $0x22] sm:$0xff]  ;;  %v6565_v39 = vld [vmem:[%s6363_s12 + $0x2a] sm:$0xff] }
  0x32   : > { %v484_v53 = vpack.c.bf16 %v466_v45, %v465_v44  ;;  %v448_v54 = vmax.f32 %v412_v46, 0.0  ;;  %v371_v55 = vmul.f32 %v6358_v4, %v328_v41  ;;  %v803_v56 = vmul.f32 %v6358_v4, %v760_v42 }
  0x33   : > { %v880_v58 = vmax.f32 %v844_v49, 0.0  ;;  %v881_v59 = vmax.f32 %v845_v50, 0.0  ;;  %v413_v60 = vadd.f32 %v6368_v5, %v370_v51  ;;  %v804_v61 = vmul.f32 %v6358_v4, %v761_v47 }
  0x34   : > { %5886 = vmatmul.mubr.msk.bf16.gmra.mxu0 %vm486_vm1, %v474_v43  ;;  %v475_v63 = vpack.c.bf16 %v448_v54, %v447_v48  ;;  %v414_v0 = vadd.f32 %v6368_v5, %v371_v55  ;;  %v846_v2 = vadd.f32 %v6368_v5, %v803_v56  ;;  %v805_v3 = vmul.f32 %v6358_v4, %v762_v52  ;;  %v768_v48 = vld [vmem:[%s6363_s12 + $0x51] sm:$0xff] }
  0x35   : > { %v916_v9 = vpack.c.bf16 %v881_v59, %v880_v58  ;;  %v449_v11 = vmax.f32 %v413_v60, 0.0  ;;  %v847_v12 = vadd.f32 %v6368_v5, %v804_v61  ;;  %v806_v13 = vmul.f32 %v6358_v4, %v763_v57  ;;  %v6580_v54 = vld [vmem:[%s6363_s12 + $0x32] sm:$0xff]  ;;  %v6590_v60 = vld [vmem:[%s6363_s12 + $0x3a] sm:$0xff] }
  0x36   : > { %5906 = vmatmul.mubr.msk.bf16.gmra.mxu1 %vm486_vm1, %v484_v53  ;;  %5889 = vmatprep.mubr.msk.bf16.mxu0 %vm486_vm1, %v475_v63  ;;  %v450_v15 = vmax.f32 %v414_v0, 0.0  ;;  %v882_v16 = vmax.f32 %v846_v2, 0.0  ;;  %v848_v10 = vadd.f32 %v6368_v5, %v805_v3  ;;  %v1321_v18 = vmul.f32 %v6358_v4, %v1278_v62  ;;  %v769_v53 = vld [vmem:[%s6363_s12 + $0x59] sm:$0xff]  ;;  %v6585_v55 = vld [vmem:[%s8411_s1 + $0x14] sm:$0xf]  ;;  %v770_v2 = vld [vmem:[%s6363_s12 + $0x61] sm:$0xff] }
  0x37   : > { %5911 = vmatprep.mubr.msk.bf16.mxu1 %vm486_vm1, %v916_v9  ;;  %v883_v19 = vmax.f32 %v847_v12, 0.0  ;;  %v849_v20 = vadd.f32 %v6368_v5, %v806_v13  ;;  %v1322_v21 = vmul.f32 %v6358_v4, %v1279_v7  ;;  %v807_v22 = vmul.f32 %v6358_v4, %v764_v8  ;;  %v771_v9 = vld [vmem:[%s6363_s12 + $0x69] sm:$0xff] }
  0x38   : > { %v476_v26 = vpack.c.bf16 %v450_v15, %v449_v11  ;;  %v884_v17 = vmax.f32 %v848_v10, 0.0  ;;  %v1364_v27 = vadd.f32 %v6368_v5, %v1321_v18  ;;  %v808_v28 = vmul.f32 %v6358_v4, %v765_v14  ;;  %v6609_v15 = vld [vmem:[%s6363_s12 + $0x42] sm:$0xff] }
  0x39   : > { %v917_v30 = vpack.c.bf16 %v883_v19, %v882_v16  ;;  %v885_v31 = vmax.f32 %v849_v20, 0.0  ;;  %v1365_v32 = vadd.f32 %v6368_v5, %v1322_v21  ;;  %v850_v33 = vadd.f32 %v6368_v5, %v807_v22  ;;  %v6615_v20 = vld [vmem:[%s6363_s12 + $0x4a] sm:$0xff] }
  0x3a   : > { %v1400_v35 = vmax.f32 %v1364_v27, 0.0  ;;  %v851_v36 = vadd.f32 %v6368_v5, %v808_v28  ;;  %v1323_v6 = vmul.f32 %v6358_v4, %v6545_v24  ;;  %v1324_v37 = vmul.f32 %v6358_v4, %v6548_v25  ;;  %v772_v21 = vld [vmem:[%s6363_s12 + $0x71] sm:$0xff]  ;;  %v773_v28 = vld [vmem:[%s6363_s12 + $0x79] sm:$0xff] }
  0x3b   : > { %v918_v40 = vpack.c.bf16 %v885_v31, %v884_v17  ;;  %v1401_v41 = vmax.f32 %v1365_v32, 0.0  ;;  %v886_v42 = vmax.f32 %v850_v33, 0.0  ;;  %v809_v43 = vmul.f32 %v6358_v4, %v766_v29  ;;  %v6624_v29 = vld [vmem:[%s8411_s1 + $0x18] sm:$0xf] }
  0x3c   : > { %5890 = vmatmul.mubr.msk.bf16.gmra.mxu0 %vm486_vm1, %v476_v26  ;;  %v887_v44 = vmax.f32 %v851_v36, 0.0  ;;  %v1366_v45 = vadd.f32 %v6368_v5, %v1323_v6  ;;  %v1367_v46 = vadd.f32 %v6368_v5, %v1324_v37  ;;  %v810_v47 = vmul.f32 %v6358_v4, %v767_v34  ;;  %v6637_v37 = vld [vmem:[%s6363_s12 + $0x52] sm:$0xff] }
  0x3d   : > { %v1436_v49 = vpack.c.bf16 %v1401_v41, %v1400_v35  ;;  %v852_v50 = vadd.f32 %v6368_v5, %v809_v43  ;;  %v1325_v51 = vmul.f32 %v6358_v4, %v6562_v38  ;;  %v1326_v52 = vmul.f32 %v6358_v4, %v6565_v39 }
  0x3e   : > { %5912 = vmatmul.mubr.msk.bf16.vlgmr.msra.gmra.mxu1 %vm486_vm1, %v917_v30  ;;  %v919_v56 = vpack.c.bf16 %v887_v44, %v886_v42  ;;  %v1402_v57 = vmax.f32 %v1366_v45, 0.0  ;;  %v1403_v58 = vmax.f32 %v1367_v46, 0.0  ;;  %v853_v59 = vadd.f32 %v6368_v5, %v810_v47  ;;  %v774_v44 = vld [vmem:[%s6363_s12 + $0x81] sm:$0xff] }
  0x3f   : > { %5986 = vmatpush3.bf16.msra.mxu1 %v6395_v23  ;;  %5915 = vmatprep.mubr.msk.bf16.mxu1 %vm486_vm1, %v918_v40  ;;  %v888_v61 = vmax.f32 %v852_v50, 0.0  ;;  %v1368_v62 = vadd.f32 %v6368_v5, %v1325_v51  ;;  %v1369_v63 = vadd.f32 %v6368_v5, %v1326_v52  ;;  %v811_v0 = vmul.f32 %v6358_v4, %v768_v48  ;;  %v6640_v40 = vld [vmem:[%s6363_s12 + $0x5a] sm:$0xff] }
  0x40   : > { %5949 = vmatprep.mubr.msk.bf16.mxu0 %vm486_vm1, %v1436_v49  ;;  %v1437_v3 = vpack.c.bf16 %v1403_v58, %v1402_v57  ;;  %v889_v7 = vmax.f32 %v853_v59, 0.0  ;;  %v812_v8 = vmul.f32 %v6358_v4, %v769_v53  ;;  %v1327_v23 = vmul.f32 %v6358_v4, %v6580_v54  ;;  %6221 = vmatprep.subr.msk.bf16.mxu1 %vm541_vm0, %v6585_v55  ;;  %v775_v49 = vld [vmem:[%s6363_s12 + $0x89] sm:$0xff] }
  0x41   : > { %v1404_v11 = vmax.f32 %v1368_v62, 0.0  ;;  %v1405_v12 = vmax.f32 %v1369_v63, 0.0  ;;  %v854_v13 = vadd.f32 %v6368_v5, %v811_v0  ;;  %v1328_v14 = vmul.f32 %v6358_v4, %v6590_v60  ;;  %v6661_v57 = vld [vmem:[%s6363_s12 + $0x6a] sm:$0xff] }
  0x42   : > { %v920_v16 = vpack.c.bf16 %v889_v7, %v888_v61  ;;  %v855_v10 = vadd.f32 %v6368_v5, %v812_v8  ;;  %v1370_v18 = vadd.f32 %v6368_v5, %v1327_v23  ;;  %v813_v19 = vmul.f32 %v6358_v4, %v770_v2  ;;  %v776_v7 = vld [vmem:[%s6363_s12 + $0x91] sm:$0xff] }
  0x43   : > { %v1438_v22 = vpack.c.bf16 %v1405_v12, %v1404_v11  ;;  %v890_v26 = vmax.f32 %v854_v13, 0.0  ;;  %v1371_v17 = vadd.f32 %v6368_v5, %v1328_v14  ;;  %v814_v27 = vmul.f32 %v6358_v4, %v771_v9  ;;  %v777_v12 = vld [vmem:[%s6363_s12 + $0x99] sm:$0xff] }
  0x44   : > { %5950 = vmatmul.mubr.msk.bf16.vlgmr.msra.gmra.mxu0 %vm486_vm1, %v1437_v3  ;;  %v891_v30 = vmax.f32 %v855_v10, 0.0  ;;  %v1406_v31 = vmax.f32 %v1370_v18, 0.0  ;;  %v856_v32 = vadd.f32 %v6368_v5, %v813_v19  ;;  %v1329_v33 = vmul.f32 %v6358_v4, %v6609_v15  ;;  %v6675_v13 = vld [vmem:[%s6363_s12 + $0x72] sm:$0xff]  ;;  %v6680_v18 = vld [vmem:[%s6363_s12 + $0x7a] sm:$0xff] }
  0x45   : > { %6024 = vmatpush3.bf16.msra.mxu0 %v6432_v1  ;;  %5953 = vmatprep.mubr.msk.bf16.mxu0 %vm486_vm1, %v1438_v22  ;;  %v1407_v34 = vmax.f32 %v1371_v17, 0.0  ;;  %v857_v35 = vadd.f32 %v6368_v5, %v814_v27  ;;  %v1330_v36 = vmul.f32 %v6358_v4, %v6615_v20  ;;  %v815_v6 = vmul.f32 %v6358_v4, %v772_v21 }
  0x46   : > { %5916 = vmatmul.mubr.msk.bf16.gmra.mxu1 %vm486_vm1, %v919_v56  ;;  %v921_v41 = vpack.c.bf16 %v891_v30, %v890_v26  ;;  %v892_v1 = vmax.f32 %v856_v32, 0.0  ;;  %v1372_v42 = vadd.f32 %v6368_v5, %v1329_v33  ;;  %v816_v43 = vmul.f32 %v6358_v4, %v773_v28  ;;  %6222 = vmatprep.subr.msk.bf16.mxu0 %vm541_vm0, %v6624_v29  ;;  %v6658_v56 = vld [vmem:[%s6363_s12 + $0x62] sm:$0xff] }
  0x47   : > { %5919 = vmatprep.mubr.msk.bf16.mxu1 %vm486_vm1, %v920_v16  ;;  %v1439_v45 = vpack.c.bf16 %v1407_v34, %v1406_v31  ;;  %v893_v46 = vmax.f32 %v857_v35, 0.0  ;;  %v1373_v47 = vadd.f32 %v6368_v5, %v1330_v36  ;;  %v858_v48 = vadd.f32 %v6368_v5, %v815_v6  ;;  %v778_v26 = vld [vmem:[%s6363_s12 + $0xa1] sm:$0xff]  ;;  %v779_v31 = vld [vmem:[%s6363_s12 + $0xa9] sm:$0xff] }
  0x48   : > { %v1408_v50 = vmax.f32 %v1372_v42, 0.0  ;;  %v859_v51 = vadd.f32 %v6368_v5, %v816_v43  ;;  %v1331_v52 = vmul.f32 %v6358_v4, %v6637_v37  ;;  %v1332_v53 = vmul.f32 %v6358_v4, %v6640_v40  ;;  %v6696_v36 = vld [vmem:[%s6363_s12 + $0x82] sm:$0xff]  ;;  %v6702_v43 = vld [vmem:[%s6363_s12 + $0x8a] sm:$0xff] }
  0x49   : > { %v922_v58 = vpack.c.bf16 %v893_v46, %v892_v1  ;;  %v1409_v59 = vmax.f32 %v1373_v47, 0.0  ;;  %v894_v61 = vmax.f32 %v858_v48, 0.0  ;;  %v817_v62 = vmul.f32 %v6358_v4, %v774_v44  ;;  %v780_v44 = vld [vmem:[%s6363_s12 + $0xb1] sm:$0xff] }
  0x4a   : > { %v895_v63 = vmax.f32 %v859_v51, 0.0  ;;  %v1374_v0 = vadd.f32 %v6368_v5, %v1331_v52  ;;  %v1375_v2 = vadd.f32 %v6368_v5, %v1332_v53  ;;  %v818_v3 = vmul.f32 %v6358_v4, %v775_v49  ;;  %v781_v49 = vld [vmem:[%s6363_s12 + $0xb9] sm:$0xff] }
  0x4b   : > { %v1440_v8 = vpack.c.bf16 %v1409_v59, %v1408_v50  ;;  %v860_v23 = vadd.f32 %v6368_v5, %v817_v62  ;;  %v1333_v9 = vmul.f32 %v6358_v4, %v6658_v56  ;;  %v1334_v11 = vmul.f32 %v6358_v4, %v6661_v57 }
  0x4c   : > { %5954 = vmatmul.mubr.msk.bf16.gmra.mxu0 %vm486_vm1, %v1439_v45  ;;  %v1410_v14 = vmax.f32 %v1374_v0, 0.0  ;;  %v1411_v16 = vmax.f32 %v1375_v2, 0.0  ;;  %v861_v10 = vadd.f32 %v6368_v5, %v818_v3  ;;  %v819_v22 = vmul.f32 %v6358_v4, %v776_v7  ;;  %v6720_v0 = vld [vmem:[%s6363_s12 + $0x9a] sm:$0xff] }
  0x4d   : > { %5957 = vmatprep.mubr.msk.bf16.mxu0 %vm486_vm1, %v1440_v8  ;;  %v1376_v19 = vadd.f32 %v6368_v5, %v1333_v9  ;;  %v1377_v21 = vadd.f32 %v6368_v5, %v1334_v11  ;;  %v896_v17 = vmax.f32 %v860_v23, 0.0  ;;  %v820_v28 = vmul.f32 %v6358_v4, %v777_v12  ;;  %v782_v8 = vld [vmem:[%s6363_s12 + $0xc1] sm:$0xff] }
  0x4e   : > { %5920 = vmatmul.mubr.msk.bf16.gmra.mxu1 %vm486_vm1, %v921_v41  ;;  %v897_v27 = vmax.f32 %v861_v10, 0.0  ;;  %v1335_v30 = vmul.f32 %v6358_v4, %v6675_v13  ;;  %v923_v32 = vpack.c.bf16 %v895_v63, %v894_v61  ;;  %v1336_v35 = vmul.f32 %v6358_v4, %v6680_v18  ;;  %v6717_v63 = vld [vmem:[%s6363_s12 + $0x92] sm:$0xff] }
  0x4f   : > { %5923 = vmatprep.mubr.msk.bf16.mxu1 %vm486_vm1, %v922_v58  ;;  %v1412_v33 = vmax.f32 %v1376_v19, 0.0  ;;  %v1413_v34 = vmax.f32 %v1377_v21, 0.0  ;;  %v1441_v6 = vpack.c.bf16 %v1411_v16, %v1410_v14  ;;  %v862_v41 = vadd.f32 %v6368_v5, %v819_v22  ;;  %v783_v14 = vld [vmem:[%s6363_s12 + $0xc9] sm:$0xff] }
  0x50   : > { %v1378_v1 = vadd.f32 %v6368_v5, %v1335_v30  ;;  %v821_v42 = vmul.f32 %v6358_v4, %v778_v26  ;;  %v863_v46 = vadd.f32 %v6368_v5, %v820_v28  ;;  %v1379_v47 = vadd.f32 %v6368_v5, %v1336_v35  ;;  %v6736_v22 = vld [vmem:[%s6363_s12 + $0xa2] sm:$0xff]  ;;  %v6739_v26 = vld [vmem:[%s6363_s12 + $0xaa] sm:$0xff] }
  0x51   : > { %v1442_v45 = vpack.c.bf16 %v1413_v34, %v1412_v33  ;;  %v822_v48 = vmul.f32 %v6358_v4, %v779_v31  ;;  %v924_v50 = vpack.c.bf16 %v897_v27, %v896_v17  ;;  %v1337_v53 = vmul.f32 %v6358_v4, %v6696_v36  ;;  %v784_v34 = vld [vmem:[%s6363_s12 + $0xd1] sm:$0xff] }
  0x52   : > { %v1414_v51 = vmax.f32 %v1378_v1, 0.0  ;;  %v864_v52 = vadd.f32 %v6368_v5, %v821_v42  ;;  %v1415_v58 = vmax.f32 %v1379_v47, 0.0  ;;  %v1338_v61 = vmul.f32 %v6358_v4, %v6702_v43  ;;  %v6753_v1 = vld [vmem:[%s6363_s12 + $0xb2] sm:$0xff] }
  0x53   : > { %v865_v59 = vadd.f32 %v6368_v5, %v822_v48  ;;  %v823_v62 = vmul.f32 %v6358_v4, %v780_v44  ;;  %v898_v2 = vmax.f32 %v862_v41, 0.0  ;;  %v1380_v3 = vadd.f32 %v6368_v5, %v1337_v53  ;;  %v785_v47 = vld [vmem:[%s6363_s12 + $0xd9] sm:$0xff]  ;;  %v786_v53 = vld [vmem:[%s6363_s12 + $0xe1] sm:$0xff] }
  0x54   : > { %5958 = vmatmul.mubr.msk.bf16.gmra.mxu0 %vm486_vm1, %v1441_v6  ;;  %v824_v7 = vmul.f32 %v6358_v4, %v781_v49  ;;  %v899_v23 = vmax.f32 %v863_v46, 0.0  ;;  %v900_v9 = vmax.f32 %v864_v52, 0.0  ;;  %v1381_v12 = vadd.f32 %v6368_v5, %v1338_v61  ;;  %v6758_v48 = vld [vmem:[%s6363_s12 + $0xba] sm:$0xff] }
  0x55   : > { %5961 = vmatprep.mubr.msk.bf16.mxu0 %vm486_vm1, %v1442_v45  ;;  %v901_v11 = vmax.f32 %v865_v59, 0.0  ;;  %v1416_v16 = vmax.f32 %v1380_v3, 0.0  ;;  %v866_v10 = vadd.f32 %v6368_v5, %v823_v62  ;;  %v1339_v19 = vmul.f32 %v6358_v4, %v6717_v63 }
  0x56   : > { %5924 = vmatmul.mubr.msk.bf16.gmra.mxu1 %vm486_vm1, %v923_v32  ;;  %v1340_v21 = vmul.f32 %v6358_v4, %v6720_v0  ;;  %v1443_v17 = vpack.c.bf16 %v1415_v58, %v1414_v51  ;;  %v1417_v27 = vmax.f32 %v1381_v12, 0.0  ;;  %v825_v28 = vmul.f32 %v6358_v4, %v782_v8  ;;  %v6779_v12 = vld [vmem:[%s6363_s12 + $0xca] sm:$0xff] }
  0x57   : > { %5927 = vmatprep.mubr.msk.bf16.mxu1 %vm486_vm1, %v924_v50  ;;  %v867_v30 = vadd.f32 %v6368_v5, %v824_v7  ;;  %v1382_v31 = vadd.f32 %v6368_v5, %v1339_v19  ;;  %v826_v33 = vmul.f32 %v6358_v4, %v783_v14  ;;  %v1341_v6 = vmul.f32 %v6358_v4, %v6736_v22 }
  0x58   : > { %v1383_v32 = vadd.f32 %v6368_v5, %v1340_v21  ;;  %v1444_v35 = vpack.c.bf16 %v1417_v27, %v1416_v16  ;;  %v1342_v41 = vmul.f32 %v6358_v4, %v6739_v26  ;;  %v925_v42 = vpack.c.bf16 %v899_v23, %v898_v2  ;;  %v787_v2 = vld [vmem:[%s6363_s12 + $0xe9] sm:$0xff]  ;;  %v788_v21 = vld [vmem:[%s6363_s12 + $0xf1] sm:$0xff] }
  0x59   : > { %v926_v44 = vpack.c.bf16 %v901_v11, %v900_v9  ;;  %v902_v45 = vmax.f32 %v866_v10, 0.0  ;;  %v868_v46 = vadd.f32 %v6368_v5, %v825_v28  ;;  %v869_v49 = vadd.f32 %v6368_v5, %v826_v33  ;;  %v6774_v9 = vld [vmem:[%s6363_s12 + $0xc2] sm:$0xff] }
  0x5a   : > { %v1384_v50 = vadd.f32 %v6368_v5, %v1341_v6  ;;  %v1385_v51 = vadd.f32 %v6368_v5, %v1342_v41  ;;  %v827_v52 = vmul.f32 %v6358_v4, %v784_v34  ;;  %v903_v58 = vmax.f32 %v867_v30, 0.0  ;;  %v6794_v6 = vld [vmem:[%s6363_s12 + $0xd2] sm:$0xff]  ;;  %v6797_v41 = vld [vmem:[%s6363_s12 + $0xda] sm:$0xff] }
  0x5b   : > { %v1418_v59 = vmax.f32 %v1382_v31, 0.0  ;;  %v1419_v61 = vmax.f32 %v1383_v32, 0.0  ;;  %v1343_v62 = vmul.f32 %v6358_v4, %v6753_v1  ;;  %v828_v8 = vmul.f32 %v6358_v4, %v785_v47  ;;  %v789_v31 = vld [vmem:[%s6363_s12 + $0xf9] sm:$0xff]  ;;  %v790_v47 = vld [vmem:[%s6363_s12 + $0x101] sm:$0xff] }
  0x5c   : > { %5962 = vmatmul.mubr.msk.bf16.gmra.mxu0 %vm486_vm1, %v1443_v17  ;;  %v1420_v3 = vmax.f32 %v1384_v50, 0.0  ;;  %v1421_v7 = vmax.f32 %v1385_v51, 0.0  ;;  %v1344_v23 = vmul.f32 %v6358_v4, %v6758_v48  ;;  %v829_v11 = vmul.f32 %v6358_v4, %v786_v53  ;;  %v791_v53 = vld [vmem:[%s6363_s12 + $0x109] sm:$0xff] }
  0x5d   : > { %5965 = vmatprep.mubr.msk.bf16.mxu0 %vm486_vm1, %v1444_v35  ;;  %v904_v14 = vmax.f32 %v868_v46, 0.0  ;;  %v905_v16 = vmax.f32 %v869_v49, 0.0  ;;  %v870_v10 = vadd.f32 %v6368_v5, %v827_v52  ;;  %v830_v19 = vmul.f32 %v6358_v4, %v787_v2  ;;  %v6813_v2 = vld [vmem:[%s6363_s12 + $0xe2] sm:$0xff] }
  0x5e   : > { %5928 = vmatmul.mubr.msk.bf16.gmra.mxu1 %vm486_vm1, %v925_v42  ;;  %v1445_v17 = vpack.c.bf16 %v1419_v61, %v1418_v59  ;;  %v1386_v27 = vadd.f32 %v6368_v5, %v1343_v62  ;;  %v1387_v28 = vadd.f32 %v6368_v5, %v1344_v23  ;;  %v1345_v30 = vmul.f32 %v6358_v4, %v6774_v9 }
  0x5f   : > { %5931 = vmatprep.mubr.msk.bf16.mxu1 %vm486_vm1, %v926_v44  ;;  %v927_v32 = vpack.c.bf16 %v903_v58, %v902_v45  ;;  %v1446_v33 = vpack.c.bf16 %v1421_v7, %v1420_v3  ;;  %v871_v34 = vadd.f32 %v6368_v5, %v828_v8  ;;  %v1346_v35 = vmul.f32 %v6358_v4, %v6779_v12  ;;  %v6816_v3 = vld [vmem:[%s6363_s12 + $0xea] sm:$0xff] }
  0x60   : > { %v872_v42 = vadd.f32 %v6368_v5, %v829_v11  ;;  %v873_v44 = vadd.f32 %v6368_v5, %v830_v19  ;;  %v1388_v46 = vadd.f32 %v6368_v5, %v1345_v30  ;;  %v831_v45 = vmul.f32 %v6358_v4, %v788_v21  ;;  %v792_v21 = vld [vmem:[%s6363_s12 + $0x111] sm:$0xff] }
  0x61   : > { %v928_v49 = vpack.c.bf16 %v905_v16, %v904_v14  ;;  %v906_v50 = vmax.f32 %v870_v10, 0.0  ;;  %v1389_v51 = vadd.f32 %v6368_v5, %v1346_v35  ;;  %v832_v52 = vmul.f32 %v6358_v4, %v789_v31  ;;  %v793_v31 = vld [vmem:[%s6363_s12 + $0x119] sm:$0xff] }
  0x62   : > { %v1422_v58 = vmax.f32 %v1386_v27, 0.0  ;;  %v1423_v59 = vmax.f32 %v1387_v28, 0.0  ;;  %v1347_v61 = vmul.f32 %v6358_v4, %v6794_v6  ;;  %v1348_v62 = vmul.f32 %v6358_v4, %v6797_v41 }
  0x63   : > { %v907_v7 = vmax.f32 %v871_v34, 0.0  ;;  %v1424_v8 = vmax.f32 %v1388_v46, 0.0  ;;  %v1425_v23 = vmax.f32 %v1389_v51, 0.0  ;;  %v833_v11 = vmul.f32 %v6358_v4, %v790_v47  ;;  %v6845_v51 = vld [vmem:[%s6363_s12 + $0x102] sm:$0xff] }
  0x64   : > { %5966 = vmatmul.mubr.msk.bf16.gmra.mxu0 %vm486_vm1, %v1445_v17  ;;  %v908_v14 = vmax.f32 %v872_v42, 0.0  ;;  %v909_v16 = vmax.f32 %v873_v44, 0.0  ;;  %v874_v10 = vadd.f32 %v6368_v5, %v831_v45  ;;  %v834_v19 = vmul.f32 %v6358_v4, %v791_v53  ;;  %v6836_v42 = vld [vmem:[%s6363_s12 + $0xf2] sm:$0xff]  ;;  %v6839_v44 = vld [vmem:[%s6363_s12 + $0xfa] sm:$0xff] }
  0x65   : > { %5969 = vmatprep.mubr.msk.bf16.mxu0 %vm486_vm1, %v1446_v33  ;;  %v875_v17 = vadd.f32 %v6368_v5, %v832_v52  ;;  %v1390_v27 = vadd.f32 %v6368_v5, %v1347_v61  ;;  %v1349_v28 = vmul.f32 %v6358_v4, %v6813_v2  ;;  %v1350_v30 = vmul.f32 %v6358_v4, %v6816_v3  ;;  %v6849_v61 = vld [vmem:[%s6363_s12 + $0x10a] sm:$0xff] }
  0x66   : > { %5932 = vmatmul.mubr.msk.bf16.gmra.mxu1 %vm486_vm1, %v927_v32  ;;  %v1447_v32 = vpack.c.bf16 %v1423_v59, %v1422_v58  ;;  %v1391_v33 = vadd.f32 %v6368_v5, %v1348_v62  ;;  %v876_v34 = vadd.f32 %v6368_v5, %v833_v11  ;;  %v877_v35 = vadd.f32 %v6368_v5, %v834_v19 }
  0x67   : > { %5935 = vmatprep.mubr.msk.bf16.mxu1 %vm486_vm1, %v928_v49  ;;  %8418 = vst [vmem:[#allocation3_spill] sm:$0xff] %v6839_v44  ;;  %v1448_v46 = vpack.c.bf16 %v1425_v23, %v1424_v8  ;;  %v1392_v45 = vadd.f32 %v6368_v5, %v1349_v28  ;;  %v1393_v47 = vadd.f32 %v6368_v5, %v1350_v30  ;;  %v910_v58 = vmax.f32 %v874_v10, 0.0  ;;  %v6254_v5 = vld [vmem:[%s8413_s3] ss:$0 sm:$0xff] }
  0x68   : > { %v835_v49 = vmul.f32 %v6358_v4, %v792_v21  ;;  %v929_v52 = vpack.c.bf16 %v907_v7, %v906_v50  ;;  %v930_v53 = vpack.c.bf16 %v909_v16, %v908_v14  ;;  %v836_v59 = vmul.f32 %v6358_v4, %v793_v31  ;;  %v6860_v50 = vld [vmem:[%s8413_s3] ss:$0 sm:$0xff]  ;;  %v6873_v31 = vld [vmem:[%s6363_s12 + $0x112] sm:$0xff] }
  0x69   : > { %v911_v62 = vmax.f32 %v875_v17, 0.0  ;;  %v1426_v11 = vmax.f32 %v1390_v27, 0.0  ;;  %v1351_v8 = vmul.f32 %v6358_v4, %v6836_v42  ;;  %v1352_v23 = vmul.f32 %v6254_v5, %v6839_v44  ;;  %v6255_v21 = vld [vmem:[%s8414_s4] ss:$0 sm:$0xff] }
  0x6a   : > { %v1427_v7 = vmax.f32 %v1391_v33, 0.0  ;;  %v912_v14 = vmax.f32 %v876_v34, 0.0  ;;  %v913_v16 = vmax.f32 %v877_v35, 0.0  ;;  %v1353_v10 = vmul.f32 %v6254_v5, %v6845_v51 }
  0x6b   : > { %v1428_v4 = vmax.f32 %v1392_v45, 0.0  ;;  %v1429_v19 = vmax.f32 %v1393_v47, 0.0  ;;  %v878_v17 = vadd.f32 %v6255_v21, %v835_v49  ;;  %v1354_v27 = vmul.f32 %v6254_v5, %v6849_v61 }
  0x6c   : > { %5970 = vmatmul.mubr.msk.bf16.gmra.mxu0 %vm486_vm1, %v1447_v32  ;;  %v879_v28 = vadd.f32 %v6255_v21, %v836_v59  ;;  %v1841_v30 = vmul.f32 %v6860_v50, %v6545_v24  ;;  %v1394_v32 = vadd.f32 %v6255_v21, %v1351_v8  ;;  %v1395_v33 = vadd.f32 %v6255_v21, %v1352_v23 }
  0x6d   : > { %5973 = vmatprep.mubr.msk.bf16.mxu0 %vm486_vm1, %v1448_v46  ;;  %v1396_v34 = vadd.f32 %v6255_v21, %v1353_v10  ;;  %v1842_v35 = vmul.f32 %v6860_v50, %v6548_v25  ;;  %v6881_v46 = vld [vmem:[%s8414_s4] ss:$0 sm:$0xff]  ;;  %v931_v45 = vpack.c.bf16 %v911_v62, %v910_v58  ;;  %v1449_v47 = vpack.c.bf16 %v1427_v7, %v1426_v11  ;;  %v2318_v58 = vld [vmem:[%s6363_s12 + $0x13] sm:$0xff] }
  0x6e   : > { %5936 = vmatmul.mubr.msk.bf16.gmra.mxu1 %vm486_vm1, %v929_v52  ;;  %v932_v24 = vpack.c.bf16 %v913_v16, %v912_v14  ;;  %v1450_v49 = vpack.c.bf16 %v1429_v19, %v1428_v4  ;;  %v914_v52 = vmax.f32 %v878_v17, 0.0  ;;  %v1397_v59 = vadd.f32 %v6255_v21, %v1354_v27  ;;  %v2319_v62 = vld [vmem:[%s6363_s12 + $0x1b] sm:$0xff] }
  0x6f   : > { %5939 = vmatprep.mubr.msk.bf16.mxu1 %vm486_vm1, %v930_v53  ;;  %v6884_v53 = vld [vmem:[%s6363_s12 + $0x11a] sm:$0xff]  ;;  %v1355_v8 = vmul.f32 %v6254_v5, %v6873_v31  ;;  %v1884_v23 = vadd.f32 %v6881_v46, %v1841_v30  ;;  %v1885_v10 = vadd.f32 %v6881_v46, %v1842_v35  ;;  %v1843_v25 = vmul.f32 %v6860_v50, %v6562_v38 }
  0x70   : > { %v1844_v44 = vmul.f32 %v6860_v50, %v6565_v39  ;;  %v915_v11 = vmax.f32 %v879_v28, 0.0  ;;  %v1430_v7 = vmax.f32 %v1394_v32, 0.0  ;;  %v1431_v14 = vmax.f32 %v1395_v33, 0.0 }
  0x71   : > { %v1432_v16 = vmax.f32 %v1396_v34, 0.0  ;;  %v1356_v4 = vmul.f32 %v6254_v5, %v6884_v53  ;;  %v1886_v19 = vadd.f32 %v6881_v46, %v1843_v25  ;;  %v1845_v38 = vmul.f32 %v6860_v50, %v6580_v54 }
  0x72   : > { %v1887_v17 = vadd.f32 %v6881_v46, %v1844_v44  ;;  %v1433_v39 = vmax.f32 %v1397_v59, 0.0  ;;  %v1398_v27 = vadd.f32 %v6255_v21, %v1355_v8  ;;  %v2361_v28 = vmul.f32 %v6860_v50, %v2318_v58  ;;  %v2320_v8 = vld [vmem:[%s6363_s12 + $0x23] sm:$0xff]  ;;  %v2322_v58 = vld [vmem:[%s6363_s12 + $0x33] sm:$0xff] }
  0x73   : > { %v2362_v30 = vmul.f32 %v6860_v50, %v2319_v62  ;;  %v1920_v5 = vmax.f32 %v1884_v23, 0.0  ;;  %v1921_v32 = vmax.f32 %v1885_v10, 0.0  ;;  %v1922_v33 = vmax.f32 %v1886_v19, 0.0  ;;  %v2321_v23 = vld [vmem:[%s6363_s12 + $0x2b] sm:$0xff] }
  0x74   : > { %5974 = vmatmul.mubr.msk.bf16.gmra.mxu0 %vm486_vm1, %v1449_v47  ;;  %v1923_v44 = vmax.f32 %v1887_v17, 0.0  ;;  %v1451_v54 = vpack.c.bf16 %v1431_v14, %v1430_v7  ;;  %v1846_v34 = vmul.f32 %v6860_v50, %v6590_v60  ;;  %v1847_v35 = vmul.f32 %v6860_v50, %v6609_v15  ;;  %v2323_v14 = vld [vmem:[%s6363_s12 + $0x3b] sm:$0xff] }
  0x75   : > { %5977 = vmatprep.mubr.msk.bf16.mxu0 %vm486_vm1, %v1450_v49  ;;  %v1399_v47 = vadd.f32 %v6255_v21, %v1356_v4  ;;  %v1848_v59 = vmul.f32 %v6860_v50, %v6615_v20  ;;  %v1452_v10 = vpack.c.bf16 %v1433_v39, %v1432_v16  ;;  %v2405_v25 = vadd.f32 %v6881_v46, %v2362_v30 }
  0x76   : > { %5940 = vmatmul.mubr.msk.bf16.gmra.mxu1 %vm486_vm1, %v931_v45  ;;  %v6910_v49 = vpack.c.bf16 %v1923_v44, %v1922_v33  ;;  %v1888_v45 = vadd.f32 %v6881_v46, %v1845_v38  ;;  %v1890_v60 = vadd.f32 %v6881_v46, %v1847_v35  ;;  %v933_v15 = vpack.c.bf16 %v915_v11, %v914_v52 }
  0x77   : > { %5943 = vmatprep.mubr.msk.bf16.mxu1 %vm486_vm1, %v932_v24  ;;  %v2404_v24 = vadd.f32 %v6881_v46, %v2361_v28  ;;  %v1956_v62 = vpack.c.bf16 %v1921_v32, %v1920_v5  ;;  %v1434_v21 = vmax.f32 %v1398_v27, 0.0  ;;  %v1891_v7 = vadd.f32 %v6881_v46, %v1848_v59  ;;  %v2324_v59 = vld [vmem:[%s6363_s12 + $0x43] sm:$0xff] }
  0x78   : > { %v1889_v4 = vadd.f32 %v6881_v46, %v1846_v34  ;;  %v1926_v19 = vmax.f32 %v1890_v60, 0.0  ;;  %v2363_v20 = vmul.f32 %v6860_v50, %v2320_v8  ;;  %v2364_v16 = vmul.f32 %v6860_v50, %v2321_v23  ;;  %v2325_v23 = vld [vmem:[%s6363_s12 + $0x4b] sm:$0xff] }
  0x79   : > { %v1435_v17 = vmax.f32 %v1399_v47, 0.0  ;;  %v1924_v38 = vmax.f32 %v1888_v45, 0.0  ;;  %v1927_v39 = vmax.f32 %v1891_v7, 0.0  ;;  %v2365_v28 = vmul.f32 %v6860_v50, %v2322_v58  ;;  %v2326_v58 = vld [vmem:[%s6363_s12 + $0x53] sm:$0xff] }
  0x7a   : > { %v2440_v52 = vmax.f32 %v2404_v24, 0.0  ;;  %v2441_v11 = vmax.f32 %v2405_v25, 0.0  ;;  %v2366_v27 = vmul.f32 %v6860_v50, %v2323_v14  ;;  %v1851_v30 = vmul.f32 %v6860_v50, %v6658_v56 }
  0x7b   : > { %v6933_v5 = vpack.c.bf16 %v1927_v39, %v1926_v19  ;;  %v1849_v32 = vmul.f32 %v6860_v50, %v6637_v37  ;;  %v1850_v33 = vmul.f32 %v6860_v50, %v6640_v40  ;;  %v1852_v44 = vmul.f32 %v6860_v50, %v6661_v57 }
  0x7c   : > { %5978 = vmatmul.mubr.msk.bf16.gmra.mxu0 %vm486_vm1, %v1451_v54  ;;  %v1925_v54 = vmax.f32 %v1889_v4, 0.0  ;;  %v2406_v56 = vadd.f32 %v6881_v46, %v2363_v20  ;;  %v2407_v34 = vadd.f32 %v6881_v46, %v2364_v16  ;;  %v1894_v35 = vadd.f32 %v6881_v46, %v1851_v30 }
  0x7d   : > { %5981 = vmatprep.mubr.msk.bf16.mxu0 %vm486_vm1, %v1452_v10  ;;  %v1453_v47 = vpack.c.bf16 %v1435_v17, %v1434_v21  ;;  %v2408_v37 = vadd.f32 %v6881_v46, %v2365_v28  ;;  %v2409_v45 = vadd.f32 %v6881_v46, %v2366_v27  ;;  %v1895_v40 = vadd.f32 %v6881_v46, %v1852_v44  ;;  %v6971_v28 = vld [vmem:[%s8411_s1 + $0x1c] sm:$0xf] }
  0x7e   : > { %5944 = vmatmul.mubr.msk.bf16.gmra.mxu1 %vm486_vm1, %v933_v15  ;;  %v2476_v57 = vpack.c.bf16 %v2441_v11, %v2440_v52  ;;  %v1930_v8 = vmax.f32 %v1894_v35, 0.0  ;;  %v3071_v10 = vsel %vm541_vm0, %v6585_v55, 0  ;;  %v1892_v24 = vadd.f32 %v6881_v46, %v1849_v32  ;;  %v2327_v15 = vld [vmem:[%s6363_s12 + $0x5b] sm:$0xff]  ;;  %v2328_v32 = vld [vmem:[%s6363_s12 + $0x63] sm:$0xff] }
  0x7f   : > { %5987 = vmatprep.mubr.msk.bf16.mxu1 %vm486_vm1, %v1956_v62  ;;  %v1893_v25 = vadd.f32 %v6881_v46, %v1850_v33  ;;  %v1931_v60 = vmax.f32 %v1895_v40, 0.0  ;;  %v1958_v62 = vpack.c.bf16 %v1925_v54, %v1924_v38  ;;  %v2442_v21 = vmax.f32 %v2406_v56, 0.0  ;;  %v2329_v56 = vld [vmem:[%s6363_s12 + $0x6b] sm:$0xff] }
  0x80   : > { %v2443_v7 = vmax.f32 %v2407_v34, 0.0  ;;  %v2367_v14 = vmul.f32 %v6860_v50, %v2324_v59  ;;  %v2444_v4 = vmax.f32 %v2408_v37, 0.0  ;;  %v2445_v19 = vmax.f32 %v2409_v45, 0.0  ;;  %v2331_v37 = vld [vmem:[%s6363_s12 + $0x7b] sm:$0xff] }
  0x81   : > { %v6958_v20 = vpack.c.bf16 %v1931_v60, %v1930_v8  ;;  %v2368_v55 = vmul.f32 %v6860_v50, %v2325_v23  ;;  %v1853_v16 = vmul.f32 %v6860_v50, %v6675_v13  ;;  %v2369_v17 = vmul.f32 %v6860_v50, %v2326_v58 }
  0x82   : > { %v2370_v38 = vmul.f32 %v6860_v50, %v2327_v15  ;;  %v1855_v39 = vmul.f32 %v6860_v50, %v6696_v36  ;;  %v1928_v52 = vmax.f32 %v1892_v24, 0.0  ;;  %v1929_v11 = vmax.f32 %v1893_v25, 0.0  ;;  %v7004_v25 = vld [vmem:[%s8411_s1 + $0x20] sm:$0xf] }
  0x83   : > { %v1854_v13 = vmul.f32 %v6860_v50, %v6680_v18  ;;  %v1856_v27 = vmul.f32 %v6860_v50, %v6702_v43  ;;  %v3591_v36 = vsel %vm541_vm0, %v6624_v29, 0  ;;  %v2410_v30 = vadd.f32 %v6881_v46, %v2367_v14  ;;  %v2330_v43 = vld [vmem:[%s6363_s12 + $0x73] sm:$0xff] }
  0x84   : > { %5982 = vmatmul.mubr.msk.bf16.gmra.mxu0 %vm486_vm1, %v1453_v47  ;;  %v2477_v33 = vpack.c.bf16 %v2443_v7, %v2442_v21  ;;  %v2478_v44 = vpack.c.bf16 %v2445_v19, %v2444_v4  ;;  %v2411_v54 = vadd.f32 %v6881_v46, %v2368_v55  ;;  %v1896_v34 = vadd.f32 %v6881_v46, %v1853_v16 }
  0x85   : > { %6025 = vmatprep.mubr.msk.bf16.mxu0 %vm486_vm1, %v2476_v57  ;;  %v1899_v18 = vadd.f32 %v6881_v46, %v1856_v27  ;;  %v2412_v29 = vadd.f32 %v6881_v46, %v2369_v17  ;;  %v2413_v35 = vadd.f32 %v6881_v46, %v2370_v38  ;;  %v1960_v45 = vpack.c.bf16 %v1929_v11, %v1928_v52  ;;  %v2333_v27 = vld [vmem:[%s6363_s12 + $0x8b] sm:$0xff] }
  0x86   : > { %5988 = vmatmul.mubr.msk.bf16.vlgmr.msra.gmra.mxu1 %vm486_vm1, %v6910_v49  ;;  %v1898_v49 = vadd.f32 %v6881_v46, %v1855_v39  ;;  %v1897_v40 = vadd.f32 %v6881_v46, %v1854_v13  ;;  %v2371_v57 = vmul.f32 %v6860_v50, %v2328_v32  ;;  %v2446_v8 = vmax.f32 %v2410_v30, 0.0  ;;  %v2332_v13 = vld [vmem:[%s6363_s12 + $0x83] sm:$0xff] }
  0x87   : > { %6062 = vmatpush3.bf16.msra.mxu1 %v3071_v10  ;;  %5991 = vmatprep.mubr.msk.bf16.mxu1 %vm486_vm1, %v1958_v62  ;;  %v1935_v59 = vmax.f32 %v1899_v18, 0.0  ;;  %v2372_v23 = vmul.f32 %v6860_v50, %v2329_v56  ;;  %v2373_v10 = vmul.f32 %v6860_v50, %v2330_v43  ;;  %v1859_v24 = vmul.f32 %v6860_v50, %v6736_v22 }
  0x88   : > { %6223 = vmatprep.subr.msk.bf16.mxu1 %vm541_vm0, %v6971_v28  ;;  %v1934_v47 = vmax.f32 %v1898_v49, 0.0  ;;  %v2447_v60 = vmax.f32 %v2411_v54, 0.0  ;;  %v2374_v15 = vmul.f32 %v6860_v50, %v2331_v37  ;;  %v1860_v62 = vmul.f32 %v6860_v50, %v6739_v26 }
  0x89   : > { %v1932_v21 = vmax.f32 %v1896_v34, 0.0  ;;  %v2448_v22 = vmax.f32 %v2412_v29, 0.0  ;;  %v2449_v7 = vmax.f32 %v2413_v35, 0.0  ;;  %v1902_v14 = vadd.f32 %v6881_v46, %v1859_v24 }
  0x8a   : > { %v7007_v58 = vpack.c.bf16 %v1935_v59, %v1934_v47  ;;  %v1933_v4 = vmax.f32 %v1897_v40, 0.0  ;;  %v2414_v19 = vadd.f32 %v6881_v46, %v2371_v57  ;;  %v1857_v55 = vmul.f32 %v6860_v50, %v6717_v63 }
  0x8b   : > { %v1903_v26 = vadd.f32 %v6881_v46, %v1860_v62  ;;  %v2415_v16 = vadd.f32 %v6881_v46, %v2372_v23  ;;  %v2416_v17 = vadd.f32 %v6881_v46, %v2373_v10  ;;  %v1938_v38 = vmax.f32 %v1902_v14, 0.0  ;;  %v2336_v23 = vld [vmem:[%s6363_s12 + $0xa3] sm:$0xff] }
  0x8c   : > { %6026 = vmatmul.mubr.msk.bf16.vlgmr.msra.gmra.mxu0 %vm486_vm1, %v2477_v33  ;;  %v2479_v39 = vpack.c.bf16 %v2447_v60, %v2446_v8  ;;  %v2417_v63 = vadd.f32 %v6881_v46, %v2374_v15  ;;  %v2480_v11 = vpack.c.bf16 %v2449_v7, %v2448_v22  ;;  %v2450_v30 = vmax.f32 %v2414_v19, 0.0  ;;  %v2334_v33 = vld [vmem:[%s6363_s12 + $0x93] sm:$0xff]  ;;  %v2337_v15 = vld [vmem:[%s6363_s12 + $0xab] sm:$0xff] }
  0x8d   : > { %6100 = vmatpush3.bf16.msra.mxu0 %v3591_v36  ;;  %6029 = vmatprep.mubr.msk.bf16.mxu0 %vm486_vm1, %v2478_v44  ;;  %v1939_v52 = vmax.f32 %v1903_v26, 0.0  ;;  %v1962_v36 = vpack.c.bf16 %v1933_v4, %v1932_v21  ;;  %v1900_v49 = vadd.f32 %v6881_v46, %v1857_v55  ;;  %v2335_v44 = vld [vmem:[%s6363_s12 + $0x9b] sm:$0xff]  ;;  %v2451_v54 = vmax.f32 %v2415_v16, 0.0  ;;  %v2338_v22 = vld [vmem:[%s6363_s12 + $0xb3] sm:$0xff] }
  0x8e   : > { %5992 = vmatmul.mubr.msk.bf16.gmra.mxu1 %vm486_vm1, %v6933_v5  ;;  %6224 = vmatprep.subr.msk.bf16.mxu0 %vm541_vm0, %v7004_v25  ;;  %v1858_v5 = vmul.f32 %v6860_v50, %v6720_v0  ;;  %v2452_v18 = vmax.f32 %v2416_v17, 0.0  ;;  %v1863_v56 = vmul.f32 %v6860_v50, %v6774_v9  ;;  %v2453_v43 = vmax.f32 %v2417_v63, 0.0  ;;  %v2339_v55 = vld [vmem:[%s6363_s12 + $0xbb] sm:$0xff] }
  0x8f   : > { %5995 = vmatprep.mubr.msk.bf16.mxu1 %vm486_vm1, %v1960_v45  ;;  %v7031_v32 = vpack.c.bf16 %v1939_v52, %v1938_v38  ;;  %v2375_v34 = vmul.f32 %v6860_v50, %v2332_v13  ;;  %v2376_v29 = vmul.f32 %v6860_v50, %v2333_v27  ;;  %v1864_v35 = vmul.f32 %v6860_v50, %v6779_v12 }
  0x90   : > { %v1901_v0 = vadd.f32 %v6881_v46, %v1858_v5  ;;  %v1861_v47 = vmul.f32 %v6860_v50, %v6753_v1  ;;  %v2377_v37 = vmul.f32 %v6860_v50, %v2334_v33  ;;  %v2378_v9 = vmul.f32 %v6860_v50, %v2335_v44 }
  0x91   : > { %v1906_v45 = vadd.f32 %v6881_v46, %v1863_v56  ;;  %v1862_v40 = vmul.f32 %v6860_v50, %v6758_v48  ;;  %v1907_v12 = vadd.f32 %v6881_v46, %v1864_v35  ;;  %v2481_v59 = vpack.c.bf16 %v2451_v54, %v2450_v30 }
  0x92   : > { %v1936_v1 = vmax.f32 %v1900_v49, 0.0  ;;  %v1937_v57 = vmax.f32 %v1901_v0, 0.0  ;;  %v2482_v10 = vpack.c.bf16 %v2453_v43, %v2452_v18  ;;  %v2418_v24 = vadd.f32 %v6881_v46, %v2375_v34  ;;  %v2340_v34 = vld [vmem:[%s6363_s12 + $0xc3] sm:$0xff] }
  0x93   : > { %v1942_v8 = vmax.f32 %v1906_v45, 0.0  ;;  %v2419_v60 = vadd.f32 %v6881_v46, %v2376_v29  ;;  %v1904_v48 = vadd.f32 %v6881_v46, %v1861_v47  ;;  %v2420_v62 = vadd.f32 %v6881_v46, %v2377_v37  ;;  %v2341_v29 = vld [vmem:[%s6363_s12 + $0xcb] sm:$0xff] }
  0x94   : > { %6030 = vmatmul.mubr.msk.bf16.gmra.mxu0 %vm486_vm1, %v2479_v39  ;;  %v2421_v21 = vadd.f32 %v6881_v46, %v2378_v9  ;;  %v1867_v7 = vmul.f32 %v6860_v50, %v6813_v2  ;;  %v1905_v14 = vadd.f32 %v6881_v46, %v1862_v40  ;;  %v2379_v19 = vmul.f32 %v6860_v50, %v2336_v23  ;;  %v2342_v9 = vld [vmem:[%s6363_s12 + $0xd3] sm:$0xff] }
  0x95   : > { %6033 = vmatprep.mubr.msk.bf16.mxu0 %vm486_vm1, %v2480_v11  ;;  %v1868_v26 = vmul.f32 %v6860_v50, %v6816_v3  ;;  %v1964_v16 = vpack.c.bf16 %v1937_v57, %v1936_v1  ;;  %v2380_v5 = vmul.f32 %v6860_v50, %v2337_v15  ;;  %v2454_v38 = vmax.f32 %v2418_v24, 0.0 }
  0x96   : > { %5996 = vmatmul.mubr.msk.bf16.gmra.mxu1 %vm486_vm1, %v6958_v20  ;;  %v1943_v20 = vmax.f32 %v1907_v12, 0.0  ;;  %v1910_v17 = vadd.f32 %v6881_v46, %v1867_v7  ;;  %v2455_v39 = vmax.f32 %v2419_v60, 0.0  ;;  %v2381_v2 = vmul.f32 %v6860_v50, %v2338_v22 }
  0x97   : > { %5999 = vmatprep.mubr.msk.bf16.mxu1 %vm486_vm1, %v1962_v36  ;;  %v1911_v63 = vadd.f32 %v6881_v46, %v1868_v26  ;;  %v2456_v52 = vmax.f32 %v2420_v62, 0.0  ;;  %v2457_v11 = vmax.f32 %v2421_v21, 0.0  ;;  %v2382_v13 = vmul.f32 %v6860_v50, %v2339_v55  ;;  %v8419_v62 = vld [vmem:[#allocation3_spill] sm:$0xff] }
  0x98   : > { %v7066_v4 = vpack.c.bf16 %v1943_v20, %v1942_v8  ;;  %v1946_v3 = vmax.f32 %v1910_v17, 0.0  ;;  %v1940_v27 = vmax.f32 %v1904_v48, 0.0  ;;  %v1941_v36 = vmax.f32 %v1905_v14, 0.0  ;;  %v2346_v17 = vld [vmem:[%s6363_s12 + $0xf3] sm:$0xff] }
  0x99   : > { %v2422_v30 = vadd.f32 %v6881_v46, %v2379_v19  ;;  %v1947_v49 = vmax.f32 %v1911_v63, 0.0  ;;  %v2423_v33 = vadd.f32 %v6881_v46, %v2380_v5  ;;  %v1865_v44 = vmul.f32 %v6860_v50, %v6794_v6  ;;  %v2343_v6 = vld [vmem:[%s6363_s12 + $0xdb] sm:$0xff]  ;;  %v2345_v5 = vld [vmem:[%s6363_s12 + $0xeb] sm:$0xff] }
  0x9a   : > { %v1866_v54 = vmul.f32 %v6860_v50, %v6797_v41  ;;  %v2483_v0 = vpack.c.bf16 %v2455_v39, %v2454_v38  ;;  %v2484_v56 = vpack.c.bf16 %v2457_v11, %v2456_v52  ;;  %v2425_v43 = vadd.f32 %v6881_v46, %v2382_v13  ;;  %v2347_v38 = vld [vmem:[%s6363_s12 + $0xfb] sm:$0xff] }
  0x9b   : > { %v7089_v18 = vpack.c.bf16 %v1947_v49, %v1946_v3  ;;  %v1871_v35 = vmul.f32 %v6860_v50, %v6845_v51  ;;  %v1966_v47 = vpack.c.bf16 %v1941_v36, %v1940_v27  ;;  %v2458_v37 = vmax.f32 %v2422_v30, 0.0 }
  0x9c   : > { %6034 = vmatmul.mubr.msk.bf16.gmra.mxu0 %vm486_vm1, %v2481_v59  ;;  %v1872_v41 = vmul.f32 %v6860_v50, %v6849_v61  ;;  %v2459_v45 = vmax.f32 %v2423_v33, 0.0  ;;  %v1908_v40 = vadd.f32 %v6881_v46, %v1865_v44  ;;  %v1909_v12 = vadd.f32 %v6881_v46, %v1866_v54 }
  0x9d   : > { %6037 = vmatprep.mubr.msk.bf16.mxu0 %vm486_vm1, %v2482_v10  ;;  %v1914_v59 = vadd.f32 %v6881_v46, %v1871_v35  ;;  %v2383_v57 = vmul.f32 %v6860_v50, %v2340_v34  ;;  %v2384_v51 = vmul.f32 %v6860_v50, %v2341_v29  ;;  %v2461_v23 = vmax.f32 %v2425_v43, 0.0  ;;  %v2348_v29 = vld [vmem:[%s6363_s12 + $0x103] sm:$0xff]  ;;  %v2349_v35 = vld [vmem:[%s6363_s12 + $0x10b] sm:$0xff] }
  0x9e   : > { %6000 = vmatmul.mubr.msk.bf16.gmra.mxu1 %vm486_vm1, %v7007_v58  ;;  %v2424_v58 = vadd.f32 %v6881_v46, %v2381_v2  ;;  %v1915_v8 = vadd.f32 %v6881_v46, %v1872_v41  ;;  %v2385_v61 = vmul.f32 %v6860_v50, %v2342_v9  ;;  %v2386_v10 = vmul.f32 %v6860_v50, %v2343_v6  ;;  %v1832_v6 = vld [vmem:[%s6363_s12 + $0x122] sm:$0xff]  ;;  %v1833_v41 = vld [vmem:[%s6363_s12 + $0x12a] sm:$0xff] }
  0x9f   : > { %6003 = vmatprep.mubr.msk.bf16.mxu1 %vm486_vm1, %v1964_v16  ;;  %v1950_v24 = vmax.f32 %v1914_v59, 0.0  ;;  %v1944_v20 = vmax.f32 %v1908_v40, 0.0  ;;  %v1945_v15 = vmax.f32 %v1909_v12, 0.0  ;;  %v1869_v48 = vmul.f32 %v6860_v50, %v6836_v42  ;;  %v2344_v16 = vld [vmem:[%s6363_s12 + $0xe3] sm:$0xff] }
  0xa0   : > { %v2460_v1 = vmax.f32 %v2424_v58, 0.0  ;;  %v1951_v60 = vmax.f32 %v1915_v8, 0.0  ;;  %v1870_v21 = vmul.f32 %v6860_v50, %v8419_v62  ;;  %v2485_v22 = vpack.c.bf16 %v2459_v45, %v2458_v37 }
  0xa1   : > { %v2426_v7 = vadd.f32 %v6881_v46, %v2383_v57  ;;  %v2427_v14 = vadd.f32 %v6881_v46, %v2384_v51  ;;  %v2428_v55 = vadd.f32 %v6881_v46, %v2385_v61  ;;  %v2429_v26 = vadd.f32 %v6881_v46, %v2386_v10  ;;  %v2839_v57 = vld [vmem:[%s6363_s12 + $0x1c] sm:$0xff] }
  0xa2   : > { %v7119_v19 = vpack.c.bf16 %v1951_v60, %v1950_v24  ;;  %v1968_v42 = vpack.c.bf16 %v1945_v15, %v1944_v20  ;;  %v1912_v39 = vadd.f32 %v6881_v46, %v1869_v48  ;;  %v1913_v2 = vadd.f32 %v6881_v46, %v1870_v21 }
  0xa3   : > { %v2462_v63 = vmax.f32 %v2426_v7, 0.0  ;;  %v2463_v52 = vmax.f32 %v2427_v14, 0.0  ;;  %v2387_v11 = vmul.f32 %v6860_v50, %v2344_v16  ;;  %v2388_v13 = vmul.f32 %v6860_v50, %v2345_v5 }
  0xa4   : > { %6038 = vmatmul.mubr.msk.bf16.gmra.mxu0 %vm486_vm1, %v2483_v0  ;;  %v2464_v3 = vmax.f32 %v2428_v55, 0.0  ;;  %v2465_v27 = vmax.f32 %v2429_v26, 0.0  ;;  %v2389_v36 = vmul.f32 %v6860_v50, %v2346_v17  ;;  %v2390_v30 = vmul.f32 %v6860_v50, %v2347_v38  ;;  %v2353_v55 = vld [vmem:[%s6363_s12 + $0x12b] sm:$0xff] }
  0xa5   : > { %6041 = vmatprep.mubr.msk.bf16.mxu0 %vm486_vm1, %v2484_v56  ;;  %v1948_v49 = vmax.f32 %v1912_v39, 0.0  ;;  %v1949_v33 = vmax.f32 %v1913_v2, 0.0  ;;  %v1873_v44 = vmul.f32 %v6860_v50, %v6873_v31  ;;  %v1874_v54 = vmul.f32 %v6860_v50, %v6884_v53  ;;  %v2351_v31 = vld [vmem:[%s6363_s12 + $0x11b] sm:$0xff]  ;;  %v2841_v39 = vld [vmem:[%s6363_s12 + $0x2c] sm:$0xff] }
  0xa6   : > { %6004 = vmatmul.mubr.msk.bf16.gmra.mxu1 %vm486_vm1, %v7031_v32  ;;  %v2486_v32 = vpack.c.bf16 %v2461_v23, %v2460_v1  ;;  %v2487_v0 = vpack.c.bf16 %v2463_v52, %v2462_v63  ;;  %v2430_v58 = vadd.f32 %v6881_v46, %v2387_v11  ;;  %v2431_v56 = vadd.f32 %v6881_v46, %v2388_v13  ;;  %v2838_v1 = vld [vmem:[%s6363_s12 + $0x14] sm:$0xff] }
  0xa7   : > { %6007 = vmatprep.mubr.msk.bf16.mxu1 %vm486_vm1, %v1966_v47  ;;  %v2488_v43 = vpack.c.bf16 %v2465_v27, %v2464_v3  ;;  %v2433_v34 = vadd.f32 %v6881_v46, %v2390_v30  ;;  %v2350_v47 = vld [vmem:[%s6363_s12 + $0x113] sm:$0xff]  ;;  %v1970_v37 = vpack.c.bf16 %v1949_v33, %v1948_v49  ;;  %v1916_v9 = vadd.f32 %v6881_v46, %v1873_v44  ;;  %v2843_v3 = vld [vmem:[%s6363_s12 + $0x3c] sm:$0xff] }
  0xa8   : > { %v1917_v53 = vadd.f32 %v6881_v46, %v1874_v54  ;;  %v2466_v45 = vmax.f32 %v2430_v58, 0.0  ;;  %v2467_v40 = vmax.f32 %v2431_v56, 0.0  ;;  %v2391_v12 = vmul.f32 %v6860_v50, %v2348_v29  ;;  %v2842_v13 = vld [vmem:[%s6363_s12 + $0x34] sm:$0xff] }
  0xa9   : > { %v2392_v59 = vmul.f32 %v6860_v50, %v2349_v35  ;;  %v2469_v8 = vmax.f32 %v2433_v34, 0.0  ;;  %v2393_v23 = vmul.f32 %v6860_v50, %v2350_v47  ;;  %v2394_v61 = vmul.f32 %v6860_v50, %v2351_v31 }
  0xaa   : > { %v1875_v10 = vmul.f32 %v6860_v50, %v1832_v6  ;;  %v1876_v24 = vmul.f32 %v6860_v50, %v1833_v41  ;;  %v1952_v60 = vmax.f32 %v1916_v9, 0.0  ;;  %v1953_v20 = vmax.f32 %v1917_v53, 0.0  ;;  %v2844_v53 = vld [vmem:[%s6363_s12 + $0x44] sm:$0xff]  ;;  %v2845_v6 = vld [vmem:[%s6363_s12 + $0x4c] sm:$0xff] }
  0xab   : > { %v2881_v15 = vmul.f32 %v6860_v50, %v2838_v1  ;;  %v2882_v48 = vmul.f32 %v6860_v50, %v2839_v57  ;;  %v2489_v62 = vpack.c.bf16 %v2467_v40, %v2466_v45  ;;  %v2434_v21 = vadd.f32 %v6881_v46, %v2391_v12  ;;  %v2846_v40 = vld [vmem:[%s6363_s12 + $0x54] sm:$0xff]  ;;  %v2847_v12 = vld [vmem:[%s6363_s12 + $0x5c] sm:$0xff] }
  0xac   : > { %6042 = vmatmul.mubr.msk.bf16.gmra.mxu0 %vm486_vm1, %v2485_v22  ;;  %v2435_v22 = vadd.f32 %v6881_v46, %v2392_v59  ;;  %v2436_v7 = vadd.f32 %v6881_v46, %v2393_v23  ;;  %v2437_v14 = vadd.f32 %v6881_v46, %v2394_v61  ;;  %v1918_v26 = vadd.f32 %v6881_v46, %v1875_v10 }
  0xad   : > { %6045 = vmatprep.mubr.msk.bf16.mxu0 %vm486_vm1, %v2486_v32  ;;  %v2352_v32 = vld [vmem:[%s6363_s12 + $0x123] sm:$0xff]  ;;  %v1919_v16 = vadd.f32 %v6881_v46, %v1876_v24  ;;  %v1972_v5 = vpack.c.bf16 %v1953_v20, %v1952_v60  ;;  %v2924_v17 = vadd.f32 %v6881_v46, %v2881_v15  ;;  %v2925_v38 = vadd.f32 %v6881_v46, %v2882_v48 }
  0xae   : > { %6008 = vmatmul.mubr.msk.bf16.gmra.mxu1 %vm486_vm1, %v7066_v4  ;;  %v2432_v4 = vadd.f32 %v6881_v46, %v2389_v36  ;;  %v2470_v2 = vmax.f32 %v2434_v21, 0.0  ;;  %v2471_v63 = vmax.f32 %v2435_v22, 0.0  ;;  %v2395_v52 = vmul.f32 %v6860_v50, %v2352_v32  ;;  %v2848_v22 = vld [vmem:[%s6363_s12 + $0x64] sm:$0xff]  ;;  %v2851_v32 = vld [vmem:[%s6363_s12 + $0x7c] sm:$0xff] }
  0xaf   : > { %6011 = vmatprep.mubr.msk.bf16.mxu1 %vm486_vm1, %v1968_v42  ;;  %v2840_v42 = vld [vmem:[%s6363_s12 + $0x24] sm:$0xff]  ;;  %v2396_v11 = vmul.f32 %v6860_v50, %v2353_v55  ;;  %v2472_v27 = vmax.f32 %v2436_v7, 0.0  ;;  %v2473_v36 = vmax.f32 %v2437_v14, 0.0  ;;  %v1954_v30 = vmax.f32 %v1918_v26, 0.0  ;;  %v2850_v14 = vld [vmem:[%s6363_s12 + $0x74] sm:$0xff] }
  0xb0   : > { %v2468_v51 = vmax.f32 %v2432_v4, 0.0  ;;  %v1955_v49 = vmax.f32 %v1919_v16, 0.0  ;;  %v2883_v33 = vmul.f32 %v6860_v50, %v2840_v42  ;;  %v2884_v44 = vmul.f32 %v6860_v50, %v2841_v39 }
  0xb1   : > { %v2960_v54 = vmax.f32 %v2924_v17, 0.0  ;;  %v2885_v58 = vmul.f32 %v6860_v50, %v2842_v13  ;;  %v2886_v56 = vmul.f32 %v6860_v50, %v2843_v3  ;;  %v2439_v4 = vadd.f32 %v6881_v46, %v2396_v11 }
  0xb2   : > { %v2492_v34 = vpack.c.bf16 %v2473_v36, %v2472_v27  ;;  %v1973_v29 = vpack.c.bf16 %v1955_v49, %v1954_v30  ;;  %v2926_v35 = vadd.f32 %v6881_v46, %v2883_v33  ;;  %v2927_v47 = vadd.f32 %v6881_v46, %v2884_v44  ;;  %v2852_v27 = vld [vmem:[%s6363_s12 + $0x84] sm:$0xff]  ;;  %v2853_v36 = vld [vmem:[%s6363_s12 + $0x8c] sm:$0xff]  ;;  %v2854_v30 = vld [vmem:[%s6363_s12 + $0x94] sm:$0xff] }
  0xb3   : > { %v2929_v9 = vadd.f32 %v6881_v46, %v2886_v56  ;;  %v2475_v45 = vmax.f32 %v2439_v4, 0.0  ;;  %v2887_v57 = vmul.f32 %v6860_v50, %v2844_v53  ;;  %v2889_v61 = vmul.f32 %v6860_v50, %v2846_v40  ;;  %v2855_v49 = vld [vmem:[%s6363_s12 + $0x9c] sm:$0xff]  ;;  %v4992_v40 = vld [vmem:[%s8412_s2 + $0x10] sm:$0xff] }
  0xb4   : > { %6046 = vmatmul.mubr.msk.bf16.gmra.mxu0 %vm486_vm1, %v2487_v0  ;;  %v2961_v0 = vmax.f32 %v2925_v38, 0.0  ;;  %v2962_v59 = vmax.f32 %v2926_v35, 0.0  ;;  %v2963_v1 = vmax.f32 %v2927_v47, 0.0  ;;  %v2890_v10 = vmul.f32 %v6860_v50, %v2847_v12 }
  0xb5   : > { %6049 = vmatprep.mubr.msk.bf16.mxu0 %vm486_vm1, %v2488_v43  ;;  %v2491_v43 = vpack.c.bf16 %v2471_v63, %v2470_v2  ;;  %v2965_v23 = vmax.f32 %v2929_v9, 0.0  ;;  %v2930_v20 = vadd.f32 %v6881_v46, %v2887_v57  ;;  %v4111_v7 = vsel %vm541_vm0, %v6971_v28, 0  ;;  %v2857_v9 = vld [vmem:[%s6363_s12 + $0xac] sm:$0xff] }
  0xb6   : > { %6012 = vmatmul.mubr.msk.bf16.gmra.mxu1 %vm486_vm1, %v7089_v18  ;;  %v2490_v18 = vpack.c.bf16 %v2469_v8, %v2468_v51  ;;  %v2996_v31 = vpack.c.bf16 %v2961_v0, %v2960_v54  ;;  %v2888_v51 = vmul.f32 %v6860_v50, %v2845_v6  ;;  %v2997_v60 = vpack.c.bf16 %v2963_v1, %v2962_v59  ;;  %v2858_v6 = vld [vmem:[%s6363_s12 + $0xb4] sm:$0xff] }
  0xb7   : > { %6015 = vmatprep.mubr.msk.bf16.mxu1 %vm486_vm1, %v1970_v37  ;;  %v2928_v37 = vadd.f32 %v6881_v46, %v2885_v58  ;;  %v2933_v21 = vadd.f32 %v6881_v46, %v2890_v10  ;;  %v2966_v55 = vmax.f32 %v2930_v20, 0.0  ;;  %v2891_v16 = vmul.f32 %v6860_v50, %v2848_v22 }
  0xb8   : > { %v2931_v15 = vadd.f32 %v6881_v46, %v2888_v51  ;;  %v2893_v38 = vmul.f32 %v6860_v50, %v2850_v14  ;;  %v2894_v42 = vmul.f32 %v6860_v50, %v2851_v32  ;;  %v4631_v2 = vsel %vm541_vm0, %v7004_v25, 0  ;;  %v4994_v14 = vld [vmem:[%s8412_s2 + $0x20] sm:$0xff] }
  0xb9   : > { %v2964_v8 = vmax.f32 %v2928_v37, 0.0  ;;  %v2969_v17 = vmax.f32 %v2933_v21, 0.0  ;;  %v2934_v63 = vadd.f32 %v6881_v46, %v2891_v16  ;;  %v2895_v44 = vmul.f32 %v6860_v50, %v2852_v27  ;;  %v2856_v37 = vld [vmem:[%s6363_s12 + $0xa4] sm:$0xff]  ;;  %v2861_v16 = vld [vmem:[%s6363_s12 + $0xcc] sm:$0xff] }
  0xba   : > { %v2967_v26 = vmax.f32 %v2931_v15, 0.0  ;;  %v2936_v13 = vadd.f32 %v6881_v46, %v2893_v38  ;;  %v2937_v3 = vadd.f32 %v6881_v46, %v2894_v42  ;;  %v2896_v54 = vmul.f32 %v6860_v50, %v2853_v36  ;;  %v2863_v38 = vld [vmem:[%s6363_s12 + $0xdc] sm:$0xff]  ;;  %v4995_v42 = vld [vmem:[%s8412_s2 + $0x28] sm:$0xff] }
  0xbb   : > { %v2998_v48 = vpack.c.bf16 %v2965_v23, %v2964_v8  ;;  %v2970_v25 = vmax.f32 %v2934_v63, 0.0  ;;  %v2897_v56 = vmul.f32 %v6860_v50, %v2854_v30  ;;  %v2938_v4 = vadd.f32 %v6881_v46, %v2895_v44  ;;  %v4991_v23 = vld [vmem:[%s8412_s2 + $0x8] sm:$0xff]  ;;  %v4997_v44 = vld [vmem:[%s8412_s2 + $0x38] sm:$0xff] }
  0xbc   : > { %6050 = vmatmul.mubr.msk.bf16.gmra.mxu0 %vm486_vm1, %v2489_v62  ;;  %v2932_v62 = vadd.f32 %v6881_v46, %v2889_v61  ;;  %v2999_v39 = vpack.c.bf16 %v2967_v26, %v2966_v55  ;;  %v2972_v0 = vmax.f32 %v2936_v13, 0.0  ;;  %v2973_v58 = vmax.f32 %v2937_v3, 0.0  ;;  %v4996_v3 = vld [vmem:[%s8412_s2 + $0x30] sm:$0xff] }
  0xbd   : > { %6053 = vmatprep.mubr.msk.bf16.mxu0 %vm486_vm1, %v2490_v18  ;;  %v2849_v18 = vld [vmem:[%s6363_s12 + $0x6c] sm:$0xff]  ;;  %v2940_v47 = vadd.f32 %v6881_v46, %v2897_v56  ;;  %v2974_v1 = vmax.f32 %v2938_v4, 0.0  ;;  %v2899_v51 = vmul.f32 %v6860_v50, %v2856_v37  ;;  %v2900_v8 = vmul.f32 %v6860_v50, %v2857_v9  ;;  %v2864_v4 = vld [vmem:[%s6363_s12 + $0xe4] sm:$0xff]  ;;  %v2866_v37 = vld [vmem:[%s6363_s12 + $0xf4] sm:$0xff] }
  0xbe   : > { %6016 = vmatmul.mubr.msk.bf16.gmra.mxu1 %vm486_vm1, %v7119_v19  ;;  %v2438_v19 = vadd.f32 %v6881_v46, %v2395_v52  ;;  %v2968_v28 = vmax.f32 %v2932_v62, 0.0  ;;  %v3002_v35 = vpack.c.bf16 %v2973_v58, %v2972_v0  ;;  %v2867_v9 = vld [vmem:[%s6363_s12 + $0xfc] sm:$0xff] }
  0xbf   : > { %6019 = vmatprep.mubr.msk.bf16.mxu1 %vm486_vm1, %v1972_v5  ;;  %v2892_v5 = vmul.f32 %v6860_v50, %v2849_v18  ;;  %v2976_v61 = vmax.f32 %v2940_v47, 0.0  ;;  %v2943_v18 = vadd.f32 %v6881_v46, %v2900_v8 }
  0xc0   : > { %v2474_v41 = vmax.f32 %v2438_v19, 0.0  ;;  %v3000_v11 = vpack.c.bf16 %v2969_v17, %v2968_v28  ;;  %v2862_v17 = vld [vmem:[%s6363_s12 + $0xd4] sm:$0xff] }
  0xc1   : > { %v2935_v52 = vadd.f32 %v6881_v46, %v2892_v5 }
  0xc2   : > { %v2493_v24 = vpack.c.bf16 %v2475_v45, %v2474_v41  ;;  %v2859_v41 = vld [vmem:[%s6363_s12 + $0xbc] sm:$0xff]  ;;  %v6284_v45 = vmov 0  }
  0xc3   : > { %v2971_v33 = vmax.f32 %v2935_v52, 0.0  ;;  %6252 = vset.pattern.permute.xlu0 %v6284_v45  ;;  %6253 = vset.pattern.permute.xlu1 %v6284_v45  ;;  %v4999_v45 = vld [vmem:[%s8412_s2 + $0x48] sm:$0xff] }
  0xc4   : > { %6054 = vmatmul.mubr.msk.bf16.gmra.mxu0 %vm486_vm1, %v2491_v43  ;;  %v2898_v43 = vmul.f32 %v6860_v50, %v2855_v49  ;;  %5038 = vperm.xlu1 %6253, %v4992_v40  }
  0xc5   : > { %6057 = vmatprep.mubr.msk.bf16.mxu0 %vm486_vm1, %v2492_v34  ;;  %v3001_v19 = vpack.c.bf16 %v2971_v33, %v2970_v25  ;;  %v2939_v34 = vadd.f32 %v6881_v46, %v2896_v54  ;;  %v7338_v54 = vld [vmem:[%s8414_s4] ss:$0 sm:$0xff] }
  0xc6   : > { %6020 = vmatmul.mubr.msk.bf16.gmra.mxu1 %vm486_vm1, %v1973_v29  ;;  %v4990_v29 = vld [vmem:[%s8412_s2] sm:$0xff] }
  0xc7   : > { %6063 = vmatprep.mubr.msk.bf16.mxu1 %vm486_vm1, %v2996_v31  ;;  %v2941_v31 = vadd.f32 %v6881_v46, %v2898_v43  ;;  %5028 = vperm.xlu0 %6252, %v4990_v29   ;;  %v2975_v57 = vmax.f32 %v2939_v34, 0.0  ;;  %v4998_v34 = vld [vmem:[%s8412_s2 + $0x40] sm:$0xff] }
  0xc9   : > { %v2977_v10 = vmax.f32 %v2941_v31, 0.0  ;;  %v3003_v22 = vpack.c.bf16 %v2975_v57, %v2974_v1  ;;  %v2865_v31 = vld [vmem:[%s6363_s12 + $0xec] sm:$0xff] }
  0xcb   : > { %5033 = vperm.xlu0 %6252, %v4991_v23   ;;  %v3004_v32 = vpack.c.bf16 %v2977_v10, %v2976_v61 }
  0xcc   : > { %6058 = vmatmul.mubr.msk.bf16.gmra.mxu0 %vm486_vm1, %v2493_v24  ;;  %v2901_v24 = vmul.f32 %v6860_v50, %v2858_v6 }
  0xcd   : > { %6101 = vmatprep.mubr.msk.bf16.mxu0 %vm486_vm1, %v2997_v60 }
  0xce   : > { %6064 = vmatmul.mubr.msk.bf16.vlgmr.msra.gmra.mxu1 %vm486_vm1, %v2997_v60  ;;  %v2902_v60 = vmul.f32 %v6860_v50, %v2859_v41  ;;  %v2942_v50 = vadd.f32 %v6881_v46, %v2899_v51  ;;  %v2944_v55 = vadd.f32 %v6881_v46, %v2901_v24  ;;  %v5000_v24 = vld [vmem:[%s8412_s2 + $0x50] sm:$0xff] }
  0xcf   : > { %6138 = vmatpush3.bf16.msra.mxu1 %v4111_v7  ;;  %6067 = vmatprep.mubr.msk.bf16.mxu1 %vm486_vm1, %v2998_v48  ;;  %v2860_v7 = vld [vmem:[%s6363_s12 + $0xc4] sm:$0xff] }
  0xd0   : > { %v2945_v26 = vadd.f32 %v6881_v46, %v2902_v60  ;;  %v7313_v46 = vld [vmem:[%s8413_s3] ss:$0 sm:$0xff]  ;;  %5048 = vperm.xlu0 %6252, %v4994_v14   ;;  %v2978_v52 = vmax.f32 %v2942_v50, 0.0  ;;  %v2980_v27 = vmax.f32 %v2944_v55, 0.0  ;;  %v2870_v14 = vld [vmem:[%s6363_s12 + $0x114] sm:$0xff] }
  0xd1   : > { %v2904_v13 = vmul.f32 %v7313_v46, %v2861_v16  ;;  %v2905_v30 = vmul.f32 %v7313_v46, %v2862_v17  ;;  %v2906_v49 = vmul.f32 %v7313_v46, %v2863_v38  ;;  %v2907_v1 = vmul.f32 %v7313_v46, %v2864_v4  ;;  %v2872_v16 = vld [vmem:[%s6363_s12 + $0x124] sm:$0xff]  ;;  %v2873_v17 = vld [vmem:[%s6363_s12 + $0x12c] sm:$0xff] }
  0xd2   : > { %v2981_v36 = vmax.f32 %v2945_v26, 0.0  ;;  %v2908_v23 = vmul.f32 %v7313_v46, %v2865_v31  ;;  %v2909_v61 = vmul.f32 %v7313_v46, %v2866_v37  ;;  %v2910_v10 = vmul.f32 %v7313_v46, %v2867_v9  ;;  %v2871_v26 = vld [vmem:[%s6363_s12 + $0x11c] sm:$0xff]  ;;  %v5003_v31 = vld [vmem:[%s8412_s2 + $0x68] sm:$0xff] }
  0xd3   : > { %v2949_v47 = vadd.f32 %v7338_v54, %v2906_v49  ;;  %v7388_v55 = vadd.f32 %v7338_v54, %v2907_v1  ;;  %v2913_v4 = vmul.f32 %v7313_v46, %v2870_v14  ;;  %v2915_v9 = vmul.f32 %v7313_v46, %v2872_v16 }
  0xd4   : > { %6102 = vmatmul.mubr.msk.bf16.vlgmr.msra.gmra.mxu0 %vm486_vm1, %v2998_v48  ;;  %v4993_v48 = vld [vmem:[%s8412_s2 + $0x18] sm:$0xff]  ;;  %5058 = vperm.xlu0 %6252, %v4996_v3   ;;  %v3006_v29 = vpack.c.bf16 %v2981_v36, %v2980_v27  ;;  %v3878_v3 = vld [vmem:[%s6363_s12 + $0x25] sm:$0xff]  ;;  %v7404_v27 = vld [vmem:[%s8413_s3] ss:$0 sm:$0xff] }
  0xd5   : > { %6176 = vmatpush3.bf16.msra.mxu0 %v4631_v2  ;;  %6105 = vmatprep.mubr.msk.bf16.mxu0 %vm486_vm1, %v2999_v39  ;;  %v5002_v36 = vld [vmem:[%s8412_s2 + $0x60] sm:$0xff]  ;;  %v2986_v37 = vmax.f32 %v7388_v55, 0.0 }
  0xd6   : > { %6068 = vmatmul.mubr.msk.bf16.gmra.mxu1 %vm486_vm1, %v2999_v39  ;;  %5043 = vperm.xlu1 %6253, %v4993_v48   ;;  %v2903_v39 = vmul.f32 %v7313_v46, %v2860_v7  ;;  %v2985_v48 = vmax.f32 %v2949_v47, 0.0  ;;  %v2869_v7 = vld [vmem:[%s6363_s12 + $0x10c] sm:$0xff]  ;;  %v3393_v47 = vld [vmem:[%s6363_s12 + $0x13c] sm:$0xff] }
  0xd7   : > { %6071 = vmatprep.mubr.msk.bf16.mxu1 %vm486_vm1, %v3000_v11  ;;  %v3436_v14 = vmul.f32 %v7313_v46, %v3393_v47 }
  0xd8   : > { %v2946_v0 = vadd.f32 %v7338_v54, %v2903_v39  ;;  %5068 = vperm.xlu0 %6252, %v4998_v34   ;;  %v2914_v34 = vmul.f32 %v7313_v46, %v2871_v26 }
  0xda   : > { %5053 = vperm.xlu1 %6253, %v4995_v42   ;;  %v2982_v40 = vmax.f32 %v2946_v0, 0.0 }
  0xdc   : > { %v7257_v53 = vpop.f32.mrf.mxu0  ;;  %6106 = vmatmul.mubr.msk.bf16.gmra.mxu0 %vm486_vm1, %v3000_v11  ;;  %v2979_v11 = vmax.f32 %v2943_v18, 0.0  ;;  %5078 = vperm.xlu0 %6252, %v5000_v24  }
  0xdd   : > { %6109 = vmatprep.mubr.msk.bf16.mxu0 %vm486_vm1, %v3001_v19 }
  0xde   : > { %v7266_v12 = vpop.f32.mrf.mxu1  ;;  %6072 = vmatmul.mubr.msk.bf16.gmra.mxu1 %vm486_vm1, %v3001_v19  ;;  %v7269_v59 = vpop.f32.mrf.mxu0  ;;  %v3005_v43 = vpack.c.bf16 %v2979_v11, %v2978_v52  ;;  %v2947_v19 = vadd.f32 %v7338_v54, %v2904_v13  ;;  %5063 = vperm.xlu1 %6253, %v4997_v44   ;;  %v2951_v52 = vadd.f32 %v7338_v54, %v2908_v23  ;;  %v3879_v44 = vld [vmem:[%s6363_s12 + $0x2d] sm:$0xff] }
  0xdf   : > { %6075 = vmatprep.mubr.msk.bf16.mxu1 %vm486_vm1, %v3002_v35  ;;  %v2952_v11 = vadd.f32 %v7338_v54, %v2909_v61  ;;  %v2953_v13 = vadd.f32 %v7338_v54, %v2910_v10  ;;  %v3922_v24 = vmul.f32 %v7404_v27, %v3879_v44 }
  0xe0   : > { %v7279_v20 = vpop.f32.mrf.mxu1  ;;  %v7281_v15 = vpop.f32.mrf.mxu0  ;;  %v2983_v8 = vmax.f32 %v2947_v19, 0.0  ;;  %v2912_v19 = vmul.f32 %v7313_v46, %v2869_v7  ;;  %5088 = vperm.xlu0 %6252, %v5002_v36   ;;  %v2987_v23 = vmax.f32 %v2951_v52, 0.0  ;;  %v3882_v52 = vld [vmem:[%s6363_s12 + $0x45] sm:$0xff] }
  0xe1   : > { %v2988_v61 = vmax.f32 %v2952_v11, 0.0  ;;  %v2989_v10 = vmax.f32 %v2953_v13, 0.0  ;;  %v5005_v11 = vld [vmem:[%s8412_s2 + $0x78] sm:$0xff] }
  0xe2   : > { %v7286_v62 = vpop.f32.mrf.mxu1  ;;  %v7288_v21 = vpop.f32.mrf.mxu0  ;;  %5073 = vperm.xlu1 %6253, %v4999_v45   ;;  %v3007_v39 = vpack.c.bf16 %v2983_v8, %v2982_v40  ;;  %v3921_v45 = vmul.f32 %v7404_v27, %v3878_v3  ;;  %v3880_v40 = vld [vmem:[%s6363_s12 + $0x35] sm:$0xff]  ;;  %v2955_v16 = vadd.f32 %v7338_v54, %v2912_v19 }
  0xe3   : > { %v3923_v36 = vmul.f32 %v7404_v27, %v3880_v40  ;;  %v3925_v40 = vmul.f32 %v7404_v27, %v3882_v52 }
  0xe4   : > { %v7299_v5 = vpop.f32.mrf.mxu1  ;;  %v7301_v28 = vpop.f32.mrf.mxu0  ;;  %6110 = vmatmul.mubr.msk.bf16.gmra.mxu0 %vm486_vm1, %v3002_v35  ;;  %v2948_v35 = vadd.f32 %v7338_v54, %v2905_v30 }
  0xe5   : > { %6113 = vmatprep.mubr.msk.bf16.mxu0 %vm486_vm1, %v3003_v22 }
  0xe6   : > { %v7316_v2 = vpop.f32.mrf.mxu1  ;;  %6076 = vmatmul.mubr.msk.bf16.gmra.mxu1 %vm486_vm1, %v3003_v22  ;;  %v7319_v63 = vpop.f32.mrf.mxu0  ;;  %v2984_v60 = vmax.f32 %v2948_v35, 0.0  ;;  %v2868_v22 = vld [vmem:[%s6363_s12 + $0x104] sm:$0xff]  ;;  %v3392_v35 = vld [vmem:[%s6363_s12 + $0x134] sm:$0xff] }
  0xe7   : > { %6079 = vmatprep.mubr.msk.bf16.mxu1 %vm486_vm1, %v3004_v32  ;;  %v2911_v49 = vmul.f32 %v7313_v46, %v2868_v22  ;;  %v3435_v7 = vmul.f32 %v7313_v46, %v3392_v35 }
  0xe8   : > { %v7328_v25 = vpop.f32.mrf.mxu1  ;;  %v7330_v33 = vpop.f32.mrf.mxu0  ;;  %v7409_v30 = vpack.c.bf16 %v2985_v48, %v2984_v60  ;;  %v7441_v60 = vld [vmem:[%s8414_s4] ss:$0 sm:$0xff]  ;;  %v5004_v48 = vld [vmem:[%s8412_s2 + $0x70] sm:$0xff] }
  0xe9   : > { %v7449_v22 = vadd.f32 %v7338_v54, %v2911_v49  ;;  %v7472_v3 = vadd.f32 %v7441_v60, %v3921_v45  ;;  %v3883_v49 = vld [vmem:[%s6363_s12 + $0x4d] sm:$0xff]  ;;  %5098 = vperm.xlu0 %6252, %v5004_v48   ;;  %v7483_v35 = vadd.f32 %v7441_v60, %v3922_v24  ;;  %v3479_v45 = vadd.f32 %v7338_v54, %v3436_v14 }
  0xea   : > { %v7341_v58 = vpop.f32.mrf.mxu1  ;;  %v7343_v56 = vpop.f32.mrf.mxu0  ;;  %v2991_v24 = vmax.f32 %v2955_v16, 0.0  ;;  %v3885_v16 = vld [vmem:[%s6363_s12 + $0x5d] sm:$0xff] }
  0xeb   : > { %v4000_v52 = vmax.f32 %v7472_v3, 0.0  ;;  %v5008_v3 = vld [vmem:[%s8412_s2 + $0x90] sm:$0xff] }
  0xec   : > { %v7355_v6 = vpop.f32.mrf.mxu1  ;;  %v7357_v41 = vpop.f32.mrf.mxu0  ;;  %6114 = vmatmul.mubr.msk.bf16.gmra.mxu0 %vm486_vm1, %v3004_v32  ;;  %v5001_v32 = vld [vmem:[%s8412_s2 + $0x58] sm:$0xff] }
  0xed   : > { %6117 = vmatprep.mubr.msk.bf16.mxu0 %vm486_vm1, %v3005_v43  ;;  %5083 = vperm.xlu1 %6253, %v5001_v32   ;;  %v3881_v32 = vld [vmem:[%s6363_s12 + $0x3d] sm:$0xff] }
  0xee   : > { %v7365_v57 = vpop.f32.mrf.mxu1  ;;  %6080 = vmatmul.mubr.msk.bf16.gmra.mxu1 %vm486_vm1, %v3005_v43  ;;  %v7368_v51 = vpop.f32.mrf.mxu0  ;;  %v3924_v47 = vmul.f32 %v7404_v27, %v3881_v32 }
  0xef   : > { %6083 = vmatprep.mubr.msk.bf16.mxu1 %vm486_vm1, %v3006_v29 }
  0xf0   : > { %v7378_v50 = vpop.f32.mrf.mxu1  ;;  %v7380_v18 = vpop.f32.mrf.mxu0 }
  0xf1   : > { %5093 = vperm.xlu1 %6253, %v5003_v31   ;;  %v5006_v31 = vld [vmem:[%s8412_s2 + $0x80] sm:$0xff] }
  0xf2   : > { %v7393_v38 = vpop.f32.mrf.mxu1  ;;  %v7395_v42 = vpop.f32.mrf.mxu0  ;;  %5108 = vperm.xlu0 %6252, %v5006_v31   ;;  %v3515_v31 = vmax.f32 %v3479_v45, 0.0 }
  0xf3   : > { %8420 = vst [vmem:[#allocation3_spill] sm:$0xff] %v7393_v38 }
  0xf4   : > { %v7413_v0 = vpop.f32.mrf.mxu1  ;;  %v7415_v43 = vpop.f32.mrf.mxu0  ;;  %6118 = vmatmul.mubr.msk.bf16.gmra.mxu0 %vm486_vm1, %v3006_v29  ;;  %v2916_v29 = vmul.f32 %v7313_v46, %v2873_v17  ;;  %v7460_v17 = vadd.f32 %v7338_v54, %v2913_v4  ;;  %v2958_v46 = vadd.f32 %v7338_v54, %v2915_v9  ;;  %v3009_v4 = vpack.c.bf16 %v2987_v23, %v2986_v37  ;;  %v4398_v37 = vld [vmem:[%s6363_s12 + $0x26] sm:$0xff]  ;;  %v4399_v23 = vld [vmem:[%s6363_s12 + $0x2e] sm:$0xff] }
  0xf5   : > { %8421 = vst [vmem:[#allocation4_spill] sm:$0xff] %v7413_v0  ;;  %6121 = vmatprep.mubr.msk.bf16.mxu0 %vm486_vm1, %v3007_v39  ;;  %v2990_v9 = vmax.f32 %v7449_v22, 0.0  ;;  %5103 = vperm.xlu1 %6253, %v5005_v11   ;;  %v7510_v11 = vadd.f32 %v7441_v60, %v3923_v36 }
  0xf6   : > { %v7432_v1 = vpop.f32.mrf.mxu1  ;;  %6084 = vmatmul.mubr.msk.bf16.gmra.mxu1 %vm486_vm1, %v3007_v39  ;;  %v7435_v8 = vpop.f32.mrf.mxu0  ;;  %v7463_v39 = vadd.f32 %v7338_v54, %v2914_v34  ;;  %v2959_v13 = vadd.f32 %v7338_v54, %v2916_v29  ;;  %v7480_v34 = vpack.c.bf16 %v2989_v10, %v2988_v61  ;;  %v3478_v29 = vadd.f32 %v7338_v54, %v3435_v7  ;;  %v5007_v7 = vld [vmem:[%s8412_s2 + $0x88] sm:$0xff] }
  0xf7   : > { %8422 = vst [vmem:[#allocation5_spill] sm:$0xff] %v7432_v1  ;;  %6087 = vmatprep.mubr.msk.bf16.mxu1 %vm486_vm1, %v7409_v30  ;;  %v2992_v48 = vmax.f32 %v7460_v17, 0.0  ;;  %v3926_v54 = vmul.f32 %v7404_v27, %v3883_v49  ;;  %v2994_v14 = vmax.f32 %v2958_v46, 0.0  ;;  %v4001_v49 = vmax.f32 %v7483_v35, 0.0  ;;  %5118 = vperm.xlu0 %6252, %v5008_v3  }
  0xf8   : > { %v7454_v55 = vpop.f32.mrf.mxu1  ;;  %v7456_v26 = vpop.f32.mrf.mxu0  ;;  %v2993_v22 = vmax.f32 %v7463_v39, 0.0  ;;  %v2995_v32 = vmax.f32 %v2959_v13, 0.0  ;;  %v4441_v46 = vmul.f32 %v7404_v27, %v4398_v37  ;;  %v4442_v13 = vmul.f32 %v7404_v27, %v4399_v23 }
  0xf9   : > { %8423 = vst [vmem:[#allocation6_spill] sm:$0xff] %v7454_v55  ;;  %v7528_v35 = vadd.f32 %v7441_v60, %v3925_v40  ;;  %5113 = vperm.xlu1 %6253, %v5007_v7   ;;  %v3011_v23 = vpack.c.bf16 %v2991_v24, %v2990_v9  ;;  %v3969_v55 = vadd.f32 %v7441_v60, %v3926_v54  ;;  %v4002_v1 = vmax.f32 %v7510_v11, 0.0  ;;  %v4401_v9 = vld [vmem:[%s6363_s12 + $0x3e] sm:$0xff] }
  0xfa   : > { %v7476_v44 = vpop.f32.mrf.mxu1  ;;  %v7478_v19 = vpop.f32.mrf.mxu0  ;;  %v7540_v40 = vpack.c.bf16 %v2993_v22, %v2992_v48  ;;  %v7542_v7 = vpack.c.bf16 %v2995_v32, %v2994_v14  ;;  %v4485_v0 = vadd.f32 %v7441_v60, %v4442_v13  ;;  %v5010_v48 = vld [vmem:[%s8412_s2 + $0xa0] sm:$0xff]  ;;  %v7556_v14 = vpack.c.bf16 %v4001_v49, %v4000_v52  ;;  %v3887_v52 = vld [vmem:[%s6363_s12 + $0x6d] sm:$0xff] }
  0xfb   : > { %8424 = vst [vmem:[#allocation7_spill] sm:$0xff] %v7476_v44  ;;  %v4005_v13 = vmax.f32 %v3969_v55, 0.0  ;;  %v5011_v49 = vld [vmem:[%s8412_s2 + $0xa8] sm:$0xff]  ;;  %5128 = vperm.xlu0 %6252, %v5010_v48  }
  0xfc   : > { %v7495_v61 = vpop.f32.mrf.mxu1  ;;  %v7497_v10 = vpop.f32.mrf.mxu0  ;;  %6122 = vmatmul.mubr.msk.bf16.gmra.mxu0 %vm486_vm1, %v7409_v30  ;;  %v3884_v30 = vld [vmem:[%s6363_s12 + $0x55] sm:$0xff] }
  0xfd   : > { %8425 = vst [vmem:[#allocation8_spill] sm:$0xff] %v7495_v61  ;;  %6125 = vmatprep.mubr.msk.bf16.mxu0 %vm486_vm1, %v3009_v4  ;;  %v3967_v61 = vadd.f32 %v7441_v60, %v3924_v47  ;;  %v4400_v47 = vld [vmem:[%s6363_s12 + $0x36] sm:$0xff] }
  0xfe   : > { %v5913_v17 = vpop.f32.mrf.mxu1  ;;  %6088 = vmatmul.mubr.msk.bf16.gmra.mxu1 %vm486_vm1, %v3009_v4  ;;  %v7515_v39 = vpop.f32.mrf.mxu0  ;;  %v3514_v4 = vmax.f32 %v3478_v29, 0.0  ;;  %v5009_v29 = vld [vmem:[%s8412_s2 + $0x98] sm:$0xff]  ;;  %v4443_v38 = vmul.f32 %v7404_v27, %v4400_v47 }
  0xff   : > { %v1208_v36 = vadd.f32 %v5913_v17, %v7257_v53  ;;  %6091 = vmatprep.mubr.msk.bf16.mxu1 %vm486_vm1, %v7480_v34  ;;  %v3927_v53 = vmul.f32 %v7404_v27, %v3884_v30  ;;  %v3928_v17 = vmul.f32 %v7404_v27, %v3885_v16  ;;  %v4003_v30 = vmax.f32 %v3967_v61, 0.0  ;;  %5123 = vperm.xlu1 %6253, %v5009_v29   ;;  %v5012_v29 = vld [vmem:[%s8412_s2 + $0xb0] sm:$0xff] }
 0x100   : > { %v1027_v37 = vpop.f32.mrf.mxu1  ;;  %v7531_v44 = vpop.f32.mrf.mxu0  ;;  %v4484_v16 = vadd.f32 %v7441_v60, %v4441_v46  ;;  %v7558_v32 = vpack.c.bf16 %v3515_v31, %v3514_v4  ;;  %v4004_v61 = vmax.f32 %v7528_v35, 0.0  ;;  %5138 = vperm.xlu0 %6252, %v5012_v29  }
 0x101   : > { %v1206_v45 = vadd.f32 %v1027_v37, %v7269_v59  ;;  %v3886_v59 = vld [vmem:[%s6363_s12 + $0x65] sm:$0xff]  ;;  %v3970_v3 = vadd.f32 %v7441_v60, %v3927_v53  ;;  %v3971_v47 = vadd.f32 %v7441_v60, %v3928_v17  ;;  %v7576_v37 = vpack.c.bf16 %v4003_v30, %v4002_v1 }
 0x102   : > { %v5914_v24 = vpop.f32.mrf.mxu1  ;;  %v7546_v54 = vpop.f32.mrf.mxu0  ;;  %v3929_v55 = vmul.f32 %v7404_v27, %v3886_v59  ;;  %v4520_v53 = vmax.f32 %v4484_v16, 0.0  ;;  %v4521_v17 = vmax.f32 %v4485_v0, 0.0  ;;  %v3930_v1 = vmul.f32 %v7404_v27, %v3887_v52  ;;  %v3888_v0 = vld [vmem:[%s6363_s12 + $0x75] sm:$0xff] }
 0x103   : > { %v1209_v22 = vadd.f32 %v5914_v24, %v7281_v15  ;;  %v4444_v15 = vmul.f32 %v7404_v27, %v4401_v9  ;;  %5133 = vperm.xlu1 %6253, %v5011_v49   ;;  %v7594_v59 = vpack.c.bf16 %v4005_v13, %v4004_v61  ;;  %v4006_v48 = vmax.f32 %v3970_v3, 0.0  ;;  %v4404_v13 = vld [vmem:[%s6363_s12 + $0x56] sm:$0xff]  ;;  %v4405_v3 = vld [vmem:[%s6363_s12 + $0x5e] sm:$0xff] }
 0x104   : > { %v1030_v11 = vpop.f32.mrf.mxu1  ;;  %v5951_v46 = vpop.f32.mrf.mxu0  ;;  %6126 = vmatmul.mubr.msk.bf16.gmra.mxu0 %vm486_vm1, %v7480_v34  ;;  %v7611_v49 = vpack.c.bf16 %v4521_v17, %v4520_v53  ;;  %v3973_v53 = vadd.f32 %v7441_v60, %v3930_v1  ;;  %v3890_v17 = vld [vmem:[%s6363_s12 + $0x85] sm:$0xff] }
 0x105   : > { %v1207_v4 = vadd.f32 %v1030_v11, %v7288_v21  ;;  %v7571_v31 = vadd.f32 %v5951_v46, %v1208_v36  ;;  %6129 = vmatprep.mubr.msk.bf16.mxu0 %vm486_vm1, %v3011_v23  ;;  %v7579_v21 = vadd.f32 %v7441_v60, %v4443_v38  ;;  %v4402_v36 = vld [vmem:[%s6363_s12 + $0x46] sm:$0xff]  ;;  %v3889_v38 = vld [vmem:[%s6363_s12 + $0x7d] sm:$0xff]  ;;  %v4007_v11 = vmax.f32 %v3971_v47, 0.0 }
 0x106   : > { %v5917_v34 = vpop.f32.mrf.mxu1  ;;  %6092 = vmatmul.mubr.msk.bf16.gmra.mxu1 %vm486_vm1, %v3011_v23  ;;  %v1547_v35 = vpop.f32.mrf.mxu0  ;;  %v4403_v23 = vld [vmem:[%s6363_s12 + $0x4e] sm:$0xff]  ;;  %v4445_v61 = vmul.f32 %v7404_v27, %v4402_v36 }
 0x107   : > { %v1212_v9 = vadd.f32 %v5917_v34, %v7301_v28  ;;  %v7586_v24 = vadd.f32 %v1547_v35, %v1206_v45  ;;  %6095 = vmatprep.mubr.msk.bf16.mxu1 %vm486_vm1, %v7540_v40  ;;  %v7597_v28 = vadd.f32 %v7441_v60, %v4444_v15  ;;  %v5013_v45 = vld [vmem:[%s8412_s2 + $0xb8] sm:$0xff]  ;;  %v7606_v34 = vadd.f32 %v7441_v60, %v3929_v55  ;;  %v5015_v1 = vld [vmem:[%s8412_s2 + $0xc8] sm:$0xff] }
 0x108   : > { %v1043_v30 = vpop.f32.mrf.mxu1  ;;  %v5952_v16 = vpop.f32.mrf.mxu0  ;;  %v4446_v35 = vmul.f32 %v7404_v27, %v4403_v23  ;;  %v4522_v29 = vmax.f32 %v7579_v21, 0.0  ;;  %5143 = vperm.xlu1 %6253, %v5013_v45   ;;  %v3891_v21 = vld [vmem:[%s6363_s12 + $0x8d] sm:$0xff] }
 0x109   : > { %8426 = vst [vmem:[#allocation9_spill] sm:$0xff] %v7586_v24  ;;  %v1210_v46 = vadd.f32 %v1043_v30, %v7319_v63  ;;  %v7603_v52 = vadd.f32 %v5952_v16, %v1209_v22  ;;  %v3931_v24 = vmul.f32 %v7404_v27, %v3888_v0  ;;  %v3932_v63 = vmul.f32 %v7404_v27, %v3889_v38  ;;  %v5014_v22 = vld [vmem:[%s8412_s2 + $0xc0] sm:$0xff] }
 0x10a   : > { %v5918_v47 = vpop.f32.mrf.mxu1  ;;  %v1550_v15 = vpop.f32.mrf.mxu0  ;;  %v7627_v38 = vpack.c.bf16 %v4007_v11, %v4006_v48  ;;  %v4523_v30 = vmax.f32 %v7597_v28, 0.0  ;;  %v7643_v48 = vadd.f32 %v7441_v60, %v4445_v61  ;;  %v4406_v11 = vld [vmem:[%s6363_s12 + $0x66] sm:$0xff]  ;;  %v4407_v28 = vld [vmem:[%s6363_s12 + $0x6e] sm:$0xff]  ;;  %5148 = vperm.xlu0 %6252, %v5014_v22  }
 0x10b   : > { %v1213_v55 = vadd.f32 %v5918_v47, %v7330_v33  ;;  %v7620_v36 = vadd.f32 %v1550_v15, %v1207_v4  ;;  %v4447_v33 = vmul.f32 %v7404_v27, %v4404_v13  ;;  %v4448_v4 = vmul.f32 %v7404_v27, %v4405_v3 }
 0x10c   : > { %v1046_v23 = vpop.f32.mrf.mxu1  ;;  %v5955_v0 = vpop.f32.mrf.mxu0  ;;  %6130 = vmatmul.mubr.msk.bf16.gmra.mxu0 %vm486_vm1, %v7540_v40  ;;  %v4008_v40 = vmax.f32 %v7606_v34, 0.0  ;;  %v3975_v47 = vadd.f32 %v7441_v60, %v3932_v63  ;;  %v3933_v15 = vmul.f32 %v7404_v27, %v3890_v17  ;;  %v5016_v34 = vld [vmem:[%s8412_s2 + $0xd0] sm:$0xff]  ;;  %5153 = vperm.xlu1 %6253, %v5015_v1  }
 0x10d   : > { %v1211_v16 = vadd.f32 %v1046_v23, %v7343_v56  ;;  %v7637_v45 = vadd.f32 %v5955_v0, %v1212_v9  ;;  %6133 = vmatprep.mubr.msk.bf16.mxu0 %vm486_vm1, %v7542_v7  ;;  %v4489_v56 = vadd.f32 %v7441_v60, %v4446_v35  ;;  %v3974_v9 = vadd.f32 %v7441_v60, %v3931_v24 }
 0x10e   : > { %v5921_v13 = vpop.f32.mrf.mxu1  ;;  %6096 = vmatmul.mubr.msk.bf16.gmra.mxu1 %vm486_vm1, %v7542_v7  ;;  %v1563_v3 = vpop.f32.mrf.mxu0  ;;  %v4009_v7 = vmax.f32 %v3973_v53, 0.0  ;;  %v3934_v35 = vmul.f32 %v7404_v27, %v3891_v21  ;;  %v4490_v63 = vadd.f32 %v7441_v60, %v4447_v33  ;;  %v4491_v17 = vadd.f32 %v7441_v60, %v4448_v4  ;;  %5158 = vperm.xlu0 %6252, %v5016_v34  }
 0x10f   : > { %v1216_v61 = vadd.f32 %v5921_v13, %v7357_v41  ;;  %v7657_v22 = vadd.f32 %v1563_v3, %v1210_v46  ;;  %6139 = vmatprep.mubr.msk.bf16.mxu1 %vm486_vm1, %v7556_v14  ;;  %v4449_v0 = vmul.f32 %v7404_v27, %v4406_v11  ;;  %v4450_v41 = vmul.f32 %v7404_v27, %v4407_v28  ;;  %v5017_v46 = vld [vmem:[%s8412_s2 + $0xd8] sm:$0xff] }
 0x110   : > { %v1059_v24 = vpop.f32.mrf.mxu1  ;;  %v5956_v23 = vpop.f32.mrf.mxu0  ;;  %v7672_v21 = vpack.c.bf16 %v4523_v30, %v4522_v29  ;;  %v4524_v33 = vmax.f32 %v7643_v48, 0.0  ;;  %v4525_v13 = vmax.f32 %v4489_v56, 0.0  ;;  %v4010_v11 = vmax.f32 %v3974_v9, 0.0  ;;  %v3893_v56 = vld [vmem:[%s6363_s12 + $0x9d] sm:$0xff]  ;;  %5163 = vperm.xlu1 %6253, %v5017_v46  }
 0x111   : > { %8427 = vst [vmem:[#allocation10_spill] sm:$0xff] %v7657_v22  ;;  %v1214_v14 = vadd.f32 %v1059_v24, %v7368_v51  ;;  %v7670_v53 = vadd.f32 %v5956_v23, %v1213_v55  ;;  %v4011_v3 = vmax.f32 %v3975_v47, 0.0  ;;  %v7676_v28 = vadd.f32 %v7441_v60, %v3933_v15  ;;  %v3892_v22 = vld [vmem:[%s6363_s12 + $0x95] sm:$0xff]  ;;  %v5018_v51 = vld [vmem:[%s8412_s2 + $0xe0] sm:$0xff] }
 0x112   : > { %v5922_v1 = vpop.f32.mrf.mxu1  ;;  %v1566_v4 = vpop.f32.mrf.mxu0  ;;  %v7685_v30 = vpack.c.bf16 %v4009_v7, %v4008_v40  ;;  %v3977_v48 = vadd.f32 %v7441_v60, %v3934_v35  ;;  %v4526_v15 = vmax.f32 %v4490_v63, 0.0  ;;  %v4527_v34 = vmax.f32 %v4491_v17, 0.0  ;;  %v5019_v40 = vld [vmem:[%s8412_s2 + $0xe8] sm:$0xff]  ;;  %v4409_v23 = vld [vmem:[%s6363_s12 + $0x7e] sm:$0xff]  ;;  %5168 = vperm.xlu0 %6252, %v5018_v51  }
 0x113   : > { %v1217_v55 = vadd.f32 %v5922_v1, %v7380_v18  ;;  %v7683_v29 = vadd.f32 %v1566_v4, %v1211_v16  ;;  %v4492_v24 = vadd.f32 %v7441_v60, %v4449_v0  ;;  %v4493_v18 = vadd.f32 %v7441_v60, %v4450_v41  ;;  %v4408_v16 = vld [vmem:[%s6363_s12 + $0x76] sm:$0xff]  ;;  %v3895_v4 = vld [vmem:[%s6363_s12 + $0xad] sm:$0xff] }
 0x114   : > { %v1062_v9 = vpop.f32.mrf.mxu1  ;;  %v5959_v47 = vpop.f32.mrf.mxu0  ;;  %6134 = vmatmul.mubr.msk.bf16.gmra.mxu0 %vm486_vm1, %v7558_v32  ;;  %v3935_v32 = vmul.f32 %v7404_v27, %v3892_v22  ;;  %v4558_v0 = vpack.c.bf16 %v4525_v13, %v4524_v33  ;;  %v7706_v41 = vpack.c.bf16 %v4011_v3, %v4010_v11  ;;  %v5020_v22 = vld [vmem:[%s8412_s2 + $0xf0] sm:$0xff]  ;;  %v4451_v33 = vmul.f32 %v7404_v27, %v4408_v16  ;;  %v4410_v13 = vld [vmem:[%s6363_s12 + $0x86] sm:$0xff] }
 0x115   : > { %v1215_v7 = vadd.f32 %v1062_v9, %v7395_v42  ;;  %v7698_v35 = vadd.f32 %v5959_v47, %v1216_v61  ;;  %6177 = vmatprep.mubr.msk.bf16.mxu0 %vm486_vm1, %v7611_v49  ;;  %v4012_v42 = vmax.f32 %v7676_v28, 0.0  ;;  %v3936_v61 = vmul.f32 %v7404_v27, %v3893_v56  ;;  %v3894_v49 = vld [vmem:[%s6363_s12 + $0xa5] sm:$0xff]  ;;  %v4411_v11 = vld [vmem:[%s6363_s12 + $0x8e] sm:$0xff]  ;;  %5173 = vperm.xlu1 %6253, %v5019_v40  }
 0x116   : > { %v5925_v63 = vpop.f32.mrf.mxu1  ;;  %6140 = vmatmul.mubr.msk.bf16.vlgmr.msra.gmra.mxu1 %vm486_vm1, %v7576_v37  ;;  %v1579_v17 = vpop.f32.mrf.mxu0  ;;  %v4013_v37 = vmax.f32 %v3977_v48, 0.0  ;;  %v7723_v51 = vpack.c.bf16 %v4527_v34, %v4526_v15  ;;  %v4528_v56 = vmax.f32 %v4492_v24, 0.0  ;;  %v7733_v47 = vadd.f32 %v7441_v60, %v3935_v32  ;;  %v3896_v15 = vld [vmem:[%s6363_s12 + $0xb5] sm:$0xff]  ;;  %v3897_v34 = vld [vmem:[%s6363_s12 + $0xbd] sm:$0xff]  ;;  %5178 = vperm.xlu0 %6252, %v5020_v22  }
 0x117   : > { %v1220_v46 = vadd.f32 %v5925_v63, %v7415_v43  ;;  %v7715_v1 = vadd.f32 %v1579_v17, %v1214_v14  ;;  %6143 = vmatprep.mubr.msk.bf16.mxu1 %vm486_vm1, %v7594_v59  ;;  %v4529_v43 = vmax.f32 %v4493_v18, 0.0  ;;  %v4452_v14 = vmul.f32 %v7404_v27, %v4409_v23  ;;  %v5021_v59 = vld [vmem:[%s8412_s2 + $0xf8] sm:$0xff]  ;;  %v5022_v32 = vld [vmem:[%s8412_s2 + $0x100] sm:$0xff] }
 0x118   : > { %v1075_v3 = vpop.f32.mrf.mxu1  ;;  %v5960_v28 = vpop.f32.mrf.mxu0  ;;  %v3937_v16 = vmul.f32 %v7404_v27, %v3894_v49  ;;  %v7739_v40 = vadd.f32 %v7441_v60, %v3936_v61  ;;  %v3938_v23 = vmul.f32 %v7404_v27, %v3895_v4  ;;  %v7750_v49 = vpack.c.bf16 %v4013_v37, %v4012_v42  ;;  %v4412_v22 = vld [vmem:[%s6363_s12 + $0x96] sm:$0xff]  ;;  %v4413_v42 = vld [vmem:[%s6363_s12 + $0x9e] sm:$0xff]  ;;  %v5023_v37 = vld [vmem:[%s8412_s2 + $0x108] sm:$0xff] }
 0x119   : > { %v1218_v48 = vadd.f32 %v1075_v3, %v7435_v8  ;;  %v7730_v9 = vadd.f32 %v5960_v28, %v1217_v55  ;;  %v4453_v8 = vmul.f32 %v7404_v27, %v4410_v13  ;;  %v4454_v55 = vmul.f32 %v7404_v27, %v4411_v11  ;;  %5183 = vperm.xlu1 %6253, %v5021_v59  }
 0x11a   : > { %v5926_v24 = vpop.f32.mrf.mxu1  ;;  %v1582_v18 = vpop.f32.mrf.mxu0  ;;  %v7753_v61 = vadd.f32 %v7441_v60, %v4451_v33  ;;  %v7758_v11 = vpack.c.bf16 %v4529_v43, %v4528_v56  ;;  %v7761_v3 = vadd.f32 %v7441_v60, %v4452_v14  ;;  %v3980_v56 = vadd.f32 %v7441_v60, %v3937_v16  ;;  %5188 = vperm.xlu0 %6252, %v5022_v32  }
 0x11b   : > { %v1221_v63 = vadd.f32 %v5926_v24, %v7456_v26  ;;  %v7748_v17 = vadd.f32 %v1582_v18, %v1215_v7  ;;  %v3939_v26 = vmul.f32 %v7404_v27, %v3896_v15  ;;  %v3940_v7 = vmul.f32 %v7404_v27, %v3897_v34  ;;  %v3899_v18 = vld [vmem:[%s6363_s12 + $0xcd] sm:$0xff] }
 0x11c   : > { %v1078_v4 = vpop.f32.mrf.mxu1  ;;  %v5963_v13 = vpop.f32.mrf.mxu0  ;;  %6178 = vmatmul.mubr.msk.bf16.vlgmr.msra.gmra.mxu0 %vm486_vm1, %v7672_v21  ;;  %v4014_v21 = vmax.f32 %v7733_v47, 0.0  ;;  %v3981_v59 = vadd.f32 %v7441_v60, %v3938_v23  ;;  %v4496_v15 = vadd.f32 %v7441_v60, %v4453_v8  ;;  %v5024_v47 = vld [vmem:[%s8412_s2 + $0x110] sm:$0xff]  ;;  %v4456_v24 = vmul.f32 %v7404_v27, %v4413_v42  ;;  %v4414_v42 = vld [vmem:[%s6363_s12 + $0xa6] sm:$0xff] }
 0x11d   : > { %v1219_v33 = vadd.f32 %v1078_v4, %v7478_v19  ;;  %v7770_v28 = vadd.f32 %v5963_v13, %v1220_v46  ;;  %6181 = vmatprep.mubr.msk.bf16.mxu0 %vm486_vm1, %v4558_v0  ;;  %v4497_v19 = vadd.f32 %v7441_v60, %v4454_v55  ;;  %v4455_v46 = vmul.f32 %v7404_v27, %v4412_v22  ;;  %v3898_v0 = vld [vmem:[%s6363_s12 + $0xc5] sm:$0xff] }
 0x11e   : > { %v5929_v43 = vpop.f32.mrf.mxu1  ;;  %6144 = vmatmul.mubr.msk.bf16.gmra.mxu1 %vm486_vm1, %v7627_v38  ;;  %v1595_v14 = vpop.f32.mrf.mxu0  ;;  %v4015_v38 = vmax.f32 %v7739_v40, 0.0  ;;  %5193 = vperm.xlu1 %6253, %v5023_v37   ;;  %v4530_v55 = vmax.f32 %v7753_v61, 0.0  ;;  %v4531_v32 = vmax.f32 %v7761_v3, 0.0  ;;  %v4016_v4 = vmax.f32 %v3980_v56, 0.0  ;;  %v4415_v37 = vld [vmem:[%s6363_s12 + $0xae] sm:$0xff] }
 0x11f   : > { %8428 = vst [vmem:[#allocation11_spill] sm:$0xff] %v7770_v28  ;;  %v1224_v16 = vadd.f32 %v5929_v43, %v7497_v10  ;;  %v7786_v34 = vadd.f32 %v1595_v14, %v1218_v48  ;;  %6147 = vmatprep.mubr.msk.bf16.mxu1 %vm486_vm1, %v7685_v30  ;;  %v3982_v10 = vadd.f32 %v7441_v60, %v3939_v26  ;;  %v5025_v30 = vld [vmem:[%s8412_s2 + $0x118] sm:$0xff]  ;;  %v4017_v43 = vmax.f32 %v3981_v59, 0.0 }
 0x120   : > { %v1091_v23 = vpop.f32.mrf.mxu1  ;;  %v5964_v8 = vpop.f32.mrf.mxu0  ;;  %v3983_v48 = vadd.f32 %v7441_v60, %v3940_v7  ;;  %v3941_v13 = vmul.f32 %v7404_v27, %v3898_v0  ;;  %5198 = vperm.xlu0 %6252, %v5024_v47   ;;  %v4532_v26 = vmax.f32 %v4496_v15, 0.0  ;;  %v4533_v7 = vmax.f32 %v4497_v19, 0.0 }
 0x121   : > { %8429 = vst [vmem:[#allocation12_spill] sm:$0xff] %v7786_v34  ;;  %v1222_v40 = vadd.f32 %v1091_v23, %v7515_v39  ;;  %v7801_v22 = vadd.f32 %v5964_v8, %v1221_v63  ;;  %v3942_v14 = vmul.f32 %v7404_v27, %v3899_v18  ;;  %v4498_v39 = vadd.f32 %v7441_v60, %v4455_v46 }
 0x122   : > { %v5930_v61 = vpop.f32.mrf.mxu1  ;;  %v1598_v3 = vpop.f32.mrf.mxu0  ;;  %v4499_v63 = vadd.f32 %v7441_v60, %v4456_v24  ;;  %5203 = vperm.xlu1 %6253, %v5025_v30   ;;  %v4018_v59 = vmax.f32 %v3982_v10, 0.0  ;;  %v4019_v15 = vmax.f32 %v3983_v48, 0.0  ;;  %v4457_v19 = vmul.f32 %v7404_v27, %v4414_v42  ;;  %v4416_v30 = vld [vmem:[%s6363_s12 + $0xb6] sm:$0xff]  ;;  %v4417_v42 = vld [vmem:[%s6363_s12 + $0xbe] sm:$0xff] }
 0x123   : > { %v1225_v34 = vadd.f32 %v5930_v61, %v7531_v44  ;;  %v7808_v28 = vadd.f32 %v1598_v3, %v1219_v33  ;;  %v4458_v44 = vmul.f32 %v7404_v27, %v4415_v37  ;;  %v3900_v33 = vld [vmem:[%s6363_s12 + $0xd5] sm:$0xff]  ;;  %v4043_v24 = vpack.c.bf16 %v4015_v38, %v4014_v21  ;;  %v3902_v37 = vld [vmem:[%s6363_s12 + $0xe5] sm:$0xff] }
 0x124   : > { %v1094_v56 = vpop.f32.mrf.mxu1  ;;  %v5967_v0 = vpop.f32.mrf.mxu0  ;;  %6182 = vmatmul.mubr.msk.bf16.gmra.mxu0 %vm486_vm1, %v7723_v51  ;;  %v3984_v18 = vadd.f32 %v7441_v60, %v3941_v13  ;;  %v3901_v51 = vld [vmem:[%s6363_s12 + $0xdd] sm:$0xff]  ;;  %v4561_v10 = vpack.c.bf16 %v4531_v32, %v4530_v55  ;;  %v4044_v48 = vpack.c.bf16 %v4017_v43, %v4016_v4  ;;  %v4534_v21 = vmax.f32 %v4498_v39, 0.0  ;;  %v4418_v61 = vld [vmem:[%s6363_s12 + $0xc6] sm:$0xff]  ;;  %v4419_v39 = vld [vmem:[%s6363_s12 + $0xce] sm:$0xff] }
 0x125   : > { %v1223_v46 = vadd.f32 %v1094_v56, %v7546_v54  ;;  %v7818_v47 = vadd.f32 %v5967_v0, %v1224_v16  ;;  %6185 = vmatprep.mubr.msk.bf16.mxu0 %vm486_vm1, %v7758_v11  ;;  %v4562_v54 = vpack.c.bf16 %v4533_v7, %v4532_v26  ;;  %v3985_v16 = vadd.f32 %v7441_v60, %v3942_v14 }
 0x126   : > { %v5933_v23 = vpop.f32.mrf.mxu1  ;;  %6148 = vmatmul.mubr.msk.bf16.gmra.mxu1 %vm486_vm1, %v7706_v41  ;;  %v1611_v8 = vpop.f32.mrf.mxu0  ;;  %v4535_v38 = vmax.f32 %v4499_v63, 0.0  ;;  %v3943_v13 = vmul.f32 %v7404_v27, %v3900_v33  ;;  %v3903_v41 = vld [vmem:[%s6363_s12 + $0xed] sm:$0xff]  ;;  %v7837_v4 = vpack.c.bf16 %v4019_v15, %v4018_v59  ;;  %v4500_v3 = vadd.f32 %v7441_v60, %v4457_v19 }
 0x127   : > { %v7829_v11 = vadd.f32 %v1611_v8, %v1222_v40  ;;  %6151 = vmatprep.mubr.msk.bf16.mxu1 %vm486_vm1, %v7750_v49  ;;  %v4501_v40 = vadd.f32 %v7441_v60, %v4458_v44  ;;  %v3944_v43 = vmul.f32 %v7404_v27, %v3901_v51  ;;  %v4020_v49 = vmax.f32 %v3984_v18, 0.0 }
 0x128   : > { %v1107_v55 = vpop.f32.mrf.mxu1  ;;  %v5968_v32 = vpop.f32.mrf.mxu0  ;;  %v4459_v7 = vmul.f32 %v7404_v27, %v4416_v30  ;;  %v4460_v14 = vmul.f32 %v7404_v27, %v4417_v42  ;;  %v4021_v0 = vmax.f32 %v3985_v16, 0.0  ;;  %v3945_v59 = vmul.f32 %v7404_v27, %v3902_v37 }
 0x129   : > { %v7842_v26 = vadd.f32 %v5968_v32, %v1225_v34  ;;  %v3946_v15 = vmul.f32 %v7404_v27, %v3903_v41  ;;  %v4461_v19 = vmul.f32 %v7404_v27, %v4418_v61  ;;  %v1228_v44 = vadd.f32 %v5933_v23, %v7266_v12  ;;  %v3904_v41 = vld [vmem:[%s6363_s12 + $0xf5] sm:$0xff] }
 0x12a   : > { %v5934_v63 = vpop.f32.mrf.mxu1  ;;  %v1614_v56 = vpop.f32.mrf.mxu0  ;;  %v4563_v33 = vpack.c.bf16 %v4535_v38, %v4534_v21  ;;  %v7854_v18 = vadd.f32 %v7441_v60, %v3943_v13  ;;  %v4536_v16 = vmax.f32 %v4500_v3, 0.0  ;;  %v4537_v30 = vmax.f32 %v4501_v40, 0.0 }
 0x12b   : > { %v7851_v34 = vadd.f32 %v1614_v56, %v1223_v46  ;;  %v7858_v42 = vadd.f32 %v7441_v60, %v3944_v43  ;;  %v4462_v37 = vmul.f32 %v7404_v27, %v4419_v39  ;;  %v1226_v12 = vadd.f32 %v1107_v55, %v7279_v20  ;;  %v4420_v43 = vld [vmem:[%s6363_s12 + $0xd6] sm:$0xff] }
 0x12c   : > { %v1110_v51 = vpop.f32.mrf.mxu1  ;;  %v5971_v8 = vpop.f32.mrf.mxu0  ;;  %6186 = vmatmul.mubr.msk.bf16.gmra.mxu0 %vm486_vm1, %v4561_v10  ;;  %v4502_v23 = vadd.f32 %v7441_v60, %v4459_v7  ;;  %v4503_v21 = vadd.f32 %v7441_v60, %v4460_v14  ;;  %v3905_v10 = vld [vmem:[%s6363_s12 + $0xfd] sm:$0xff]  ;;  %v4046_v61 = vpack.c.bf16 %v4021_v0, %v4020_v49  ;;  %v3988_v32 = vadd.f32 %v7441_v60, %v3945_v59 }
 0x12d   : > { %v7863_v46 = vadd.f32 %v5971_v8, %v1228_v44  ;;  %6189 = vmatprep.mubr.msk.bf16.mxu0 %vm486_vm1, %v4562_v54  ;;  %v3989_v20 = vadd.f32 %v7441_v60, %v3946_v15  ;;  %v4504_v55 = vadd.f32 %v7441_v60, %v4461_v19  ;;  %v1229_v54 = vadd.f32 %v5934_v63, %v7286_v62  ;;  %v4421_v63 = vld [vmem:[%s6363_s12 + $0xde] sm:$0xff]  ;;  %v3907_v44 = vld [vmem:[%s6363_s12 + $0x10d] sm:$0xff] }
 0x12e   : > { %v5937_v38 = vpop.f32.mrf.mxu1  ;;  %6152 = vmatmul.mubr.msk.bf16.gmra.mxu1 %vm486_vm1, %v4043_v24  ;;  %v1627_v13 = vpop.f32.mrf.mxu0  ;;  %v4022_v40 = vmax.f32 %v7854_v18, 0.0  ;;  %v3947_v24 = vmul.f32 %v7404_v27, %v3904_v41  ;;  %v4564_v14 = vpack.c.bf16 %v4537_v30, %v4536_v16  ;;  %v4023_v39 = vmax.f32 %v7858_v42, 0.0  ;;  %v3906_v19 = vld [vmem:[%s6363_s12 + $0x105] sm:$0xff] }
 0x12f   : > { %v7874_v3 = vadd.f32 %v1627_v13, %v1226_v12  ;;  %6155 = vmatprep.mubr.msk.bf16.mxu1 %vm486_vm1, %v4044_v48  ;;  %v4505_v56 = vadd.f32 %v7441_v60, %v4462_v37  ;;  %v3948_v62 = vmul.f32 %v7404_v27, %v3905_v10  ;;  %v1227_v48 = vadd.f32 %v1110_v51, %v7299_v5  ;;  %v4422_v37 = vld [vmem:[%s6363_s12 + $0xe6] sm:$0xff]  ;;  %v4423_v12 = vld [vmem:[%s6363_s12 + $0xee] sm:$0xff] }
 0x130   : > { %v1123_v49 = vpop.f32.mrf.mxu1  ;;  %v5972_v7 = vpop.f32.mrf.mxu0  ;;  %v4538_v59 = vmax.f32 %v4502_v23, 0.0  ;;  %v4539_v15 = vmax.f32 %v4503_v21, 0.0  ;;  %v4024_v16 = vmax.f32 %v3988_v32, 0.0  ;;  %v4025_v30 = vmax.f32 %v3989_v20, 0.0 }
 0x131   : > { %v7885_v0 = vadd.f32 %v5972_v7, %v1229_v54  ;;  %v4540_v42 = vmax.f32 %v4504_v55, 0.0  ;;  %v4463_v41 = vmul.f32 %v7404_v27, %v4420_v43  ;;  %v1232_v10 = vadd.f32 %v5937_v38, %v7316_v2 }
 0x132   : > { %v5938_v18 = vpop.f32.mrf.mxu1  ;;  %v1630_v8 = vpop.f32.mrf.mxu0  ;;  %v7896_v5 = vadd.f32 %v7441_v60, %v3947_v24  ;;  %v4464_v51 = vmul.f32 %v7404_v27, %v4421_v63  ;;  %v4541_v32 = vmax.f32 %v4505_v56, 0.0  ;;  %v7901_v20 = vadd.f32 %v7441_v60, %v3948_v62 }
 0x133   : > { %v7893_v13 = vadd.f32 %v1630_v8, %v1227_v48  ;;  %v3949_v55 = vmul.f32 %v7404_v27, %v3906_v19  ;;  %v3950_v54 = vmul.f32 %v7404_v27, %v3907_v44  ;;  %v1230_v2 = vadd.f32 %v1123_v49, %v7328_v25 }
 0x134   : > { %v1126_v23 = vpop.f32.mrf.mxu1  ;;  %v5975_v21 = vpop.f32.mrf.mxu0  ;;  %6190 = vmatmul.mubr.msk.bf16.gmra.mxu0 %vm486_vm1, %v4563_v33  ;;  %v4465_v24 = vmul.f32 %v7404_v27, %v4422_v37  ;;  %v4466_v33 = vmul.f32 %v7404_v27, %v4423_v12  ;;  %v4047_v56 = vpack.c.bf16 %v4023_v39, %v4022_v40  ;;  %v4565_v62 = vpack.c.bf16 %v4539_v15, %v4538_v59  ;;  %v4424_v40 = vld [vmem:[%s6363_s12 + $0xf6] sm:$0xff]  ;;  %v4425_v39 = vld [vmem:[%s6363_s12 + $0xfe] sm:$0xff] }
 0x135   : > { %v7906_v38 = vadd.f32 %v5975_v21, %v1232_v10  ;;  %6193 = vmatprep.mubr.msk.bf16.mxu0 %vm486_vm1, %v4564_v14  ;;  %v4048_v63 = vpack.c.bf16 %v4025_v30, %v4024_v16  ;;  %v7914_v25 = vadd.f32 %v7441_v60, %v4463_v41  ;;  %v1233_v49 = vadd.f32 %v5938_v18, %v7341_v58  ;;  %v4426_v16 = vld [vmem:[%s6363_s12 + $0x106] sm:$0xff]  ;;  %v3909_v12 = vld [vmem:[%s6363_s12 + $0x11d] sm:$0xff]  ;;  %v4427_v10 = vld [vmem:[%s6363_s12 + $0x10e] sm:$0xff] }
 0x136   : > { %v5941_v43 = vpop.f32.mrf.mxu1  ;;  %6156 = vmatmul.mubr.msk.bf16.gmra.mxu1 %vm486_vm1, %v7837_v4  ;;  %v1643_v7 = vpop.f32.mrf.mxu0  ;;  %v4026_v48 = vmax.f32 %v7896_v5, 0.0  ;;  %v4507_v19 = vadd.f32 %v7441_v60, %v4464_v51  ;;  %v3908_v4 = vld [vmem:[%s6363_s12 + $0x115] sm:$0xff]  ;;  %v4566_v44 = vpack.c.bf16 %v4541_v32, %v4540_v42  ;;  %v4027_v8 = vmax.f32 %v7901_v20, 0.0 }
 0x137   : > { %v7917_v14 = vadd.f32 %v1643_v7, %v1230_v2  ;;  %6159 = vmatprep.mubr.msk.bf16.mxu1 %vm486_vm1, %v4046_v61  ;;  %v3992_v58 = vadd.f32 %v7441_v60, %v3949_v55  ;;  %v3993_v18 = vadd.f32 %v7441_v60, %v3950_v54  ;;  %v1231_v61 = vadd.f32 %v1126_v23, %v7355_v6  ;;  %v3910_v54 = vld [vmem:[%s6363_s12 + $0x125] sm:$0xff] }
 0x138   : > { %v1139_v59 = vpop.f32.mrf.mxu1  ;;  %v5976_v15 = vpop.f32.mrf.mxu0  ;;  %v4508_v41 = vadd.f32 %v7441_v60, %v4465_v24  ;;  %v4509_v37 = vadd.f32 %v7441_v60, %v4466_v33  ;;  %v4542_v51 = vmax.f32 %v7914_v25, 0.0  ;;  %v3951_v21 = vmul.f32 %v7404_v27, %v3908_v4 }
 0x139   : > { %v7930_v30 = vadd.f32 %v5976_v15, %v1233_v49  ;;  %v4467_v32 = vmul.f32 %v7404_v27, %v4424_v40  ;;  %v4468_v20 = vmul.f32 %v7404_v27, %v4425_v39  ;;  %v1236_v6 = vadd.f32 %v5941_v43, %v7365_v57  ;;  %v7949_v49 = vld [vmem:[%s8413_s3] ss:$0 sm:$0xff]  ;;  %v3911_v57 = vld [vmem:[%s6363_s12 + $0x12d] sm:$0xff] }
 0x13a   : > { %v5942_v5 = vpop.f32.mrf.mxu1  ;;  %v1646_v42 = vpop.f32.mrf.mxu0  ;;  %v4543_v55 = vmax.f32 %v4507_v19, 0.0  ;;  %v4469_v2 = vmul.f32 %v7404_v27, %v4426_v16  ;;  %v4028_v7 = vmax.f32 %v3992_v58, 0.0  ;;  %v4029_v25 = vmax.f32 %v3993_v18, 0.0 }
 0x13b   : > { %v7941_v23 = vadd.f32 %v1646_v42, %v1231_v61  ;;  %v3952_v4 = vmul.f32 %v7949_v49, %v3909_v12  ;;  %v4470_v43 = vmul.f32 %v7949_v49, %v4427_v10  ;;  %v1234_v19 = vadd.f32 %v1139_v59, %v7378_v50  ;;  %v8430_v50 = vld [vmem:[#allocation3_spill] sm:$0xff] }
 0x13c   : > { %v1142_v24 = vpop.f32.mrf.mxu1  ;;  %v5979_v33 = vpop.f32.mrf.mxu0  ;;  %6194 = vmatmul.mubr.msk.bf16.gmra.mxu0 %vm486_vm1, %v4565_v62  ;;  %v4544_v27 = vmax.f32 %v4508_v41, 0.0  ;;  %v4545_v62 = vmax.f32 %v4509_v37, 0.0  ;;  %v7960_v58 = vadd.f32 %v7441_v60, %v3951_v21  ;;  %v4510_v18 = vadd.f32 %v7441_v60, %v4467_v32 }
 0x13d   : > { %v7955_v40 = vadd.f32 %v5979_v33, %v1236_v6  ;;  %6197 = vmatprep.mubr.msk.bf16.mxu0 %vm486_vm1, %v4566_v44  ;;  %v4511_v16 = vadd.f32 %v7441_v60, %v4468_v20  ;;  %v3953_v61 = vmul.f32 %v7949_v49, %v3910_v54  ;;  %v1237_v59 = vadd.f32 %v5942_v5, %v8430_v50  ;;  %v8431_v5 = vld [vmem:[#allocation4_spill] sm:$0xff]  ;;  %v3913_v50 = vld [vmem:[%s6363_s12 + $0x13d] sm:$0xff] }
 0x13e   : > { %v5945_v39 = vpop.f32.mrf.mxu1  ;;  %6160 = vmatmul.mubr.msk.bf16.gmra.mxu1 %vm486_vm1, %v4047_v56  ;;  %v1659_v15 = vpop.f32.mrf.mxu0  ;;  %v3954_v56 = vmul.f32 %v7949_v49, %v3911_v57  ;;  %v4512_v41 = vadd.f32 %v7441_v60, %v4469_v2  ;;  %v4049_v10 = vpack.c.bf16 %v4027_v8, %v4026_v48  ;;  %v4567_v42 = vpack.c.bf16 %v4543_v55, %v4542_v51  ;;  %v4429_v57 = vld [vmem:[%s6363_s12 + $0x11e] sm:$0xff]  ;;  %v4430_v2 = vld [vmem:[%s6363_s12 + $0x126] sm:$0xff] }
 0x13f   : > { %v7966_v44 = vadd.f32 %v1659_v15, %v1234_v19  ;;  %6163 = vmatprep.mubr.msk.bf16.mxu1 %vm486_vm1, %v4048_v63  ;;  %v3995_v21 = vadd.f32 %v7441_v60, %v3952_v4  ;;  %v4513_v32 = vadd.f32 %v7441_v60, %v4470_v43  ;;  %v1235_v20 = vadd.f32 %v1142_v24, %v8431_v5  ;;  %v4428_v63 = vld [vmem:[%s6363_s12 + $0x116] sm:$0xff]  ;;  %v7983_v60 = vld [vmem:[%s8414_s4] ss:$0 sm:$0xff]  ;;  %v4431_v24 = vld [vmem:[%s6363_s12 + $0x12e] sm:$0xff] }
 0x140   : > { %v1155_v37 = vpop.f32.mrf.mxu1  ;;  %v5980_v12 = vpop.f32.mrf.mxu0  ;;  %v4050_v54 = vpack.c.bf16 %v4029_v25, %v4028_v7  ;;  %v4568_v33 = vpack.c.bf16 %v4545_v62, %v4544_v27  ;;  %v4030_v48 = vmax.f32 %v7960_v58, 0.0  ;;  %v4546_v8 = vmax.f32 %v4510_v18, 0.0  ;;  %v8432_v7 = vld [vmem:[#allocation5_spill] sm:$0xff]  ;;  %v8433_v5 = vld [vmem:[#allocation6_spill] sm:$0xff] }
 0x141   : > { %v7974_v6 = vadd.f32 %v5980_v12, %v1237_v59  ;;  %v4547_v51 = vmax.f32 %v4511_v16, 0.0  ;;  %v3996_v55 = vadd.f32 %v7983_v60, %v3953_v61  ;;  %v1240_v25 = vadd.f32 %v5945_v39, %v8432_v7  ;;  %v3912_v62 = vld [vmem:[%s6363_s12 + $0x135] sm:$0xff] }
 0x142   : > { %v5946_v19 = vpop.f32.mrf.mxu1  ;;  %v1662_v15 = vpop.f32.mrf.mxu0  ;;  %v3997_v43 = vadd.f32 %v7983_v60, %v3954_v56  ;;  %v4548_v27 = vmax.f32 %v4512_v41, 0.0  ;;  %v4549_v16 = vmax.f32 %v4513_v32, 0.0  ;;  %v4471_v59 = vmul.f32 %v7949_v49, %v4428_v63 }
 0x143   : > { %v7988_v4 = vadd.f32 %v1662_v15, %v1235_v20  ;;  %v4472_v12 = vmul.f32 %v7949_v49, %v4429_v57  ;;  %v4473_v61 = vmul.f32 %v7949_v49, %v4430_v2  ;;  %v1238_v39 = vadd.f32 %v1155_v37, %v8433_v5  ;;  %v8434_v2 = vld [vmem:[#allocation7_spill] sm:$0xff] }
 0x144   : > { %v1158_v58 = vpop.f32.mrf.mxu1  ;;  %v5983_v18 = vpop.f32.mrf.mxu0  ;;  %6198 = vmatmul.mubr.msk.bf16.gmra.mxu0 %vm486_vm1, %v4567_v42  ;;  %v4031_v56 = vmax.f32 %v3995_v21, 0.0  ;;  %v4474_v41 = vmul.f32 %v7949_v49, %v4431_v24  ;;  %v4569_v32 = vpack.c.bf16 %v4547_v51, %v4546_v8  ;;  %v4032_v7 = vmax.f32 %v3996_v55, 0.0 }
 0x145   : > { %v7998_v20 = vadd.f32 %v5983_v18, %v1240_v25  ;;  %6201 = vmatprep.mubr.msk.bf16.mxu0 %vm486_vm1, %v4568_v33  ;;  %v3955_v63 = vmul.f32 %v7949_v49, %v3912_v62  ;;  %v3956_v57 = vmul.f32 %v7949_v49, %v3913_v50  ;;  %v1241_v37 = vadd.f32 %v5946_v19, %v8434_v2  ;;  %v8435_v62 = vld [vmem:[#allocation8_spill] sm:$0xff]  ;;  %v8436_v19 = vld [vmem:[#allocation9_spill] sm:$0xff] }
 0x146   : > { %v5989_v15 = vpop.f32.mrf.mxu1  ;;  %6164 = vmatmul.mubr.msk.bf16.gmra.mxu1 %vm486_vm1, %v4049_v10  ;;  %v1675_v42 = vpop.f32.mrf.mxu0  ;;  %v4033_v21 = vmax.f32 %v3997_v43, 0.0  ;;  %v4570_v18 = vpack.c.bf16 %v4549_v16, %v4548_v27  ;;  %v4514_v8 = vadd.f32 %v7983_v60, %v4471_v59  ;;  %v4515_v51 = vadd.f32 %v7983_v60, %v4472_v12 }
 0x147   : > { %v2248_v25 = vadd.f32 %v5989_v15, %v7571_v31  ;;  %v8007_v33 = vadd.f32 %v1675_v42, %v1238_v39  ;;  %6167 = vmatprep.mubr.msk.bf16.mxu1 %vm486_vm1, %v4050_v54  ;;  %v4516_v55 = vadd.f32 %v7983_v60, %v4473_v61  ;;  %v1239_v50 = vadd.f32 %v1158_v58, %v8435_v62  ;;  %v4432_v39 = vld [vmem:[%s6363_s12 + $0x136] sm:$0xff]  ;;  %v4433_v54 = vld [vmem:[%s6363_s12 + $0x13e] sm:$0xff]  ;;  %s6226_s12 = smul.u32 288, %s8453_s21 }
 0x148   : > { %v2067_v24 = vpop.f32.mrf.mxu1  ;;  %v5984_v10 = vpop.f32.mrf.mxu0  ;;  %v4517_v31 = vadd.f32 %v7983_v60, %v4474_v41  ;;  %v4051_v42 = vpack.c.bf16 %v4031_v56, %v4030_v48  ;;  %v3998_v27 = vadd.f32 %v7983_v60, %v3955_v63  ;;  %v3999_v16 = vadd.f32 %v7983_v60, %v3956_v57 }
 0x149   : > { %v2246_v5 = vadd.f32 %v2067_v24, %v8436_v19  ;;  %v8015_v2 = vadd.f32 %v5984_v10, %v1241_v37  ;;  %v4052_v58 = vpack.c.bf16 %v4033_v21, %v4032_v7  ;;  %v4550_v37 = vmax.f32 %v4514_v8, 0.0  ;;  %s8275_s30 = scalar_lea.vmem %s8415_s5, %s6226_s12 }
 0x14a   : > { %v5990_v43 = vpop.f32.mrf.mxu1  ;;  %v1678_v15 = vpop.f32.mrf.mxu0  ;;  %v4551_v41 = vmax.f32 %v4515_v51, 0.0  ;;  %v4475_v10 = vmul.f32 %v7949_v49, %v4432_v39  ;;  %v4476_v62 = vmul.f32 %v7949_v49, %v4433_v54  ;;  %v4553_v63 = vmax.f32 %v4517_v31, 0.0 }
 0x14b   : > { %v2249_v59 = vadd.f32 %v5990_v43, %v7603_v52  ;;  %v8023_v12 = vadd.f32 %v1678_v15, %v1239_v50  ;;  %v4552_v52 = vmax.f32 %v4516_v55, 0.0  ;;  %v4034_v21 = vmax.f32 %v3998_v27, 0.0  ;;  %v8437_v55 = vld [vmem:[#allocation10_spill] sm:$0xff] }
 0x14c   : > { %v2070_v61 = vpop.f32.mrf.mxu1  ;;  %v6027_v24 = vpop.f32.mrf.mxu0  ;;  %6202 = vmatmul.mubr.msk.bf16.gmra.mxu0 %vm486_vm1, %v4569_v32  ;;  %v4035_v32 = vmax.f32 %v3999_v16, 0.0  ;;  %v4518_v50 = vadd.f32 %v7983_v60, %v4475_v10 }
 0x14d   : > { %v2247_v48 = vadd.f32 %v2070_v61, %v7620_v36  ;;  %v8029_v56 = vadd.f32 %v6027_v24, %v2248_v25  ;;  %6205 = vmatprep.mubr.msk.bf16.mxu0 %vm486_vm1, %v4570_v18  ;;  %v4571_v25 = vpack.c.bf16 %v4551_v41, %v4550_v37  ;;  %v4519_v18 = vadd.f32 %v7983_v60, %v4476_v62 }
 0x14e   : > { %v5993_v57 = vpop.f32.mrf.mxu1  ;;  %6168 = vmatmul.mubr.msk.bf16.gmra.mxu1 %vm486_vm1, %v4051_v42  ;;  %v2587_v7 = vpop.f32.mrf.mxu0  ;;  %v4572_v39 = vpack.c.bf16 %v4553_v63, %v4552_v52  ;;  %v4053_v15 = vpack.c.bf16 %v4035_v32, %v4034_v21  ;;  %v4554_v16 = vmax.f32 %v4518_v50, 0.0 }
 0x14f   : > { %v2252_v8 = vadd.f32 %v5993_v57, %v7637_v45  ;;  %v8034_v51 = vadd.f32 %v2587_v7, %v2246_v5  ;;  %6171 = vmatprep.mubr.msk.bf16.mxu1 %vm486_vm1, %v4052_v58  ;;  %v4555_v58 = vmax.f32 %v4519_v18, 0.0 }
 0x150   : > { %v2083_v49 = vpop.f32.mrf.mxu1  ;;  %v6028_v36 = vpop.f32.mrf.mxu0 }
 0x151   : > { %v2250_v19 = vadd.f32 %v2083_v49, %v8437_v55  ;;  %v8040_v31 = vadd.f32 %v6028_v36, %v2249_v59  ;;  %v4573_v62 = vpack.c.bf16 %v4555_v58, %v4554_v16 }
 0x152   : > { %v5994_v54 = vpop.f32.mrf.mxu1  ;;  %v2590_v43 = vpop.f32.mrf.mxu0 }
 0x153   : > { %v2253_v45 = vadd.f32 %v5994_v54, %v7670_v53  ;;  %v8043_v5 = vadd.f32 %v2590_v43, %v2247_v48 }
 0x154   : > { %v2086_v42 = vpop.f32.mrf.mxu1  ;;  %v6031_v27 = vpop.f32.mrf.mxu0  ;;  %6206 = vmatmul.mubr.msk.bf16.gmra.mxu0 %vm486_vm1, %v4571_v25  ;;  %v8438_v25 = vld [vmem:[#allocation11_spill] sm:$0xff] }
 0x155   : > { %v2251_v60 = vadd.f32 %v2086_v42, %v7683_v29  ;;  %v8047_v61 = vadd.f32 %v6031_v27, %v2252_v8  ;;  %6209 = vmatprep.mubr.msk.bf16.mxu0 %vm486_vm1, %v4572_v39 }
 0x156   : > { %v5997_v59 = vpop.f32.mrf.mxu1  ;;  %6172 = vmatmul.mubr.msk.bf16.gmra.mxu1 %vm486_vm1, %v4053_v15  ;;  %v2603_v24 = vpop.f32.mrf.mxu0 }
 0x157   : > { %v2256_v53 = vadd.f32 %v5997_v59, %v7698_v35  ;;  %v8052_v37 = vadd.f32 %v2603_v24, %v2250_v19  ;;  %v8439_v19 = vld [vmem:[#allocation12_spill] sm:$0xff] }
 0x158   : > { %v2099_v41 = vpop.f32.mrf.mxu1  ;;  %v6032_v10 = vpop.f32.mrf.mxu0 }
 0x159   : > { %v2254_v48 = vadd.f32 %v2099_v41, %v7715_v1  ;;  %v8055_v52 = vadd.f32 %v6032_v10, %v2253_v45 }
 0x15a   : > { %v5998_v29 = vpop.f32.mrf.mxu1  ;;  %v2606_v63 = vpop.f32.mrf.mxu0 }
 0x15b   : > { %v2257_v57 = vadd.f32 %v5998_v29, %v7730_v9  ;;  %v8058_v7 = vadd.f32 %v2606_v63, %v2251_v60 }
 0x15c   : > { %v2102_v21 = vpop.f32.mrf.mxu1  ;;  %v6035_v32 = vpop.f32.mrf.mxu0  ;;  %6210 = vmatmul.mubr.msk.bf16.gmra.mxu0 %vm486_vm1, %v4573_v62 }
 0x15d   : > { %v2255_v35 = vadd.f32 %v2102_v21, %v7748_v17  ;;  %v8062_v8 = vadd.f32 %v6035_v32, %v2256_v53 }
 0x15e   : > { %v6001_v49 = vpop.f32.mrf.mxu1  ;;  %v2619_v36 = vpop.f32.mrf.mxu0 }
 0x15f   : > { %v2260_v1 = vadd.f32 %v6001_v49, %v8438_v25  ;;  %v8065_v50 = vadd.f32 %v2619_v36, %v2254_v48 }
 0x160   : > { %v2115_v18 = vpop.f32.mrf.mxu1  ;;  %v6036_v55 = vpop.f32.mrf.mxu0 }
 0x161   : > { %v2258_v9 = vadd.f32 %v2115_v18, %v8439_v19  ;;  %v8068_v39 = vadd.f32 %v6036_v55, %v2257_v57 }
 0x162   : > { %v6002_v54 = vpop.f32.mrf.mxu1  ;;  %v2622_v43 = vpop.f32.mrf.mxu0 }
 0x163   : > { %v2261_v15 = vadd.f32 %v6002_v54, %v7801_v22  ;;  %v8071_v45 = vadd.f32 %v2622_v43, %v2255_v35 }
 0x164   : > { %v2118_v17 = vpop.f32.mrf.mxu1  ;;  %v6039_v42 = vpop.f32.mrf.mxu0 }
 0x165   : > { %v2259_v27 = vadd.f32 %v2118_v17, %v7808_v28  ;;  %v8074_v16 = vadd.f32 %v6039_v42, %v2260_v1 }
 0x166   : > { %v6005_v58 = vpop.f32.mrf.mxu1  ;;  %v2635_v60 = vpop.f32.mrf.mxu0 }
 0x167   : > { %v2264_v59 = vadd.f32 %v6005_v58, %v7818_v47  ;;  %v8077_v24 = vadd.f32 %v2635_v60, %v2258_v9 }
 0x168   : > { %v2131_v53 = vpop.f32.mrf.mxu1  ;;  %v6040_v41 = vpop.f32.mrf.mxu0 }
 0x169   : > { %v2262_v10 = vadd.f32 %v2131_v53, %v7829_v11  ;;  %v8080_v62 = vadd.f32 %v6040_v41, %v2261_v15 }
 0x16a   : > { %v6006_v22 = vpop.f32.mrf.mxu1  ;;  %v2638_v48 = vpop.f32.mrf.mxu0 }
 0x16b   : > { %v2265_v29 = vadd.f32 %v6006_v22, %v7842_v26  ;;  %v8083_v63 = vadd.f32 %v2638_v48, %v2259_v27 }
 0x16c   : > { %v2134_v28 = vpop.f32.mrf.mxu1  ;;  %v6043_v57 = vpop.f32.mrf.mxu0 }
 0x16d   : > { %v2263_v21 = vadd.f32 %v2134_v28, %v7851_v34  ;;  %v8086_v32 = vadd.f32 %v6043_v57, %v2264_v59 }
 0x16e   : > { %v6009_v47 = vpop.f32.mrf.mxu1  ;;  %v2651_v35 = vpop.f32.mrf.mxu0 }
 0x16f   : > { %v2268_v49 = vadd.f32 %v6009_v47, %v7863_v46  ;;  %v8089_v36 = vadd.f32 %v2651_v35, %v2262_v10 }
 0x170   : > { %v2147_v11 = vpop.f32.mrf.mxu1  ;;  %v6044_v25 = vpop.f32.mrf.mxu0 }
 0x171   : > { %v2266_v1 = vadd.f32 %v2147_v11, %v7874_v3  ;;  %v8092_v18 = vadd.f32 %v6044_v25, %v2265_v29 }
 0x172   : > { %v6010_v26 = vpop.f32.mrf.mxu1  ;;  %v2654_v55 = vpop.f32.mrf.mxu0 }
 0x173   : > { %v2269_v19 = vadd.f32 %v6010_v26, %v7885_v0  ;;  %v8095_v9 = vadd.f32 %v2654_v55, %v2263_v21 }
 0x174   : > { %v2150_v34 = vpop.f32.mrf.mxu1  ;;  %v6047_v54 = vpop.f32.mrf.mxu0 }
 0x175   : > { %v2267_v43 = vadd.f32 %v2150_v34, %v7893_v13  ;;  %v8098_v15 = vadd.f32 %v6047_v54, %v2268_v49 }
 0x176   : > { %v6013_v46 = vpop.f32.mrf.mxu1  ;;  %v2667_v17 = vpop.f32.mrf.mxu0 }
 0x177   : > { %v2272_v42 = vadd.f32 %v6013_v46, %v7906_v38  ;;  %v8101_v27 = vadd.f32 %v2667_v17, %v2266_v1 }
 0x178   : > { %v2163_v3 = vpop.f32.mrf.mxu1  ;;  %v6048_v58 = vpop.f32.mrf.mxu0 }
 0x179   : > { %v2270_v60 = vadd.f32 %v2163_v3, %v7917_v14  ;;  %v8104_v59 = vadd.f32 %v6048_v58, %v2269_v19 }
 0x17a   : > { %v6014_v0 = vpop.f32.mrf.mxu1  ;;  %v2670_v53 = vpop.f32.mrf.mxu0 }
 0x17b   : > { %v2273_v41 = vadd.f32 %v6014_v0, %v7930_v30  ;;  %v8107_v10 = vadd.f32 %v2670_v53, %v2267_v43 }
 0x17c   : > { %v2166_v13 = vpop.f32.mrf.mxu1  ;;  %v6051_v22 = vpop.f32.mrf.mxu0 }
 0x17d   : > { %v2271_v48 = vadd.f32 %v2166_v13, %v7941_v23  ;;  %v8110_v29 = vadd.f32 %v6051_v22, %v2272_v42 }
 0x17e   : > { %v6017_v38 = vpop.f32.mrf.mxu1  ;;  %v2683_v28 = vpop.f32.mrf.mxu0 }
 0x17f   : > { %v2276_v57 = vadd.f32 %v6017_v38, %v7955_v40  ;;  %v8113_v21 = vadd.f32 %v2683_v28, %v2270_v60 }
 0x180   : > { %v2179_v14 = vpop.f32.mrf.mxu1  ;;  %v6052_v47 = vpop.f32.mrf.mxu0 }
 0x181   : > { %v2274_v35 = vadd.f32 %v2179_v14, %v7966_v44  ;;  %v8116_v49 = vadd.f32 %v6052_v47, %v2273_v41 }
 0x182   : > { %v6018_v30 = vpop.f32.mrf.mxu1  ;;  %v2686_v11 = vpop.f32.mrf.mxu0 }
 0x183   : > { %v2277_v25 = vadd.f32 %v6018_v30, %v7974_v6  ;;  %v8119_v1 = vadd.f32 %v2686_v11, %v2271_v48 }
 0x184   : > { %v2182_v23 = vpop.f32.mrf.mxu1  ;;  %v6055_v26 = vpop.f32.mrf.mxu0 }
 0x185   : > { %v2275_v55 = vadd.f32 %v2182_v23, %v7988_v4  ;;  %v8122_v19 = vadd.f32 %v6055_v26, %v2276_v57 }
 0x186   : > { %v6021_v40 = vpop.f32.mrf.mxu1  ;;  %v2699_v34 = vpop.f32.mrf.mxu0 }
 0x187   : > { %v2280_v54 = vadd.f32 %v6021_v40, %v7998_v20  ;;  %v8125_v43 = vadd.f32 %v2699_v34, %v2274_v35 }
 0x188   : > { %v2195_v44 = vpop.f32.mrf.mxu1  ;;  %v6056_v46 = vpop.f32.mrf.mxu0 }
 0x189   : > { %v2278_v17 = vadd.f32 %v2195_v44, %v8007_v33  ;;  %v8128_v42 = vadd.f32 %v6056_v46, %v2277_v25 }
 0x18a   : > { %v6022_v6 = vpop.f32.mrf.mxu1  ;;  %v2702_v3 = vpop.f32.mrf.mxu0 }
 0x18b   : > { %v2281_v58 = vadd.f32 %v6022_v6, %v8015_v2  ;;  %v8131_v60 = vadd.f32 %v2702_v3, %v2275_v55 }
 0x18c   : > { %v2198_v4 = vpop.f32.mrf.mxu1  ;;  %v6059_v0 = vpop.f32.mrf.mxu0 }
 0x18d   : > { %v2279_v53 = vadd.f32 %v2198_v4, %v8023_v12  ;;  %v8134_v41 = vadd.f32 %v6059_v0, %v2280_v54 }
 0x18e   : > { %v6065_v20 = vpop.f32.mrf.mxu1  ;;  %v2715_v13 = vpop.f32.mrf.mxu0 }
 0x18f   : > { %v3288_v22 = vadd.f32 %v6065_v20, %v8029_v56  ;;  %v8137_v48 = vadd.f32 %v2715_v13, %v2278_v17 }
 0x190   : > { %v3107_v33 = vpop.f32.mrf.mxu1  ;;  %v6060_v38 = vpop.f32.mrf.mxu0 }
 0x191   : > { %v3286_v28 = vadd.f32 %v3107_v33, %v8034_v51  ;;  %v8140_v57 = vadd.f32 %v6060_v38, %v2281_v58 }
 0x192   : > { %v6066_v2 = vpop.f32.mrf.mxu1  ;;  %v2718_v14 = vpop.f32.mrf.mxu0 }
 0x193   : > { %v3289_v47 = vadd.f32 %v6066_v2, %v8040_v31  ;;  %v8143_v35 = vadd.f32 %v2718_v14, %v2279_v53 }
 0x194   : > { %v3110_v12 = vpop.f32.mrf.mxu1  ;;  %v6103_v30 = vpop.f32.mrf.mxu0 }
 0x195   : > { %v3287_v11 = vadd.f32 %v3110_v12, %v8043_v5  ;;  %v8146_v25 = vadd.f32 %v6103_v30, %v3288_v22 }
 0x196   : > { %v6069_v56 = vpop.f32.mrf.mxu1  ;;  %v3627_v23 = vpop.f32.mrf.mxu0 }
 0x197   : > { %v3292_v26 = vadd.f32 %v6069_v56, %v8047_v61  ;;  %v8149_v55 = vadd.f32 %v3627_v23, %v3286_v28 }
 0x198   : > { %v3123_v51 = vpop.f32.mrf.mxu1  ;;  %v6104_v40 = vpop.f32.mrf.mxu0 }
 0x199   : > { %v3290_v34 = vadd.f32 %v3123_v51, %v8052_v37  ;;  %v8152_v54 = vadd.f32 %v6104_v40, %v3289_v47 }
 0x19a   : > { %v6070_v31 = vpop.f32.mrf.mxu1  ;;  %v3630_v44 = vpop.f32.mrf.mxu0 }
 0x19b   : > { %v3293_v46 = vadd.f32 %v6070_v31, %v8055_v52  ;;  %v8155_v17 = vadd.f32 %v3630_v44, %v3287_v11 }
 0x19c   : > { %v3126_v5 = vpop.f32.mrf.mxu1  ;;  %v6107_v6 = vpop.f32.mrf.mxu0 }
 0x19d   : > { %v3291_v3 = vadd.f32 %v3126_v5, %v8058_v7  ;;  %v8158_v58 = vadd.f32 %v6107_v6, %v3292_v26 }
 0x19e   : > { %v6073_v61 = vpop.f32.mrf.mxu1  ;;  %v3643_v4 = vpop.f32.mrf.mxu0 }
 0x19f   : > { %v3296_v0 = vadd.f32 %v6073_v61, %v8062_v8  ;;  %v8161_v53 = vadd.f32 %v3643_v4, %v3290_v34 }
 0x1a0   : > { %v3139_v37 = vpop.f32.mrf.mxu1  ;;  %v6108_v20 = vpop.f32.mrf.mxu0 }
 0x1a1   : > { %v3294_v13 = vadd.f32 %v3139_v37, %v8065_v50  ;;  %v8164_v22 = vadd.f32 %v6108_v20, %v3293_v46 }
 0x1a2   : > { %v6074_v52 = vpop.f32.mrf.mxu1  ;;  %v3646_v33 = vpop.f32.mrf.mxu0 }
 0x1a3   : > { %v3297_v38 = vadd.f32 %v6074_v52, %v8068_v39  ;;  %v8167_v28 = vadd.f32 %v3646_v33, %v3291_v3 }
 0x1a4   : > { %v3142_v7 = vpop.f32.mrf.mxu1  ;;  %v6111_v2 = vpop.f32.mrf.mxu0 }
 0x1a5   : > { %v3295_v14 = vadd.f32 %v3142_v7, %v8071_v45  ;;  %v8170_v47 = vadd.f32 %v6111_v2, %v3296_v0 }
 0x1a6   : > { %v6077_v8 = vpop.f32.mrf.mxu1  ;;  %v3659_v12 = vpop.f32.mrf.mxu0 }
 0x1a7   : > { %v3300_v30 = vadd.f32 %v6077_v8, %v8074_v16  ;;  %v8173_v11 = vadd.f32 %v3659_v12, %v3294_v13 }
 0x1a8   : > { %v3155_v50 = vpop.f32.mrf.mxu1  ;;  %v6112_v56 = vpop.f32.mrf.mxu0 }
 0x1a9   : > { %v3298_v23 = vadd.f32 %v3155_v50, %v8077_v24  ;;  %v8176_v26 = vadd.f32 %v6112_v56, %v3297_v38 }
 0x1aa   : > { %v6078_v39 = vpop.f32.mrf.mxu1  ;;  %v3662_v51 = vpop.f32.mrf.mxu0 }
 0x1ab   : > { %v3301_v40 = vadd.f32 %v6078_v39, %v8080_v62  ;;  %v8179_v34 = vadd.f32 %v3662_v51, %v3295_v14 }
 0x1ac   : > { %v3158_v45 = vpop.f32.mrf.mxu1  ;;  %v6115_v31 = vpop.f32.mrf.mxu0 }
 0x1ad   : > { %v3299_v44 = vadd.f32 %v3158_v45, %v8083_v63  ;;  %v8182_v46 = vadd.f32 %v6115_v31, %v3300_v30  ;;  %v8208_v31 = vpop.permute.xlu0 %5028 }
 0x1ae   : > { %v6081_v16 = vpop.f32.mrf.mxu1  ;;  %v3675_v5 = vpop.f32.mrf.mxu0 }
 0x1af   : > { %v3304_v6 = vadd.f32 %v6081_v16, %v8086_v32  ;;  %v8185_v3 = vadd.f32 %v3675_v5, %v3298_v23 }
 0x1b0   : > { %v3171_v24 = vpop.f32.mrf.mxu1  ;;  %v6116_v61 = vpop.f32.mrf.mxu0 }
 0x1b1   : > { %v3302_v4 = vadd.f32 %v3171_v24, %v8089_v36  ;;  %v8188_v0 = vadd.f32 %v6116_v61, %v3301_v40 }
 0x1b2   : > { %v6082_v62 = vpop.f32.mrf.mxu1  ;;  %v3678_v37 = vpop.f32.mrf.mxu0 }
 0x1b3   : > { %v3305_v20 = vadd.f32 %v6082_v62, %v8092_v18  ;;  %v8191_v13 = vadd.f32 %v3678_v37, %v3299_v44 }
 0x1b4   : > { %v3174_v63 = vpop.f32.mrf.mxu1  ;;  %v6119_v52 = vpop.f32.mrf.mxu0 }
 0x1b5   : > { %v3303_v33 = vadd.f32 %v3174_v63, %v8095_v9  ;;  %v8194_v38 = vadd.f32 %v6119_v52, %v3304_v6  ;;  %v8213_v6 = vpop.permute.xlu1 %5038  ;;  %v8221_v63 = vpop.permute.xlu0 %5033 }
 0x1b6   : > { %v6085_v32 = vpop.f32.mrf.mxu1  ;;  %v3691_v7 = vpop.f32.mrf.mxu0 }
 0x1b7   : > { %v3308_v2 = vadd.f32 %v6085_v32, %v8098_v15  ;;  %v8197_v14 = vadd.f32 %v3691_v7, %v3302_v4 }
 0x1b8   : > { %v3187_v36 = vpop.f32.mrf.mxu1  ;;  %v6120_v8 = vpop.f32.mrf.mxu0 }
 0x1b9   : > { %v3306_v12 = vadd.f32 %v3187_v36, %v8101_v27  ;;  %v8200_v30 = vadd.f32 %v6120_v8, %v3305_v20  ;;  %v8226_v7 = vpop.permute.xlu1 %5043 }
 0x1ba   : > { %v6086_v18 = vpop.f32.mrf.mxu1  ;;  %v3694_v50 = vpop.f32.mrf.mxu0 }
 0x1bb   : > { %v3309_v56 = vadd.f32 %v6086_v18, %v8104_v59  ;;  %v8203_v23 = vadd.f32 %v3694_v50, %v3303_v33 }
 0x1bc   : > { %v3190_v9 = vpop.f32.mrf.mxu1  ;;  %v6123_v39 = vpop.f32.mrf.mxu0 }
 0x1bd   : > { %v3307_v51 = vadd.f32 %v3190_v9, %v8107_v10  ;;  %v8206_v40 = vadd.f32 %v6123_v39, %v3308_v2 }
 0x1be   : > { %v6089_v15 = vpop.f32.mrf.mxu1  ;;  %v3707_v45 = vpop.f32.mrf.mxu0 }
 0x1bf   : > { %v3312_v27 = vadd.f32 %v6089_v15, %v8110_v29  ;;  %v8211_v44 = vadd.f32 %v3707_v45, %v3306_v12  ;;  %v8239_v15 = vpop.permute.xlu1 %5053 }
 0x1c0   : > { %v3203_v16 = vpop.f32.mrf.mxu1  ;;  %v6124_v5 = vpop.f32.mrf.mxu0 }
 0x1c1   : > { %v3310_v59 = vadd.f32 %v3203_v16, %v8113_v21  ;;  %v8216_v24 = vadd.f32 %v6124_v5, %v3309_v56  ;;  %v8234_v56 = vpop.permute.xlu0 %5048 }
 0x1c2   : > { %v6090_v61 = vpop.f32.mrf.mxu1  ;;  %v3710_v10 = vpop.f32.mrf.mxu0 }
 0x1c3   : > { %v3313_v4 = vadd.f32 %v6090_v61, %v8116_v49  ;;  %v8219_v62 = vadd.f32 %v3710_v10, %v3307_v51 }
 0x1c4   : > { %v3206_v37 = vpop.f32.mrf.mxu1  ;;  %v6127_v20 = vpop.f32.mrf.mxu0 }
 0x1c5   : > { %v3311_v29 = vadd.f32 %v3206_v37, %v8119_v1  ;;  %v8224_v52 = vadd.f32 %v6127_v20, %v3312_v27  ;;  %v8247_v10 = vpop.permute.xlu0 %5058 }
 0x1c6   : > { %v6093_v33 = vpop.f32.mrf.mxu1  ;;  %v3723_v32 = vpop.f32.mrf.mxu0 }
 0x1c7   : > { %v3316_v21 = vadd.f32 %v6093_v33, %v8122_v19  ;;  %v8229_v2 = vadd.f32 %v3723_v32, %v3310_v59 }
 0x1c8   : > { %v3219_v36 = vpop.f32.mrf.mxu1  ;;  %v6128_v49 = vpop.f32.mrf.mxu0 }
 0x1c9   : > { %v3314_v8 = vadd.f32 %v3219_v36, %v8125_v43  ;;  %v8232_v12 = vadd.f32 %v6128_v49, %v3313_v4 }
 0x1ca   : > { %v6094_v18 = vpop.f32.mrf.mxu1  ;;  %v3726_v50 = vpop.f32.mrf.mxu0 }
 0x1cb   : > { %v3317_v1 = vadd.f32 %v6094_v18, %v8128_v42  ;;  %v8237_v9 = vadd.f32 %v3726_v50, %v3311_v29 }
 0x1cc   : > { %v3222_v39 = vpop.f32.mrf.mxu1  ;;  %v6131_v51 = vpop.f32.mrf.mxu0 }
 0x1cd   : > { %v3315_v19 = vadd.f32 %v3222_v39, %v8131_v60  ;;  %v8242_v45 = vadd.f32 %v6131_v51, %v3316_v21  ;;  %v8252_v60 = vpop.permute.xlu1 %5063 }
 0x1ce   : > { %v6097_v27 = vpop.f32.mrf.mxu1  ;;  %v3739_v43 = vpop.f32.mrf.mxu0 }
 0x1cf   : > { %v3320_v16 = vadd.f32 %v6097_v27, %v8134_v41  ;;  %v8245_v5 = vadd.f32 %v3739_v43, %v3314_v8 }
 0x1d0   : > { %v3235_v59 = vpop.f32.mrf.mxu1  ;;  %v6132_v61 = vpop.f32.mrf.mxu0 }
 0x1d1   : > { %v3318_v42 = vadd.f32 %v3235_v59, %v8137_v48  ;;  %v8250_v4 = vadd.f32 %v6132_v61, %v3317_v1  ;;  %v8260_v48 = vpop.permute.xlu0 %5068  ;;  %v8265_v39 = vpop.permute.xlu1 %5073 }
 0x1d2   : > { %v6098_v37 = vpop.f32.mrf.mxu1  ;;  %v3742_v20 = vpop.f32.mrf.mxu0 }
 0x1d3   : > { %v3321_v29 = vadd.f32 %v6098_v37, %v8140_v57  ;;  %v8255_v33 = vadd.f32 %v3742_v20, %v3315_v19 }
 0x1d4   : > { %v3238_v41 = vpop.f32.mrf.mxu1  ;;  %v6135_v32 = vpop.f32.mrf.mxu0 }
 0x1d5   : > { %v3319_v21 = vadd.f32 %v3238_v41, %v8143_v35  ;;  %v8258_v36 = vadd.f32 %v6135_v32, %v3320_v16  ;;  %v8277_v59 = vpop.permute.xlu0 %5078 }
 0x1d6   : > { %v6141_v49 = vpop.f32.mrf.mxu1  ;;  %v3755_v8 = vpop.f32.mrf.mxu0 }
 0x1d7   : > { %8440 = vst [vmem:[#allocation3_spill] sm:$0xff] %v8258_v36  ;;  %v8262_v18 = vadd.f32 %v3755_v8, %v3318_v42  ;;  %v4328_v27 = vadd.f32 %v6141_v49, %v8146_v25  ;;  %v8280_v25 = vpop.permute.xlu1 %5083 }
 0x1d8   : > { %v4147_v50 = vpop.f32.mrf.mxu1  ;;  %v6136_v1 = vpop.f32.mrf.mxu0 }
 0x1d9   : > { %8441 = vst [vmem:[#allocation4_spill] sm:$0xff] %v8262_v18  ;;  %v8267_v57 = vadd.f32 %v6136_v1, %v3321_v29  ;;  %v4326_v61 = vadd.f32 %v4147_v50, %v8149_v55  ;;  %v8286_v55 = vpop.permute.xlu0 %5088 }
 0x1da   : > { %v6142_v51 = vpop.f32.mrf.mxu1  ;;  %v3758_v19 = vpop.f32.mrf.mxu0 }
 0x1db   : > { %8442 = vst [vmem:[#allocation5_spill] sm:$0xff] %v8267_v57  ;;  %v8270_v35 = vadd.f32 %v3758_v19, %v3319_v21  ;;  %v4329_v29 = vadd.f32 %v6142_v51, %v8152_v54 }
 0x1dc   : > { %v4150_v43 = vpop.f32.mrf.mxu1  ;;  %v6179_v16 = vpop.f32.mrf.mxu0 }
 0x1dd   : > { %8443 = vst [vmem:[#allocation6_spill] sm:$0xff] %v8270_v35  ;;  %v4848_v42 = vadd.f32 %v6179_v16, %v4328_v27  ;;  %v4327_v49 = vadd.f32 %v4150_v43, %v8155_v17  ;;  %v8300_v36 = vpop.permute.xlu0 %5098 }
 0x1de   : > { %v6145_v37 = vpop.f32.mrf.mxu1  ;;  %v4667_v20 = vpop.f32.mrf.mxu0 }
 0x1df   : > { %4956 = vst [vmem:[%s8275_s30 + $0x10] sm:$0xff] %v4848_v42  ;;  %v4846_v41 = vadd.f32 %v4667_v20, %v4326_v61  ;;  %v4332_v50 = vadd.f32 %v6145_v37, %v8158_v58  ;;  %v8291_v61 = vpop.permute.xlu1 %5093  ;;  %v5208_v20 = vmul.f32 %v8213_v6, %v4848_v42 }
 0x1e0   : > { %v4163_v32 = vpop.f32.mrf.mxu1  ;;  %v6180_v21 = vpop.f32.mrf.mxu0 }
 0x1e1   : > { %4954 = vst [vmem:[%s8275_s30] sm:$0xff] %v4846_v41  ;;  %v4849_v8 = vadd.f32 %v6180_v21, %v4329_v29  ;;  %v5206_v27 = vmul.f32 %v8208_v31, %v4846_v41  ;;  %v4330_v29 = vadd.f32 %v4163_v32, %v8161_v53 }
 0x1e2   : > { %v6146_v1 = vpop.f32.mrf.mxu1  ;;  %v4670_v19 = vpop.f32.mrf.mxu0 }
 0x1e3   : > { %4957 = vst [vmem:[%s8275_s30 + $0x18] sm:$0xff] %v4849_v8  ;;  %v4847_v54 = vadd.f32 %v4670_v19, %v4327_v49  ;;  %v5283_v37 = vmul.f32 %v5206_v27, %v4846_v41  ;;  %v5209_v31 = vmul.f32 %v8226_v7, %v4849_v8  ;;  %v4333_v19 = vadd.f32 %v6146_v1, %v8164_v22 }
 0x1e4   : > { %v4166_v51 = vpop.f32.mrf.mxu1  ;;  %v6183_v16 = vpop.f32.mrf.mxu0 }
 0x1e5   : > { %4955 = vst [vmem:[%s8275_s30 + $0x8] sm:$0xff] %v4847_v54  ;;  %v5207_v17 = vmul.f32 %v8221_v63, %v4847_v54  ;;  %v4852_v43 = vadd.f32 %v6183_v16, %v4332_v50  ;;  %v5285_v63 = vmul.f32 %v5208_v20, %v4848_v42  ;;  %v4331_v53 = vadd.f32 %v4166_v51, %v8167_v28  ;;  %v8305_v16 = vpop.permute.xlu1 %5103 }
 0x1e6   : > { %v6149_v21 = vpop.f32.mrf.mxu1  ;;  %v4683_v58 = vpop.f32.mrf.mxu0  ;;  %v5286_v22 = vmul.f32 %v5209_v31, %v4849_v8 }
 0x1e7   : > { %v5242_v35 = vadd.f32 %v5207_v17, %v5206_v27  ;;  %v5284_v49 = vmul.f32 %v5207_v17, %v4847_v54  ;;  %4960 = vst [vmem:[%s8275_s30 + $0x30] sm:$0xff] %v4852_v43  ;;  %v4850_v18 = vadd.f32 %v4683_v58, %v4330_v29  ;;  %v4336_v42 = vadd.f32 %v6149_v21, %v8170_v47  ;;  %v8314_v47 = vpop.permute.xlu0 %5108 }
 0x1e8   : > { %v4179_v57 = vpop.f32.mrf.mxu1  ;;  %v6184_v6 = vpop.f32.mrf.mxu0  ;;  %v5212_v58 = vmul.f32 %v8247_v10, %v4852_v43 }
 0x1e9   : > { %v5243_v32 = vadd.f32 %v5242_v35, %v5208_v20  ;;  %v5319_v50 = vadd.f32 %v5284_v49, %v5283_v37  ;;  %4958 = vst [vmem:[%s8275_s30 + $0x20] sm:$0xff] %v4850_v18  ;;  %v5210_v41 = vmul.f32 %v8234_v56, %v4850_v18  ;;  %v4853_v27 = vadd.f32 %v6184_v6, %v4333_v19 }
 0x1ea   : > { %v6150_v7 = vpop.f32.mrf.mxu1  ;;  %v4686_v54 = vpop.f32.mrf.mxu0  ;;  %v4334_v49 = vadd.f32 %v4179_v57, %v8173_v11  ;;  %v5289_v11 = vmul.f32 %v5212_v58, %v4852_v43 }
 0x1eb   : > { %v5320_v1 = vadd.f32 %v5319_v50, %v5285_v63  ;;  %v5244_v17 = vadd.f32 %v5243_v32, %v5209_v31  ;;  %v4851_v29 = vadd.f32 %v4686_v54, %v4331_v53  ;;  %4961 = vst [vmem:[%s8275_s30 + $0x38] sm:$0xff] %v4853_v27  ;;  %v5287_v56 = vmul.f32 %v5210_v41, %v4850_v18  ;;  %v8318_v50 = vpop.permute.xlu1 %5113 }
 0x1ec   : > { %v4182_v28 = vpop.f32.mrf.mxu1  ;;  %v6187_v35 = vpop.f32.mrf.mxu0  ;;  %v4337_v8 = vadd.f32 %v6150_v7, %v8176_v26  ;;  %v5213_v21 = vmul.f32 %v8252_v60, %v4853_v27 }
 0x1ed   : > { %v5245_v51 = vadd.f32 %v5244_v17, %v5210_v41  ;;  %v5321_v20 = vadd.f32 %v5320_v1, %v5286_v22  ;;  %4959 = vst [vmem:[%s8275_s30 + $0x28] sm:$0xff] %v4851_v29  ;;  %v5211_v37 = vmul.f32 %v8239_v15, %v4851_v29  ;;  %v4856_v19 = vadd.f32 %v6187_v35, %v4336_v42 }
 0x1ee   : > { %v6153_v31 = vpop.f32.mrf.mxu1  ;;  %v4699_v6 = vpop.f32.mrf.mxu0  ;;  %v4335_v7 = vadd.f32 %v4182_v28, %v8179_v34  ;;  %v5290_v1 = vmul.f32 %v5213_v21, %v4853_v27 }
 0x1ef   : > { %v5322_v10 = vadd.f32 %v5321_v20, %v5287_v56  ;;  %v5246_v63 = vadd.f32 %v5245_v51, %v5211_v37  ;;  %v5288_v53 = vmul.f32 %v5211_v37, %v4851_v29  ;;  %4964 = vst [vmem:[%s8275_s30 + $0x50] sm:$0xff] %v4856_v19  ;;  %v4854_v32 = vadd.f32 %v4699_v6, %v4334_v49 }
 0x1f0   : > { %v4195_v18 = vpop.f32.mrf.mxu1  ;;  %v6188_v15 = vpop.f32.mrf.mxu0  ;;  %v4340_v42 = vadd.f32 %v6153_v31, %v8182_v46  ;;  %v5216_v20 = vmul.f32 %v8277_v59, %v4856_v19 }
 0x1f1   : > { %v5247_v26 = vadd.f32 %v5246_v63, %v5212_v58  ;;  %v5323_v57 = vadd.f32 %v5322_v10, %v5288_v53  ;;  %v4857_v41 = vadd.f32 %v6188_v15, %v4337_v8  ;;  %4962 = vst [vmem:[%s8275_s30 + $0x40] sm:$0xff] %v4854_v32  ;;  %v5214_v54 = vmul.f32 %v8260_v48, %v4854_v32  ;;  %v8325_v58 = vpop.permute.xlu0 %5118  ;;  %v8331_v8 = vpop.permute.xlu1 %5123 }
 0x1f2   : > { %v6154_v22 = vpop.f32.mrf.mxu1  ;;  %v4702_v60 = vpop.f32.mrf.mxu0  ;;  %v4338_v56 = vadd.f32 %v4195_v18, %v8185_v3 }
 0x1f3   : > { %v5324_v17 = vadd.f32 %v5323_v57, %v5289_v11  ;;  %v5248_v29 = vadd.f32 %v5247_v26, %v5213_v21  ;;  %4965 = vst [vmem:[%s8275_s30 + $0x58] sm:$0xff] %v4857_v41  ;;  %v4855_v51 = vadd.f32 %v4702_v60, %v4335_v7  ;;  %v5291_v28 = vmul.f32 %v5214_v54, %v4854_v32 }
 0x1f4   : > { %v4198_v35 = vpop.f32.mrf.mxu1  ;;  %v6191_v43 = vpop.f32.mrf.mxu0  ;;  %v4341_v6 = vadd.f32 %v6154_v22, %v8188_v0  ;;  %v5217_v3 = vmul.f32 %v8280_v25, %v4857_v41  ;;  %v5293_v32 = vmul.f32 %v5216_v20, %v4856_v19 }
 0x1f5   : > { %v5249_v34 = vadd.f32 %v5248_v29, %v5214_v54  ;;  %v5325_v48 = vadd.f32 %v5324_v17, %v5290_v1  ;;  %4963 = vst [vmem:[%s8275_s30 + $0x48] sm:$0xff] %v4855_v51  ;;  %v5215_v27 = vmul.f32 %v8265_v39, %v4855_v51  ;;  %v4860_v49 = vadd.f32 %v6191_v43, %v4340_v42  ;;  %v8339_v7 = vpop.permute.xlu0 %5128  ;;  %v8343_v19 = vpop.permute.xlu1 %5133 }
 0x1f6   : > { %v6157_v37 = vpop.f32.mrf.mxu1  ;;  %v4715_v46 = vpop.f32.mrf.mxu0  ;;  %v4339_v18 = vadd.f32 %v4198_v35, %v8191_v13  ;;  %v5294_v22 = vmul.f32 %v5217_v3, %v4857_v41 }
 0x1f7   : > { %v5326_v31 = vadd.f32 %v5325_v48, %v5291_v28  ;;  %v4858_v10 = vadd.f32 %v4715_v46, %v4338_v56  ;;  %v5250_v21 = vadd.f32 %v5249_v34, %v5215_v27  ;;  %v5292_v63 = vmul.f32 %v5215_v27, %v4855_v51  ;;  %4968 = vst [vmem:[%s8275_s30 + $0x70] sm:$0xff] %v4860_v49 }
 0x1f8   : > { %v4211_v59 = vpop.f32.mrf.mxu1  ;;  %v6192_v53 = vpop.f32.mrf.mxu0  ;;  %v4344_v25 = vadd.f32 %v6157_v37, %v8194_v38  ;;  %v5220_v35 = vmul.f32 %v8300_v36, %v4860_v49 }
 0x1f9   : > { %4966 = vst [vmem:[%s8275_s30 + $0x60] sm:$0xff] %v4858_v10  ;;  %v4861_v39 = vadd.f32 %v6192_v53, %v4341_v6  ;;  %v5251_v15 = vadd.f32 %v5250_v21, %v5216_v20  ;;  %v5327_v11 = vadd.f32 %v5326_v31, %v5292_v63  ;;  %v5218_v26 = vmul.f32 %v8286_v55, %v4858_v10  ;;  %v5139_v46 = vpop.permute.xlu0 %5138 }
 0x1fa   : > { %v6158_v0 = vpop.f32.mrf.mxu1  ;;  %v4718_v57 = vpop.f32.mrf.mxu0  ;;  %v4342_v29 = vadd.f32 %v4211_v59, %v8197_v14  ;;  %v5297_v6 = vmul.f32 %v5220_v35, %v4860_v49 }
 0x1fb   : > { %4969 = vst [vmem:[%s8275_s30 + $0x78] sm:$0xff] %v4861_v39  ;;  %v4859_v54 = vadd.f32 %v4718_v57, %v4339_v18  ;;  %v5328_v60 = vadd.f32 %v5327_v11, %v5293_v32  ;;  %v5252_v1 = vadd.f32 %v5251_v15, %v5217_v3  ;;  %v5295_v38 = vmul.f32 %v5218_v26, %v4858_v10  ;;  %v8355_v59 = vpop.permute.xlu1 %5143 }
 0x1fc   : > { %v4214_v13 = vpop.f32.mrf.mxu1  ;;  %v6195_v17 = vpop.f32.mrf.mxu0  ;;  %v4345_v34 = vadd.f32 %v6158_v0, %v8200_v30  ;;  %v5221_v14 = vmul.f32 %v8305_v16, %v4861_v39 }
 0x1fd   : > { %4967 = vst [vmem:[%s8275_s30 + $0x68] sm:$0xff] %v4859_v54  ;;  %v5219_v55 = vmul.f32 %v8291_v61, %v4859_v54  ;;  %v4864_v42 = vadd.f32 %v6195_v17, %v4344_v25  ;;  %v5253_v51 = vadd.f32 %v5252_v1, %v5218_v26  ;;  %v5329_v43 = vadd.f32 %v5328_v60, %v5294_v22 }
 0x1fe   : > { %v6161_v41 = vpop.f32.mrf.mxu1  ;;  %v4731_v56 = vpop.f32.mrf.mxu0  ;;  %v4343_v36 = vadd.f32 %v4214_v13, %v8203_v23  ;;  %v5298_v18 = vmul.f32 %v5221_v14, %v4861_v39 }
 0x1ff   : > { %v5296_v28 = vmul.f32 %v5219_v55, %v4859_v54  ;;  %4972 = vst [vmem:[%s8275_s30 + $0x90] sm:$0xff] %v4864_v42  ;;  %v4862_v48 = vadd.f32 %v4731_v56, %v4342_v29  ;;  %v5330_v20 = vadd.f32 %v5329_v43, %v5295_v38  ;;  %v5254_v27 = vadd.f32 %v5253_v51, %v5219_v55  ;;  %v5149_v39 = vpop.permute.xlu0 %5148 }
 0x200   : > { %v4227_v61 = vpop.f32.mrf.mxu1  ;;  %v6196_v37 = vpop.f32.mrf.mxu0  ;;  %v4348_v16 = vadd.f32 %v6161_v41, %v8206_v40  ;;  %v5224_v0 = vmul.f32 %v8325_v58, %v4864_v42 }
 0x201   : > { %4970 = vst [vmem:[%s8275_s30 + $0x80] sm:$0xff] %v4862_v48  ;;  %v4865_v31 = vadd.f32 %v6196_v37, %v4345_v34  ;;  %v5255_v10 = vadd.f32 %v5254_v27, %v5220_v35  ;;  %v5331_v3 = vadd.f32 %v5330_v20, %v5296_v28  ;;  %v5222_v30 = vmul.f32 %v8314_v47, %v4862_v48  ;;  %v5154_v58 = vpop.permute.xlu1 %5153 }
 0x202   : > { %v6162_v21 = vpop.f32.mrf.mxu1  ;;  %v4734_v63 = vpop.f32.mrf.mxu0  ;;  %v4346_v49 = vadd.f32 %v4227_v61, %v8211_v44  ;;  %v5301_v38 = vmul.f32 %v5224_v0, %v4864_v42 }
 0x203   : > { %4973 = vst [vmem:[%s8275_s30 + $0x98] sm:$0xff] %v4865_v31  ;;  %v4863_v53 = vadd.f32 %v4734_v63, %v4343_v36  ;;  %v5332_v32 = vadd.f32 %v5331_v3, %v5297_v6  ;;  %v5256_v15 = vadd.f32 %v5255_v10, %v5221_v14  ;;  %v5299_v25 = vmul.f32 %v5222_v30, %v4862_v48  ;;  %v5159_v61 = vpop.permute.xlu0 %5158 }
 0x204   : > { %v4230_v23 = vpop.f32.mrf.mxu1  ;;  %v6199_v11 = vpop.f32.mrf.mxu0  ;;  %v4349_v60 = vadd.f32 %v6162_v21, %v8216_v24  ;;  %v5225_v44 = vmul.f32 %v8331_v8, %v4865_v31 }
 0x205   : > { %4971 = vst [vmem:[%s8275_s30 + $0x88] sm:$0xff] %v4863_v53  ;;  %v5223_v26 = vmul.f32 %v8318_v50, %v4863_v53  ;;  %v4868_v47 = vadd.f32 %v6199_v11, %v4348_v16  ;;  %v5257_v57 = vadd.f32 %v5256_v15, %v5222_v30  ;;  %v5333_v40 = vadd.f32 %v5332_v32, %v5298_v18 }
 0x206   : > { %v6165_v54 = vpop.f32.mrf.mxu1  ;;  %v4747_v22 = vpop.f32.mrf.mxu0  ;;  %v4347_v35 = vadd.f32 %v4230_v23, %v8219_v62  ;;  %v5302_v48 = vmul.f32 %v5225_v44, %v4865_v31 }
 0x207   : > { %v5300_v1 = vmul.f32 %v5223_v26, %v4863_v53  ;;  %4976 = vst [vmem:[%s8275_s30 + $0xb0] sm:$0xff] %v4868_v47  ;;  %v4866_v13 = vadd.f32 %v4747_v22, %v4346_v49  ;;  %v5334_v17 = vadd.f32 %v5333_v40, %v5299_v25  ;;  %v5258_v50 = vadd.f32 %v5257_v57, %v5223_v26  ;;  %v5164_v31 = vpop.permute.xlu1 %5163  ;;  %v5169_v57 = vpop.permute.xlu0 %5168 }
 0x208   : > { %v4243_v29 = vpop.f32.mrf.mxu1  ;;  %v6200_v55 = vpop.f32.mrf.mxu0  ;;  %v4352_v28 = vadd.f32 %v6165_v54, %v8224_v52 }
 0x209   : > { %4974 = vst [vmem:[%s8275_s30 + $0xa0] sm:$0xff] %v4866_v13  ;;  %v4869_v51 = vadd.f32 %v6200_v55, %v4349_v60  ;;  %v5259_v43 = vadd.f32 %v5258_v50, %v5224_v0  ;;  %v5335_v41 = vadd.f32 %v5334_v17, %v5300_v1  ;;  %v5226_v24 = vmul.f32 %v8339_v7, %v4866_v13 }
 0x20a   : > { %v6166_v56 = vpop.f32.mrf.mxu1  ;;  %v4750_v34 = vpop.f32.mrf.mxu0  ;;  %v4350_v42 = vadd.f32 %v4243_v29, %v8229_v2  ;;  %v5228_v7 = vmul.f32 %v5139_v46, %v4868_v47 }
 0x20b   : > { %4977 = vst [vmem:[%s8275_s30 + $0xb8] sm:$0xff] %v4869_v51  ;;  %v4867_v8 = vadd.f32 %v4750_v34, %v4347_v35  ;;  %v5336_v20 = vadd.f32 %v5335_v41, %v5301_v38  ;;  %v5260_v14 = vadd.f32 %v5259_v43, %v5225_v44  ;;  %v5303_v10 = vmul.f32 %v5226_v24, %v4866_v13  ;;  %v5174_v1 = vpop.permute.xlu1 %5173 }
 0x20c   : > { %v4246_v27 = vpop.f32.mrf.mxu1  ;;  %v6203_v62 = vpop.f32.mrf.mxu0  ;;  %v4353_v21 = vadd.f32 %v6166_v56, %v8232_v12  ;;  %v5229_v2 = vmul.f32 %v8355_v59, %v4869_v51  ;;  %v5305_v23 = vmul.f32 %v5228_v7, %v4868_v47 }
 0x20d   : > { %4975 = vst [vmem:[%s8275_s30 + $0xa8] sm:$0xff] %v4867_v8  ;;  %v5227_v37 = vmul.f32 %v8343_v19, %v4867_v8  ;;  %v4872_v36 = vadd.f32 %v6203_v62, %v4352_v28  ;;  %v5261_v6 = vadd.f32 %v5260_v14, %v5226_v24  ;;  %v5337_v52 = vadd.f32 %v5336_v20, %v5302_v48 }
 0x20e   : > { %v6169_v3 = vpop.f32.mrf.mxu1  ;;  %v4763_v30 = vpop.f32.mrf.mxu0  ;;  %v4351_v46 = vadd.f32 %v4246_v27, %v8237_v9  ;;  %v5306_v59 = vmul.f32 %v5229_v2, %v4869_v51 }
 0x20f   : > { %v5304_v63 = vmul.f32 %v5227_v37, %v4867_v8  ;;  %4980 = vst [vmem:[%s8275_s30 + $0xd0] sm:$0xff] %v4872_v36  ;;  %v4870_v16 = vadd.f32 %v4763_v30, %v4350_v42  ;;  %v5338_v53 = vadd.f32 %v5337_v52, %v5303_v10  ;;  %v5262_v18 = vadd.f32 %v5261_v6, %v5227_v37  ;;  %v5184_v62 = vpop.permute.xlu1 %5183 }
 0x210   : > { %v4259_v19 = vpop.f32.mrf.mxu1  ;;  %v6204_v32 = vpop.f32.mrf.mxu0  ;;  %v4356_v25 = vadd.f32 %v6169_v3, %v8242_v45 }
 0x211   : > { %4978 = vst [vmem:[%s8275_s30 + $0xc0] sm:$0xff] %v4870_v16  ;;  %v4873_v15 = vadd.f32 %v6204_v32, %v4353_v21  ;;  %v5263_v11 = vadd.f32 %v5262_v18, %v5228_v7  ;;  %v5339_v49 = vadd.f32 %v5338_v53, %v5304_v63  ;;  %v5230_v26 = vmul.f32 %v5149_v39, %v4870_v16 }
 0x212   : > { %v6170_v12 = vpop.f32.mrf.mxu1  ;;  %v4766_v0 = vpop.f32.mrf.mxu0  ;;  %v4354_v47 = vadd.f32 %v4259_v19, %v8245_v5  ;;  %v5232_v39 = vmul.f32 %v5159_v61, %v4872_v36  ;;  %v8444_v61 = vld [vmem:[#allocation3_spill] sm:$0xff]  ;;  %v8446_v19 = vld [vmem:[#allocation5_spill] sm:$0xff] }
 0x213   : > { %4981 = vst [vmem:[%s8275_s30 + $0xd8] sm:$0xff] %v4873_v15  ;;  %v4871_v40 = vadd.f32 %v4766_v0, %v4351_v46  ;;  %v5340_v54 = vadd.f32 %v5339_v49, %v5305_v23  ;;  %v5264_v22 = vadd.f32 %v5263_v11, %v5229_v2  ;;  %v5307_v50 = vmul.f32 %v5230_v26, %v4870_v16  ;;  %v8447_v0 = vld [vmem:[#allocation6_spill] sm:$0xff] }
 0x214   : > { %v4262_v60 = vpop.f32.mrf.mxu1  ;;  %v6207_v9 = vpop.f32.mrf.mxu0  ;;  %v4357_v35 = vadd.f32 %v6170_v12, %v8250_v4  ;;  %v5233_v41 = vmul.f32 %v5164_v31, %v4873_v15  ;;  %v5309_v8 = vmul.f32 %v5232_v39, %v4872_v36 }
 0x215   : > { %4979 = vst [vmem:[%s8275_s30 + $0xc8] sm:$0xff] %v4871_v40  ;;  %v5231_v13 = vmul.f32 %v5154_v58, %v4871_v40  ;;  %v4876_v17 = vadd.f32 %v6207_v9, %v4356_v25  ;;  %v5265_v44 = vadd.f32 %v5264_v22, %v5230_v26  ;;  %v5341_v29 = vadd.f32 %v5340_v54, %v5306_v59  ;;  %v5179_v58 = vpop.permute.xlu0 %5178  ;;  %v5194_v12 = vpop.permute.xlu1 %5193 }
 0x216   : > { %v6173_v45 = vpop.f32.mrf.mxu1  ;;  %v4779_v55 = vpop.f32.mrf.mxu0  ;;  %v4355_v34 = vadd.f32 %v4262_v60, %v8255_v33  ;;  %v5310_v7 = vmul.f32 %v5233_v41, %v4873_v15  ;;  %v8445_v33 = vld [vmem:[#allocation4_spill] sm:$0xff] }
 0x217   : > { %v5308_v51 = vmul.f32 %v5231_v13, %v4871_v40  ;;  %4984 = vst [vmem:[%s8275_s30 + $0xf0] sm:$0xff] %v4876_v17  ;;  %v4874_v38 = vadd.f32 %v4779_v55, %v4354_v47  ;;  %v5342_v43 = vadd.f32 %v5341_v29, %v5307_v50  ;;  %v5266_v24 = vadd.f32 %v5265_v44, %v5231_v13 }
 0x218   : > { %v4275_v5 = vpop.f32.mrf.mxu1  ;;  %v6208_v56 = vpop.f32.mrf.mxu0  ;;  %v4360_v42 = vadd.f32 %v6173_v45, %v8444_v61  ;;  %v5236_v31 = vmul.f32 %v5179_v58, %v4876_v17 }
 0x219   : > { %4982 = vst [vmem:[%s8275_s30 + $0xe0] sm:$0xff] %v4874_v38  ;;  %v4877_v28 = vadd.f32 %v6208_v56, %v4357_v35  ;;  %v5267_v48 = vadd.f32 %v5266_v24, %v5232_v39  ;;  %v5343_v20 = vadd.f32 %v5342_v43, %v5308_v51  ;;  %v5234_v14 = vmul.f32 %v5169_v57, %v4874_v38  ;;  %v5189_v18 = vpop.permute.xlu0 %5188  ;;  %v5204_v35 = vpop.permute.xlu1 %5203 }
 0x21a   : > { %v6174_v4 = vpop.f32.mrf.mxu1  ;;  %v4782_v27 = vpop.f32.mrf.mxu0  ;;  %v4358_v3 = vadd.f32 %v4275_v5, %v8445_v33  ;;  %v5313_v40 = vmul.f32 %v5236_v31, %v4876_v17 }
 0x21b   : > { %4985 = vst [vmem:[%s8275_s30 + $0xf8] sm:$0xff] %v4877_v28  ;;  %v4875_v37 = vadd.f32 %v4782_v27, %v4355_v34  ;;  %v5344_v6 = vadd.f32 %v5343_v20, %v5309_v8  ;;  %v5268_v10 = vadd.f32 %v5267_v48, %v5233_v41  ;;  %v5311_v63 = vmul.f32 %v5234_v14, %v4874_v38 }
 0x21c   : > { %v6211_v52 = vpop.f32.mrf.mxu0  ;;  %v4278_v53 = vpop.f32.mrf.mxu1  ;;  %v4361_v32 = vadd.f32 %v6174_v4, %v8446_v19  ;;  %v5237_v11 = vmul.f32 %v5184_v62, %v4877_v28 }
 0x21d   : > { %4983 = vst [vmem:[%s8275_s30 + $0xe8] sm:$0xff] %v4875_v37  ;;  %v5235_v30 = vmul.f32 %v5174_v1, %v4875_v37  ;;  %v4880_v36 = vadd.f32 %v6211_v52, %v4360_v42  ;;  %v5269_v21 = vadd.f32 %v5268_v10, %v5234_v14  ;;  %v5345_v16 = vadd.f32 %v5344_v6, %v5310_v7  ;;  %v5199_v39 = vpop.permute.xlu0 %5198 }
 0x21e   : > { %v4795_v2 = vpop.f32.mrf.mxu0  ;;  %v4359_v57 = vadd.f32 %v4278_v53, %v8447_v0  ;;  %v5314_v1 = vmul.f32 %v5237_v11, %v4877_v28  ;;  %v5360_v14 = vlaneseq }
 0x21f   : > { %v5312_v46 = vmul.f32 %v5235_v30, %v4875_v37  ;;  %4988 = vst [vmem:[%s8275_s30 + $0x110] sm:$0xff] %v4880_v36  ;;  %v4878_v15 = vadd.f32 %v4795_v2, %v4358_v3  ;;  %v5346_v23 = vadd.f32 %v5345_v16, %v5311_v63  ;;  %v5270_v49 = vadd.f32 %v5269_v21, %v5235_v30 }
 0x220   : > { %v6212_v26 = vpop.f32.mrf.mxu0  ;;  %v5240_v50 = vmul.f32 %v5199_v39, %v4880_v36  ;;  %v5361_v42 = vshrl.u32 %v5360_v14, 7 }
 0x221   : > { %4986 = vst [vmem:[%s8275_s30 + $0x100] sm:$0xff] %v4878_v15  ;;  %v4881_v25 = vadd.f32 %v6212_v26, %v4361_v32  ;;  %v5271_v59 = vadd.f32 %v5270_v49, %v5236_v31  ;;  %v5347_v54 = vadd.f32 %v5346_v23, %v5312_v46  ;;  %v5238_v22 = vmul.f32 %v5189_v18, %v4878_v15 }
 0x222   : > { %v4798_v60 = vpop.f32.mrf.mxu0  ;;  %v5317_v41 = vmul.f32 %v5240_v50, %v4880_v36  ;;  %vm5363_vm2 = vcmp.eq.s32.totalorder %v5361_v42, 1  ;;  %vm5362_vm3 = vcmp.eq.s32.totalorder %v5361_v42, 0 }
 0x223   : > { %4989 = vst [vmem:[%s8275_s30 + $0x118] sm:$0xff] %v4881_v25  ;;  %v4879_v9 = vadd.f32 %v4798_v60, %v4359_v57  ;;  %v5348_v47 = vadd.f32 %v5347_v54, %v5313_v40  ;;  %v5272_v13 = vadd.f32 %v5271_v59, %v5237_v11  ;;  %v5315_v45 = vmul.f32 %v5238_v22, %v4878_v15 }
 0x224   : > { %v5241_v17 = vmul.f32 %v5204_v35, %v4881_v25 }
 0x225   : > { %4987 = vst [vmem:[%s8275_s30 + $0x108] sm:$0xff] %v4879_v9  ;;  %v5239_v44 = vmul.f32 %v5194_v12, %v4879_v9  ;;  %v5273_v29 = vadd.f32 %v5272_v13, %v5238_v22  ;;  %v5349_v55 = vadd.f32 %v5348_v47, %v5314_v1 }
 0x226   : > { %v5318_v56 = vmul.f32 %v5241_v17, %v4881_v25 }
 0x227   : > { %v5316_v51 = vmul.f32 %v5239_v44, %v4879_v9  ;;  %v5350_v38 = vadd.f32 %v5349_v55, %v5315_v45  ;;  %v5274_v43 = vadd.f32 %v5273_v29, %v5239_v44 }
 0x229   : > { %v5275_v24 = vadd.f32 %v5274_v43, %v5240_v50  ;;  %v5351_v5 = vadd.f32 %v5350_v38, %v5316_v51 }
 0x22b   : > { %v5276_v58 = vadd.f32 %v5275_v24, %v5241_v17  ;;  %v5352_v34 = vadd.f32 %v5351_v5, %v5317_v41 }
 0x22d   : > { %v5277_v28 = vrot.slane %v5276_v58, 4  ;;  %v5353_v8 = vadd.f32 %v5352_v34, %v5318_v56 }
 0x22f   : > { %v5278_v48 = vadd.f32 %v5277_v28, %v5276_v58  ;;  %v5354_v20 = vrot.slane %v5353_v8, 4 }
 0x231   : > { %v5279_v4 = vrot.slane %v5278_v48, 2  ;;  %v5355_v27 = vadd.f32 %v5354_v20, %v5353_v8 }
 0x233   : > { %v5280_v62 = vadd.f32 %v5279_v4, %v5278_v48  ;;  %v5356_v61 = vrot.slane %v5355_v27, 2 }
 0x235   : > { %v5357_v37 = vadd.f32 %v5356_v61, %v5355_v27  ;;  %v5281_v7 = vrot.slane %v5280_v62, 1 }
 0x237   : > { %v5358_v6 = vrot.slane %v5357_v37, 1  ;;  %v5282_v52 = vadd.f32 %v5281_v7, %v5280_v62 }
 0x239   : > { %v5359_v10 = vadd.f32 %v5358_v6, %v5357_v37 }
 0x23b   : > { %v5364_v33 = vsel %vm5363_vm2, %v5359_v10, 0.0 }
 0x23c   : > { %v5365_v3 = vsel %vm5362_vm3, %v5282_v52, %v5364_v33 }
 0x23d   : > { %5366 = vst [vmem:[%s307_s10] sm:$0xff] %v5365_v3 }
 0x23e PF: > { %s17_s23 = sadd.s32 1, %s6282_s23   ;;  %s8448_s21 = smov %s6278_s22 }
 0x23f   : > { %p14_p5 = scmp.ge.s32.totalorder %s17_s23, 4   ;;  %s8449_s22 = smov %s8451_s24 }
 0x241   :  { %16 = sbr.rel (!%p14_p5) target bundleno = 2 (0x2), region = 93 }

</bundles_post_ra>
